<compile_context>
chip_gen: v5e
topology: v5e:2x2
jax: 0.10.0
libtpu: 0.0.40
codegen_flags: <defaults>
</compile_context>

<pallas_src>
import jax
import jax.numpy as jnp
from jax.experimental import pallas as pl
from jax.experimental.pallas import tpu as pltpu


def _qmix_ns_mixer_kernel(q_ref, a_ref, w1_ref, b1_ref, w2_ref, b2_ref,
                          o_ref, qt_s, base_s):
    # q_ref : (A, U, TB) f32   per-agent, per-action Q, TB samples on lanes
    # a_ref : (A, TB)    i32   taken-action index per agent
    # w1_ref: (E*A,) f32 SMEM  layer1 weight, w1_ref[e*A + j] = W1[e, j]
    # b1_ref: (E,)   f32 SMEM
    # w2_ref: (E,)   f32 SMEM  layer2 weight
    # b2_ref: (1,)   f32 SMEM
    # o_ref : (A, U, TB) f32   q_tot
    # qt_s  : (A, TB) f32 VMEM scratch  (q_taken per agent)
    # base_s: (E, TB) f32 VMEM scratch  (b1[e] + sum_j W1[e,j]*q_taken[j])
    A, U, TB = q_ref.shape
    E = base_s.shape[0]

    act_iota = jax.lax.broadcasted_iota(jnp.int32, (U, TB), 0)

    # ---- Phase 1: q_taken[i, n] = q[i, a[i,n], n] via one-hot masked sum.
    # (An out-of-range action index contributes 0.0 instead of raising, unlike
    #  torch.gather which would error.)
    qt_rows = []
    for i in range(A):
        q_i = q_ref[i]                                        # (U, TB)
        a_i = a_ref[pl.ds(i, 1), :]                           # (1, TB) i32
        qt_i = jnp.sum(jnp.where(act_iota == a_i, q_i, 0.0),
                       axis=0, keepdims=True)                 # (1, TB)
        qt_s[pl.ds(i, 1), :] = qt_i
        qt_rows.append(qt_i)

    # ---- Phase 2: base[e, n] = b1[e] + sum_j W1[e, j] * q_taken[j, n]
    for e in range(E):
        be = jnp.zeros((1, TB), jnp.float32) + b1_ref[e]
        for j in range(A):
            be = be + w1_ref[e * A + j] * qt_rows[j]
        base_s[pl.ds(e, 1), :] = be

    # ---- Phase 3: per agent row, accumulate layer2(relu(layer1(.))) over e.
    b2 = b2_ref[0]
    for i in range(A):
        d_i = q_ref[i] - qt_s[pl.ds(i, 1), :]                 # (U, TB)
        acc = jnp.zeros((U, TB), jnp.float32) + b2
        for e in range(E):
            z = base_s[pl.ds(e, 1), :] + w1_ref[e * A + i] * d_i
            acc = acc + w2_ref[e] * jnp.maximum(z, 0.0)
        o_ref[i] = acc                                        # lane-dense store


def qmix_ns_critic_mixer(q_agents, actions, w1, b1, w2, b2, *, bt_tile=512):
    """q_agents: (B, T, A, U) f32; actions: (B, T, A, 1) int; w1: (E, A);
    b1: (E,); w2: (1, E); b2: (1,).  Returns q_tot of shape (B, T, A, U)."""
    bs, T, A, U = q_agents.shape
    E = w1.shape[0]
    BT = bs * T

    # Layout plumbing (wrapper side): put the BT sample axis on TPU lanes.
    q_l = jnp.transpose(q_agents.astype(jnp.float32).reshape(BT, A, U),
                        (1, 2, 0))                            # (A, U, BT)
    a_l = jnp.transpose(actions.reshape(BT, A).astype(jnp.int32),
                        (1, 0))                               # (A, BT)

    lane = 128
    TB = min(int(bt_tile), ((BT + lane - 1) // lane) * lane)
    TB = max(TB, lane)
    BT_pad = ((BT + TB - 1) // TB) * TB
    if BT_pad != BT:
        q_l = jnp.pad(q_l, ((0, 0), (0, 0), (0, BT_pad - BT)))
        a_l = jnp.pad(a_l, ((0, 0), (0, BT_pad - BT)))

    w1_flat = w1.reshape(E * A).astype(jnp.float32)   # w1_flat[e*A + j] = W1[e, j]
    b1_s = b1.reshape(E).astype(jnp.float32)
    w2_s = w2.reshape(E).astype(jnp.float32)
    b2_s = b2.reshape(1).astype(jnp.float32)

    smem = pl.BlockSpec(memory_space=pltpu.MemorySpace.SMEM)
    out = pl.pallas_call(
        _qmix_ns_mixer_kernel,
        out_shape=jax.ShapeDtypeStruct((A, U, BT_pad), jnp.float32),
        grid_spec=pltpu.PrefetchScalarGridSpec(
            num_scalar_prefetch=0,
            grid=(BT_pad // TB,),
            in_specs=[
                pl.BlockSpec((A, U, TB), lambda g: (0, 0, g)),   # q tile
                pl.BlockSpec((A, TB), lambda g: (0, g)),          # actions tile
                smem, smem, smem, smem,                           # W1, b1, W2, b2
            ],
            out_specs=pl.BlockSpec((A, U, TB), lambda g: (0, 0, g)),
            scratch_shapes=[
                pltpu.VMEM((A, TB), jnp.float32),                 # q_taken
                pltpu.VMEM((E, TB), jnp.float32),                 # base
            ],
        ),
        compiler_params=pltpu.CompilerParams(
            dimension_semantics=("parallel",)),
    )(q_l, a_l, w1_flat, b1_s, w2_s, b2_s)

    out = out[:, :, :BT]                                          # (A, U, BT)
    return jnp.transpose(out, (2, 0, 1)).reshape(bs, T, A, U)


def _reference(q_agents, actions, w1, b1, w2, b2):
    """Pure-JAX replica of the PyTorch forward (t=None path) for verification."""
    bs, T, A, U = q_agents.shape
    q_taken = jnp.take_along_axis(q_agents, actions, axis=3)[..., 0]       # (B,T,A)
    x_off = jnp.broadcast_to(q_taken[:, :, None, None, :], (bs, T, A, U, A))
    eye = jnp.eye(A, dtype=bool)[None, None, :, None, :]                   # (1,1,A,1,A)
    x = jnp.where(eye, q_agents[:, :, :, :, None], x_off)                  # (B,T,A,U,A)
    h = jax.nn.relu(jnp.einsum('btiuj,ej->btiue', x, w1) + b1)
    y = jnp.einsum('btiue,oe->btiuo', h, w2) + b2
    return y[..., 0]


if __name__ == "__main__":
    # Small, module-consistent shapes: n_agents=4, n_actions=6, embed_dim=32.
    bs, T, A, U, E = 2, 8, 4, 6, 32

    key = jax.random.PRNGKey(0)
    k_q, k_a, k_w1, k_b1, k_w2, k_b2 = jax.random.split(key, 6)

    q_agents = jax.random.normal(k_q, (bs, T, A, U), dtype=jnp.float32)
    actions = jax.random.randint(k_a, (bs, T, A, 1), 0, U, dtype=jnp.int32)

    # nn.Linear-style init: U(-1/sqrt(fan_in), 1/sqrt(fan_in))
    lim1 = 1.0 / (A ** 0.5)
    lim2 = 1.0 / (E ** 0.5)
    w1 = jax.random.uniform(k_w1, (E, A), minval=-lim1, maxval=lim1, dtype=jnp.float32)
    b1 = jax.random.uniform(k_b1, (E,), minval=-lim1, maxval=lim1, dtype=jnp.float32)
    w2 = jax.random.uniform(k_w2, (1, E), minval=-lim2, maxval=lim2, dtype=jnp.float32)
    b2 = jax.random.uniform(k_b2, (1,), minval=-lim2, maxval=lim2, dtype=jnp.float32)

    out = qmix_ns_critic_mixer(q_agents, actions, w1, b1, w2, b2)
    out = jax.block_until_ready(out)

    ref = _reference(q_agents, actions, w1, b1, w2, b2)
    assert out.shape == (bs, T, A, U)
    assert jnp.allclose(out, ref, rtol=1e-4, atol=1e-4), "mismatch vs JAX reference"

    print("KERNEL_OK")
</pallas_src>

<mosaic_0001>
module attributes {stable_mosaic.version = 11 : i64} {
  func.func @_qmix_ns_mixer_kernel(%arg0: i32, %arg1: memref<4x6x128xf32, #tpu.memory_space<vmem>>, %arg2: memref<4x128xi32, #tpu.memory_space<vmem>>, %arg3: memref<128xf32, #tpu.memory_space<smem>>, %arg4: memref<32xf32, #tpu.memory_space<smem>>, %arg5: memref<32xf32, #tpu.memory_space<smem>>, %arg6: memref<1xf32, #tpu.memory_space<smem>>, %arg7: memref<4x6x128xf32, #tpu.memory_space<vmem>>, %arg8: memref<4x128xf32, #tpu.memory_space<vmem>>, %arg9: memref<32x128xf32, #tpu.memory_space<vmem>>) attributes {dimension_semantics = [#tpu.dimension_semantics<parallel>], iteration_bounds = array<i64: 1>, scalar_prefetch = 0 : i64, scratch_operands = 2 : i64, tpu.core_type = #tpu.core_type<tc>, window_params = [{transform_indices = @transform_0, window_bounds = array<i64: 4, 6, 128>}, {transform_indices = @transform_1, window_bounds = array<i64: 4, 128>}, {transform_indices = @transform_2, window_bounds = array<i64: 128>}, {transform_indices = @transform_3, window_bounds = array<i64: 32>}, {transform_indices = @transform_4, window_bounds = array<i64: 32>}, {transform_indices = @transform_5, window_bounds = array<i64: 1>}, {transform_indices = @transform_6, window_bounds = array<i64: 4, 6, 128>}]} {
    %0 = tpu.iota {dimensions = array<i32: 0>} : vector<6x128xi32>
    %c0 = arith.constant 0 : index
    %c0_0 = arith.constant 0 : index
    %c0_1 = arith.constant 0 : index
    %1 = vector.load %arg1[%c0, %c0_0, %c0_1] : memref<4x6x128xf32, #tpu.memory_space<vmem>>, vector<1x6x128xf32>
    %2 = vector.shape_cast %1 : vector<1x6x128xf32> to vector<6x128xf32>
    %c0_2 = arith.constant 0 : index
    %c0_3 = arith.constant 0 : index
    %3 = vector.load %arg2[%c0_2, %c0_3] : memref<4x128xi32, #tpu.memory_space<vmem>>, vector<1x128xi32>
    %4 = vector.broadcast %3 : vector<1x128xi32> to vector<6x128xi32>
    %5 = arith.cmpi eq, %0, %4 : vector<6x128xi32>
    %cst = arith.constant 0.000000e+00 : f32
    %6 = vector.broadcast %cst : f32 to vector<6x128xf32>
    %7 = arith.select %5, %2, %6 : vector<6x128xi1>, vector<6x128xf32>
    %cst_4 = arith.constant dense<0.000000e+00> : vector<128xf32>
    %8 = vector.multi_reduction <add>, %7, %cst_4 [0] : vector<6x128xf32> to vector<128xf32>
    %9 = vector.shape_cast %8 : vector<128xf32> to vector<1x128xf32>
    %c0_5 = arith.constant 0 : index
    %c0_6 = arith.constant 0 : index
    %10 = vector.load %arg8[%c0_5, %c0_6] : memref<4x128xf32, #tpu.memory_space<vmem>>, vector<1x128xf32>
    tpu.vector_store %arg8[%c0_5, %c0_6], %9 {strides = array<i32>} : memref<4x128xf32, #tpu.memory_space<vmem>>, vector<1x128xf32>,
    %c1 = arith.constant 1 : index
    %c0_7 = arith.constant 0 : index
    %c0_8 = arith.constant 0 : index
    %11 = vector.load %arg1[%c1, %c0_7, %c0_8] : memref<4x6x128xf32, #tpu.memory_space<vmem>>, vector<1x6x128xf32>
    %12 = vector.shape_cast %11 : vector<1x6x128xf32> to vector<6x128xf32>
    %c1_9 = arith.constant 1 : index
    %c0_10 = arith.constant 0 : index
    %13 = vector.load %arg2[%c1_9, %c0_10] : memref<4x128xi32, #tpu.memory_space<vmem>>, vector<1x128xi32>
    %14 = vector.broadcast %13 : vector<1x128xi32> to vector<6x128xi32>
    %15 = arith.cmpi eq, %0, %14 : vector<6x128xi32>
    %cst_11 = arith.constant 0.000000e+00 : f32
    %16 = vector.broadcast %cst_11 : f32 to vector<6x128xf32>
    %17 = arith.select %15, %12, %16 : vector<6x128xi1>, vector<6x128xf32>
    %cst_12 = arith.constant dense<0.000000e+00> : vector<128xf32>
    %18 = vector.multi_reduction <add>, %17, %cst_12 [0] : vector<6x128xf32> to vector<128xf32>
    %19 = vector.shape_cast %18 : vector<128xf32> to vector<1x128xf32>
    %c1_13 = arith.constant 1 : index
    %c0_14 = arith.constant 0 : index
    %20 = vector.load %arg8[%c1_13, %c0_14] : memref<4x128xf32, #tpu.memory_space<vmem>>, vector<1x128xf32>
    tpu.vector_store %arg8[%c1_13, %c0_14], %19 {strides = array<i32>} : memref<4x128xf32, #tpu.memory_space<vmem>>, vector<1x128xf32>,
    %c2 = arith.constant 2 : index
    %c0_15 = arith.constant 0 : index
    %c0_16 = arith.constant 0 : index
    %21 = vector.load %arg1[%c2, %c0_15, %c0_16] : memref<4x6x128xf32, #tpu.memory_space<vmem>>, vector<1x6x128xf32>
    %22 = vector.shape_cast %21 : vector<1x6x128xf32> to vector<6x128xf32>
    %c2_17 = arith.constant 2 : index
    %c0_18 = arith.constant 0 : index
    %23 = vector.load %arg2[%c2_17, %c0_18] : memref<4x128xi32, #tpu.memory_space<vmem>>, vector<1x128xi32>
    %24 = vector.broadcast %23 : vector<1x128xi32> to vector<6x128xi32>
    %25 = arith.cmpi eq, %0, %24 : vector<6x128xi32>
    %cst_19 = arith.constant 0.000000e+00 : f32
    %26 = vector.broadcast %cst_19 : f32 to vector<6x128xf32>
    %27 = arith.select %25, %22, %26 : vector<6x128xi1>, vector<6x128xf32>
    %cst_20 = arith.constant dense<0.000000e+00> : vector<128xf32>
    %28 = vector.multi_reduction <add>, %27, %cst_20 [0] : vector<6x128xf32> to vector<128xf32>
    %29 = vector.shape_cast %28 : vector<128xf32> to vector<1x128xf32>
    %c2_21 = arith.constant 2 : index
    %c0_22 = arith.constant 0 : index
    %30 = vector.load %arg8[%c2_21, %c0_22] : memref<4x128xf32, #tpu.memory_space<vmem>>, vector<1x128xf32>
    tpu.vector_store %arg8[%c2_21, %c0_22], %29 {strides = array<i32>} : memref<4x128xf32, #tpu.memory_space<vmem>>, vector<1x128xf32>,
    %c3 = arith.constant 3 : index
    %c0_23 = arith.constant 0 : index
    %c0_24 = arith.constant 0 : index
    %31 = vector.load %arg1[%c3, %c0_23, %c0_24] : memref<4x6x128xf32, #tpu.memory_space<vmem>>, vector<1x6x128xf32>
    %32 = vector.shape_cast %31 : vector<1x6x128xf32> to vector<6x128xf32>
    %c3_25 = arith.constant 3 : index
    %c0_26 = arith.constant 0 : index
    %33 = vector.load %arg2[%c3_25, %c0_26] : memref<4x128xi32, #tpu.memory_space<vmem>>, vector<1x128xi32>
    %34 = vector.broadcast %33 : vector<1x128xi32> to vector<6x128xi32>
    %35 = arith.cmpi eq, %0, %34 : vector<6x128xi32>
    %cst_27 = arith.constant 0.000000e+00 : f32
    %36 = vector.broadcast %cst_27 : f32 to vector<6x128xf32>
    %37 = arith.select %35, %32, %36 : vector<6x128xi1>, vector<6x128xf32>
    %cst_28 = arith.constant dense<0.000000e+00> : vector<128xf32>
    %38 = vector.multi_reduction <add>, %37, %cst_28 [0] : vector<6x128xf32> to vector<128xf32>
    %39 = vector.shape_cast %38 : vector<128xf32> to vector<1x128xf32>
    %c3_29 = arith.constant 3 : index
    %c0_30 = arith.constant 0 : index
    %40 = vector.load %arg8[%c3_29, %c0_30] : memref<4x128xf32, #tpu.memory_space<vmem>>, vector<1x128xf32>
    tpu.vector_store %arg8[%c3_29, %c0_30], %39 {strides = array<i32>} : memref<4x128xf32, #tpu.memory_space<vmem>>, vector<1x128xf32>,
    %cst_31 = arith.constant 0.000000e+00 : f32
    %41 = vector.broadcast %cst_31 : f32 to vector<1x128xf32>
    %c0_32 = arith.constant 0 : index
    %42 = memref.load %arg4[%c0_32] : memref<32xf32, #tpu.memory_space<smem>>
    %43 = vector.broadcast %42 : f32 to vector<1x128xf32>
    %44 = arith.addf %41, %43 : vector<1x128xf32>
    %c0_33 = arith.constant 0 : index
    %45 = memref.load %arg3[%c0_33] : memref<128xf32, #tpu.memory_space<smem>>
    %46 = vector.broadcast %45 : f32 to vector<1x128xf32>
    %47 = arith.mulf %46, %9 : vector<1x128xf32>
    %48 = arith.addf %44, %47 : vector<1x128xf32>
    %c1_34 = arith.constant 1 : index
    %49 = memref.load %arg3[%c1_34] : memref<128xf32, #tpu.memory_space<smem>>
    %50 = vector.broadcast %49 : f32 to vector<1x128xf32>
    %51 = arith.mulf %50, %19 : vector<1x128xf32>
    %52 = arith.addf %48, %51 : vector<1x128xf32>
    %c2_35 = arith.constant 2 : index
    %53 = memref.load %arg3[%c2_35] : memref<128xf32, #tpu.memory_space<smem>>
    %54 = vector.broadcast %53 : f32 to vector<1x128xf32>
    %55 = arith.mulf %54, %29 : vector<1x128xf32>
    %56 = arith.addf %52, %55 : vector<1x128xf32>
    %c3_36 = arith.constant 3 : index
    %57 = memref.load %arg3[%c3_36] : memref<128xf32, #tpu.memory_space<smem>>
    %58 = vector.broadcast %57 : f32 to vector<1x128xf32>
    %59 = arith.mulf %58, %39 : vector<1x128xf32>
    %60 = arith.addf %56, %59 : vector<1x128xf32>
    %c0_37 = arith.constant 0 : index
    %c0_38 = arith.constant 0 : index
    %61 = vector.load %arg9[%c0_37, %c0_38] : memref<32x128xf32, #tpu.memory_space<vmem>>, vector<1x128xf32>
    tpu.vector_store %arg9[%c0_37, %c0_38], %60 {strides = array<i32>} : memref<32x128xf32, #tpu.memory_space<vmem>>, vector<1x128xf32>,
    %cst_39 = arith.constant 0.000000e+00 : f32
    %62 = vector.broadcast %cst_39 : f32 to vector<1x128xf32>
    %c1_40 = arith.constant 1 : index
    %63 = memref.load %arg4[%c1_40] : memref<32xf32, #tpu.memory_space<smem>>
    %64 = vector.broadcast %63 : f32 to vector<1x128xf32>
    %65 = arith.addf %62, %64 : vector<1x128xf32>
    %c4 = arith.constant 4 : index
    %66 = memref.load %arg3[%c4] : memref<128xf32, #tpu.memory_space<smem>>
    %67 = vector.broadcast %66 : f32 to vector<1x128xf32>
    %68 = arith.mulf %67, %9 : vector<1x128xf32>
    %69 = arith.addf %65, %68 : vector<1x128xf32>
    %c5 = arith.constant 5 : index
    %70 = memref.load %arg3[%c5] : memref<128xf32, #tpu.memory_space<smem>>
    %71 = vector.broadcast %70 : f32 to vector<1x128xf32>
    %72 = arith.mulf %71, %19 : vector<1x128xf32>
    %73 = arith.addf %69, %72 : vector<1x128xf32>
    %c6 = arith.constant 6 : index
    %74 = memref.load %arg3[%c6] : memref<128xf32, #tpu.memory_space<smem>>
    %75 = vector.broadcast %74 : f32 to vector<1x128xf32>
    %76 = arith.mulf %75, %29 : vector<1x128xf32>
    %77 = arith.addf %73, %76 : vector<1x128xf32>
    %c7 = arith.constant 7 : index
    %78 = memref.load %arg3[%c7] : memref<128xf32, #tpu.memory_space<smem>>
    %79 = vector.broadcast %78 : f32 to vector<1x128xf32>
    %80 = arith.mulf %79, %39 : vector<1x128xf32>
    %81 = arith.addf %77, %80 : vector<1x128xf32>
    %c1_41 = arith.constant 1 : index
    %c0_42 = arith.constant 0 : index
    %82 = vector.load %arg9[%c1_41, %c0_42] : memref<32x128xf32, #tpu.memory_space<vmem>>, vector<1x128xf32>
    tpu.vector_store %arg9[%c1_41, %c0_42], %81 {strides = array<i32>} : memref<32x128xf32, #tpu.memory_space<vmem>>, vector<1x128xf32>,
    %cst_43 = arith.constant 0.000000e+00 : f32
    %83 = vector.broadcast %cst_43 : f32 to vector<1x128xf32>
    %c2_44 = arith.constant 2 : index
    %84 = memref.load %arg4[%c2_44] : memref<32xf32, #tpu.memory_space<smem>>
    %85 = vector.broadcast %84 : f32 to vector<1x128xf32>
    %86 = arith.addf %83, %85 : vector<1x128xf32>
    %c8 = arith.constant 8 : index
    %87 = memref.load %arg3[%c8] : memref<128xf32, #tpu.memory_space<smem>>
    %88 = vector.broadcast %87 : f32 to vector<1x128xf32>
    %89 = arith.mulf %88, %9 : vector<1x128xf32>
    %90 = arith.addf %86, %89 : vector<1x128xf32>
    %c9 = arith.constant 9 : index
    %91 = memref.load %arg3[%c9] : memref<128xf32, #tpu.memory_space<smem>>
    %92 = vector.broadcast %91 : f32 to vector<1x128xf32>
    %93 = arith.mulf %92, %19 : vector<1x128xf32>
    %94 = arith.addf %90, %93 : vector<1x128xf32>
    %c10 = arith.constant 10 : index
    %95 = memref.load %arg3[%c10] : memref<128xf32, #tpu.memory_space<smem>>
    %96 = vector.broadcast %95 : f32 to vector<1x128xf32>
    %97 = arith.mulf %96, %29 : vector<1x128xf32>
    %98 = arith.addf %94, %97 : vector<1x128xf32>
    %c11 = arith.constant 11 : index
    %99 = memref.load %arg3[%c11] : memref<128xf32, #tpu.memory_space<smem>>
    %100 = vector.broadcast %99 : f32 to vector<1x128xf32>
    %101 = arith.mulf %100, %39 : vector<1x128xf32>
    %102 = arith.addf %98, %101 : vector<1x128xf32>
    %c2_45 = arith.constant 2 : index
    %c0_46 = arith.constant 0 : index
    %103 = vector.load %arg9[%c2_45, %c0_46] : memref<32x128xf32, #tpu.memory_space<vmem>>, vector<1x128xf32>
    tpu.vector_store %arg9[%c2_45, %c0_46], %102 {strides = array<i32>} : memref<32x128xf32, #tpu.memory_space<vmem>>, vector<1x128xf32>,
    %cst_47 = arith.constant 0.000000e+00 : f32
    %104 = vector.broadcast %cst_47 : f32 to vector<1x128xf32>
    %c3_48 = arith.constant 3 : index
    %105 = memref.load %arg4[%c3_48] : memref<32xf32, #tpu.memory_space<smem>>
    %106 = vector.broadcast %105 : f32 to vector<1x128xf32>
    %107 = arith.addf %104, %106 : vector<1x128xf32>
    %c12 = arith.constant 12 : index
    %108 = memref.load %arg3[%c12] : memref<128xf32, #tpu.memory_space<smem>>
    %109 = vector.broadcast %108 : f32 to vector<1x128xf32>
    %110 = arith.mulf %109, %9 : vector<1x128xf32>
    %111 = arith.addf %107, %110 : vector<1x128xf32>
    %c13 = arith.constant 13 : index
    %112 = memref.load %arg3[%c13] : memref<128xf32, #tpu.memory_space<smem>>
    %113 = vector.broadcast %112 : f32 to vector<1x128xf32>
    %114 = arith.mulf %113, %19 : vector<1x128xf32>
    %115 = arith.addf %111, %114 : vector<1x128xf32>
    %c14 = arith.constant 14 : index
    %116 = memref.load %arg3[%c14] : memref<128xf32, #tpu.memory_space<smem>>
    %117 = vector.broadcast %116 : f32 to vector<1x128xf32>
    %118 = arith.mulf %117, %29 : vector<1x128xf32>
    %119 = arith.addf %115, %118 : vector<1x128xf32>
    %c15 = arith.constant 15 : index
    %120 = memref.load %arg3[%c15] : memref<128xf32, #tpu.memory_space<smem>>
    %121 = vector.broadcast %120 : f32 to vector<1x128xf32>
    %122 = arith.mulf %121, %39 : vector<1x128xf32>
    %123 = arith.addf %119, %122 : vector<1x128xf32>
    %c3_49 = arith.constant 3 : index
    %c0_50 = arith.constant 0 : index
    %124 = vector.load %arg9[%c3_49, %c0_50] : memref<32x128xf32, #tpu.memory_space<vmem>>, vector<1x128xf32>
    tpu.vector_store %arg9[%c3_49, %c0_50], %123 {strides = array<i32>} : memref<32x128xf32, #tpu.memory_space<vmem>>, vector<1x128xf32>,
    %cst_51 = arith.constant 0.000000e+00 : f32
    %125 = vector.broadcast %cst_51 : f32 to vector<1x128xf32>
    %c4_52 = arith.constant 4 : index
    %126 = memref.load %arg4[%c4_52] : memref<32xf32, #tpu.memory_space<smem>>
    %127 = vector.broadcast %126 : f32 to vector<1x128xf32>
    %128 = arith.addf %125, %127 : vector<1x128xf32>
    %c16 = arith.constant 16 : index
    %129 = memref.load %arg3[%c16] : memref<128xf32, #tpu.memory_space<smem>>
    %130 = vector.broadcast %129 : f32 to vector<1x128xf32>
    %131 = arith.mulf %130, %9 : vector<1x128xf32>
    %132 = arith.addf %128, %131 : vector<1x128xf32>
    %c17 = arith.constant 17 : index
    %133 = memref.load %arg3[%c17] : memref<128xf32, #tpu.memory_space<smem>>
    %134 = vector.broadcast %133 : f32 to vector<1x128xf32>
    %135 = arith.mulf %134, %19 : vector<1x128xf32>
    %136 = arith.addf %132, %135 : vector<1x128xf32>
    %c18 = arith.constant 18 : index
    %137 = memref.load %arg3[%c18] : memref<128xf32, #tpu.memory_space<smem>>
    %138 = vector.broadcast %137 : f32 to vector<1x128xf32>
    %139 = arith.mulf %138, %29 : vector<1x128xf32>
    %140 = arith.addf %136, %139 : vector<1x128xf32>
    %c19 = arith.constant 19 : index
    %141 = memref.load %arg3[%c19] : memref<128xf32, #tpu.memory_space<smem>>
    %142 = vector.broadcast %141 : f32 to vector<1x128xf32>
    %143 = arith.mulf %142, %39 : vector<1x128xf32>
    %144 = arith.addf %140, %143 : vector<1x128xf32>
    %c4_53 = arith.constant 4 : index
    %c0_54 = arith.constant 0 : index
    %145 = vector.load %arg9[%c4_53, %c0_54] : memref<32x128xf32, #tpu.memory_space<vmem>>, vector<1x128xf32>
    tpu.vector_store %arg9[%c4_53, %c0_54], %144 {strides = array<i32>} : memref<32x128xf32, #tpu.memory_space<vmem>>, vector<1x128xf32>,
    %cst_55 = arith.constant 0.000000e+00 : f32
    %146 = vector.broadcast %cst_55 : f32 to vector<1x128xf32>
    %c5_56 = arith.constant 5 : index
    %147 = memref.load %arg4[%c5_56] : memref<32xf32, #tpu.memory_space<smem>>
    %148 = vector.broadcast %147 : f32 to vector<1x128xf32>
    %149 = arith.addf %146, %148 : vector<1x128xf32>
    %c20 = arith.constant 20 : index
    %150 = memref.load %arg3[%c20] : memref<128xf32, #tpu.memory_space<smem>>
    %151 = vector.broadcast %150 : f32 to vector<1x128xf32>
    %152 = arith.mulf %151, %9 : vector<1x128xf32>
    %153 = arith.addf %149, %152 : vector<1x128xf32>
    %c21 = arith.constant 21 : index
    %154 = memref.load %arg3[%c21] : memref<128xf32, #tpu.memory_space<smem>>
    %155 = vector.broadcast %154 : f32 to vector<1x128xf32>
    %156 = arith.mulf %155, %19 : vector<1x128xf32>
    %157 = arith.addf %153, %156 : vector<1x128xf32>
    %c22 = arith.constant 22 : index
    %158 = memref.load %arg3[%c22] : memref<128xf32, #tpu.memory_space<smem>>
    %159 = vector.broadcast %158 : f32 to vector<1x128xf32>
    %160 = arith.mulf %159, %29 : vector<1x128xf32>
    %161 = arith.addf %157, %160 : vector<1x128xf32>
    %c23 = arith.constant 23 : index
    %162 = memref.load %arg3[%c23] : memref<128xf32, #tpu.memory_space<smem>>
    %163 = vector.broadcast %162 : f32 to vector<1x128xf32>
    %164 = arith.mulf %163, %39 : vector<1x128xf32>
    %165 = arith.addf %161, %164 : vector<1x128xf32>
    %c5_57 = arith.constant 5 : index
    %c0_58 = arith.constant 0 : index
    %166 = vector.load %arg9[%c5_57, %c0_58] : memref<32x128xf32, #tpu.memory_space<vmem>>, vector<1x128xf32>
    tpu.vector_store %arg9[%c5_57, %c0_58], %165 {strides = array<i32>} : memref<32x128xf32, #tpu.memory_space<vmem>>, vector<1x128xf32>,
    %cst_59 = arith.constant 0.000000e+00 : f32
    %167 = vector.broadcast %cst_59 : f32 to vector<1x128xf32>
    %c6_60 = arith.constant 6 : index
    %168 = memref.load %arg4[%c6_60] : memref<32xf32, #tpu.memory_space<smem>>
    %169 = vector.broadcast %168 : f32 to vector<1x128xf32>
    %170 = arith.addf %167, %169 : vector<1x128xf32>
    %c24 = arith.constant 24 : index
    %171 = memref.load %arg3[%c24] : memref<128xf32, #tpu.memory_space<smem>>
    %172 = vector.broadcast %171 : f32 to vector<1x128xf32>
    %173 = arith.mulf %172, %9 : vector<1x128xf32>
    %174 = arith.addf %170, %173 : vector<1x128xf32>
    %c25 = arith.constant 25 : index
    %175 = memref.load %arg3[%c25] : memref<128xf32, #tpu.memory_space<smem>>
    %176 = vector.broadcast %175 : f32 to vector<1x128xf32>
    %177 = arith.mulf %176, %19 : vector<1x128xf32>
    %178 = arith.addf %174, %177 : vector<1x128xf32>
    %c26 = arith.constant 26 : index
    %179 = memref.load %arg3[%c26] : memref<128xf32, #tpu.memory_space<smem>>
    %180 = vector.broadcast %179 : f32 to vector<1x128xf32>
    %181 = arith.mulf %180, %29 : vector<1x128xf32>
    %182 = arith.addf %178, %181 : vector<1x128xf32>
    %c27 = arith.constant 27 : index
    %183 = memref.load %arg3[%c27] : memref<128xf32, #tpu.memory_space<smem>>
    %184 = vector.broadcast %183 : f32 to vector<1x128xf32>
    %185 = arith.mulf %184, %39 : vector<1x128xf32>
    %186 = arith.addf %182, %185 : vector<1x128xf32>
    %c6_61 = arith.constant 6 : index
    %c0_62 = arith.constant 0 : index
    %187 = vector.load %arg9[%c6_61, %c0_62] : memref<32x128xf32, #tpu.memory_space<vmem>>, vector<1x128xf32>
    tpu.vector_store %arg9[%c6_61, %c0_62], %186 {strides = array<i32>} : memref<32x128xf32, #tpu.memory_space<vmem>>, vector<1x128xf32>,
    %cst_63 = arith.constant 0.000000e+00 : f32
    %188 = vector.broadcast %cst_63 : f32 to vector<1x128xf32>
    %c7_64 = arith.constant 7 : index
    %189 = memref.load %arg4[%c7_64] : memref<32xf32, #tpu.memory_space<smem>>
    %190 = vector.broadcast %189 : f32 to vector<1x128xf32>
    %191 = arith.addf %188, %190 : vector<1x128xf32>
    %c28 = arith.constant 28 : index
    %192 = memref.load %arg3[%c28] : memref<128xf32, #tpu.memory_space<smem>>
    %193 = vector.broadcast %192 : f32 to vector<1x128xf32>
    %194 = arith.mulf %193, %9 : vector<1x128xf32>
    %195 = arith.addf %191, %194 : vector<1x128xf32>
    %c29 = arith.constant 29 : index
    %196 = memref.load %arg3[%c29] : memref<128xf32, #tpu.memory_space<smem>>
    %197 = vector.broadcast %196 : f32 to vector<1x128xf32>
    %198 = arith.mulf %197, %19 : vector<1x128xf32>
    %199 = arith.addf %195, %198 : vector<1x128xf32>
    %c30 = arith.constant 30 : index
    %200 = memref.load %arg3[%c30] : memref<128xf32, #tpu.memory_space<smem>>
    %201 = vector.broadcast %200 : f32 to vector<1x128xf32>
    %202 = arith.mulf %201, %29 : vector<1x128xf32>
    %203 = arith.addf %199, %202 : vector<1x128xf32>
    %c31 = arith.constant 31 : index
    %204 = memref.load %arg3[%c31] : memref<128xf32, #tpu.memory_space<smem>>
    %205 = vector.broadcast %204 : f32 to vector<1x128xf32>
    %206 = arith.mulf %205, %39 : vector<1x128xf32>
    %207 = arith.addf %203, %206 : vector<1x128xf32>
    %c7_65 = arith.constant 7 : index
    %c0_66 = arith.constant 0 : index
    %208 = vector.load %arg9[%c7_65, %c0_66] : memref<32x128xf32, #tpu.memory_space<vmem>>, vector<1x128xf32>
    tpu.vector_store %arg9[%c7_65, %c0_66], %207 {strides = array<i32>} : memref<32x128xf32, #tpu.memory_space<vmem>>, vector<1x128xf32>,
    %cst_67 = arith.constant 0.000000e+00 : f32
    %209 = vector.broadcast %cst_67 : f32 to vector<1x128xf32>
    %c8_68 = arith.constant 8 : index
    %210 = memref.load %arg4[%c8_68] : memref<32xf32, #tpu.memory_space<smem>>
    %211 = vector.broadcast %210 : f32 to vector<1x128xf32>
    %212 = arith.addf %209, %211 : vector<1x128xf32>
    %c32 = arith.constant 32 : index
    %213 = memref.load %arg3[%c32] : memref<128xf32, #tpu.memory_space<smem>>
    %214 = vector.broadcast %213 : f32 to vector<1x128xf32>
    %215 = arith.mulf %214, %9 : vector<1x128xf32>
    %216 = arith.addf %212, %215 : vector<1x128xf32>
    %c33 = arith.constant 33 : index
    %217 = memref.load %arg3[%c33] : memref<128xf32, #tpu.memory_space<smem>>
    %218 = vector.broadcast %217 : f32 to vector<1x128xf32>
    %219 = arith.mulf %218, %19 : vector<1x128xf32>
    %220 = arith.addf %216, %219 : vector<1x128xf32>
    %c34 = arith.constant 34 : index
    %221 = memref.load %arg3[%c34] : memref<128xf32, #tpu.memory_space<smem>>
    %222 = vector.broadcast %221 : f32 to vector<1x128xf32>
    %223 = arith.mulf %222, %29 : vector<1x128xf32>
    %224 = arith.addf %220, %223 : vector<1x128xf32>
    %c35 = arith.constant 35 : index
    %225 = memref.load %arg3[%c35] : memref<128xf32, #tpu.memory_space<smem>>
    %226 = vector.broadcast %225 : f32 to vector<1x128xf32>
    %227 = arith.mulf %226, %39 : vector<1x128xf32>
    %228 = arith.addf %224, %227 : vector<1x128xf32>
    %c8_69 = arith.constant 8 : index
    %c0_70 = arith.constant 0 : index
    %229 = vector.load %arg9[%c8_69, %c0_70] : memref<32x128xf32, #tpu.memory_space<vmem>>, vector<1x128xf32>
    tpu.vector_store %arg9[%c8_69, %c0_70], %228 {strides = array<i32>} : memref<32x128xf32, #tpu.memory_space<vmem>>, vector<1x128xf32>,
    %cst_71 = arith.constant 0.000000e+00 : f32
    %230 = vector.broadcast %cst_71 : f32 to vector<1x128xf32>
    %c9_72 = arith.constant 9 : index
    %231 = memref.load %arg4[%c9_72] : memref<32xf32, #tpu.memory_space<smem>>
    %232 = vector.broadcast %231 : f32 to vector<1x128xf32>
    %233 = arith.addf %230, %232 : vector<1x128xf32>
    %c36 = arith.constant 36 : index
    %234 = memref.load %arg3[%c36] : memref<128xf32, #tpu.memory_space<smem>>
    %235 = vector.broadcast %234 : f32 to vector<1x128xf32>
    %236 = arith.mulf %235, %9 : vector<1x128xf32>
    %237 = arith.addf %233, %236 : vector<1x128xf32>
    %c37 = arith.constant 37 : index
    %238 = memref.load %arg3[%c37] : memref<128xf32, #tpu.memory_space<smem>>
    %239 = vector.broadcast %238 : f32 to vector<1x128xf32>
    %240 = arith.mulf %239, %19 : vector<1x128xf32>
    %241 = arith.addf %237, %240 : vector<1x128xf32>
    %c38 = arith.constant 38 : index
    %242 = memref.load %arg3[%c38] : memref<128xf32, #tpu.memory_space<smem>>
    %243 = vector.broadcast %242 : f32 to vector<1x128xf32>
    %244 = arith.mulf %243, %29 : vector<1x128xf32>
    %245 = arith.addf %241, %244 : vector<1x128xf32>
    %c39 = arith.constant 39 : index
    %246 = memref.load %arg3[%c39] : memref<128xf32, #tpu.memory_space<smem>>
    %247 = vector.broadcast %246 : f32 to vector<1x128xf32>
    %248 = arith.mulf %247, %39 : vector<1x128xf32>
    %249 = arith.addf %245, %248 : vector<1x128xf32>
    %c9_73 = arith.constant 9 : index
    %c0_74 = arith.constant 0 : index
    %250 = vector.load %arg9[%c9_73, %c0_74] : memref<32x128xf32, #tpu.memory_space<vmem>>, vector<1x128xf32>
    tpu.vector_store %arg9[%c9_73, %c0_74], %249 {strides = array<i32>} : memref<32x128xf32, #tpu.memory_space<vmem>>, vector<1x128xf32>,
    %cst_75 = arith.constant 0.000000e+00 : f32
    %251 = vector.broadcast %cst_75 : f32 to vector<1x128xf32>
    %c10_76 = arith.constant 10 : index
    %252 = memref.load %arg4[%c10_76] : memref<32xf32, #tpu.memory_space<smem>>
    %253 = vector.broadcast %252 : f32 to vector<1x128xf32>
    %254 = arith.addf %251, %253 : vector<1x128xf32>
    %c40 = arith.constant 40 : index
    %255 = memref.load %arg3[%c40] : memref<128xf32, #tpu.memory_space<smem>>
    %256 = vector.broadcast %255 : f32 to vector<1x128xf32>
    %257 = arith.mulf %256, %9 : vector<1x128xf32>
    %258 = arith.addf %254, %257 : vector<1x128xf32>
    %c41 = arith.constant 41 : index
    %259 = memref.load %arg3[%c41] : memref<128xf32, #tpu.memory_space<smem>>
    %260 = vector.broadcast %259 : f32 to vector<1x128xf32>
    %261 = arith.mulf %260, %19 : vector<1x128xf32>
    %262 = arith.addf %258, %261 : vector<1x128xf32>
    %c42 = arith.constant 42 : index
    %263 = memref.load %arg3[%c42] : memref<128xf32, #tpu.memory_space<smem>>
    %264 = vector.broadcast %263 : f32 to vector<1x128xf32>
    %265 = arith.mulf %264, %29 : vector<1x128xf32>
    %266 = arith.addf %262, %265 : vector<1x128xf32>
    %c43 = arith.constant 43 : index
    %267 = memref.load %arg3[%c43] : memref<128xf32, #tpu.memory_space<smem>>
    %268 = vector.broadcast %267 : f32 to vector<1x128xf32>
    %269 = arith.mulf %268, %39 : vector<1x128xf32>
    %270 = arith.addf %266, %269 : vector<1x128xf32>
    %c10_77 = arith.constant 10 : index
    %c0_78 = arith.constant 0 : index
    %271 = vector.load %arg9[%c10_77, %c0_78] : memref<32x128xf32, #tpu.memory_space<vmem>>, vector<1x128xf32>
    tpu.vector_store %arg9[%c10_77, %c0_78], %270 {strides = array<i32>} : memref<32x128xf32, #tpu.memory_space<vmem>>, vector<1x128xf32>,
    %cst_79 = arith.constant 0.000000e+00 : f32
    %272 = vector.broadcast %cst_79 : f32 to vector<1x128xf32>
    %c11_80 = arith.constant 11 : index
    %273 = memref.load %arg4[%c11_80] : memref<32xf32, #tpu.memory_space<smem>>
    %274 = vector.broadcast %273 : f32 to vector<1x128xf32>
    %275 = arith.addf %272, %274 : vector<1x128xf32>
    %c44 = arith.constant 44 : index
    %276 = memref.load %arg3[%c44] : memref<128xf32, #tpu.memory_space<smem>>
    %277 = vector.broadcast %276 : f32 to vector<1x128xf32>
    %278 = arith.mulf %277, %9 : vector<1x128xf32>
    %279 = arith.addf %275, %278 : vector<1x128xf32>
    %c45 = arith.constant 45 : index
    %280 = memref.load %arg3[%c45] : memref<128xf32, #tpu.memory_space<smem>>
    %281 = vector.broadcast %280 : f32 to vector<1x128xf32>
    %282 = arith.mulf %281, %19 : vector<1x128xf32>
    %283 = arith.addf %279, %282 : vector<1x128xf32>
    %c46 = arith.constant 46 : index
    %284 = memref.load %arg3[%c46] : memref<128xf32, #tpu.memory_space<smem>>
    %285 = vector.broadcast %284 : f32 to vector<1x128xf32>
    %286 = arith.mulf %285, %29 : vector<1x128xf32>
    %287 = arith.addf %283, %286 : vector<1x128xf32>
    %c47 = arith.constant 47 : index
    %288 = memref.load %arg3[%c47] : memref<128xf32, #tpu.memory_space<smem>>
    %289 = vector.broadcast %288 : f32 to vector<1x128xf32>
    %290 = arith.mulf %289, %39 : vector<1x128xf32>
    %291 = arith.addf %287, %290 : vector<1x128xf32>
    %c11_81 = arith.constant 11 : index
    %c0_82 = arith.constant 0 : index
    %292 = vector.load %arg9[%c11_81, %c0_82] : memref<32x128xf32, #tpu.memory_space<vmem>>, vector<1x128xf32>
    tpu.vector_store %arg9[%c11_81, %c0_82], %291 {strides = array<i32>} : memref<32x128xf32, #tpu.memory_space<vmem>>, vector<1x128xf32>,
    %cst_83 = arith.constant 0.000000e+00 : f32
    %293 = vector.broadcast %cst_83 : f32 to vector<1x128xf32>
    %c12_84 = arith.constant 12 : index
    %294 = memref.load %arg4[%c12_84] : memref<32xf32, #tpu.memory_space<smem>>
    %295 = vector.broadcast %294 : f32 to vector<1x128xf32>
    %296 = arith.addf %293, %295 : vector<1x128xf32>
    %c48 = arith.constant 48 : index
    %297 = memref.load %arg3[%c48] : memref<128xf32, #tpu.memory_space<smem>>
    %298 = vector.broadcast %297 : f32 to vector<1x128xf32>
    %299 = arith.mulf %298, %9 : vector<1x128xf32>
    %300 = arith.addf %296, %299 : vector<1x128xf32>
    %c49 = arith.constant 49 : index
    %301 = memref.load %arg3[%c49] : memref<128xf32, #tpu.memory_space<smem>>
    %302 = vector.broadcast %301 : f32 to vector<1x128xf32>
    %303 = arith.mulf %302, %19 : vector<1x128xf32>
    %304 = arith.addf %300, %303 : vector<1x128xf32>
    %c50 = arith.constant 50 : index
    %305 = memref.load %arg3[%c50] : memref<128xf32, #tpu.memory_space<smem>>
    %306 = vector.broadcast %305 : f32 to vector<1x128xf32>
    %307 = arith.mulf %306, %29 : vector<1x128xf32>
    %308 = arith.addf %304, %307 : vector<1x128xf32>
    %c51 = arith.constant 51 : index
    %309 = memref.load %arg3[%c51] : memref<128xf32, #tpu.memory_space<smem>>
    %310 = vector.broadcast %309 : f32 to vector<1x128xf32>
    %311 = arith.mulf %310, %39 : vector<1x128xf32>
    %312 = arith.addf %308, %311 : vector<1x128xf32>
    %c12_85 = arith.constant 12 : index
    %c0_86 = arith.constant 0 : index
    %313 = vector.load %arg9[%c12_85, %c0_86] : memref<32x128xf32, #tpu.memory_space<vmem>>, vector<1x128xf32>
    tpu.vector_store %arg9[%c12_85, %c0_86], %312 {strides = array<i32>} : memref<32x128xf32, #tpu.memory_space<vmem>>, vector<1x128xf32>,
    %cst_87 = arith.constant 0.000000e+00 : f32
    %314 = vector.broadcast %cst_87 : f32 to vector<1x128xf32>
    %c13_88 = arith.constant 13 : index
    %315 = memref.load %arg4[%c13_88] : memref<32xf32, #tpu.memory_space<smem>>
    %316 = vector.broadcast %315 : f32 to vector<1x128xf32>
    %317 = arith.addf %314, %316 : vector<1x128xf32>
    %c52 = arith.constant 52 : index
    %318 = memref.load %arg3[%c52] : memref<128xf32, #tpu.memory_space<smem>>
    %319 = vector.broadcast %318 : f32 to vector<1x128xf32>
    %320 = arith.mulf %319, %9 : vector<1x128xf32>
    %321 = arith.addf %317, %320 : vector<1x128xf32>
    %c53 = arith.constant 53 : index
    %322 = memref.load %arg3[%c53] : memref<128xf32, #tpu.memory_space<smem>>
    %323 = vector.broadcast %322 : f32 to vector<1x128xf32>
    %324 = arith.mulf %323, %19 : vector<1x128xf32>
    %325 = arith.addf %321, %324 : vector<1x128xf32>
    %c54 = arith.constant 54 : index
    %326 = memref.load %arg3[%c54] : memref<128xf32, #tpu.memory_space<smem>>
    %327 = vector.broadcast %326 : f32 to vector<1x128xf32>
    %328 = arith.mulf %327, %29 : vector<1x128xf32>
    %329 = arith.addf %325, %328 : vector<1x128xf32>
    %c55 = arith.constant 55 : index
    %330 = memref.load %arg3[%c55] : memref<128xf32, #tpu.memory_space<smem>>
    %331 = vector.broadcast %330 : f32 to vector<1x128xf32>
    %332 = arith.mulf %331, %39 : vector<1x128xf32>
    %333 = arith.addf %329, %332 : vector<1x128xf32>
    %c13_89 = arith.constant 13 : index
    %c0_90 = arith.constant 0 : index
    %334 = vector.load %arg9[%c13_89, %c0_90] : memref<32x128xf32, #tpu.memory_space<vmem>>, vector<1x128xf32>
    tpu.vector_store %arg9[%c13_89, %c0_90], %333 {strides = array<i32>} : memref<32x128xf32, #tpu.memory_space<vmem>>, vector<1x128xf32>,
    %cst_91 = arith.constant 0.000000e+00 : f32
    %335 = vector.broadcast %cst_91 : f32 to vector<1x128xf32>
    %c14_92 = arith.constant 14 : index
    %336 = memref.load %arg4[%c14_92] : memref<32xf32, #tpu.memory_space<smem>>
    %337 = vector.broadcast %336 : f32 to vector<1x128xf32>
    %338 = arith.addf %335, %337 : vector<1x128xf32>
    %c56 = arith.constant 56 : index
    %339 = memref.load %arg3[%c56] : memref<128xf32, #tpu.memory_space<smem>>
    %340 = vector.broadcast %339 : f32 to vector<1x128xf32>
    %341 = arith.mulf %340, %9 : vector<1x128xf32>
    %342 = arith.addf %338, %341 : vector<1x128xf32>
    %c57 = arith.constant 57 : index
    %343 = memref.load %arg3[%c57] : memref<128xf32, #tpu.memory_space<smem>>
    %344 = vector.broadcast %343 : f32 to vector<1x128xf32>
    %345 = arith.mulf %344, %19 : vector<1x128xf32>
    %346 = arith.addf %342, %345 : vector<1x128xf32>
    %c58 = arith.constant 58 : index
    %347 = memref.load %arg3[%c58] : memref<128xf32, #tpu.memory_space<smem>>
    %348 = vector.broadcast %347 : f32 to vector<1x128xf32>
    %349 = arith.mulf %348, %29 : vector<1x128xf32>
    %350 = arith.addf %346, %349 : vector<1x128xf32>
    %c59 = arith.constant 59 : index
    %351 = memref.load %arg3[%c59] : memref<128xf32, #tpu.memory_space<smem>>
    %352 = vector.broadcast %351 : f32 to vector<1x128xf32>
    %353 = arith.mulf %352, %39 : vector<1x128xf32>
    %354 = arith.addf %350, %353 : vector<1x128xf32>
    %c14_93 = arith.constant 14 : index
    %c0_94 = arith.constant 0 : index
    %355 = vector.load %arg9[%c14_93, %c0_94] : memref<32x128xf32, #tpu.memory_space<vmem>>, vector<1x128xf32>
    tpu.vector_store %arg9[%c14_93, %c0_94], %354 {strides = array<i32>} : memref<32x128xf32, #tpu.memory_space<vmem>>, vector<1x128xf32>,
    %cst_95 = arith.constant 0.000000e+00 : f32
    %356 = vector.broadcast %cst_95 : f32 to vector<1x128xf32>
    %c15_96 = arith.constant 15 : index
    %357 = memref.load %arg4[%c15_96] : memref<32xf32, #tpu.memory_space<smem>>
    %358 = vector.broadcast %357 : f32 to vector<1x128xf32>
    %359 = arith.addf %356, %358 : vector<1x128xf32>
    %c60 = arith.constant 60 : index
    %360 = memref.load %arg3[%c60] : memref<128xf32, #tpu.memory_space<smem>>
    %361 = vector.broadcast %360 : f32 to vector<1x128xf32>
    %362 = arith.mulf %361, %9 : vector<1x128xf32>
    %363 = arith.addf %359, %362 : vector<1x128xf32>
    %c61 = arith.constant 61 : index
    %364 = memref.load %arg3[%c61] : memref<128xf32, #tpu.memory_space<smem>>
    %365 = vector.broadcast %364 : f32 to vector<1x128xf32>
    %366 = arith.mulf %365, %19 : vector<1x128xf32>
    %367 = arith.addf %363, %366 : vector<1x128xf32>
    %c62 = arith.constant 62 : index
    %368 = memref.load %arg3[%c62] : memref<128xf32, #tpu.memory_space<smem>>
    %369 = vector.broadcast %368 : f32 to vector<1x128xf32>
    %370 = arith.mulf %369, %29 : vector<1x128xf32>
    %371 = arith.addf %367, %370 : vector<1x128xf32>
    %c63 = arith.constant 63 : index
    %372 = memref.load %arg3[%c63] : memref<128xf32, #tpu.memory_space<smem>>
    %373 = vector.broadcast %372 : f32 to vector<1x128xf32>
    %374 = arith.mulf %373, %39 : vector<1x128xf32>
    %375 = arith.addf %371, %374 : vector<1x128xf32>
    %c15_97 = arith.constant 15 : index
    %c0_98 = arith.constant 0 : index
    %376 = vector.load %arg9[%c15_97, %c0_98] : memref<32x128xf32, #tpu.memory_space<vmem>>, vector<1x128xf32>
    tpu.vector_store %arg9[%c15_97, %c0_98], %375 {strides = array<i32>} : memref<32x128xf32, #tpu.memory_space<vmem>>, vector<1x128xf32>,
    %cst_99 = arith.constant 0.000000e+00 : f32
    %377 = vector.broadcast %cst_99 : f32 to vector<1x128xf32>
    %c16_100 = arith.constant 16 : index
    %378 = memref.load %arg4[%c16_100] : memref<32xf32, #tpu.memory_space<smem>>
    %379 = vector.broadcast %378 : f32 to vector<1x128xf32>
    %380 = arith.addf %377, %379 : vector<1x128xf32>
    %c64 = arith.constant 64 : index
    %381 = memref.load %arg3[%c64] : memref<128xf32, #tpu.memory_space<smem>>
    %382 = vector.broadcast %381 : f32 to vector<1x128xf32>
    %383 = arith.mulf %382, %9 : vector<1x128xf32>
    %384 = arith.addf %380, %383 : vector<1x128xf32>
    %c65 = arith.constant 65 : index
    %385 = memref.load %arg3[%c65] : memref<128xf32, #tpu.memory_space<smem>>
    %386 = vector.broadcast %385 : f32 to vector<1x128xf32>
    %387 = arith.mulf %386, %19 : vector<1x128xf32>
    %388 = arith.addf %384, %387 : vector<1x128xf32>
    %c66 = arith.constant 66 : index
    %389 = memref.load %arg3[%c66] : memref<128xf32, #tpu.memory_space<smem>>
    %390 = vector.broadcast %389 : f32 to vector<1x128xf32>
    %391 = arith.mulf %390, %29 : vector<1x128xf32>
    %392 = arith.addf %388, %391 : vector<1x128xf32>
    %c67 = arith.constant 67 : index
    %393 = memref.load %arg3[%c67] : memref<128xf32, #tpu.memory_space<smem>>
    %394 = vector.broadcast %393 : f32 to vector<1x128xf32>
    %395 = arith.mulf %394, %39 : vector<1x128xf32>
    %396 = arith.addf %392, %395 : vector<1x128xf32>
    %c16_101 = arith.constant 16 : index
    %c0_102 = arith.constant 0 : index
    %397 = vector.load %arg9[%c16_101, %c0_102] : memref<32x128xf32, #tpu.memory_space<vmem>>, vector<1x128xf32>
    tpu.vector_store %arg9[%c16_101, %c0_102], %396 {strides = array<i32>} : memref<32x128xf32, #tpu.memory_space<vmem>>, vector<1x128xf32>,
    %cst_103 = arith.constant 0.000000e+00 : f32
    %398 = vector.broadcast %cst_103 : f32 to vector<1x128xf32>
    %c17_104 = arith.constant 17 : index
    %399 = memref.load %arg4[%c17_104] : memref<32xf32, #tpu.memory_space<smem>>
    %400 = vector.broadcast %399 : f32 to vector<1x128xf32>
    %401 = arith.addf %398, %400 : vector<1x128xf32>
    %c68 = arith.constant 68 : index
    %402 = memref.load %arg3[%c68] : memref<128xf32, #tpu.memory_space<smem>>
    %403 = vector.broadcast %402 : f32 to vector<1x128xf32>
    %404 = arith.mulf %403, %9 : vector<1x128xf32>
    %405 = arith.addf %401, %404 : vector<1x128xf32>
    %c69 = arith.constant 69 : index
    %406 = memref.load %arg3[%c69] : memref<128xf32, #tpu.memory_space<smem>>
    %407 = vector.broadcast %406 : f32 to vector<1x128xf32>
    %408 = arith.mulf %407, %19 : vector<1x128xf32>
    %409 = arith.addf %405, %408 : vector<1x128xf32>
    %c70 = arith.constant 70 : index
    %410 = memref.load %arg3[%c70] : memref<128xf32, #tpu.memory_space<smem>>
    %411 = vector.broadcast %410 : f32 to vector<1x128xf32>
    %412 = arith.mulf %411, %29 : vector<1x128xf32>
    %413 = arith.addf %409, %412 : vector<1x128xf32>
    %c71 = arith.constant 71 : index
    %414 = memref.load %arg3[%c71] : memref<128xf32, #tpu.memory_space<smem>>
    %415 = vector.broadcast %414 : f32 to vector<1x128xf32>
    %416 = arith.mulf %415, %39 : vector<1x128xf32>
    %417 = arith.addf %413, %416 : vector<1x128xf32>
    %c17_105 = arith.constant 17 : index
    %c0_106 = arith.constant 0 : index
    %418 = vector.load %arg9[%c17_105, %c0_106] : memref<32x128xf32, #tpu.memory_space<vmem>>, vector<1x128xf32>
    tpu.vector_store %arg9[%c17_105, %c0_106], %417 {strides = array<i32>} : memref<32x128xf32, #tpu.memory_space<vmem>>, vector<1x128xf32>,
    %cst_107 = arith.constant 0.000000e+00 : f32
    %419 = vector.broadcast %cst_107 : f32 to vector<1x128xf32>
    %c18_108 = arith.constant 18 : index
    %420 = memref.load %arg4[%c18_108] : memref<32xf32, #tpu.memory_space<smem>>
    %421 = vector.broadcast %420 : f32 to vector<1x128xf32>
    %422 = arith.addf %419, %421 : vector<1x128xf32>
    %c72 = arith.constant 72 : index
    %423 = memref.load %arg3[%c72] : memref<128xf32, #tpu.memory_space<smem>>
    %424 = vector.broadcast %423 : f32 to vector<1x128xf32>
    %425 = arith.mulf %424, %9 : vector<1x128xf32>
    %426 = arith.addf %422, %425 : vector<1x128xf32>
    %c73 = arith.constant 73 : index
    %427 = memref.load %arg3[%c73] : memref<128xf32, #tpu.memory_space<smem>>
    %428 = vector.broadcast %427 : f32 to vector<1x128xf32>
    %429 = arith.mulf %428, %19 : vector<1x128xf32>
    %430 = arith.addf %426, %429 : vector<1x128xf32>
    %c74 = arith.constant 74 : index
    %431 = memref.load %arg3[%c74] : memref<128xf32, #tpu.memory_space<smem>>
    %432 = vector.broadcast %431 : f32 to vector<1x128xf32>
    %433 = arith.mulf %432, %29 : vector<1x128xf32>
    %434 = arith.addf %430, %433 : vector<1x128xf32>
    %c75 = arith.constant 75 : index
    %435 = memref.load %arg3[%c75] : memref<128xf32, #tpu.memory_space<smem>>
    %436 = vector.broadcast %435 : f32 to vector<1x128xf32>
    %437 = arith.mulf %436, %39 : vector<1x128xf32>
    %438 = arith.addf %434, %437 : vector<1x128xf32>
    %c18_109 = arith.constant 18 : index
    %c0_110 = arith.constant 0 : index
    %439 = vector.load %arg9[%c18_109, %c0_110] : memref<32x128xf32, #tpu.memory_space<vmem>>, vector<1x128xf32>
    tpu.vector_store %arg9[%c18_109, %c0_110], %438 {strides = array<i32>} : memref<32x128xf32, #tpu.memory_space<vmem>>, vector<1x128xf32>,
    %cst_111 = arith.constant 0.000000e+00 : f32
    %440 = vector.broadcast %cst_111 : f32 to vector<1x128xf32>
    %c19_112 = arith.constant 19 : index
    %441 = memref.load %arg4[%c19_112] : memref<32xf32, #tpu.memory_space<smem>>
    %442 = vector.broadcast %441 : f32 to vector<1x128xf32>
    %443 = arith.addf %440, %442 : vector<1x128xf32>
    %c76 = arith.constant 76 : index
    %444 = memref.load %arg3[%c76] : memref<128xf32, #tpu.memory_space<smem>>
    %445 = vector.broadcast %444 : f32 to vector<1x128xf32>
    %446 = arith.mulf %445, %9 : vector<1x128xf32>
    %447 = arith.addf %443, %446 : vector<1x128xf32>
    %c77 = arith.constant 77 : index
    %448 = memref.load %arg3[%c77] : memref<128xf32, #tpu.memory_space<smem>>
    %449 = vector.broadcast %448 : f32 to vector<1x128xf32>
    %450 = arith.mulf %449, %19 : vector<1x128xf32>
    %451 = arith.addf %447, %450 : vector<1x128xf32>
    %c78 = arith.constant 78 : index
    %452 = memref.load %arg3[%c78] : memref<128xf32, #tpu.memory_space<smem>>
    %453 = vector.broadcast %452 : f32 to vector<1x128xf32>
    %454 = arith.mulf %453, %29 : vector<1x128xf32>
    %455 = arith.addf %451, %454 : vector<1x128xf32>
    %c79 = arith.constant 79 : index
    %456 = memref.load %arg3[%c79] : memref<128xf32, #tpu.memory_space<smem>>
    %457 = vector.broadcast %456 : f32 to vector<1x128xf32>
    %458 = arith.mulf %457, %39 : vector<1x128xf32>
    %459 = arith.addf %455, %458 : vector<1x128xf32>
    %c19_113 = arith.constant 19 : index
    %c0_114 = arith.constant 0 : index
    %460 = vector.load %arg9[%c19_113, %c0_114] : memref<32x128xf32, #tpu.memory_space<vmem>>, vector<1x128xf32>
    tpu.vector_store %arg9[%c19_113, %c0_114], %459 {strides = array<i32>} : memref<32x128xf32, #tpu.memory_space<vmem>>, vector<1x128xf32>,
    %cst_115 = arith.constant 0.000000e+00 : f32
    %461 = vector.broadcast %cst_115 : f32 to vector<1x128xf32>
    %c20_116 = arith.constant 20 : index
    %462 = memref.load %arg4[%c20_116] : memref<32xf32, #tpu.memory_space<smem>>
    %463 = vector.broadcast %462 : f32 to vector<1x128xf32>
    %464 = arith.addf %461, %463 : vector<1x128xf32>
    %c80 = arith.constant 80 : index
    %465 = memref.load %arg3[%c80] : memref<128xf32, #tpu.memory_space<smem>>
    %466 = vector.broadcast %465 : f32 to vector<1x128xf32>
    %467 = arith.mulf %466, %9 : vector<1x128xf32>
    %468 = arith.addf %464, %467 : vector<1x128xf32>
    %c81 = arith.constant 81 : index
    %469 = memref.load %arg3[%c81] : memref<128xf32, #tpu.memory_space<smem>>
    %470 = vector.broadcast %469 : f32 to vector<1x128xf32>
    %471 = arith.mulf %470, %19 : vector<1x128xf32>
    %472 = arith.addf %468, %471 : vector<1x128xf32>
    %c82 = arith.constant 82 : index
    %473 = memref.load %arg3[%c82] : memref<128xf32, #tpu.memory_space<smem>>
    %474 = vector.broadcast %473 : f32 to vector<1x128xf32>
    %475 = arith.mulf %474, %29 : vector<1x128xf32>
    %476 = arith.addf %472, %475 : vector<1x128xf32>
    %c83 = arith.constant 83 : index
    %477 = memref.load %arg3[%c83] : memref<128xf32, #tpu.memory_space<smem>>
    %478 = vector.broadcast %477 : f32 to vector<1x128xf32>
    %479 = arith.mulf %478, %39 : vector<1x128xf32>
    %480 = arith.addf %476, %479 : vector<1x128xf32>
    %c20_117 = arith.constant 20 : index
    %c0_118 = arith.constant 0 : index
    %481 = vector.load %arg9[%c20_117, %c0_118] : memref<32x128xf32, #tpu.memory_space<vmem>>, vector<1x128xf32>
    tpu.vector_store %arg9[%c20_117, %c0_118], %480 {strides = array<i32>} : memref<32x128xf32, #tpu.memory_space<vmem>>, vector<1x128xf32>,
    %cst_119 = arith.constant 0.000000e+00 : f32
    %482 = vector.broadcast %cst_119 : f32 to vector<1x128xf32>
    %c21_120 = arith.constant 21 : index
    %483 = memref.load %arg4[%c21_120] : memref<32xf32, #tpu.memory_space<smem>>
    %484 = vector.broadcast %483 : f32 to vector<1x128xf32>
    %485 = arith.addf %482, %484 : vector<1x128xf32>
    %c84 = arith.constant 84 : index
    %486 = memref.load %arg3[%c84] : memref<128xf32, #tpu.memory_space<smem>>
    %487 = vector.broadcast %486 : f32 to vector<1x128xf32>
    %488 = arith.mulf %487, %9 : vector<1x128xf32>
    %489 = arith.addf %485, %488 : vector<1x128xf32>
    %c85 = arith.constant 85 : index
    %490 = memref.load %arg3[%c85] : memref<128xf32, #tpu.memory_space<smem>>
    %491 = vector.broadcast %490 : f32 to vector<1x128xf32>
    %492 = arith.mulf %491, %19 : vector<1x128xf32>
    %493 = arith.addf %489, %492 : vector<1x128xf32>
    %c86 = arith.constant 86 : index
    %494 = memref.load %arg3[%c86] : memref<128xf32, #tpu.memory_space<smem>>
    %495 = vector.broadcast %494 : f32 to vector<1x128xf32>
    %496 = arith.mulf %495, %29 : vector<1x128xf32>
    %497 = arith.addf %493, %496 : vector<1x128xf32>
    %c87 = arith.constant 87 : index
    %498 = memref.load %arg3[%c87] : memref<128xf32, #tpu.memory_space<smem>>
    %499 = vector.broadcast %498 : f32 to vector<1x128xf32>
    %500 = arith.mulf %499, %39 : vector<1x128xf32>
    %501 = arith.addf %497, %500 : vector<1x128xf32>
    %c21_121 = arith.constant 21 : index
    %c0_122 = arith.constant 0 : index
    %502 = vector.load %arg9[%c21_121, %c0_122] : memref<32x128xf32, #tpu.memory_space<vmem>>, vector<1x128xf32>
    tpu.vector_store %arg9[%c21_121, %c0_122], %501 {strides = array<i32>} : memref<32x128xf32, #tpu.memory_space<vmem>>, vector<1x128xf32>,
    %cst_123 = arith.constant 0.000000e+00 : f32
    %503 = vector.broadcast %cst_123 : f32 to vector<1x128xf32>
    %c22_124 = arith.constant 22 : index
    %504 = memref.load %arg4[%c22_124] : memref<32xf32, #tpu.memory_space<smem>>
    %505 = vector.broadcast %504 : f32 to vector<1x128xf32>
    %506 = arith.addf %503, %505 : vector<1x128xf32>
    %c88 = arith.constant 88 : index
    %507 = memref.load %arg3[%c88] : memref<128xf32, #tpu.memory_space<smem>>
    %508 = vector.broadcast %507 : f32 to vector<1x128xf32>
    %509 = arith.mulf %508, %9 : vector<1x128xf32>
    %510 = arith.addf %506, %509 : vector<1x128xf32>
    %c89 = arith.constant 89 : index
    %511 = memref.load %arg3[%c89] : memref<128xf32, #tpu.memory_space<smem>>
    %512 = vector.broadcast %511 : f32 to vector<1x128xf32>
    %513 = arith.mulf %512, %19 : vector<1x128xf32>
    %514 = arith.addf %510, %513 : vector<1x128xf32>
    %c90 = arith.constant 90 : index
    %515 = memref.load %arg3[%c90] : memref<128xf32, #tpu.memory_space<smem>>
    %516 = vector.broadcast %515 : f32 to vector<1x128xf32>
    %517 = arith.mulf %516, %29 : vector<1x128xf32>
    %518 = arith.addf %514, %517 : vector<1x128xf32>
    %c91 = arith.constant 91 : index
    %519 = memref.load %arg3[%c91] : memref<128xf32, #tpu.memory_space<smem>>
    %520 = vector.broadcast %519 : f32 to vector<1x128xf32>
    %521 = arith.mulf %520, %39 : vector<1x128xf32>
    %522 = arith.addf %518, %521 : vector<1x128xf32>
    %c22_125 = arith.constant 22 : index
    %c0_126 = arith.constant 0 : index
    %523 = vector.load %arg9[%c22_125, %c0_126] : memref<32x128xf32, #tpu.memory_space<vmem>>, vector<1x128xf32>
    tpu.vector_store %arg9[%c22_125, %c0_126], %522 {strides = array<i32>} : memref<32x128xf32, #tpu.memory_space<vmem>>, vector<1x128xf32>,
    %cst_127 = arith.constant 0.000000e+00 : f32
    %524 = vector.broadcast %cst_127 : f32 to vector<1x128xf32>
    %c23_128 = arith.constant 23 : index
    %525 = memref.load %arg4[%c23_128] : memref<32xf32, #tpu.memory_space<smem>>
    %526 = vector.broadcast %525 : f32 to vector<1x128xf32>
    %527 = arith.addf %524, %526 : vector<1x128xf32>
    %c92 = arith.constant 92 : index
    %528 = memref.load %arg3[%c92] : memref<128xf32, #tpu.memory_space<smem>>
    %529 = vector.broadcast %528 : f32 to vector<1x128xf32>
    %530 = arith.mulf %529, %9 : vector<1x128xf32>
    %531 = arith.addf %527, %530 : vector<1x128xf32>
    %c93 = arith.constant 93 : index
    %532 = memref.load %arg3[%c93] : memref<128xf32, #tpu.memory_space<smem>>
    %533 = vector.broadcast %532 : f32 to vector<1x128xf32>
    %534 = arith.mulf %533, %19 : vector<1x128xf32>
    %535 = arith.addf %531, %534 : vector<1x128xf32>
    %c94 = arith.constant 94 : index
    %536 = memref.load %arg3[%c94] : memref<128xf32, #tpu.memory_space<smem>>
    %537 = vector.broadcast %536 : f32 to vector<1x128xf32>
    %538 = arith.mulf %537, %29 : vector<1x128xf32>
    %539 = arith.addf %535, %538 : vector<1x128xf32>
    %c95 = arith.constant 95 : index
    %540 = memref.load %arg3[%c95] : memref<128xf32, #tpu.memory_space<smem>>
    %541 = vector.broadcast %540 : f32 to vector<1x128xf32>
    %542 = arith.mulf %541, %39 : vector<1x128xf32>
    %543 = arith.addf %539, %542 : vector<1x128xf32>
    %c23_129 = arith.constant 23 : index
    %c0_130 = arith.constant 0 : index
    %544 = vector.load %arg9[%c23_129, %c0_130] : memref<32x128xf32, #tpu.memory_space<vmem>>, vector<1x128xf32>
    tpu.vector_store %arg9[%c23_129, %c0_130], %543 {strides = array<i32>} : memref<32x128xf32, #tpu.memory_space<vmem>>, vector<1x128xf32>,
    %cst_131 = arith.constant 0.000000e+00 : f32
    %545 = vector.broadcast %cst_131 : f32 to vector<1x128xf32>
    %c24_132 = arith.constant 24 : index
    %546 = memref.load %arg4[%c24_132] : memref<32xf32, #tpu.memory_space<smem>>
    %547 = vector.broadcast %546 : f32 to vector<1x128xf32>
    %548 = arith.addf %545, %547 : vector<1x128xf32>
    %c96 = arith.constant 96 : index
    %549 = memref.load %arg3[%c96] : memref<128xf32, #tpu.memory_space<smem>>
    %550 = vector.broadcast %549 : f32 to vector<1x128xf32>
    %551 = arith.mulf %550, %9 : vector<1x128xf32>
    %552 = arith.addf %548, %551 : vector<1x128xf32>
    %c97 = arith.constant 97 : index
    %553 = memref.load %arg3[%c97] : memref<128xf32, #tpu.memory_space<smem>>
    %554 = vector.broadcast %553 : f32 to vector<1x128xf32>
    %555 = arith.mulf %554, %19 : vector<1x128xf32>
    %556 = arith.addf %552, %555 : vector<1x128xf32>
    %c98 = arith.constant 98 : index
    %557 = memref.load %arg3[%c98] : memref<128xf32, #tpu.memory_space<smem>>
    %558 = vector.broadcast %557 : f32 to vector<1x128xf32>
    %559 = arith.mulf %558, %29 : vector<1x128xf32>
    %560 = arith.addf %556, %559 : vector<1x128xf32>
    %c99 = arith.constant 99 : index
    %561 = memref.load %arg3[%c99] : memref<128xf32, #tpu.memory_space<smem>>
    %562 = vector.broadcast %561 : f32 to vector<1x128xf32>
    %563 = arith.mulf %562, %39 : vector<1x128xf32>
    %564 = arith.addf %560, %563 : vector<1x128xf32>
    %c24_133 = arith.constant 24 : index
    %c0_134 = arith.constant 0 : index
    %565 = vector.load %arg9[%c24_133, %c0_134] : memref<32x128xf32, #tpu.memory_space<vmem>>, vector<1x128xf32>
    tpu.vector_store %arg9[%c24_133, %c0_134], %564 {strides = array<i32>} : memref<32x128xf32, #tpu.memory_space<vmem>>, vector<1x128xf32>,
    %cst_135 = arith.constant 0.000000e+00 : f32
    %566 = vector.broadcast %cst_135 : f32 to vector<1x128xf32>
    %c25_136 = arith.constant 25 : index
    %567 = memref.load %arg4[%c25_136] : memref<32xf32, #tpu.memory_space<smem>>
    %568 = vector.broadcast %567 : f32 to vector<1x128xf32>
    %569 = arith.addf %566, %568 : vector<1x128xf32>
    %c100 = arith.constant 100 : index
    %570 = memref.load %arg3[%c100] : memref<128xf32, #tpu.memory_space<smem>>
    %571 = vector.broadcast %570 : f32 to vector<1x128xf32>
    %572 = arith.mulf %571, %9 : vector<1x128xf32>
    %573 = arith.addf %569, %572 : vector<1x128xf32>
    %c101 = arith.constant 101 : index
    %574 = memref.load %arg3[%c101] : memref<128xf32, #tpu.memory_space<smem>>
    %575 = vector.broadcast %574 : f32 to vector<1x128xf32>
    %576 = arith.mulf %575, %19 : vector<1x128xf32>
    %577 = arith.addf %573, %576 : vector<1x128xf32>
    %c102 = arith.constant 102 : index
    %578 = memref.load %arg3[%c102] : memref<128xf32, #tpu.memory_space<smem>>
    %579 = vector.broadcast %578 : f32 to vector<1x128xf32>
    %580 = arith.mulf %579, %29 : vector<1x128xf32>
    %581 = arith.addf %577, %580 : vector<1x128xf32>
    %c103 = arith.constant 103 : index
    %582 = memref.load %arg3[%c103] : memref<128xf32, #tpu.memory_space<smem>>
    %583 = vector.broadcast %582 : f32 to vector<1x128xf32>
    %584 = arith.mulf %583, %39 : vector<1x128xf32>
    %585 = arith.addf %581, %584 : vector<1x128xf32>
    %c25_137 = arith.constant 25 : index
    %c0_138 = arith.constant 0 : index
    %586 = vector.load %arg9[%c25_137, %c0_138] : memref<32x128xf32, #tpu.memory_space<vmem>>, vector<1x128xf32>
    tpu.vector_store %arg9[%c25_137, %c0_138], %585 {strides = array<i32>} : memref<32x128xf32, #tpu.memory_space<vmem>>, vector<1x128xf32>,
    %cst_139 = arith.constant 0.000000e+00 : f32
    %587 = vector.broadcast %cst_139 : f32 to vector<1x128xf32>
    %c26_140 = arith.constant 26 : index
    %588 = memref.load %arg4[%c26_140] : memref<32xf32, #tpu.memory_space<smem>>
    %589 = vector.broadcast %588 : f32 to vector<1x128xf32>
    %590 = arith.addf %587, %589 : vector<1x128xf32>
    %c104 = arith.constant 104 : index
    %591 = memref.load %arg3[%c104] : memref<128xf32, #tpu.memory_space<smem>>
    %592 = vector.broadcast %591 : f32 to vector<1x128xf32>
    %593 = arith.mulf %592, %9 : vector<1x128xf32>
    %594 = arith.addf %590, %593 : vector<1x128xf32>
    %c105 = arith.constant 105 : index
    %595 = memref.load %arg3[%c105] : memref<128xf32, #tpu.memory_space<smem>>
    %596 = vector.broadcast %595 : f32 to vector<1x128xf32>
    %597 = arith.mulf %596, %19 : vector<1x128xf32>
    %598 = arith.addf %594, %597 : vector<1x128xf32>
    %c106 = arith.constant 106 : index
    %599 = memref.load %arg3[%c106] : memref<128xf32, #tpu.memory_space<smem>>
    %600 = vector.broadcast %599 : f32 to vector<1x128xf32>
    %601 = arith.mulf %600, %29 : vector<1x128xf32>
    %602 = arith.addf %598, %601 : vector<1x128xf32>
    %c107 = arith.constant 107 : index
    %603 = memref.load %arg3[%c107] : memref<128xf32, #tpu.memory_space<smem>>
    %604 = vector.broadcast %603 : f32 to vector<1x128xf32>
    %605 = arith.mulf %604, %39 : vector<1x128xf32>
    %606 = arith.addf %602, %605 : vector<1x128xf32>
    %c26_141 = arith.constant 26 : index
    %c0_142 = arith.constant 0 : index
    %607 = vector.load %arg9[%c26_141, %c0_142] : memref<32x128xf32, #tpu.memory_space<vmem>>, vector<1x128xf32>
    tpu.vector_store %arg9[%c26_141, %c0_142], %606 {strides = array<i32>} : memref<32x128xf32, #tpu.memory_space<vmem>>, vector<1x128xf32>,
    %cst_143 = arith.constant 0.000000e+00 : f32
    %608 = vector.broadcast %cst_143 : f32 to vector<1x128xf32>
    %c27_144 = arith.constant 27 : index
    %609 = memref.load %arg4[%c27_144] : memref<32xf32, #tpu.memory_space<smem>>
    %610 = vector.broadcast %609 : f32 to vector<1x128xf32>
    %611 = arith.addf %608, %610 : vector<1x128xf32>
    %c108 = arith.constant 108 : index
    %612 = memref.load %arg3[%c108] : memref<128xf32, #tpu.memory_space<smem>>
    %613 = vector.broadcast %612 : f32 to vector<1x128xf32>
    %614 = arith.mulf %613, %9 : vector<1x128xf32>
    %615 = arith.addf %611, %614 : vector<1x128xf32>
    %c109 = arith.constant 109 : index
    %616 = memref.load %arg3[%c109] : memref<128xf32, #tpu.memory_space<smem>>
    %617 = vector.broadcast %616 : f32 to vector<1x128xf32>
    %618 = arith.mulf %617, %19 : vector<1x128xf32>
    %619 = arith.addf %615, %618 : vector<1x128xf32>
    %c110 = arith.constant 110 : index
    %620 = memref.load %arg3[%c110] : memref<128xf32, #tpu.memory_space<smem>>
    %621 = vector.broadcast %620 : f32 to vector<1x128xf32>
    %622 = arith.mulf %621, %29 : vector<1x128xf32>
    %623 = arith.addf %619, %622 : vector<1x128xf32>
    %c111 = arith.constant 111 : index
    %624 = memref.load %arg3[%c111] : memref<128xf32, #tpu.memory_space<smem>>
    %625 = vector.broadcast %624 : f32 to vector<1x128xf32>
    %626 = arith.mulf %625, %39 : vector<1x128xf32>
    %627 = arith.addf %623, %626 : vector<1x128xf32>
    %c27_145 = arith.constant 27 : index
    %c0_146 = arith.constant 0 : index
    %628 = vector.load %arg9[%c27_145, %c0_146] : memref<32x128xf32, #tpu.memory_space<vmem>>, vector<1x128xf32>
    tpu.vector_store %arg9[%c27_145, %c0_146], %627 {strides = array<i32>} : memref<32x128xf32, #tpu.memory_space<vmem>>, vector<1x128xf32>,
    %cst_147 = arith.constant 0.000000e+00 : f32
    %629 = vector.broadcast %cst_147 : f32 to vector<1x128xf32>
    %c28_148 = arith.constant 28 : index
    %630 = memref.load %arg4[%c28_148] : memref<32xf32, #tpu.memory_space<smem>>
    %631 = vector.broadcast %630 : f32 to vector<1x128xf32>
    %632 = arith.addf %629, %631 : vector<1x128xf32>
    %c112 = arith.constant 112 : index
    %633 = memref.load %arg3[%c112] : memref<128xf32, #tpu.memory_space<smem>>
    %634 = vector.broadcast %633 : f32 to vector<1x128xf32>
    %635 = arith.mulf %634, %9 : vector<1x128xf32>
    %636 = arith.addf %632, %635 : vector<1x128xf32>
    %c113 = arith.constant 113 : index
    %637 = memref.load %arg3[%c113] : memref<128xf32, #tpu.memory_space<smem>>
    %638 = vector.broadcast %637 : f32 to vector<1x128xf32>
    %639 = arith.mulf %638, %19 : vector<1x128xf32>
    %640 = arith.addf %636, %639 : vector<1x128xf32>
    %c114 = arith.constant 114 : index
    %641 = memref.load %arg3[%c114] : memref<128xf32, #tpu.memory_space<smem>>
    %642 = vector.broadcast %641 : f32 to vector<1x128xf32>
    %643 = arith.mulf %642, %29 : vector<1x128xf32>
    %644 = arith.addf %640, %643 : vector<1x128xf32>
    %c115 = arith.constant 115 : index
    %645 = memref.load %arg3[%c115] : memref<128xf32, #tpu.memory_space<smem>>
    %646 = vector.broadcast %645 : f32 to vector<1x128xf32>
    %647 = arith.mulf %646, %39 : vector<1x128xf32>
    %648 = arith.addf %644, %647 : vector<1x128xf32>
    %c28_149 = arith.constant 28 : index
    %c0_150 = arith.constant 0 : index
    %649 = vector.load %arg9[%c28_149, %c0_150] : memref<32x128xf32, #tpu.memory_space<vmem>>, vector<1x128xf32>
    tpu.vector_store %arg9[%c28_149, %c0_150], %648 {strides = array<i32>} : memref<32x128xf32, #tpu.memory_space<vmem>>, vector<1x128xf32>,
    %cst_151 = arith.constant 0.000000e+00 : f32
    %650 = vector.broadcast %cst_151 : f32 to vector<1x128xf32>
    %c29_152 = arith.constant 29 : index
    %651 = memref.load %arg4[%c29_152] : memref<32xf32, #tpu.memory_space<smem>>
    %652 = vector.broadcast %651 : f32 to vector<1x128xf32>
    %653 = arith.addf %650, %652 : vector<1x128xf32>
    %c116 = arith.constant 116 : index
    %654 = memref.load %arg3[%c116] : memref<128xf32, #tpu.memory_space<smem>>
    %655 = vector.broadcast %654 : f32 to vector<1x128xf32>
    %656 = arith.mulf %655, %9 : vector<1x128xf32>
    %657 = arith.addf %653, %656 : vector<1x128xf32>
    %c117 = arith.constant 117 : index
    %658 = memref.load %arg3[%c117] : memref<128xf32, #tpu.memory_space<smem>>
    %659 = vector.broadcast %658 : f32 to vector<1x128xf32>
    %660 = arith.mulf %659, %19 : vector<1x128xf32>
    %661 = arith.addf %657, %660 : vector<1x128xf32>
    %c118 = arith.constant 118 : index
    %662 = memref.load %arg3[%c118] : memref<128xf32, #tpu.memory_space<smem>>
    %663 = vector.broadcast %662 : f32 to vector<1x128xf32>
    %664 = arith.mulf %663, %29 : vector<1x128xf32>
    %665 = arith.addf %661, %664 : vector<1x128xf32>
    %c119 = arith.constant 119 : index
    %666 = memref.load %arg3[%c119] : memref<128xf32, #tpu.memory_space<smem>>
    %667 = vector.broadcast %666 : f32 to vector<1x128xf32>
    %668 = arith.mulf %667, %39 : vector<1x128xf32>
    %669 = arith.addf %665, %668 : vector<1x128xf32>
    %c29_153 = arith.constant 29 : index
    %c0_154 = arith.constant 0 : index
    %670 = vector.load %arg9[%c29_153, %c0_154] : memref<32x128xf32, #tpu.memory_space<vmem>>, vector<1x128xf32>
    tpu.vector_store %arg9[%c29_153, %c0_154], %669 {strides = array<i32>} : memref<32x128xf32, #tpu.memory_space<vmem>>, vector<1x128xf32>,
    %cst_155 = arith.constant 0.000000e+00 : f32
    %671 = vector.broadcast %cst_155 : f32 to vector<1x128xf32>
    %c30_156 = arith.constant 30 : index
    %672 = memref.load %arg4[%c30_156] : memref<32xf32, #tpu.memory_space<smem>>
    %673 = vector.broadcast %672 : f32 to vector<1x128xf32>
    %674 = arith.addf %671, %673 : vector<1x128xf32>
    %c120 = arith.constant 120 : index
    %675 = memref.load %arg3[%c120] : memref<128xf32, #tpu.memory_space<smem>>
    %676 = vector.broadcast %675 : f32 to vector<1x128xf32>
    %677 = arith.mulf %676, %9 : vector<1x128xf32>
    %678 = arith.addf %674, %677 : vector<1x128xf32>
    %c121 = arith.constant 121 : index
    %679 = memref.load %arg3[%c121] : memref<128xf32, #tpu.memory_space<smem>>
    %680 = vector.broadcast %679 : f32 to vector<1x128xf32>
    %681 = arith.mulf %680, %19 : vector<1x128xf32>
    %682 = arith.addf %678, %681 : vector<1x128xf32>
    %c122 = arith.constant 122 : index
    %683 = memref.load %arg3[%c122] : memref<128xf32, #tpu.memory_space<smem>>
    %684 = vector.broadcast %683 : f32 to vector<1x128xf32>
    %685 = arith.mulf %684, %29 : vector<1x128xf32>
    %686 = arith.addf %682, %685 : vector<1x128xf32>
    %c123 = arith.constant 123 : index
    %687 = memref.load %arg3[%c123] : memref<128xf32, #tpu.memory_space<smem>>
    %688 = vector.broadcast %687 : f32 to vector<1x128xf32>
    %689 = arith.mulf %688, %39 : vector<1x128xf32>
    %690 = arith.addf %686, %689 : vector<1x128xf32>
    %c30_157 = arith.constant 30 : index
    %c0_158 = arith.constant 0 : index
    %691 = vector.load %arg9[%c30_157, %c0_158] : memref<32x128xf32, #tpu.memory_space<vmem>>, vector<1x128xf32>
    tpu.vector_store %arg9[%c30_157, %c0_158], %690 {strides = array<i32>} : memref<32x128xf32, #tpu.memory_space<vmem>>, vector<1x128xf32>,
    %cst_159 = arith.constant 0.000000e+00 : f32
    %692 = vector.broadcast %cst_159 : f32 to vector<1x128xf32>
    %c31_160 = arith.constant 31 : index
    %693 = memref.load %arg4[%c31_160] : memref<32xf32, #tpu.memory_space<smem>>
    %694 = vector.broadcast %693 : f32 to vector<1x128xf32>
    %695 = arith.addf %692, %694 : vector<1x128xf32>
    %c124 = arith.constant 124 : index
    %696 = memref.load %arg3[%c124] : memref<128xf32, #tpu.memory_space<smem>>
    %697 = vector.broadcast %696 : f32 to vector<1x128xf32>
    %698 = arith.mulf %697, %9 : vector<1x128xf32>
    %699 = arith.addf %695, %698 : vector<1x128xf32>
    %c125 = arith.constant 125 : index
    %700 = memref.load %arg3[%c125] : memref<128xf32, #tpu.memory_space<smem>>
    %701 = vector.broadcast %700 : f32 to vector<1x128xf32>
    %702 = arith.mulf %701, %19 : vector<1x128xf32>
    %703 = arith.addf %699, %702 : vector<1x128xf32>
    %c126 = arith.constant 126 : index
    %704 = memref.load %arg3[%c126] : memref<128xf32, #tpu.memory_space<smem>>
    %705 = vector.broadcast %704 : f32 to vector<1x128xf32>
    %706 = arith.mulf %705, %29 : vector<1x128xf32>
    %707 = arith.addf %703, %706 : vector<1x128xf32>
    %c127 = arith.constant 127 : index
    %708 = memref.load %arg3[%c127] : memref<128xf32, #tpu.memory_space<smem>>
    %709 = vector.broadcast %708 : f32 to vector<1x128xf32>
    %710 = arith.mulf %709, %39 : vector<1x128xf32>
    %711 = arith.addf %707, %710 : vector<1x128xf32>
    %c31_161 = arith.constant 31 : index
    %c0_162 = arith.constant 0 : index
    %712 = vector.load %arg9[%c31_161, %c0_162] : memref<32x128xf32, #tpu.memory_space<vmem>>, vector<1x128xf32>
    tpu.vector_store %arg9[%c31_161, %c0_162], %711 {strides = array<i32>} : memref<32x128xf32, #tpu.memory_space<vmem>>, vector<1x128xf32>,
    %c0_163 = arith.constant 0 : index
    %713 = memref.load %arg6[%c0_163] : memref<1xf32, #tpu.memory_space<smem>>
    %c0_164 = arith.constant 0 : index
    %c0_165 = arith.constant 0 : index
    %c0_166 = arith.constant 0 : index
    %714 = vector.load %arg1[%c0_164, %c0_165, %c0_166] : memref<4x6x128xf32, #tpu.memory_space<vmem>>, vector<1x6x128xf32>
    %715 = vector.shape_cast %714 : vector<1x6x128xf32> to vector<6x128xf32>
    %c0_167 = arith.constant 0 : index
    %c0_168 = arith.constant 0 : index
    %716 = vector.load %arg8[%c0_167, %c0_168] : memref<4x128xf32, #tpu.memory_space<vmem>>, vector<1x128xf32>
    %717 = vector.broadcast %716 : vector<1x128xf32> to vector<6x128xf32>
    %718 = arith.subf %715, %717 : vector<6x128xf32>
    %cst_169 = arith.constant 0.000000e+00 : f32
    %719 = vector.broadcast %cst_169 : f32 to vector<6x128xf32>
    %720 = vector.broadcast %713 : f32 to vector<6x128xf32>
    %721 = arith.addf %719, %720 : vector<6x128xf32>
    %c0_170 = arith.constant 0 : index
    %c0_171 = arith.constant 0 : index
    %722 = vector.load %arg9[%c0_170, %c0_171] : memref<32x128xf32, #tpu.memory_space<vmem>>, vector<1x128xf32>
    %c0_172 = arith.constant 0 : index
    %723 = memref.load %arg3[%c0_172] : memref<128xf32, #tpu.memory_space<smem>>
    %724 = vector.broadcast %723 : f32 to vector<6x128xf32>
    %725 = arith.mulf %724, %718 : vector<6x128xf32>
    %726 = vector.broadcast %722 : vector<1x128xf32> to vector<6x128xf32>
    %727 = arith.addf %726, %725 : vector<6x128xf32>
    %c0_173 = arith.constant 0 : index
    %728 = memref.load %arg5[%c0_173] : memref<32xf32, #tpu.memory_space<smem>>
    %cst_174 = arith.constant 0.000000e+00 : f32
    %729 = vector.broadcast %cst_174 : f32 to vector<6x128xf32>
    %730 = arith.maximumf %727, %729 : vector<6x128xf32>
    %731 = vector.broadcast %728 : f32 to vector<6x128xf32>
    %732 = arith.mulf %731, %730 : vector<6x128xf32>
    %733 = arith.addf %721, %732 : vector<6x128xf32>
    %c1_175 = arith.constant 1 : index
    %c0_176 = arith.constant 0 : index
    %734 = vector.load %arg9[%c1_175, %c0_176] : memref<32x128xf32, #tpu.memory_space<vmem>>, vector<1x128xf32>
    %c4_177 = arith.constant 4 : index
    %735 = memref.load %arg3[%c4_177] : memref<128xf32, #tpu.memory_space<smem>>
    %736 = vector.broadcast %735 : f32 to vector<6x128xf32>
    %737 = arith.mulf %736, %718 : vector<6x128xf32>
    %738 = vector.broadcast %734 : vector<1x128xf32> to vector<6x128xf32>
    %739 = arith.addf %738, %737 : vector<6x128xf32>
    %c1_178 = arith.constant 1 : index
    %740 = memref.load %arg5[%c1_178] : memref<32xf32, #tpu.memory_space<smem>>
    %cst_179 = arith.constant 0.000000e+00 : f32
    %741 = vector.broadcast %cst_179 : f32 to vector<6x128xf32>
    %742 = arith.maximumf %739, %741 : vector<6x128xf32>
    %743 = vector.broadcast %740 : f32 to vector<6x128xf32>
    %744 = arith.mulf %743, %742 : vector<6x128xf32>
    %745 = arith.addf %733, %744 : vector<6x128xf32>
    %c2_180 = arith.constant 2 : index
    %c0_181 = arith.constant 0 : index
    %746 = vector.load %arg9[%c2_180, %c0_181] : memref<32x128xf32, #tpu.memory_space<vmem>>, vector<1x128xf32>
    %c8_182 = arith.constant 8 : index
    %747 = memref.load %arg3[%c8_182] : memref<128xf32, #tpu.memory_space<smem>>
    %748 = vector.broadcast %747 : f32 to vector<6x128xf32>
    %749 = arith.mulf %748, %718 : vector<6x128xf32>
    %750 = vector.broadcast %746 : vector<1x128xf32> to vector<6x128xf32>
    %751 = arith.addf %750, %749 : vector<6x128xf32>
    %c2_183 = arith.constant 2 : index
    %752 = memref.load %arg5[%c2_183] : memref<32xf32, #tpu.memory_space<smem>>
    %cst_184 = arith.constant 0.000000e+00 : f32
    %753 = vector.broadcast %cst_184 : f32 to vector<6x128xf32>
    %754 = arith.maximumf %751, %753 : vector<6x128xf32>
    %755 = vector.broadcast %752 : f32 to vector<6x128xf32>
    %756 = arith.mulf %755, %754 : vector<6x128xf32>
    %757 = arith.addf %745, %756 : vector<6x128xf32>
    %c3_185 = arith.constant 3 : index
    %c0_186 = arith.constant 0 : index
    %758 = vector.load %arg9[%c3_185, %c0_186] : memref<32x128xf32, #tpu.memory_space<vmem>>, vector<1x128xf32>
    %c12_187 = arith.constant 12 : index
    %759 = memref.load %arg3[%c12_187] : memref<128xf32, #tpu.memory_space<smem>>
    %760 = vector.broadcast %759 : f32 to vector<6x128xf32>
    %761 = arith.mulf %760, %718 : vector<6x128xf32>
    %762 = vector.broadcast %758 : vector<1x128xf32> to vector<6x128xf32>
    %763 = arith.addf %762, %761 : vector<6x128xf32>
    %c3_188 = arith.constant 3 : index
    %764 = memref.load %arg5[%c3_188] : memref<32xf32, #tpu.memory_space<smem>>
    %cst_189 = arith.constant 0.000000e+00 : f32
    %765 = vector.broadcast %cst_189 : f32 to vector<6x128xf32>
    %766 = arith.maximumf %763, %765 : vector<6x128xf32>
    %767 = vector.broadcast %764 : f32 to vector<6x128xf32>
    %768 = arith.mulf %767, %766 : vector<6x128xf32>
    %769 = arith.addf %757, %768 : vector<6x128xf32>
    %c4_190 = arith.constant 4 : index
    %c0_191 = arith.constant 0 : index
    %770 = vector.load %arg9[%c4_190, %c0_191] : memref<32x128xf32, #tpu.memory_space<vmem>>, vector<1x128xf32>
    %c16_192 = arith.constant 16 : index
    %771 = memref.load %arg3[%c16_192] : memref<128xf32, #tpu.memory_space<smem>>
    %772 = vector.broadcast %771 : f32 to vector<6x128xf32>
    %773 = arith.mulf %772, %718 : vector<6x128xf32>
    %774 = vector.broadcast %770 : vector<1x128xf32> to vector<6x128xf32>
    %775 = arith.addf %774, %773 : vector<6x128xf32>
    %c4_193 = arith.constant 4 : index
    %776 = memref.load %arg5[%c4_193] : memref<32xf32, #tpu.memory_space<smem>>
    %cst_194 = arith.constant 0.000000e+00 : f32
    %777 = vector.broadcast %cst_194 : f32 to vector<6x128xf32>
    %778 = arith.maximumf %775, %777 : vector<6x128xf32>
    %779 = vector.broadcast %776 : f32 to vector<6x128xf32>
    %780 = arith.mulf %779, %778 : vector<6x128xf32>
    %781 = arith.addf %769, %780 : vector<6x128xf32>
    %c5_195 = arith.constant 5 : index
    %c0_196 = arith.constant 0 : index
    %782 = vector.load %arg9[%c5_195, %c0_196] : memref<32x128xf32, #tpu.memory_space<vmem>>, vector<1x128xf32>
    %c20_197 = arith.constant 20 : index
    %783 = memref.load %arg3[%c20_197] : memref<128xf32, #tpu.memory_space<smem>>
    %784 = vector.broadcast %783 : f32 to vector<6x128xf32>
    %785 = arith.mulf %784, %718 : vector<6x128xf32>
    %786 = vector.broadcast %782 : vector<1x128xf32> to vector<6x128xf32>
    %787 = arith.addf %786, %785 : vector<6x128xf32>
    %c5_198 = arith.constant 5 : index
    %788 = memref.load %arg5[%c5_198] : memref<32xf32, #tpu.memory_space<smem>>
    %cst_199 = arith.constant 0.000000e+00 : f32
    %789 = vector.broadcast %cst_199 : f32 to vector<6x128xf32>
    %790 = arith.maximumf %787, %789 : vector<6x128xf32>
    %791 = vector.broadcast %788 : f32 to vector<6x128xf32>
    %792 = arith.mulf %791, %790 : vector<6x128xf32>
    %793 = arith.addf %781, %792 : vector<6x128xf32>
    %c6_200 = arith.constant 6 : index
    %c0_201 = arith.constant 0 : index
    %794 = vector.load %arg9[%c6_200, %c0_201] : memref<32x128xf32, #tpu.memory_space<vmem>>, vector<1x128xf32>
    %c24_202 = arith.constant 24 : index
    %795 = memref.load %arg3[%c24_202] : memref<128xf32, #tpu.memory_space<smem>>
    %796 = vector.broadcast %795 : f32 to vector<6x128xf32>
    %797 = arith.mulf %796, %718 : vector<6x128xf32>
    %798 = vector.broadcast %794 : vector<1x128xf32> to vector<6x128xf32>
    %799 = arith.addf %798, %797 : vector<6x128xf32>
    %c6_203 = arith.constant 6 : index
    %800 = memref.load %arg5[%c6_203] : memref<32xf32, #tpu.memory_space<smem>>
    %cst_204 = arith.constant 0.000000e+00 : f32
    %801 = vector.broadcast %cst_204 : f32 to vector<6x128xf32>
    %802 = arith.maximumf %799, %801 : vector<6x128xf32>
    %803 = vector.broadcast %800 : f32 to vector<6x128xf32>
    %804 = arith.mulf %803, %802 : vector<6x128xf32>
    %805 = arith.addf %793, %804 : vector<6x128xf32>
    %c7_205 = arith.constant 7 : index
    %c0_206 = arith.constant 0 : index
    %806 = vector.load %arg9[%c7_205, %c0_206] : memref<32x128xf32, #tpu.memory_space<vmem>>, vector<1x128xf32>
    %c28_207 = arith.constant 28 : index
    %807 = memref.load %arg3[%c28_207] : memref<128xf32, #tpu.memory_space<smem>>
    %808 = vector.broadcast %807 : f32 to vector<6x128xf32>
    %809 = arith.mulf %808, %718 : vector<6x128xf32>
    %810 = vector.broadcast %806 : vector<1x128xf32> to vector<6x128xf32>
    %811 = arith.addf %810, %809 : vector<6x128xf32>
    %c7_208 = arith.constant 7 : index
    %812 = memref.load %arg5[%c7_208] : memref<32xf32, #tpu.memory_space<smem>>
    %cst_209 = arith.constant 0.000000e+00 : f32
    %813 = vector.broadcast %cst_209 : f32 to vector<6x128xf32>
    %814 = arith.maximumf %811, %813 : vector<6x128xf32>
    %815 = vector.broadcast %812 : f32 to vector<6x128xf32>
    %816 = arith.mulf %815, %814 : vector<6x128xf32>
    %817 = arith.addf %805, %816 : vector<6x128xf32>
    %c8_210 = arith.constant 8 : index
    %c0_211 = arith.constant 0 : index
    %818 = vector.load %arg9[%c8_210, %c0_211] : memref<32x128xf32, #tpu.memory_space<vmem>>, vector<1x128xf32>
    %c32_212 = arith.constant 32 : index
    %819 = memref.load %arg3[%c32_212] : memref<128xf32, #tpu.memory_space<smem>>
    %820 = vector.broadcast %819 : f32 to vector<6x128xf32>
    %821 = arith.mulf %820, %718 : vector<6x128xf32>
    %822 = vector.broadcast %818 : vector<1x128xf32> to vector<6x128xf32>
    %823 = arith.addf %822, %821 : vector<6x128xf32>
    %c8_213 = arith.constant 8 : index
    %824 = memref.load %arg5[%c8_213] : memref<32xf32, #tpu.memory_space<smem>>
    %cst_214 = arith.constant 0.000000e+00 : f32
    %825 = vector.broadcast %cst_214 : f32 to vector<6x128xf32>
    %826 = arith.maximumf %823, %825 : vector<6x128xf32>
    %827 = vector.broadcast %824 : f32 to vector<6x128xf32>
    %828 = arith.mulf %827, %826 : vector<6x128xf32>
    %829 = arith.addf %817, %828 : vector<6x128xf32>
    %c9_215 = arith.constant 9 : index
    %c0_216 = arith.constant 0 : index
    %830 = vector.load %arg9[%c9_215, %c0_216] : memref<32x128xf32, #tpu.memory_space<vmem>>, vector<1x128xf32>
    %c36_217 = arith.constant 36 : index
    %831 = memref.load %arg3[%c36_217] : memref<128xf32, #tpu.memory_space<smem>>
    %832 = vector.broadcast %831 : f32 to vector<6x128xf32>
    %833 = arith.mulf %832, %718 : vector<6x128xf32>
    %834 = vector.broadcast %830 : vector<1x128xf32> to vector<6x128xf32>
    %835 = arith.addf %834, %833 : vector<6x128xf32>
    %c9_218 = arith.constant 9 : index
    %836 = memref.load %arg5[%c9_218] : memref<32xf32, #tpu.memory_space<smem>>
    %cst_219 = arith.constant 0.000000e+00 : f32
    %837 = vector.broadcast %cst_219 : f32 to vector<6x128xf32>
    %838 = arith.maximumf %835, %837 : vector<6x128xf32>
    %839 = vector.broadcast %836 : f32 to vector<6x128xf32>
    %840 = arith.mulf %839, %838 : vector<6x128xf32>
    %841 = arith.addf %829, %840 : vector<6x128xf32>
    %c10_220 = arith.constant 10 : index
    %c0_221 = arith.constant 0 : index
    %842 = vector.load %arg9[%c10_220, %c0_221] : memref<32x128xf32, #tpu.memory_space<vmem>>, vector<1x128xf32>
    %c40_222 = arith.constant 40 : index
    %843 = memref.load %arg3[%c40_222] : memref<128xf32, #tpu.memory_space<smem>>
    %844 = vector.broadcast %843 : f32 to vector<6x128xf32>
    %845 = arith.mulf %844, %718 : vector<6x128xf32>
    %846 = vector.broadcast %842 : vector<1x128xf32> to vector<6x128xf32>
    %847 = arith.addf %846, %845 : vector<6x128xf32>
    %c10_223 = arith.constant 10 : index
    %848 = memref.load %arg5[%c10_223] : memref<32xf32, #tpu.memory_space<smem>>
    %cst_224 = arith.constant 0.000000e+00 : f32
    %849 = vector.broadcast %cst_224 : f32 to vector<6x128xf32>
    %850 = arith.maximumf %847, %849 : vector<6x128xf32>
    %851 = vector.broadcast %848 : f32 to vector<6x128xf32>
    %852 = arith.mulf %851, %850 : vector<6x128xf32>
    %853 = arith.addf %841, %852 : vector<6x128xf32>
    %c11_225 = arith.constant 11 : index
    %c0_226 = arith.constant 0 : index
    %854 = vector.load %arg9[%c11_225, %c0_226] : memref<32x128xf32, #tpu.memory_space<vmem>>, vector<1x128xf32>
    %c44_227 = arith.constant 44 : index
    %855 = memref.load %arg3[%c44_227] : memref<128xf32, #tpu.memory_space<smem>>
    %856 = vector.broadcast %855 : f32 to vector<6x128xf32>
    %857 = arith.mulf %856, %718 : vector<6x128xf32>
    %858 = vector.broadcast %854 : vector<1x128xf32> to vector<6x128xf32>
    %859 = arith.addf %858, %857 : vector<6x128xf32>
    %c11_228 = arith.constant 11 : index
    %860 = memref.load %arg5[%c11_228] : memref<32xf32, #tpu.memory_space<smem>>
    %cst_229 = arith.constant 0.000000e+00 : f32
    %861 = vector.broadcast %cst_229 : f32 to vector<6x128xf32>
    %862 = arith.maximumf %859, %861 : vector<6x128xf32>
    %863 = vector.broadcast %860 : f32 to vector<6x128xf32>
    %864 = arith.mulf %863, %862 : vector<6x128xf32>
    %865 = arith.addf %853, %864 : vector<6x128xf32>
    %c12_230 = arith.constant 12 : index
    %c0_231 = arith.constant 0 : index
    %866 = vector.load %arg9[%c12_230, %c0_231] : memref<32x128xf32, #tpu.memory_space<vmem>>, vector<1x128xf32>
    %c48_232 = arith.constant 48 : index
    %867 = memref.load %arg3[%c48_232] : memref<128xf32, #tpu.memory_space<smem>>
    %868 = vector.broadcast %867 : f32 to vector<6x128xf32>
    %869 = arith.mulf %868, %718 : vector<6x128xf32>
    %870 = vector.broadcast %866 : vector<1x128xf32> to vector<6x128xf32>
    %871 = arith.addf %870, %869 : vector<6x128xf32>
    %c12_233 = arith.constant 12 : index
    %872 = memref.load %arg5[%c12_233] : memref<32xf32, #tpu.memory_space<smem>>
    %cst_234 = arith.constant 0.000000e+00 : f32
    %873 = vector.broadcast %cst_234 : f32 to vector<6x128xf32>
    %874 = arith.maximumf %871, %873 : vector<6x128xf32>
    %875 = vector.broadcast %872 : f32 to vector<6x128xf32>
    %876 = arith.mulf %875, %874 : vector<6x128xf32>
    %877 = arith.addf %865, %876 : vector<6x128xf32>
    %c13_235 = arith.constant 13 : index
    %c0_236 = arith.constant 0 : index
    %878 = vector.load %arg9[%c13_235, %c0_236] : memref<32x128xf32, #tpu.memory_space<vmem>>, vector<1x128xf32>
    %c52_237 = arith.constant 52 : index
    %879 = memref.load %arg3[%c52_237] : memref<128xf32, #tpu.memory_space<smem>>
    %880 = vector.broadcast %879 : f32 to vector<6x128xf32>
    %881 = arith.mulf %880, %718 : vector<6x128xf32>
    %882 = vector.broadcast %878 : vector<1x128xf32> to vector<6x128xf32>
    %883 = arith.addf %882, %881 : vector<6x128xf32>
    %c13_238 = arith.constant 13 : index
    %884 = memref.load %arg5[%c13_238] : memref<32xf32, #tpu.memory_space<smem>>
    %cst_239 = arith.constant 0.000000e+00 : f32
    %885 = vector.broadcast %cst_239 : f32 to vector<6x128xf32>
    %886 = arith.maximumf %883, %885 : vector<6x128xf32>
    %887 = vector.broadcast %884 : f32 to vector<6x128xf32>
    %888 = arith.mulf %887, %886 : vector<6x128xf32>
    %889 = arith.addf %877, %888 : vector<6x128xf32>
    %c14_240 = arith.constant 14 : index
    %c0_241 = arith.constant 0 : index
    %890 = vector.load %arg9[%c14_240, %c0_241] : memref<32x128xf32, #tpu.memory_space<vmem>>, vector<1x128xf32>
    %c56_242 = arith.constant 56 : index
    %891 = memref.load %arg3[%c56_242] : memref<128xf32, #tpu.memory_space<smem>>
    %892 = vector.broadcast %891 : f32 to vector<6x128xf32>
    %893 = arith.mulf %892, %718 : vector<6x128xf32>
    %894 = vector.broadcast %890 : vector<1x128xf32> to vector<6x128xf32>
    %895 = arith.addf %894, %893 : vector<6x128xf32>
    %c14_243 = arith.constant 14 : index
    %896 = memref.load %arg5[%c14_243] : memref<32xf32, #tpu.memory_space<smem>>
    %cst_244 = arith.constant 0.000000e+00 : f32
    %897 = vector.broadcast %cst_244 : f32 to vector<6x128xf32>
    %898 = arith.maximumf %895, %897 : vector<6x128xf32>
    %899 = vector.broadcast %896 : f32 to vector<6x128xf32>
    %900 = arith.mulf %899, %898 : vector<6x128xf32>
    %901 = arith.addf %889, %900 : vector<6x128xf32>
    %c15_245 = arith.constant 15 : index
    %c0_246 = arith.constant 0 : index
    %902 = vector.load %arg9[%c15_245, %c0_246] : memref<32x128xf32, #tpu.memory_space<vmem>>, vector<1x128xf32>
    %c60_247 = arith.constant 60 : index
    %903 = memref.load %arg3[%c60_247] : memref<128xf32, #tpu.memory_space<smem>>
    %904 = vector.broadcast %903 : f32 to vector<6x128xf32>
    %905 = arith.mulf %904, %718 : vector<6x128xf32>
    %906 = vector.broadcast %902 : vector<1x128xf32> to vector<6x128xf32>
    %907 = arith.addf %906, %905 : vector<6x128xf32>
    %c15_248 = arith.constant 15 : index
    %908 = memref.load %arg5[%c15_248] : memref<32xf32, #tpu.memory_space<smem>>
    %cst_249 = arith.constant 0.000000e+00 : f32
    %909 = vector.broadcast %cst_249 : f32 to vector<6x128xf32>
    %910 = arith.maximumf %907, %909 : vector<6x128xf32>
    %911 = vector.broadcast %908 : f32 to vector<6x128xf32>
    %912 = arith.mulf %911, %910 : vector<6x128xf32>
    %913 = arith.addf %901, %912 : vector<6x128xf32>
    %c16_250 = arith.constant 16 : index
    %c0_251 = arith.constant 0 : index
    %914 = vector.load %arg9[%c16_250, %c0_251] : memref<32x128xf32, #tpu.memory_space<vmem>>, vector<1x128xf32>
    %c64_252 = arith.constant 64 : index
    %915 = memref.load %arg3[%c64_252] : memref<128xf32, #tpu.memory_space<smem>>
    %916 = vector.broadcast %915 : f32 to vector<6x128xf32>
    %917 = arith.mulf %916, %718 : vector<6x128xf32>
    %918 = vector.broadcast %914 : vector<1x128xf32> to vector<6x128xf32>
    %919 = arith.addf %918, %917 : vector<6x128xf32>
    %c16_253 = arith.constant 16 : index
    %920 = memref.load %arg5[%c16_253] : memref<32xf32, #tpu.memory_space<smem>>
    %cst_254 = arith.constant 0.000000e+00 : f32
    %921 = vector.broadcast %cst_254 : f32 to vector<6x128xf32>
    %922 = arith.maximumf %919, %921 : vector<6x128xf32>
    %923 = vector.broadcast %920 : f32 to vector<6x128xf32>
    %924 = arith.mulf %923, %922 : vector<6x128xf32>
    %925 = arith.addf %913, %924 : vector<6x128xf32>
    %c17_255 = arith.constant 17 : index
    %c0_256 = arith.constant 0 : index
    %926 = vector.load %arg9[%c17_255, %c0_256] : memref<32x128xf32, #tpu.memory_space<vmem>>, vector<1x128xf32>
    %c68_257 = arith.constant 68 : index
    %927 = memref.load %arg3[%c68_257] : memref<128xf32, #tpu.memory_space<smem>>
    %928 = vector.broadcast %927 : f32 to vector<6x128xf32>
    %929 = arith.mulf %928, %718 : vector<6x128xf32>
    %930 = vector.broadcast %926 : vector<1x128xf32> to vector<6x128xf32>
    %931 = arith.addf %930, %929 : vector<6x128xf32>
    %c17_258 = arith.constant 17 : index
    %932 = memref.load %arg5[%c17_258] : memref<32xf32, #tpu.memory_space<smem>>
    %cst_259 = arith.constant 0.000000e+00 : f32
    %933 = vector.broadcast %cst_259 : f32 to vector<6x128xf32>
    %934 = arith.maximumf %931, %933 : vector<6x128xf32>
    %935 = vector.broadcast %932 : f32 to vector<6x128xf32>
    %936 = arith.mulf %935, %934 : vector<6x128xf32>
    %937 = arith.addf %925, %936 : vector<6x128xf32>
    %c18_260 = arith.constant 18 : index
    %c0_261 = arith.constant 0 : index
    %938 = vector.load %arg9[%c18_260, %c0_261] : memref<32x128xf32, #tpu.memory_space<vmem>>, vector<1x128xf32>
    %c72_262 = arith.constant 72 : index
    %939 = memref.load %arg3[%c72_262] : memref<128xf32, #tpu.memory_space<smem>>
    %940 = vector.broadcast %939 : f32 to vector<6x128xf32>
    %941 = arith.mulf %940, %718 : vector<6x128xf32>
    %942 = vector.broadcast %938 : vector<1x128xf32> to vector<6x128xf32>
    %943 = arith.addf %942, %941 : vector<6x128xf32>
    %c18_263 = arith.constant 18 : index
    %944 = memref.load %arg5[%c18_263] : memref<32xf32, #tpu.memory_space<smem>>
    %cst_264 = arith.constant 0.000000e+00 : f32
    %945 = vector.broadcast %cst_264 : f32 to vector<6x128xf32>
    %946 = arith.maximumf %943, %945 : vector<6x128xf32>
    %947 = vector.broadcast %944 : f32 to vector<6x128xf32>
    %948 = arith.mulf %947, %946 : vector<6x128xf32>
    %949 = arith.addf %937, %948 : vector<6x128xf32>
    %c19_265 = arith.constant 19 : index
    %c0_266 = arith.constant 0 : index
    %950 = vector.load %arg9[%c19_265, %c0_266] : memref<32x128xf32, #tpu.memory_space<vmem>>, vector<1x128xf32>
    %c76_267 = arith.constant 76 : index
    %951 = memref.load %arg3[%c76_267] : memref<128xf32, #tpu.memory_space<smem>>
    %952 = vector.broadcast %951 : f32 to vector<6x128xf32>
    %953 = arith.mulf %952, %718 : vector<6x128xf32>
    %954 = vector.broadcast %950 : vector<1x128xf32> to vector<6x128xf32>
    %955 = arith.addf %954, %953 : vector<6x128xf32>
    %c19_268 = arith.constant 19 : index
    %956 = memref.load %arg5[%c19_268] : memref<32xf32, #tpu.memory_space<smem>>
    %cst_269 = arith.constant 0.000000e+00 : f32
    %957 = vector.broadcast %cst_269 : f32 to vector<6x128xf32>
    %958 = arith.maximumf %955, %957 : vector<6x128xf32>
    %959 = vector.broadcast %956 : f32 to vector<6x128xf32>
    %960 = arith.mulf %959, %958 : vector<6x128xf32>
    %961 = arith.addf %949, %960 : vector<6x128xf32>
    %c20_270 = arith.constant 20 : index
    %c0_271 = arith.constant 0 : index
    %962 = vector.load %arg9[%c20_270, %c0_271] : memref<32x128xf32, #tpu.memory_space<vmem>>, vector<1x128xf32>
    %c80_272 = arith.constant 80 : index
    %963 = memref.load %arg3[%c80_272] : memref<128xf32, #tpu.memory_space<smem>>
    %964 = vector.broadcast %963 : f32 to vector<6x128xf32>
    %965 = arith.mulf %964, %718 : vector<6x128xf32>
    %966 = vector.broadcast %962 : vector<1x128xf32> to vector<6x128xf32>
    %967 = arith.addf %966, %965 : vector<6x128xf32>
    %c20_273 = arith.constant 20 : index
    %968 = memref.load %arg5[%c20_273] : memref<32xf32, #tpu.memory_space<smem>>
    %cst_274 = arith.constant 0.000000e+00 : f32
    %969 = vector.broadcast %cst_274 : f32 to vector<6x128xf32>
    %970 = arith.maximumf %967, %969 : vector<6x128xf32>
    %971 = vector.broadcast %968 : f32 to vector<6x128xf32>
    %972 = arith.mulf %971, %970 : vector<6x128xf32>
    %973 = arith.addf %961, %972 : vector<6x128xf32>
    %c21_275 = arith.constant 21 : index
    %c0_276 = arith.constant 0 : index
    %974 = vector.load %arg9[%c21_275, %c0_276] : memref<32x128xf32, #tpu.memory_space<vmem>>, vector<1x128xf32>
    %c84_277 = arith.constant 84 : index
    %975 = memref.load %arg3[%c84_277] : memref<128xf32, #tpu.memory_space<smem>>
    %976 = vector.broadcast %975 : f32 to vector<6x128xf32>
    %977 = arith.mulf %976, %718 : vector<6x128xf32>
    %978 = vector.broadcast %974 : vector<1x128xf32> to vector<6x128xf32>
    %979 = arith.addf %978, %977 : vector<6x128xf32>
    %c21_278 = arith.constant 21 : index
    %980 = memref.load %arg5[%c21_278] : memref<32xf32, #tpu.memory_space<smem>>
    %cst_279 = arith.constant 0.000000e+00 : f32
    %981 = vector.broadcast %cst_279 : f32 to vector<6x128xf32>
    %982 = arith.maximumf %979, %981 : vector<6x128xf32>
    %983 = vector.broadcast %980 : f32 to vector<6x128xf32>
    %984 = arith.mulf %983, %982 : vector<6x128xf32>
    %985 = arith.addf %973, %984 : vector<6x128xf32>
    %c22_280 = arith.constant 22 : index
    %c0_281 = arith.constant 0 : index
    %986 = vector.load %arg9[%c22_280, %c0_281] : memref<32x128xf32, #tpu.memory_space<vmem>>, vector<1x128xf32>
    %c88_282 = arith.constant 88 : index
    %987 = memref.load %arg3[%c88_282] : memref<128xf32, #tpu.memory_space<smem>>
    %988 = vector.broadcast %987 : f32 to vector<6x128xf32>
    %989 = arith.mulf %988, %718 : vector<6x128xf32>
    %990 = vector.broadcast %986 : vector<1x128xf32> to vector<6x128xf32>
    %991 = arith.addf %990, %989 : vector<6x128xf32>
    %c22_283 = arith.constant 22 : index
    %992 = memref.load %arg5[%c22_283] : memref<32xf32, #tpu.memory_space<smem>>
    %cst_284 = arith.constant 0.000000e+00 : f32
    %993 = vector.broadcast %cst_284 : f32 to vector<6x128xf32>
    %994 = arith.maximumf %991, %993 : vector<6x128xf32>
    %995 = vector.broadcast %992 : f32 to vector<6x128xf32>
    %996 = arith.mulf %995, %994 : vector<6x128xf32>
    %997 = arith.addf %985, %996 : vector<6x128xf32>
    %c23_285 = arith.constant 23 : index
    %c0_286 = arith.constant 0 : index
    %998 = vector.load %arg9[%c23_285, %c0_286] : memref<32x128xf32, #tpu.memory_space<vmem>>, vector<1x128xf32>
    %c92_287 = arith.constant 92 : index
    %999 = memref.load %arg3[%c92_287] : memref<128xf32, #tpu.memory_space<smem>>
    %1000 = vector.broadcast %999 : f32 to vector<6x128xf32>
    %1001 = arith.mulf %1000, %718 : vector<6x128xf32>
    %1002 = vector.broadcast %998 : vector<1x128xf32> to vector<6x128xf32>
    %1003 = arith.addf %1002, %1001 : vector<6x128xf32>
    %c23_288 = arith.constant 23 : index
    %1004 = memref.load %arg5[%c23_288] : memref<32xf32, #tpu.memory_space<smem>>
    %cst_289 = arith.constant 0.000000e+00 : f32
    %1005 = vector.broadcast %cst_289 : f32 to vector<6x128xf32>
    %1006 = arith.maximumf %1003, %1005 : vector<6x128xf32>
    %1007 = vector.broadcast %1004 : f32 to vector<6x128xf32>
    %1008 = arith.mulf %1007, %1006 : vector<6x128xf32>
    %1009 = arith.addf %997, %1008 : vector<6x128xf32>
    %c24_290 = arith.constant 24 : index
    %c0_291 = arith.constant 0 : index
    %1010 = vector.load %arg9[%c24_290, %c0_291] : memref<32x128xf32, #tpu.memory_space<vmem>>, vector<1x128xf32>
    %c96_292 = arith.constant 96 : index
    %1011 = memref.load %arg3[%c96_292] : memref<128xf32, #tpu.memory_space<smem>>
    %1012 = vector.broadcast %1011 : f32 to vector<6x128xf32>
    %1013 = arith.mulf %1012, %718 : vector<6x128xf32>
    %1014 = vector.broadcast %1010 : vector<1x128xf32> to vector<6x128xf32>
    %1015 = arith.addf %1014, %1013 : vector<6x128xf32>
    %c24_293 = arith.constant 24 : index
    %1016 = memref.load %arg5[%c24_293] : memref<32xf32, #tpu.memory_space<smem>>
    %cst_294 = arith.constant 0.000000e+00 : f32
    %1017 = vector.broadcast %cst_294 : f32 to vector<6x128xf32>
    %1018 = arith.maximumf %1015, %1017 : vector<6x128xf32>
    %1019 = vector.broadcast %1016 : f32 to vector<6x128xf32>
    %1020 = arith.mulf %1019, %1018 : vector<6x128xf32>
    %1021 = arith.addf %1009, %1020 : vector<6x128xf32>
    %c25_295 = arith.constant 25 : index
    %c0_296 = arith.constant 0 : index
    %1022 = vector.load %arg9[%c25_295, %c0_296] : memref<32x128xf32, #tpu.memory_space<vmem>>, vector<1x128xf32>
    %c100_297 = arith.constant 100 : index
    %1023 = memref.load %arg3[%c100_297] : memref<128xf32, #tpu.memory_space<smem>>
    %1024 = vector.broadcast %1023 : f32 to vector<6x128xf32>
    %1025 = arith.mulf %1024, %718 : vector<6x128xf32>
    %1026 = vector.broadcast %1022 : vector<1x128xf32> to vector<6x128xf32>
    %1027 = arith.addf %1026, %1025 : vector<6x128xf32>
    %c25_298 = arith.constant 25 : index
    %1028 = memref.load %arg5[%c25_298] : memref<32xf32, #tpu.memory_space<smem>>
    %cst_299 = arith.constant 0.000000e+00 : f32
    %1029 = vector.broadcast %cst_299 : f32 to vector<6x128xf32>
    %1030 = arith.maximumf %1027, %1029 : vector<6x128xf32>
    %1031 = vector.broadcast %1028 : f32 to vector<6x128xf32>
    %1032 = arith.mulf %1031, %1030 : vector<6x128xf32>
    %1033 = arith.addf %1021, %1032 : vector<6x128xf32>
    %c26_300 = arith.constant 26 : index
    %c0_301 = arith.constant 0 : index
    %1034 = vector.load %arg9[%c26_300, %c0_301] : memref<32x128xf32, #tpu.memory_space<vmem>>, vector<1x128xf32>
    %c104_302 = arith.constant 104 : index
    %1035 = memref.load %arg3[%c104_302] : memref<128xf32, #tpu.memory_space<smem>>
    %1036 = vector.broadcast %1035 : f32 to vector<6x128xf32>
    %1037 = arith.mulf %1036, %718 : vector<6x128xf32>
    %1038 = vector.broadcast %1034 : vector<1x128xf32> to vector<6x128xf32>
    %1039 = arith.addf %1038, %1037 : vector<6x128xf32>
    %c26_303 = arith.constant 26 : index
    %1040 = memref.load %arg5[%c26_303] : memref<32xf32, #tpu.memory_space<smem>>
    %cst_304 = arith.constant 0.000000e+00 : f32
    %1041 = vector.broadcast %cst_304 : f32 to vector<6x128xf32>
    %1042 = arith.maximumf %1039, %1041 : vector<6x128xf32>
    %1043 = vector.broadcast %1040 : f32 to vector<6x128xf32>
    %1044 = arith.mulf %1043, %1042 : vector<6x128xf32>
    %1045 = arith.addf %1033, %1044 : vector<6x128xf32>
    %c27_305 = arith.constant 27 : index
    %c0_306 = arith.constant 0 : index
    %1046 = vector.load %arg9[%c27_305, %c0_306] : memref<32x128xf32, #tpu.memory_space<vmem>>, vector<1x128xf32>
    %c108_307 = arith.constant 108 : index
    %1047 = memref.load %arg3[%c108_307] : memref<128xf32, #tpu.memory_space<smem>>
    %1048 = vector.broadcast %1047 : f32 to vector<6x128xf32>
    %1049 = arith.mulf %1048, %718 : vector<6x128xf32>
    %1050 = vector.broadcast %1046 : vector<1x128xf32> to vector<6x128xf32>
    %1051 = arith.addf %1050, %1049 : vector<6x128xf32>
    %c27_308 = arith.constant 27 : index
    %1052 = memref.load %arg5[%c27_308] : memref<32xf32, #tpu.memory_space<smem>>
    %cst_309 = arith.constant 0.000000e+00 : f32
    %1053 = vector.broadcast %cst_309 : f32 to vector<6x128xf32>
    %1054 = arith.maximumf %1051, %1053 : vector<6x128xf32>
    %1055 = vector.broadcast %1052 : f32 to vector<6x128xf32>
    %1056 = arith.mulf %1055, %1054 : vector<6x128xf32>
    %1057 = arith.addf %1045, %1056 : vector<6x128xf32>
    %c28_310 = arith.constant 28 : index
    %c0_311 = arith.constant 0 : index
    %1058 = vector.load %arg9[%c28_310, %c0_311] : memref<32x128xf32, #tpu.memory_space<vmem>>, vector<1x128xf32>
    %c112_312 = arith.constant 112 : index
    %1059 = memref.load %arg3[%c112_312] : memref<128xf32, #tpu.memory_space<smem>>
    %1060 = vector.broadcast %1059 : f32 to vector<6x128xf32>
    %1061 = arith.mulf %1060, %718 : vector<6x128xf32>
    %1062 = vector.broadcast %1058 : vector<1x128xf32> to vector<6x128xf32>
    %1063 = arith.addf %1062, %1061 : vector<6x128xf32>
    %c28_313 = arith.constant 28 : index
    %1064 = memref.load %arg5[%c28_313] : memref<32xf32, #tpu.memory_space<smem>>
    %cst_314 = arith.constant 0.000000e+00 : f32
    %1065 = vector.broadcast %cst_314 : f32 to vector<6x128xf32>
    %1066 = arith.maximumf %1063, %1065 : vector<6x128xf32>
    %1067 = vector.broadcast %1064 : f32 to vector<6x128xf32>
    %1068 = arith.mulf %1067, %1066 : vector<6x128xf32>
    %1069 = arith.addf %1057, %1068 : vector<6x128xf32>
    %c29_315 = arith.constant 29 : index
    %c0_316 = arith.constant 0 : index
    %1070 = vector.load %arg9[%c29_315, %c0_316] : memref<32x128xf32, #tpu.memory_space<vmem>>, vector<1x128xf32>
    %c116_317 = arith.constant 116 : index
    %1071 = memref.load %arg3[%c116_317] : memref<128xf32, #tpu.memory_space<smem>>
    %1072 = vector.broadcast %1071 : f32 to vector<6x128xf32>
    %1073 = arith.mulf %1072, %718 : vector<6x128xf32>
    %1074 = vector.broadcast %1070 : vector<1x128xf32> to vector<6x128xf32>
    %1075 = arith.addf %1074, %1073 : vector<6x128xf32>
    %c29_318 = arith.constant 29 : index
    %1076 = memref.load %arg5[%c29_318] : memref<32xf32, #tpu.memory_space<smem>>
    %cst_319 = arith.constant 0.000000e+00 : f32
    %1077 = vector.broadcast %cst_319 : f32 to vector<6x128xf32>
    %1078 = arith.maximumf %1075, %1077 : vector<6x128xf32>
    %1079 = vector.broadcast %1076 : f32 to vector<6x128xf32>
    %1080 = arith.mulf %1079, %1078 : vector<6x128xf32>
    %1081 = arith.addf %1069, %1080 : vector<6x128xf32>
    %c30_320 = arith.constant 30 : index
    %c0_321 = arith.constant 0 : index
    %1082 = vector.load %arg9[%c30_320, %c0_321] : memref<32x128xf32, #tpu.memory_space<vmem>>, vector<1x128xf32>
    %c120_322 = arith.constant 120 : index
    %1083 = memref.load %arg3[%c120_322] : memref<128xf32, #tpu.memory_space<smem>>
    %1084 = vector.broadcast %1083 : f32 to vector<6x128xf32>
    %1085 = arith.mulf %1084, %718 : vector<6x128xf32>
    %1086 = vector.broadcast %1082 : vector<1x128xf32> to vector<6x128xf32>
    %1087 = arith.addf %1086, %1085 : vector<6x128xf32>
    %c30_323 = arith.constant 30 : index
    %1088 = memref.load %arg5[%c30_323] : memref<32xf32, #tpu.memory_space<smem>>
    %cst_324 = arith.constant 0.000000e+00 : f32
    %1089 = vector.broadcast %cst_324 : f32 to vector<6x128xf32>
    %1090 = arith.maximumf %1087, %1089 : vector<6x128xf32>
    %1091 = vector.broadcast %1088 : f32 to vector<6x128xf32>
    %1092 = arith.mulf %1091, %1090 : vector<6x128xf32>
    %1093 = arith.addf %1081, %1092 : vector<6x128xf32>
    %c31_325 = arith.constant 31 : index
    %c0_326 = arith.constant 0 : index
    %1094 = vector.load %arg9[%c31_325, %c0_326] : memref<32x128xf32, #tpu.memory_space<vmem>>, vector<1x128xf32>
    %c124_327 = arith.constant 124 : index
    %1095 = memref.load %arg3[%c124_327] : memref<128xf32, #tpu.memory_space<smem>>
    %1096 = vector.broadcast %1095 : f32 to vector<6x128xf32>
    %1097 = arith.mulf %1096, %718 : vector<6x128xf32>
    %1098 = vector.broadcast %1094 : vector<1x128xf32> to vector<6x128xf32>
    %1099 = arith.addf %1098, %1097 : vector<6x128xf32>
    %c31_328 = arith.constant 31 : index
    %1100 = memref.load %arg5[%c31_328] : memref<32xf32, #tpu.memory_space<smem>>
    %cst_329 = arith.constant 0.000000e+00 : f32
    %1101 = vector.broadcast %cst_329 : f32 to vector<6x128xf32>
    %1102 = arith.maximumf %1099, %1101 : vector<6x128xf32>
    %1103 = vector.broadcast %1100 : f32 to vector<6x128xf32>
    %1104 = arith.mulf %1103, %1102 : vector<6x128xf32>
    %1105 = arith.addf %1093, %1104 : vector<6x128xf32>
    %c0_330 = arith.constant 0 : index
    %c0_331 = arith.constant 0 : index
    %c0_332 = arith.constant 0 : index
    %1106 = vector.load %arg7[%c0_330, %c0_331, %c0_332] : memref<4x6x128xf32, #tpu.memory_space<vmem>>, vector<1x6x128xf32>
    %1107 = vector.shape_cast %1106 : vector<1x6x128xf32> to vector<6x128xf32>
    %1108 = vector.shape_cast %1105 : vector<6x128xf32> to vector<1x6x128xf32>
    tpu.vector_store %arg7[%c0_330, %c0_331, %c0_332], %1108 {strides = array<i32>} : memref<4x6x128xf32, #tpu.memory_space<vmem>>, vector<1x6x128xf32>,
    %c1_333 = arith.constant 1 : index
    %c0_334 = arith.constant 0 : index
    %c0_335 = arith.constant 0 : index
    %1109 = vector.load %arg1[%c1_333, %c0_334, %c0_335] : memref<4x6x128xf32, #tpu.memory_space<vmem>>, vector<1x6x128xf32>
    %1110 = vector.shape_cast %1109 : vector<1x6x128xf32> to vector<6x128xf32>
    %c1_336 = arith.constant 1 : index
    %c0_337 = arith.constant 0 : index
    %1111 = vector.load %arg8[%c1_336, %c0_337] : memref<4x128xf32, #tpu.memory_space<vmem>>, vector<1x128xf32>
    %1112 = vector.broadcast %1111 : vector<1x128xf32> to vector<6x128xf32>
    %1113 = arith.subf %1110, %1112 : vector<6x128xf32>
    %cst_338 = arith.constant 0.000000e+00 : f32
    %1114 = vector.broadcast %cst_338 : f32 to vector<6x128xf32>
    %1115 = vector.broadcast %713 : f32 to vector<6x128xf32>
    %1116 = arith.addf %1114, %1115 : vector<6x128xf32>
    %c0_339 = arith.constant 0 : index
    %c0_340 = arith.constant 0 : index
    %1117 = vector.load %arg9[%c0_339, %c0_340] : memref<32x128xf32, #tpu.memory_space<vmem>>, vector<1x128xf32>
    %c1_341 = arith.constant 1 : index
    %1118 = memref.load %arg3[%c1_341] : memref<128xf32, #tpu.memory_space<smem>>
    %1119 = vector.broadcast %1118 : f32 to vector<6x128xf32>
    %1120 = arith.mulf %1119, %1113 : vector<6x128xf32>
    %1121 = vector.broadcast %1117 : vector<1x128xf32> to vector<6x128xf32>
    %1122 = arith.addf %1121, %1120 : vector<6x128xf32>
    %c0_342 = arith.constant 0 : index
    %1123 = memref.load %arg5[%c0_342] : memref<32xf32, #tpu.memory_space<smem>>
    %cst_343 = arith.constant 0.000000e+00 : f32
    %1124 = vector.broadcast %cst_343 : f32 to vector<6x128xf32>
    %1125 = arith.maximumf %1122, %1124 : vector<6x128xf32>
    %1126 = vector.broadcast %1123 : f32 to vector<6x128xf32>
    %1127 = arith.mulf %1126, %1125 : vector<6x128xf32>
    %1128 = arith.addf %1116, %1127 : vector<6x128xf32>
    %c1_344 = arith.constant 1 : index
    %c0_345 = arith.constant 0 : index
    %1129 = vector.load %arg9[%c1_344, %c0_345] : memref<32x128xf32, #tpu.memory_space<vmem>>, vector<1x128xf32>
    %c5_346 = arith.constant 5 : index
    %1130 = memref.load %arg3[%c5_346] : memref<128xf32, #tpu.memory_space<smem>>
    %1131 = vector.broadcast %1130 : f32 to vector<6x128xf32>
    %1132 = arith.mulf %1131, %1113 : vector<6x128xf32>
    %1133 = vector.broadcast %1129 : vector<1x128xf32> to vector<6x128xf32>
    %1134 = arith.addf %1133, %1132 : vector<6x128xf32>
    %c1_347 = arith.constant 1 : index
    %1135 = memref.load %arg5[%c1_347] : memref<32xf32, #tpu.memory_space<smem>>
    %cst_348 = arith.constant 0.000000e+00 : f32
    %1136 = vector.broadcast %cst_348 : f32 to vector<6x128xf32>
    %1137 = arith.maximumf %1134, %1136 : vector<6x128xf32>
    %1138 = vector.broadcast %1135 : f32 to vector<6x128xf32>
    %1139 = arith.mulf %1138, %1137 : vector<6x128xf32>
    %1140 = arith.addf %1128, %1139 : vector<6x128xf32>
    %c2_349 = arith.constant 2 : index
    %c0_350 = arith.constant 0 : index
    %1141 = vector.load %arg9[%c2_349, %c0_350] : memref<32x128xf32, #tpu.memory_space<vmem>>, vector<1x128xf32>
    %c9_351 = arith.constant 9 : index
    %1142 = memref.load %arg3[%c9_351] : memref<128xf32, #tpu.memory_space<smem>>
    %1143 = vector.broadcast %1142 : f32 to vector<6x128xf32>
    %1144 = arith.mulf %1143, %1113 : vector<6x128xf32>
    %1145 = vector.broadcast %1141 : vector<1x128xf32> to vector<6x128xf32>
    %1146 = arith.addf %1145, %1144 : vector<6x128xf32>
    %c2_352 = arith.constant 2 : index
    %1147 = memref.load %arg5[%c2_352] : memref<32xf32, #tpu.memory_space<smem>>
    %cst_353 = arith.constant 0.000000e+00 : f32
    %1148 = vector.broadcast %cst_353 : f32 to vector<6x128xf32>
    %1149 = arith.maximumf %1146, %1148 : vector<6x128xf32>
    %1150 = vector.broadcast %1147 : f32 to vector<6x128xf32>
    %1151 = arith.mulf %1150, %1149 : vector<6x128xf32>
    %1152 = arith.addf %1140, %1151 : vector<6x128xf32>
    %c3_354 = arith.constant 3 : index
    %c0_355 = arith.constant 0 : index
    %1153 = vector.load %arg9[%c3_354, %c0_355] : memref<32x128xf32, #tpu.memory_space<vmem>>, vector<1x128xf32>
    %c13_356 = arith.constant 13 : index
    %1154 = memref.load %arg3[%c13_356] : memref<128xf32, #tpu.memory_space<smem>>
    %1155 = vector.broadcast %1154 : f32 to vector<6x128xf32>
    %1156 = arith.mulf %1155, %1113 : vector<6x128xf32>
    %1157 = vector.broadcast %1153 : vector<1x128xf32> to vector<6x128xf32>
    %1158 = arith.addf %1157, %1156 : vector<6x128xf32>
    %c3_357 = arith.constant 3 : index
    %1159 = memref.load %arg5[%c3_357] : memref<32xf32, #tpu.memory_space<smem>>
    %cst_358 = arith.constant 0.000000e+00 : f32
    %1160 = vector.broadcast %cst_358 : f32 to vector<6x128xf32>
    %1161 = arith.maximumf %1158, %1160 : vector<6x128xf32>
    %1162 = vector.broadcast %1159 : f32 to vector<6x128xf32>
    %1163 = arith.mulf %1162, %1161 : vector<6x128xf32>
    %1164 = arith.addf %1152, %1163 : vector<6x128xf32>
    %c4_359 = arith.constant 4 : index
    %c0_360 = arith.constant 0 : index
    %1165 = vector.load %arg9[%c4_359, %c0_360] : memref<32x128xf32, #tpu.memory_space<vmem>>, vector<1x128xf32>
    %c17_361 = arith.constant 17 : index
    %1166 = memref.load %arg3[%c17_361] : memref<128xf32, #tpu.memory_space<smem>>
    %1167 = vector.broadcast %1166 : f32 to vector<6x128xf32>
    %1168 = arith.mulf %1167, %1113 : vector<6x128xf32>
    %1169 = vector.broadcast %1165 : vector<1x128xf32> to vector<6x128xf32>
    %1170 = arith.addf %1169, %1168 : vector<6x128xf32>
    %c4_362 = arith.constant 4 : index
    %1171 = memref.load %arg5[%c4_362] : memref<32xf32, #tpu.memory_space<smem>>
    %cst_363 = arith.constant 0.000000e+00 : f32
    %1172 = vector.broadcast %cst_363 : f32 to vector<6x128xf32>
    %1173 = arith.maximumf %1170, %1172 : vector<6x128xf32>
    %1174 = vector.broadcast %1171 : f32 to vector<6x128xf32>
    %1175 = arith.mulf %1174, %1173 : vector<6x128xf32>
    %1176 = arith.addf %1164, %1175 : vector<6x128xf32>
    %c5_364 = arith.constant 5 : index
    %c0_365 = arith.constant 0 : index
    %1177 = vector.load %arg9[%c5_364, %c0_365] : memref<32x128xf32, #tpu.memory_space<vmem>>, vector<1x128xf32>
    %c21_366 = arith.constant 21 : index
    %1178 = memref.load %arg3[%c21_366] : memref<128xf32, #tpu.memory_space<smem>>
    %1179 = vector.broadcast %1178 : f32 to vector<6x128xf32>
    %1180 = arith.mulf %1179, %1113 : vector<6x128xf32>
    %1181 = vector.broadcast %1177 : vector<1x128xf32> to vector<6x128xf32>
    %1182 = arith.addf %1181, %1180 : vector<6x128xf32>
    %c5_367 = arith.constant 5 : index
    %1183 = memref.load %arg5[%c5_367] : memref<32xf32, #tpu.memory_space<smem>>
    %cst_368 = arith.constant 0.000000e+00 : f32
    %1184 = vector.broadcast %cst_368 : f32 to vector<6x128xf32>
    %1185 = arith.maximumf %1182, %1184 : vector<6x128xf32>
    %1186 = vector.broadcast %1183 : f32 to vector<6x128xf32>
    %1187 = arith.mulf %1186, %1185 : vector<6x128xf32>
    %1188 = arith.addf %1176, %1187 : vector<6x128xf32>
    %c6_369 = arith.constant 6 : index
    %c0_370 = arith.constant 0 : index
    %1189 = vector.load %arg9[%c6_369, %c0_370] : memref<32x128xf32, #tpu.memory_space<vmem>>, vector<1x128xf32>
    %c25_371 = arith.constant 25 : index
    %1190 = memref.load %arg3[%c25_371] : memref<128xf32, #tpu.memory_space<smem>>
    %1191 = vector.broadcast %1190 : f32 to vector<6x128xf32>
    %1192 = arith.mulf %1191, %1113 : vector<6x128xf32>
    %1193 = vector.broadcast %1189 : vector<1x128xf32> to vector<6x128xf32>
    %1194 = arith.addf %1193, %1192 : vector<6x128xf32>
    %c6_372 = arith.constant 6 : index
    %1195 = memref.load %arg5[%c6_372] : memref<32xf32, #tpu.memory_space<smem>>
    %cst_373 = arith.constant 0.000000e+00 : f32
    %1196 = vector.broadcast %cst_373 : f32 to vector<6x128xf32>
    %1197 = arith.maximumf %1194, %1196 : vector<6x128xf32>
    %1198 = vector.broadcast %1195 : f32 to vector<6x128xf32>
    %1199 = arith.mulf %1198, %1197 : vector<6x128xf32>
    %1200 = arith.addf %1188, %1199 : vector<6x128xf32>
    %c7_374 = arith.constant 7 : index
    %c0_375 = arith.constant 0 : index
    %1201 = vector.load %arg9[%c7_374, %c0_375] : memref<32x128xf32, #tpu.memory_space<vmem>>, vector<1x128xf32>
    %c29_376 = arith.constant 29 : index
    %1202 = memref.load %arg3[%c29_376] : memref<128xf32, #tpu.memory_space<smem>>
    %1203 = vector.broadcast %1202 : f32 to vector<6x128xf32>
    %1204 = arith.mulf %1203, %1113 : vector<6x128xf32>
    %1205 = vector.broadcast %1201 : vector<1x128xf32> to vector<6x128xf32>
    %1206 = arith.addf %1205, %1204 : vector<6x128xf32>
    %c7_377 = arith.constant 7 : index
    %1207 = memref.load %arg5[%c7_377] : memref<32xf32, #tpu.memory_space<smem>>
    %cst_378 = arith.constant 0.000000e+00 : f32
    %1208 = vector.broadcast %cst_378 : f32 to vector<6x128xf32>
    %1209 = arith.maximumf %1206, %1208 : vector<6x128xf32>
    %1210 = vector.broadcast %1207 : f32 to vector<6x128xf32>
    %1211 = arith.mulf %1210, %1209 : vector<6x128xf32>
    %1212 = arith.addf %1200, %1211 : vector<6x128xf32>
    %c8_379 = arith.constant 8 : index
    %c0_380 = arith.constant 0 : index
    %1213 = vector.load %arg9[%c8_379, %c0_380] : memref<32x128xf32, #tpu.memory_space<vmem>>, vector<1x128xf32>
    %c33_381 = arith.constant 33 : index
    %1214 = memref.load %arg3[%c33_381] : memref<128xf32, #tpu.memory_space<smem>>
    %1215 = vector.broadcast %1214 : f32 to vector<6x128xf32>
    %1216 = arith.mulf %1215, %1113 : vector<6x128xf32>
    %1217 = vector.broadcast %1213 : vector<1x128xf32> to vector<6x128xf32>
    %1218 = arith.addf %1217, %1216 : vector<6x128xf32>
    %c8_382 = arith.constant 8 : index
    %1219 = memref.load %arg5[%c8_382] : memref<32xf32, #tpu.memory_space<smem>>
    %cst_383 = arith.constant 0.000000e+00 : f32
    %1220 = vector.broadcast %cst_383 : f32 to vector<6x128xf32>
    %1221 = arith.maximumf %1218, %1220 : vector<6x128xf32>
    %1222 = vector.broadcast %1219 : f32 to vector<6x128xf32>
    %1223 = arith.mulf %1222, %1221 : vector<6x128xf32>
    %1224 = arith.addf %1212, %1223 : vector<6x128xf32>
    %c9_384 = arith.constant 9 : index
    %c0_385 = arith.constant 0 : index
    %1225 = vector.load %arg9[%c9_384, %c0_385] : memref<32x128xf32, #tpu.memory_space<vmem>>, vector<1x128xf32>
    %c37_386 = arith.constant 37 : index
    %1226 = memref.load %arg3[%c37_386] : memref<128xf32, #tpu.memory_space<smem>>
    %1227 = vector.broadcast %1226 : f32 to vector<6x128xf32>
    %1228 = arith.mulf %1227, %1113 : vector<6x128xf32>
    %1229 = vector.broadcast %1225 : vector<1x128xf32> to vector<6x128xf32>
    %1230 = arith.addf %1229, %1228 : vector<6x128xf32>
    %c9_387 = arith.constant 9 : index
    %1231 = memref.load %arg5[%c9_387] : memref<32xf32, #tpu.memory_space<smem>>
    %cst_388 = arith.constant 0.000000e+00 : f32
    %1232 = vector.broadcast %cst_388 : f32 to vector<6x128xf32>
    %1233 = arith.maximumf %1230, %1232 : vector<6x128xf32>
    %1234 = vector.broadcast %1231 : f32 to vector<6x128xf32>
    %1235 = arith.mulf %1234, %1233 : vector<6x128xf32>
    %1236 = arith.addf %1224, %1235 : vector<6x128xf32>
    %c10_389 = arith.constant 10 : index
    %c0_390 = arith.constant 0 : index
    %1237 = vector.load %arg9[%c10_389, %c0_390] : memref<32x128xf32, #tpu.memory_space<vmem>>, vector<1x128xf32>
    %c41_391 = arith.constant 41 : index
    %1238 = memref.load %arg3[%c41_391] : memref<128xf32, #tpu.memory_space<smem>>
    %1239 = vector.broadcast %1238 : f32 to vector<6x128xf32>
    %1240 = arith.mulf %1239, %1113 : vector<6x128xf32>
    %1241 = vector.broadcast %1237 : vector<1x128xf32> to vector<6x128xf32>
    %1242 = arith.addf %1241, %1240 : vector<6x128xf32>
    %c10_392 = arith.constant 10 : index
    %1243 = memref.load %arg5[%c10_392] : memref<32xf32, #tpu.memory_space<smem>>
    %cst_393 = arith.constant 0.000000e+00 : f32
    %1244 = vector.broadcast %cst_393 : f32 to vector<6x128xf32>
    %1245 = arith.maximumf %1242, %1244 : vector<6x128xf32>
    %1246 = vector.broadcast %1243 : f32 to vector<6x128xf32>
    %1247 = arith.mulf %1246, %1245 : vector<6x128xf32>
    %1248 = arith.addf %1236, %1247 : vector<6x128xf32>
    %c11_394 = arith.constant 11 : index
    %c0_395 = arith.constant 0 : index
    %1249 = vector.load %arg9[%c11_394, %c0_395] : memref<32x128xf32, #tpu.memory_space<vmem>>, vector<1x128xf32>
    %c45_396 = arith.constant 45 : index
    %1250 = memref.load %arg3[%c45_396] : memref<128xf32, #tpu.memory_space<smem>>
    %1251 = vector.broadcast %1250 : f32 to vector<6x128xf32>
    %1252 = arith.mulf %1251, %1113 : vector<6x128xf32>
    %1253 = vector.broadcast %1249 : vector<1x128xf32> to vector<6x128xf32>
    %1254 = arith.addf %1253, %1252 : vector<6x128xf32>
    %c11_397 = arith.constant 11 : index
    %1255 = memref.load %arg5[%c11_397] : memref<32xf32, #tpu.memory_space<smem>>
    %cst_398 = arith.constant 0.000000e+00 : f32
    %1256 = vector.broadcast %cst_398 : f32 to vector<6x128xf32>
    %1257 = arith.maximumf %1254, %1256 : vector<6x128xf32>
    %1258 = vector.broadcast %1255 : f32 to vector<6x128xf32>
    %1259 = arith.mulf %1258, %1257 : vector<6x128xf32>
    %1260 = arith.addf %1248, %1259 : vector<6x128xf32>
    %c12_399 = arith.constant 12 : index
    %c0_400 = arith.constant 0 : index
    %1261 = vector.load %arg9[%c12_399, %c0_400] : memref<32x128xf32, #tpu.memory_space<vmem>>, vector<1x128xf32>
    %c49_401 = arith.constant 49 : index
    %1262 = memref.load %arg3[%c49_401] : memref<128xf32, #tpu.memory_space<smem>>
    %1263 = vector.broadcast %1262 : f32 to vector<6x128xf32>
    %1264 = arith.mulf %1263, %1113 : vector<6x128xf32>
    %1265 = vector.broadcast %1261 : vector<1x128xf32> to vector<6x128xf32>
    %1266 = arith.addf %1265, %1264 : vector<6x128xf32>
    %c12_402 = arith.constant 12 : index
    %1267 = memref.load %arg5[%c12_402] : memref<32xf32, #tpu.memory_space<smem>>
    %cst_403 = arith.constant 0.000000e+00 : f32
    %1268 = vector.broadcast %cst_403 : f32 to vector<6x128xf32>
    %1269 = arith.maximumf %1266, %1268 : vector<6x128xf32>
    %1270 = vector.broadcast %1267 : f32 to vector<6x128xf32>
    %1271 = arith.mulf %1270, %1269 : vector<6x128xf32>
    %1272 = arith.addf %1260, %1271 : vector<6x128xf32>
    %c13_404 = arith.constant 13 : index
    %c0_405 = arith.constant 0 : index
    %1273 = vector.load %arg9[%c13_404, %c0_405] : memref<32x128xf32, #tpu.memory_space<vmem>>, vector<1x128xf32>
    %c53_406 = arith.constant 53 : index
    %1274 = memref.load %arg3[%c53_406] : memref<128xf32, #tpu.memory_space<smem>>
    %1275 = vector.broadcast %1274 : f32 to vector<6x128xf32>
    %1276 = arith.mulf %1275, %1113 : vector<6x128xf32>
    %1277 = vector.broadcast %1273 : vector<1x128xf32> to vector<6x128xf32>
    %1278 = arith.addf %1277, %1276 : vector<6x128xf32>
    %c13_407 = arith.constant 13 : index
    %1279 = memref.load %arg5[%c13_407] : memref<32xf32, #tpu.memory_space<smem>>
    %cst_408 = arith.constant 0.000000e+00 : f32
    %1280 = vector.broadcast %cst_408 : f32 to vector<6x128xf32>
    %1281 = arith.maximumf %1278, %1280 : vector<6x128xf32>
    %1282 = vector.broadcast %1279 : f32 to vector<6x128xf32>
    %1283 = arith.mulf %1282, %1281 : vector<6x128xf32>
    %1284 = arith.addf %1272, %1283 : vector<6x128xf32>
    %c14_409 = arith.constant 14 : index
    %c0_410 = arith.constant 0 : index
    %1285 = vector.load %arg9[%c14_409, %c0_410] : memref<32x128xf32, #tpu.memory_space<vmem>>, vector<1x128xf32>
    %c57_411 = arith.constant 57 : index
    %1286 = memref.load %arg3[%c57_411] : memref<128xf32, #tpu.memory_space<smem>>
    %1287 = vector.broadcast %1286 : f32 to vector<6x128xf32>
    %1288 = arith.mulf %1287, %1113 : vector<6x128xf32>
    %1289 = vector.broadcast %1285 : vector<1x128xf32> to vector<6x128xf32>
    %1290 = arith.addf %1289, %1288 : vector<6x128xf32>
    %c14_412 = arith.constant 14 : index
    %1291 = memref.load %arg5[%c14_412] : memref<32xf32, #tpu.memory_space<smem>>
    %cst_413 = arith.constant 0.000000e+00 : f32
    %1292 = vector.broadcast %cst_413 : f32 to vector<6x128xf32>
    %1293 = arith.maximumf %1290, %1292 : vector<6x128xf32>
    %1294 = vector.broadcast %1291 : f32 to vector<6x128xf32>
    %1295 = arith.mulf %1294, %1293 : vector<6x128xf32>
    %1296 = arith.addf %1284, %1295 : vector<6x128xf32>
    %c15_414 = arith.constant 15 : index
    %c0_415 = arith.constant 0 : index
    %1297 = vector.load %arg9[%c15_414, %c0_415] : memref<32x128xf32, #tpu.memory_space<vmem>>, vector<1x128xf32>
    %c61_416 = arith.constant 61 : index
    %1298 = memref.load %arg3[%c61_416] : memref<128xf32, #tpu.memory_space<smem>>
    %1299 = vector.broadcast %1298 : f32 to vector<6x128xf32>
    %1300 = arith.mulf %1299, %1113 : vector<6x128xf32>
    %1301 = vector.broadcast %1297 : vector<1x128xf32> to vector<6x128xf32>
    %1302 = arith.addf %1301, %1300 : vector<6x128xf32>
    %c15_417 = arith.constant 15 : index
    %1303 = memref.load %arg5[%c15_417] : memref<32xf32, #tpu.memory_space<smem>>
    %cst_418 = arith.constant 0.000000e+00 : f32
    %1304 = vector.broadcast %cst_418 : f32 to vector<6x128xf32>
    %1305 = arith.maximumf %1302, %1304 : vector<6x128xf32>
    %1306 = vector.broadcast %1303 : f32 to vector<6x128xf32>
    %1307 = arith.mulf %1306, %1305 : vector<6x128xf32>
    %1308 = arith.addf %1296, %1307 : vector<6x128xf32>
    %c16_419 = arith.constant 16 : index
    %c0_420 = arith.constant 0 : index
    %1309 = vector.load %arg9[%c16_419, %c0_420] : memref<32x128xf32, #tpu.memory_space<vmem>>, vector<1x128xf32>
    %c65_421 = arith.constant 65 : index
    %1310 = memref.load %arg3[%c65_421] : memref<128xf32, #tpu.memory_space<smem>>
    %1311 = vector.broadcast %1310 : f32 to vector<6x128xf32>
    %1312 = arith.mulf %1311, %1113 : vector<6x128xf32>
    %1313 = vector.broadcast %1309 : vector<1x128xf32> to vector<6x128xf32>
    %1314 = arith.addf %1313, %1312 : vector<6x128xf32>
    %c16_422 = arith.constant 16 : index
    %1315 = memref.load %arg5[%c16_422] : memref<32xf32, #tpu.memory_space<smem>>
    %cst_423 = arith.constant 0.000000e+00 : f32
    %1316 = vector.broadcast %cst_423 : f32 to vector<6x128xf32>
    %1317 = arith.maximumf %1314, %1316 : vector<6x128xf32>
    %1318 = vector.broadcast %1315 : f32 to vector<6x128xf32>
    %1319 = arith.mulf %1318, %1317 : vector<6x128xf32>
    %1320 = arith.addf %1308, %1319 : vector<6x128xf32>
    %c17_424 = arith.constant 17 : index
    %c0_425 = arith.constant 0 : index
    %1321 = vector.load %arg9[%c17_424, %c0_425] : memref<32x128xf32, #tpu.memory_space<vmem>>, vector<1x128xf32>
    %c69_426 = arith.constant 69 : index
    %1322 = memref.load %arg3[%c69_426] : memref<128xf32, #tpu.memory_space<smem>>
    %1323 = vector.broadcast %1322 : f32 to vector<6x128xf32>
    %1324 = arith.mulf %1323, %1113 : vector<6x128xf32>
    %1325 = vector.broadcast %1321 : vector<1x128xf32> to vector<6x128xf32>
    %1326 = arith.addf %1325, %1324 : vector<6x128xf32>
    %c17_427 = arith.constant 17 : index
    %1327 = memref.load %arg5[%c17_427] : memref<32xf32, #tpu.memory_space<smem>>
    %cst_428 = arith.constant 0.000000e+00 : f32
    %1328 = vector.broadcast %cst_428 : f32 to vector<6x128xf32>
    %1329 = arith.maximumf %1326, %1328 : vector<6x128xf32>
    %1330 = vector.broadcast %1327 : f32 to vector<6x128xf32>
    %1331 = arith.mulf %1330, %1329 : vector<6x128xf32>
    %1332 = arith.addf %1320, %1331 : vector<6x128xf32>
    %c18_429 = arith.constant 18 : index
    %c0_430 = arith.constant 0 : index
    %1333 = vector.load %arg9[%c18_429, %c0_430] : memref<32x128xf32, #tpu.memory_space<vmem>>, vector<1x128xf32>
    %c73_431 = arith.constant 73 : index
    %1334 = memref.load %arg3[%c73_431] : memref<128xf32, #tpu.memory_space<smem>>
    %1335 = vector.broadcast %1334 : f32 to vector<6x128xf32>
    %1336 = arith.mulf %1335, %1113 : vector<6x128xf32>
    %1337 = vector.broadcast %1333 : vector<1x128xf32> to vector<6x128xf32>
    %1338 = arith.addf %1337, %1336 : vector<6x128xf32>
    %c18_432 = arith.constant 18 : index
    %1339 = memref.load %arg5[%c18_432] : memref<32xf32, #tpu.memory_space<smem>>
    %cst_433 = arith.constant 0.000000e+00 : f32
    %1340 = vector.broadcast %cst_433 : f32 to vector<6x128xf32>
    %1341 = arith.maximumf %1338, %1340 : vector<6x128xf32>
    %1342 = vector.broadcast %1339 : f32 to vector<6x128xf32>
    %1343 = arith.mulf %1342, %1341 : vector<6x128xf32>
    %1344 = arith.addf %1332, %1343 : vector<6x128xf32>
    %c19_434 = arith.constant 19 : index
    %c0_435 = arith.constant 0 : index
    %1345 = vector.load %arg9[%c19_434, %c0_435] : memref<32x128xf32, #tpu.memory_space<vmem>>, vector<1x128xf32>
    %c77_436 = arith.constant 77 : index
    %1346 = memref.load %arg3[%c77_436] : memref<128xf32, #tpu.memory_space<smem>>
    %1347 = vector.broadcast %1346 : f32 to vector<6x128xf32>
    %1348 = arith.mulf %1347, %1113 : vector<6x128xf32>
    %1349 = vector.broadcast %1345 : vector<1x128xf32> to vector<6x128xf32>
    %1350 = arith.addf %1349, %1348 : vector<6x128xf32>
    %c19_437 = arith.constant 19 : index
    %1351 = memref.load %arg5[%c19_437] : memref<32xf32, #tpu.memory_space<smem>>
    %cst_438 = arith.constant 0.000000e+00 : f32
    %1352 = vector.broadcast %cst_438 : f32 to vector<6x128xf32>
    %1353 = arith.maximumf %1350, %1352 : vector<6x128xf32>
    %1354 = vector.broadcast %1351 : f32 to vector<6x128xf32>
    %1355 = arith.mulf %1354, %1353 : vector<6x128xf32>
    %1356 = arith.addf %1344, %1355 : vector<6x128xf32>
    %c20_439 = arith.constant 20 : index
    %c0_440 = arith.constant 0 : index
    %1357 = vector.load %arg9[%c20_439, %c0_440] : memref<32x128xf32, #tpu.memory_space<vmem>>, vector<1x128xf32>
    %c81_441 = arith.constant 81 : index
    %1358 = memref.load %arg3[%c81_441] : memref<128xf32, #tpu.memory_space<smem>>
    %1359 = vector.broadcast %1358 : f32 to vector<6x128xf32>
    %1360 = arith.mulf %1359, %1113 : vector<6x128xf32>
    %1361 = vector.broadcast %1357 : vector<1x128xf32> to vector<6x128xf32>
    %1362 = arith.addf %1361, %1360 : vector<6x128xf32>
    %c20_442 = arith.constant 20 : index
    %1363 = memref.load %arg5[%c20_442] : memref<32xf32, #tpu.memory_space<smem>>
    %cst_443 = arith.constant 0.000000e+00 : f32
    %1364 = vector.broadcast %cst_443 : f32 to vector<6x128xf32>
    %1365 = arith.maximumf %1362, %1364 : vector<6x128xf32>
    %1366 = vector.broadcast %1363 : f32 to vector<6x128xf32>
    %1367 = arith.mulf %1366, %1365 : vector<6x128xf32>
    %1368 = arith.addf %1356, %1367 : vector<6x128xf32>
    %c21_444 = arith.constant 21 : index
    %c0_445 = arith.constant 0 : index
    %1369 = vector.load %arg9[%c21_444, %c0_445] : memref<32x128xf32, #tpu.memory_space<vmem>>, vector<1x128xf32>
    %c85_446 = arith.constant 85 : index
    %1370 = memref.load %arg3[%c85_446] : memref<128xf32, #tpu.memory_space<smem>>
    %1371 = vector.broadcast %1370 : f32 to vector<6x128xf32>
    %1372 = arith.mulf %1371, %1113 : vector<6x128xf32>
    %1373 = vector.broadcast %1369 : vector<1x128xf32> to vector<6x128xf32>
    %1374 = arith.addf %1373, %1372 : vector<6x128xf32>
    %c21_447 = arith.constant 21 : index
    %1375 = memref.load %arg5[%c21_447] : memref<32xf32, #tpu.memory_space<smem>>
    %cst_448 = arith.constant 0.000000e+00 : f32
    %1376 = vector.broadcast %cst_448 : f32 to vector<6x128xf32>
    %1377 = arith.maximumf %1374, %1376 : vector<6x128xf32>
    %1378 = vector.broadcast %1375 : f32 to vector<6x128xf32>
    %1379 = arith.mulf %1378, %1377 : vector<6x128xf32>
    %1380 = arith.addf %1368, %1379 : vector<6x128xf32>
    %c22_449 = arith.constant 22 : index
    %c0_450 = arith.constant 0 : index
    %1381 = vector.load %arg9[%c22_449, %c0_450] : memref<32x128xf32, #tpu.memory_space<vmem>>, vector<1x128xf32>
    %c89_451 = arith.constant 89 : index
    %1382 = memref.load %arg3[%c89_451] : memref<128xf32, #tpu.memory_space<smem>>
    %1383 = vector.broadcast %1382 : f32 to vector<6x128xf32>
    %1384 = arith.mulf %1383, %1113 : vector<6x128xf32>
    %1385 = vector.broadcast %1381 : vector<1x128xf32> to vector<6x128xf32>
    %1386 = arith.addf %1385, %1384 : vector<6x128xf32>
    %c22_452 = arith.constant 22 : index
    %1387 = memref.load %arg5[%c22_452] : memref<32xf32, #tpu.memory_space<smem>>
    %cst_453 = arith.constant 0.000000e+00 : f32
    %1388 = vector.broadcast %cst_453 : f32 to vector<6x128xf32>
    %1389 = arith.maximumf %1386, %1388 : vector<6x128xf32>
    %1390 = vector.broadcast %1387 : f32 to vector<6x128xf32>
    %1391 = arith.mulf %1390, %1389 : vector<6x128xf32>
    %1392 = arith.addf %1380, %1391 : vector<6x128xf32>
    %c23_454 = arith.constant 23 : index
    %c0_455 = arith.constant 0 : index
    %1393 = vector.load %arg9[%c23_454, %c0_455] : memref<32x128xf32, #tpu.memory_space<vmem>>, vector<1x128xf32>
    %c93_456 = arith.constant 93 : index
    %1394 = memref.load %arg3[%c93_456] : memref<128xf32, #tpu.memory_space<smem>>
    %1395 = vector.broadcast %1394 : f32 to vector<6x128xf32>
    %1396 = arith.mulf %1395, %1113 : vector<6x128xf32>
    %1397 = vector.broadcast %1393 : vector<1x128xf32> to vector<6x128xf32>
    %1398 = arith.addf %1397, %1396 : vector<6x128xf32>
    %c23_457 = arith.constant 23 : index
    %1399 = memref.load %arg5[%c23_457] : memref<32xf32, #tpu.memory_space<smem>>
    %cst_458 = arith.constant 0.000000e+00 : f32
    %1400 = vector.broadcast %cst_458 : f32 to vector<6x128xf32>
    %1401 = arith.maximumf %1398, %1400 : vector<6x128xf32>
    %1402 = vector.broadcast %1399 : f32 to vector<6x128xf32>
    %1403 = arith.mulf %1402, %1401 : vector<6x128xf32>
    %1404 = arith.addf %1392, %1403 : vector<6x128xf32>
    %c24_459 = arith.constant 24 : index
    %c0_460 = arith.constant 0 : index
    %1405 = vector.load %arg9[%c24_459, %c0_460] : memref<32x128xf32, #tpu.memory_space<vmem>>, vector<1x128xf32>
    %c97_461 = arith.constant 97 : index
    %1406 = memref.load %arg3[%c97_461] : memref<128xf32, #tpu.memory_space<smem>>
    %1407 = vector.broadcast %1406 : f32 to vector<6x128xf32>
    %1408 = arith.mulf %1407, %1113 : vector<6x128xf32>
    %1409 = vector.broadcast %1405 : vector<1x128xf32> to vector<6x128xf32>
    %1410 = arith.addf %1409, %1408 : vector<6x128xf32>
    %c24_462 = arith.constant 24 : index
    %1411 = memref.load %arg5[%c24_462] : memref<32xf32, #tpu.memory_space<smem>>
    %cst_463 = arith.constant 0.000000e+00 : f32
    %1412 = vector.broadcast %cst_463 : f32 to vector<6x128xf32>
    %1413 = arith.maximumf %1410, %1412 : vector<6x128xf32>
    %1414 = vector.broadcast %1411 : f32 to vector<6x128xf32>
    %1415 = arith.mulf %1414, %1413 : vector<6x128xf32>
    %1416 = arith.addf %1404, %1415 : vector<6x128xf32>
    %c25_464 = arith.constant 25 : index
    %c0_465 = arith.constant 0 : index
    %1417 = vector.load %arg9[%c25_464, %c0_465] : memref<32x128xf32, #tpu.memory_space<vmem>>, vector<1x128xf32>
    %c101_466 = arith.constant 101 : index
    %1418 = memref.load %arg3[%c101_466] : memref<128xf32, #tpu.memory_space<smem>>
    %1419 = vector.broadcast %1418 : f32 to vector<6x128xf32>
    %1420 = arith.mulf %1419, %1113 : vector<6x128xf32>
    %1421 = vector.broadcast %1417 : vector<1x128xf32> to vector<6x128xf32>
    %1422 = arith.addf %1421, %1420 : vector<6x128xf32>
    %c25_467 = arith.constant 25 : index
    %1423 = memref.load %arg5[%c25_467] : memref<32xf32, #tpu.memory_space<smem>>
    %cst_468 = arith.constant 0.000000e+00 : f32
    %1424 = vector.broadcast %cst_468 : f32 to vector<6x128xf32>
    %1425 = arith.maximumf %1422, %1424 : vector<6x128xf32>
    %1426 = vector.broadcast %1423 : f32 to vector<6x128xf32>
    %1427 = arith.mulf %1426, %1425 : vector<6x128xf32>
    %1428 = arith.addf %1416, %1427 : vector<6x128xf32>
    %c26_469 = arith.constant 26 : index
    %c0_470 = arith.constant 0 : index
    %1429 = vector.load %arg9[%c26_469, %c0_470] : memref<32x128xf32, #tpu.memory_space<vmem>>, vector<1x128xf32>
    %c105_471 = arith.constant 105 : index
    %1430 = memref.load %arg3[%c105_471] : memref<128xf32, #tpu.memory_space<smem>>
    %1431 = vector.broadcast %1430 : f32 to vector<6x128xf32>
    %1432 = arith.mulf %1431, %1113 : vector<6x128xf32>
    %1433 = vector.broadcast %1429 : vector<1x128xf32> to vector<6x128xf32>
    %1434 = arith.addf %1433, %1432 : vector<6x128xf32>
    %c26_472 = arith.constant 26 : index
    %1435 = memref.load %arg5[%c26_472] : memref<32xf32, #tpu.memory_space<smem>>
    %cst_473 = arith.constant 0.000000e+00 : f32
    %1436 = vector.broadcast %cst_473 : f32 to vector<6x128xf32>
    %1437 = arith.maximumf %1434, %1436 : vector<6x128xf32>
    %1438 = vector.broadcast %1435 : f32 to vector<6x128xf32>
    %1439 = arith.mulf %1438, %1437 : vector<6x128xf32>
    %1440 = arith.addf %1428, %1439 : vector<6x128xf32>
    %c27_474 = arith.constant 27 : index
    %c0_475 = arith.constant 0 : index
    %1441 = vector.load %arg9[%c27_474, %c0_475] : memref<32x128xf32, #tpu.memory_space<vmem>>, vector<1x128xf32>
    %c109_476 = arith.constant 109 : index
    %1442 = memref.load %arg3[%c109_476] : memref<128xf32, #tpu.memory_space<smem>>
    %1443 = vector.broadcast %1442 : f32 to vector<6x128xf32>
    %1444 = arith.mulf %1443, %1113 : vector<6x128xf32>
    %1445 = vector.broadcast %1441 : vector<1x128xf32> to vector<6x128xf32>
    %1446 = arith.addf %1445, %1444 : vector<6x128xf32>
    %c27_477 = arith.constant 27 : index
    %1447 = memref.load %arg5[%c27_477] : memref<32xf32, #tpu.memory_space<smem>>
    %cst_478 = arith.constant 0.000000e+00 : f32
    %1448 = vector.broadcast %cst_478 : f32 to vector<6x128xf32>
    %1449 = arith.maximumf %1446, %1448 : vector<6x128xf32>
    %1450 = vector.broadcast %1447 : f32 to vector<6x128xf32>
    %1451 = arith.mulf %1450, %1449 : vector<6x128xf32>
    %1452 = arith.addf %1440, %1451 : vector<6x128xf32>
    %c28_479 = arith.constant 28 : index
    %c0_480 = arith.constant 0 : index
    %1453 = vector.load %arg9[%c28_479, %c0_480] : memref<32x128xf32, #tpu.memory_space<vmem>>, vector<1x128xf32>
    %c113_481 = arith.constant 113 : index
    %1454 = memref.load %arg3[%c113_481] : memref<128xf32, #tpu.memory_space<smem>>
    %1455 = vector.broadcast %1454 : f32 to vector<6x128xf32>
    %1456 = arith.mulf %1455, %1113 : vector<6x128xf32>
    %1457 = vector.broadcast %1453 : vector<1x128xf32> to vector<6x128xf32>
    %1458 = arith.addf %1457, %1456 : vector<6x128xf32>
    %c28_482 = arith.constant 28 : index
    %1459 = memref.load %arg5[%c28_482] : memref<32xf32, #tpu.memory_space<smem>>
    %cst_483 = arith.constant 0.000000e+00 : f32
    %1460 = vector.broadcast %cst_483 : f32 to vector<6x128xf32>
    %1461 = arith.maximumf %1458, %1460 : vector<6x128xf32>
    %1462 = vector.broadcast %1459 : f32 to vector<6x128xf32>
    %1463 = arith.mulf %1462, %1461 : vector<6x128xf32>
    %1464 = arith.addf %1452, %1463 : vector<6x128xf32>
    %c29_484 = arith.constant 29 : index
    %c0_485 = arith.constant 0 : index
    %1465 = vector.load %arg9[%c29_484, %c0_485] : memref<32x128xf32, #tpu.memory_space<vmem>>, vector<1x128xf32>
    %c117_486 = arith.constant 117 : index
    %1466 = memref.load %arg3[%c117_486] : memref<128xf32, #tpu.memory_space<smem>>
    %1467 = vector.broadcast %1466 : f32 to vector<6x128xf32>
    %1468 = arith.mulf %1467, %1113 : vector<6x128xf32>
    %1469 = vector.broadcast %1465 : vector<1x128xf32> to vector<6x128xf32>
    %1470 = arith.addf %1469, %1468 : vector<6x128xf32>
    %c29_487 = arith.constant 29 : index
    %1471 = memref.load %arg5[%c29_487] : memref<32xf32, #tpu.memory_space<smem>>
    %cst_488 = arith.constant 0.000000e+00 : f32
    %1472 = vector.broadcast %cst_488 : f32 to vector<6x128xf32>
    %1473 = arith.maximumf %1470, %1472 : vector<6x128xf32>
    %1474 = vector.broadcast %1471 : f32 to vector<6x128xf32>
    %1475 = arith.mulf %1474, %1473 : vector<6x128xf32>
    %1476 = arith.addf %1464, %1475 : vector<6x128xf32>
    %c30_489 = arith.constant 30 : index
    %c0_490 = arith.constant 0 : index
    %1477 = vector.load %arg9[%c30_489, %c0_490] : memref<32x128xf32, #tpu.memory_space<vmem>>, vector<1x128xf32>
    %c121_491 = arith.constant 121 : index
    %1478 = memref.load %arg3[%c121_491] : memref<128xf32, #tpu.memory_space<smem>>
    %1479 = vector.broadcast %1478 : f32 to vector<6x128xf32>
    %1480 = arith.mulf %1479, %1113 : vector<6x128xf32>
    %1481 = vector.broadcast %1477 : vector<1x128xf32> to vector<6x128xf32>
    %1482 = arith.addf %1481, %1480 : vector<6x128xf32>
    %c30_492 = arith.constant 30 : index
    %1483 = memref.load %arg5[%c30_492] : memref<32xf32, #tpu.memory_space<smem>>
    %cst_493 = arith.constant 0.000000e+00 : f32
    %1484 = vector.broadcast %cst_493 : f32 to vector<6x128xf32>
    %1485 = arith.maximumf %1482, %1484 : vector<6x128xf32>
    %1486 = vector.broadcast %1483 : f32 to vector<6x128xf32>
    %1487 = arith.mulf %1486, %1485 : vector<6x128xf32>
    %1488 = arith.addf %1476, %1487 : vector<6x128xf32>
    %c31_494 = arith.constant 31 : index
    %c0_495 = arith.constant 0 : index
    %1489 = vector.load %arg9[%c31_494, %c0_495] : memref<32x128xf32, #tpu.memory_space<vmem>>, vector<1x128xf32>
    %c125_496 = arith.constant 125 : index
    %1490 = memref.load %arg3[%c125_496] : memref<128xf32, #tpu.memory_space<smem>>
    %1491 = vector.broadcast %1490 : f32 to vector<6x128xf32>
    %1492 = arith.mulf %1491, %1113 : vector<6x128xf32>
    %1493 = vector.broadcast %1489 : vector<1x128xf32> to vector<6x128xf32>
    %1494 = arith.addf %1493, %1492 : vector<6x128xf32>
    %c31_497 = arith.constant 31 : index
    %1495 = memref.load %arg5[%c31_497] : memref<32xf32, #tpu.memory_space<smem>>
    %cst_498 = arith.constant 0.000000e+00 : f32
    %1496 = vector.broadcast %cst_498 : f32 to vector<6x128xf32>
    %1497 = arith.maximumf %1494, %1496 : vector<6x128xf32>
    %1498 = vector.broadcast %1495 : f32 to vector<6x128xf32>
    %1499 = arith.mulf %1498, %1497 : vector<6x128xf32>
    %1500 = arith.addf %1488, %1499 : vector<6x128xf32>
    %c1_499 = arith.constant 1 : index
    %c0_500 = arith.constant 0 : index
    %c0_501 = arith.constant 0 : index
    %1501 = vector.load %arg7[%c1_499, %c0_500, %c0_501] : memref<4x6x128xf32, #tpu.memory_space<vmem>>, vector<1x6x128xf32>
    %1502 = vector.shape_cast %1501 : vector<1x6x128xf32> to vector<6x128xf32>
    %1503 = vector.shape_cast %1500 : vector<6x128xf32> to vector<1x6x128xf32>
    tpu.vector_store %arg7[%c1_499, %c0_500, %c0_501], %1503 {strides = array<i32>} : memref<4x6x128xf32, #tpu.memory_space<vmem>>, vector<1x6x128xf32>,
    %c2_502 = arith.constant 2 : index
    %c0_503 = arith.constant 0 : index
    %c0_504 = arith.constant 0 : index
    %1504 = vector.load %arg1[%c2_502, %c0_503, %c0_504] : memref<4x6x128xf32, #tpu.memory_space<vmem>>, vector<1x6x128xf32>
    %1505 = vector.shape_cast %1504 : vector<1x6x128xf32> to vector<6x128xf32>
    %c2_505 = arith.constant 2 : index
    %c0_506 = arith.constant 0 : index
    %1506 = vector.load %arg8[%c2_505, %c0_506] : memref<4x128xf32, #tpu.memory_space<vmem>>, vector<1x128xf32>
    %1507 = vector.broadcast %1506 : vector<1x128xf32> to vector<6x128xf32>
    %1508 = arith.subf %1505, %1507 : vector<6x128xf32>
    %cst_507 = arith.constant 0.000000e+00 : f32
    %1509 = vector.broadcast %cst_507 : f32 to vector<6x128xf32>
    %1510 = vector.broadcast %713 : f32 to vector<6x128xf32>
    %1511 = arith.addf %1509, %1510 : vector<6x128xf32>
    %c0_508 = arith.constant 0 : index
    %c0_509 = arith.constant 0 : index
    %1512 = vector.load %arg9[%c0_508, %c0_509] : memref<32x128xf32, #tpu.memory_space<vmem>>, vector<1x128xf32>
    %c2_510 = arith.constant 2 : index
    %1513 = memref.load %arg3[%c2_510] : memref<128xf32, #tpu.memory_space<smem>>
    %1514 = vector.broadcast %1513 : f32 to vector<6x128xf32>
    %1515 = arith.mulf %1514, %1508 : vector<6x128xf32>
    %1516 = vector.broadcast %1512 : vector<1x128xf32> to vector<6x128xf32>
    %1517 = arith.addf %1516, %1515 : vector<6x128xf32>
    %c0_511 = arith.constant 0 : index
    %1518 = memref.load %arg5[%c0_511] : memref<32xf32, #tpu.memory_space<smem>>
    %cst_512 = arith.constant 0.000000e+00 : f32
    %1519 = vector.broadcast %cst_512 : f32 to vector<6x128xf32>
    %1520 = arith.maximumf %1517, %1519 : vector<6x128xf32>
    %1521 = vector.broadcast %1518 : f32 to vector<6x128xf32>
    %1522 = arith.mulf %1521, %1520 : vector<6x128xf32>
    %1523 = arith.addf %1511, %1522 : vector<6x128xf32>
    %c1_513 = arith.constant 1 : index
    %c0_514 = arith.constant 0 : index
    %1524 = vector.load %arg9[%c1_513, %c0_514] : memref<32x128xf32, #tpu.memory_space<vmem>>, vector<1x128xf32>
    %c6_515 = arith.constant 6 : index
    %1525 = memref.load %arg3[%c6_515] : memref<128xf32, #tpu.memory_space<smem>>
    %1526 = vector.broadcast %1525 : f32 to vector<6x128xf32>
    %1527 = arith.mulf %1526, %1508 : vector<6x128xf32>
    %1528 = vector.broadcast %1524 : vector<1x128xf32> to vector<6x128xf32>
    %1529 = arith.addf %1528, %1527 : vector<6x128xf32>
    %c1_516 = arith.constant 1 : index
    %1530 = memref.load %arg5[%c1_516] : memref<32xf32, #tpu.memory_space<smem>>
    %cst_517 = arith.constant 0.000000e+00 : f32
    %1531 = vector.broadcast %cst_517 : f32 to vector<6x128xf32>
    %1532 = arith.maximumf %1529, %1531 : vector<6x128xf32>
    %1533 = vector.broadcast %1530 : f32 to vector<6x128xf32>
    %1534 = arith.mulf %1533, %1532 : vector<6x128xf32>
    %1535 = arith.addf %1523, %1534 : vector<6x128xf32>
    %c2_518 = arith.constant 2 : index
    %c0_519 = arith.constant 0 : index
    %1536 = vector.load %arg9[%c2_518, %c0_519] : memref<32x128xf32, #tpu.memory_space<vmem>>, vector<1x128xf32>
    %c10_520 = arith.constant 10 : index
    %1537 = memref.load %arg3[%c10_520] : memref<128xf32, #tpu.memory_space<smem>>
    %1538 = vector.broadcast %1537 : f32 to vector<6x128xf32>
    %1539 = arith.mulf %1538, %1508 : vector<6x128xf32>
    %1540 = vector.broadcast %1536 : vector<1x128xf32> to vector<6x128xf32>
    %1541 = arith.addf %1540, %1539 : vector<6x128xf32>
    %c2_521 = arith.constant 2 : index
    %1542 = memref.load %arg5[%c2_521] : memref<32xf32, #tpu.memory_space<smem>>
    %cst_522 = arith.constant 0.000000e+00 : f32
    %1543 = vector.broadcast %cst_522 : f32 to vector<6x128xf32>
    %1544 = arith.maximumf %1541, %1543 : vector<6x128xf32>
    %1545 = vector.broadcast %1542 : f32 to vector<6x128xf32>
    %1546 = arith.mulf %1545, %1544 : vector<6x128xf32>
    %1547 = arith.addf %1535, %1546 : vector<6x128xf32>
    %c3_523 = arith.constant 3 : index
    %c0_524 = arith.constant 0 : index
    %1548 = vector.load %arg9[%c3_523, %c0_524] : memref<32x128xf32, #tpu.memory_space<vmem>>, vector<1x128xf32>
    %c14_525 = arith.constant 14 : index
    %1549 = memref.load %arg3[%c14_525] : memref<128xf32, #tpu.memory_space<smem>>
    %1550 = vector.broadcast %1549 : f32 to vector<6x128xf32>
    %1551 = arith.mulf %1550, %1508 : vector<6x128xf32>
    %1552 = vector.broadcast %1548 : vector<1x128xf32> to vector<6x128xf32>
    %1553 = arith.addf %1552, %1551 : vector<6x128xf32>
    %c3_526 = arith.constant 3 : index
    %1554 = memref.load %arg5[%c3_526] : memref<32xf32, #tpu.memory_space<smem>>
    %cst_527 = arith.constant 0.000000e+00 : f32
    %1555 = vector.broadcast %cst_527 : f32 to vector<6x128xf32>
    %1556 = arith.maximumf %1553, %1555 : vector<6x128xf32>
    %1557 = vector.broadcast %1554 : f32 to vector<6x128xf32>
    %1558 = arith.mulf %1557, %1556 : vector<6x128xf32>
    %1559 = arith.addf %1547, %1558 : vector<6x128xf32>
    %c4_528 = arith.constant 4 : index
    %c0_529 = arith.constant 0 : index
    %1560 = vector.load %arg9[%c4_528, %c0_529] : memref<32x128xf32, #tpu.memory_space<vmem>>, vector<1x128xf32>
    %c18_530 = arith.constant 18 : index
    %1561 = memref.load %arg3[%c18_530] : memref<128xf32, #tpu.memory_space<smem>>
    %1562 = vector.broadcast %1561 : f32 to vector<6x128xf32>
    %1563 = arith.mulf %1562, %1508 : vector<6x128xf32>
    %1564 = vector.broadcast %1560 : vector<1x128xf32> to vector<6x128xf32>
    %1565 = arith.addf %1564, %1563 : vector<6x128xf32>
    %c4_531 = arith.constant 4 : index
    %1566 = memref.load %arg5[%c4_531] : memref<32xf32, #tpu.memory_space<smem>>
    %cst_532 = arith.constant 0.000000e+00 : f32
    %1567 = vector.broadcast %cst_532 : f32 to vector<6x128xf32>
    %1568 = arith.maximumf %1565, %1567 : vector<6x128xf32>
    %1569 = vector.broadcast %1566 : f32 to vector<6x128xf32>
    %1570 = arith.mulf %1569, %1568 : vector<6x128xf32>
    %1571 = arith.addf %1559, %1570 : vector<6x128xf32>
    %c5_533 = arith.constant 5 : index
    %c0_534 = arith.constant 0 : index
    %1572 = vector.load %arg9[%c5_533, %c0_534] : memref<32x128xf32, #tpu.memory_space<vmem>>, vector<1x128xf32>
    %c22_535 = arith.constant 22 : index
    %1573 = memref.load %arg3[%c22_535] : memref<128xf32, #tpu.memory_space<smem>>
    %1574 = vector.broadcast %1573 : f32 to vector<6x128xf32>
    %1575 = arith.mulf %1574, %1508 : vector<6x128xf32>
    %1576 = vector.broadcast %1572 : vector<1x128xf32> to vector<6x128xf32>
    %1577 = arith.addf %1576, %1575 : vector<6x128xf32>
    %c5_536 = arith.constant 5 : index
    %1578 = memref.load %arg5[%c5_536] : memref<32xf32, #tpu.memory_space<smem>>
    %cst_537 = arith.constant 0.000000e+00 : f32
    %1579 = vector.broadcast %cst_537 : f32 to vector<6x128xf32>
    %1580 = arith.maximumf %1577, %1579 : vector<6x128xf32>
    %1581 = vector.broadcast %1578 : f32 to vector<6x128xf32>
    %1582 = arith.mulf %1581, %1580 : vector<6x128xf32>
    %1583 = arith.addf %1571, %1582 : vector<6x128xf32>
    %c6_538 = arith.constant 6 : index
    %c0_539 = arith.constant 0 : index
    %1584 = vector.load %arg9[%c6_538, %c0_539] : memref<32x128xf32, #tpu.memory_space<vmem>>, vector<1x128xf32>
    %c26_540 = arith.constant 26 : index
    %1585 = memref.load %arg3[%c26_540] : memref<128xf32, #tpu.memory_space<smem>>
    %1586 = vector.broadcast %1585 : f32 to vector<6x128xf32>
    %1587 = arith.mulf %1586, %1508 : vector<6x128xf32>
    %1588 = vector.broadcast %1584 : vector<1x128xf32> to vector<6x128xf32>
    %1589 = arith.addf %1588, %1587 : vector<6x128xf32>
    %c6_541 = arith.constant 6 : index
    %1590 = memref.load %arg5[%c6_541] : memref<32xf32, #tpu.memory_space<smem>>
    %cst_542 = arith.constant 0.000000e+00 : f32
    %1591 = vector.broadcast %cst_542 : f32 to vector<6x128xf32>
    %1592 = arith.maximumf %1589, %1591 : vector<6x128xf32>
    %1593 = vector.broadcast %1590 : f32 to vector<6x128xf32>
    %1594 = arith.mulf %1593, %1592 : vector<6x128xf32>
    %1595 = arith.addf %1583, %1594 : vector<6x128xf32>
    %c7_543 = arith.constant 7 : index
    %c0_544 = arith.constant 0 : index
    %1596 = vector.load %arg9[%c7_543, %c0_544] : memref<32x128xf32, #tpu.memory_space<vmem>>, vector<1x128xf32>
    %c30_545 = arith.constant 30 : index
    %1597 = memref.load %arg3[%c30_545] : memref<128xf32, #tpu.memory_space<smem>>
    %1598 = vector.broadcast %1597 : f32 to vector<6x128xf32>
    %1599 = arith.mulf %1598, %1508 : vector<6x128xf32>
    %1600 = vector.broadcast %1596 : vector<1x128xf32> to vector<6x128xf32>
    %1601 = arith.addf %1600, %1599 : vector<6x128xf32>
    %c7_546 = arith.constant 7 : index
    %1602 = memref.load %arg5[%c7_546] : memref<32xf32, #tpu.memory_space<smem>>
    %cst_547 = arith.constant 0.000000e+00 : f32
    %1603 = vector.broadcast %cst_547 : f32 to vector<6x128xf32>
    %1604 = arith.maximumf %1601, %1603 : vector<6x128xf32>
    %1605 = vector.broadcast %1602 : f32 to vector<6x128xf32>
    %1606 = arith.mulf %1605, %1604 : vector<6x128xf32>
    %1607 = arith.addf %1595, %1606 : vector<6x128xf32>
    %c8_548 = arith.constant 8 : index
    %c0_549 = arith.constant 0 : index
    %1608 = vector.load %arg9[%c8_548, %c0_549] : memref<32x128xf32, #tpu.memory_space<vmem>>, vector<1x128xf32>
    %c34_550 = arith.constant 34 : index
    %1609 = memref.load %arg3[%c34_550] : memref<128xf32, #tpu.memory_space<smem>>
    %1610 = vector.broadcast %1609 : f32 to vector<6x128xf32>
    %1611 = arith.mulf %1610, %1508 : vector<6x128xf32>
    %1612 = vector.broadcast %1608 : vector<1x128xf32> to vector<6x128xf32>
    %1613 = arith.addf %1612, %1611 : vector<6x128xf32>
    %c8_551 = arith.constant 8 : index
    %1614 = memref.load %arg5[%c8_551] : memref<32xf32, #tpu.memory_space<smem>>
    %cst_552 = arith.constant 0.000000e+00 : f32
    %1615 = vector.broadcast %cst_552 : f32 to vector<6x128xf32>
    %1616 = arith.maximumf %1613, %1615 : vector<6x128xf32>
    %1617 = vector.broadcast %1614 : f32 to vector<6x128xf32>
    %1618 = arith.mulf %1617, %1616 : vector<6x128xf32>
    %1619 = arith.addf %1607, %1618 : vector<6x128xf32>
    %c9_553 = arith.constant 9 : index
    %c0_554 = arith.constant 0 : index
    %1620 = vector.load %arg9[%c9_553, %c0_554] : memref<32x128xf32, #tpu.memory_space<vmem>>, vector<1x128xf32>
    %c38_555 = arith.constant 38 : index
    %1621 = memref.load %arg3[%c38_555] : memref<128xf32, #tpu.memory_space<smem>>
    %1622 = vector.broadcast %1621 : f32 to vector<6x128xf32>
    %1623 = arith.mulf %1622, %1508 : vector<6x128xf32>
    %1624 = vector.broadcast %1620 : vector<1x128xf32> to vector<6x128xf32>
    %1625 = arith.addf %1624, %1623 : vector<6x128xf32>
    %c9_556 = arith.constant 9 : index
    %1626 = memref.load %arg5[%c9_556] : memref<32xf32, #tpu.memory_space<smem>>
    %cst_557 = arith.constant 0.000000e+00 : f32
    %1627 = vector.broadcast %cst_557 : f32 to vector<6x128xf32>
    %1628 = arith.maximumf %1625, %1627 : vector<6x128xf32>
    %1629 = vector.broadcast %1626 : f32 to vector<6x128xf32>
    %1630 = arith.mulf %1629, %1628 : vector<6x128xf32>
    %1631 = arith.addf %1619, %1630 : vector<6x128xf32>
    %c10_558 = arith.constant 10 : index
    %c0_559 = arith.constant 0 : index
    %1632 = vector.load %arg9[%c10_558, %c0_559] : memref<32x128xf32, #tpu.memory_space<vmem>>, vector<1x128xf32>
    %c42_560 = arith.constant 42 : index
    %1633 = memref.load %arg3[%c42_560] : memref<128xf32, #tpu.memory_space<smem>>
    %1634 = vector.broadcast %1633 : f32 to vector<6x128xf32>
    %1635 = arith.mulf %1634, %1508 : vector<6x128xf32>
    %1636 = vector.broadcast %1632 : vector<1x128xf32> to vector<6x128xf32>
    %1637 = arith.addf %1636, %1635 : vector<6x128xf32>
    %c10_561 = arith.constant 10 : index
    %1638 = memref.load %arg5[%c10_561] : memref<32xf32, #tpu.memory_space<smem>>
    %cst_562 = arith.constant 0.000000e+00 : f32
    %1639 = vector.broadcast %cst_562 : f32 to vector<6x128xf32>
    %1640 = arith.maximumf %1637, %1639 : vector<6x128xf32>
    %1641 = vector.broadcast %1638 : f32 to vector<6x128xf32>
    %1642 = arith.mulf %1641, %1640 : vector<6x128xf32>
    %1643 = arith.addf %1631, %1642 : vector<6x128xf32>
    %c11_563 = arith.constant 11 : index
    %c0_564 = arith.constant 0 : index
    %1644 = vector.load %arg9[%c11_563, %c0_564] : memref<32x128xf32, #tpu.memory_space<vmem>>, vector<1x128xf32>
    %c46_565 = arith.constant 46 : index
    %1645 = memref.load %arg3[%c46_565] : memref<128xf32, #tpu.memory_space<smem>>
    %1646 = vector.broadcast %1645 : f32 to vector<6x128xf32>
    %1647 = arith.mulf %1646, %1508 : vector<6x128xf32>
    %1648 = vector.broadcast %1644 : vector<1x128xf32> to vector<6x128xf32>
    %1649 = arith.addf %1648, %1647 : vector<6x128xf32>
    %c11_566 = arith.constant 11 : index
    %1650 = memref.load %arg5[%c11_566] : memref<32xf32, #tpu.memory_space<smem>>
    %cst_567 = arith.constant 0.000000e+00 : f32
    %1651 = vector.broadcast %cst_567 : f32 to vector<6x128xf32>
    %1652 = arith.maximumf %1649, %1651 : vector<6x128xf32>
    %1653 = vector.broadcast %1650 : f32 to vector<6x128xf32>
    %1654 = arith.mulf %1653, %1652 : vector<6x128xf32>
    %1655 = arith.addf %1643, %1654 : vector<6x128xf32>
    %c12_568 = arith.constant 12 : index
    %c0_569 = arith.constant 0 : index
    %1656 = vector.load %arg9[%c12_568, %c0_569] : memref<32x128xf32, #tpu.memory_space<vmem>>, vector<1x128xf32>
    %c50_570 = arith.constant 50 : index
    %1657 = memref.load %arg3[%c50_570] : memref<128xf32, #tpu.memory_space<smem>>
    %1658 = vector.broadcast %1657 : f32 to vector<6x128xf32>
    %1659 = arith.mulf %1658, %1508 : vector<6x128xf32>
    %1660 = vector.broadcast %1656 : vector<1x128xf32> to vector<6x128xf32>
    %1661 = arith.addf %1660, %1659 : vector<6x128xf32>
    %c12_571 = arith.constant 12 : index
    %1662 = memref.load %arg5[%c12_571] : memref<32xf32, #tpu.memory_space<smem>>
    %cst_572 = arith.constant 0.000000e+00 : f32
    %1663 = vector.broadcast %cst_572 : f32 to vector<6x128xf32>
    %1664 = arith.maximumf %1661, %1663 : vector<6x128xf32>
    %1665 = vector.broadcast %1662 : f32 to vector<6x128xf32>
    %1666 = arith.mulf %1665, %1664 : vector<6x128xf32>
    %1667 = arith.addf %1655, %1666 : vector<6x128xf32>
    %c13_573 = arith.constant 13 : index
    %c0_574 = arith.constant 0 : index
    %1668 = vector.load %arg9[%c13_573, %c0_574] : memref<32x128xf32, #tpu.memory_space<vmem>>, vector<1x128xf32>
    %c54_575 = arith.constant 54 : index
    %1669 = memref.load %arg3[%c54_575] : memref<128xf32, #tpu.memory_space<smem>>
    %1670 = vector.broadcast %1669 : f32 to vector<6x128xf32>
    %1671 = arith.mulf %1670, %1508 : vector<6x128xf32>
    %1672 = vector.broadcast %1668 : vector<1x128xf32> to vector<6x128xf32>
    %1673 = arith.addf %1672, %1671 : vector<6x128xf32>
    %c13_576 = arith.constant 13 : index
    %1674 = memref.load %arg5[%c13_576] : memref<32xf32, #tpu.memory_space<smem>>
    %cst_577 = arith.constant 0.000000e+00 : f32
    %1675 = vector.broadcast %cst_577 : f32 to vector<6x128xf32>
    %1676 = arith.maximumf %1673, %1675 : vector<6x128xf32>
    %1677 = vector.broadcast %1674 : f32 to vector<6x128xf32>
    %1678 = arith.mulf %1677, %1676 : vector<6x128xf32>
    %1679 = arith.addf %1667, %1678 : vector<6x128xf32>
    %c14_578 = arith.constant 14 : index
    %c0_579 = arith.constant 0 : index
    %1680 = vector.load %arg9[%c14_578, %c0_579] : memref<32x128xf32, #tpu.memory_space<vmem>>, vector<1x128xf32>
    %c58_580 = arith.constant 58 : index
    %1681 = memref.load %arg3[%c58_580] : memref<128xf32, #tpu.memory_space<smem>>
    %1682 = vector.broadcast %1681 : f32 to vector<6x128xf32>
    %1683 = arith.mulf %1682, %1508 : vector<6x128xf32>
    %1684 = vector.broadcast %1680 : vector<1x128xf32> to vector<6x128xf32>
    %1685 = arith.addf %1684, %1683 : vector<6x128xf32>
    %c14_581 = arith.constant 14 : index
    %1686 = memref.load %arg5[%c14_581] : memref<32xf32, #tpu.memory_space<smem>>
    %cst_582 = arith.constant 0.000000e+00 : f32
    %1687 = vector.broadcast %cst_582 : f32 to vector<6x128xf32>
    %1688 = arith.maximumf %1685, %1687 : vector<6x128xf32>
    %1689 = vector.broadcast %1686 : f32 to vector<6x128xf32>
    %1690 = arith.mulf %1689, %1688 : vector<6x128xf32>
    %1691 = arith.addf %1679, %1690 : vector<6x128xf32>
    %c15_583 = arith.constant 15 : index
    %c0_584 = arith.constant 0 : index
    %1692 = vector.load %arg9[%c15_583, %c0_584] : memref<32x128xf32, #tpu.memory_space<vmem>>, vector<1x128xf32>
    %c62_585 = arith.constant 62 : index
    %1693 = memref.load %arg3[%c62_585] : memref<128xf32, #tpu.memory_space<smem>>
    %1694 = vector.broadcast %1693 : f32 to vector<6x128xf32>
    %1695 = arith.mulf %1694, %1508 : vector<6x128xf32>
    %1696 = vector.broadcast %1692 : vector<1x128xf32> to vector<6x128xf32>
    %1697 = arith.addf %1696, %1695 : vector<6x128xf32>
    %c15_586 = arith.constant 15 : index
    %1698 = memref.load %arg5[%c15_586] : memref<32xf32, #tpu.memory_space<smem>>
    %cst_587 = arith.constant 0.000000e+00 : f32
    %1699 = vector.broadcast %cst_587 : f32 to vector<6x128xf32>
    %1700 = arith.maximumf %1697, %1699 : vector<6x128xf32>
    %1701 = vector.broadcast %1698 : f32 to vector<6x128xf32>
    %1702 = arith.mulf %1701, %1700 : vector<6x128xf32>
    %1703 = arith.addf %1691, %1702 : vector<6x128xf32>
    %c16_588 = arith.constant 16 : index
    %c0_589 = arith.constant 0 : index
    %1704 = vector.load %arg9[%c16_588, %c0_589] : memref<32x128xf32, #tpu.memory_space<vmem>>, vector<1x128xf32>
    %c66_590 = arith.constant 66 : index
    %1705 = memref.load %arg3[%c66_590] : memref<128xf32, #tpu.memory_space<smem>>
    %1706 = vector.broadcast %1705 : f32 to vector<6x128xf32>
    %1707 = arith.mulf %1706, %1508 : vector<6x128xf32>
    %1708 = vector.broadcast %1704 : vector<1x128xf32> to vector<6x128xf32>
    %1709 = arith.addf %1708, %1707 : vector<6x128xf32>
    %c16_591 = arith.constant 16 : index
    %1710 = memref.load %arg5[%c16_591] : memref<32xf32, #tpu.memory_space<smem>>
    %cst_592 = arith.constant 0.000000e+00 : f32
    %1711 = vector.broadcast %cst_592 : f32 to vector<6x128xf32>
    %1712 = arith.maximumf %1709, %1711 : vector<6x128xf32>
    %1713 = vector.broadcast %1710 : f32 to vector<6x128xf32>
    %1714 = arith.mulf %1713, %1712 : vector<6x128xf32>
    %1715 = arith.addf %1703, %1714 : vector<6x128xf32>
    %c17_593 = arith.constant 17 : index
    %c0_594 = arith.constant 0 : index
    %1716 = vector.load %arg9[%c17_593, %c0_594] : memref<32x128xf32, #tpu.memory_space<vmem>>, vector<1x128xf32>
    %c70_595 = arith.constant 70 : index
    %1717 = memref.load %arg3[%c70_595] : memref<128xf32, #tpu.memory_space<smem>>
    %1718 = vector.broadcast %1717 : f32 to vector<6x128xf32>
    %1719 = arith.mulf %1718, %1508 : vector<6x128xf32>
    %1720 = vector.broadcast %1716 : vector<1x128xf32> to vector<6x128xf32>
    %1721 = arith.addf %1720, %1719 : vector<6x128xf32>
    %c17_596 = arith.constant 17 : index
    %1722 = memref.load %arg5[%c17_596] : memref<32xf32, #tpu.memory_space<smem>>
    %cst_597 = arith.constant 0.000000e+00 : f32
    %1723 = vector.broadcast %cst_597 : f32 to vector<6x128xf32>
    %1724 = arith.maximumf %1721, %1723 : vector<6x128xf32>
    %1725 = vector.broadcast %1722 : f32 to vector<6x128xf32>
    %1726 = arith.mulf %1725, %1724 : vector<6x128xf32>
    %1727 = arith.addf %1715, %1726 : vector<6x128xf32>
    %c18_598 = arith.constant 18 : index
    %c0_599 = arith.constant 0 : index
    %1728 = vector.load %arg9[%c18_598, %c0_599] : memref<32x128xf32, #tpu.memory_space<vmem>>, vector<1x128xf32>
    %c74_600 = arith.constant 74 : index
    %1729 = memref.load %arg3[%c74_600] : memref<128xf32, #tpu.memory_space<smem>>
    %1730 = vector.broadcast %1729 : f32 to vector<6x128xf32>
    %1731 = arith.mulf %1730, %1508 : vector<6x128xf32>
    %1732 = vector.broadcast %1728 : vector<1x128xf32> to vector<6x128xf32>
    %1733 = arith.addf %1732, %1731 : vector<6x128xf32>
    %c18_601 = arith.constant 18 : index
    %1734 = memref.load %arg5[%c18_601] : memref<32xf32, #tpu.memory_space<smem>>
    %cst_602 = arith.constant 0.000000e+00 : f32
    %1735 = vector.broadcast %cst_602 : f32 to vector<6x128xf32>
    %1736 = arith.maximumf %1733, %1735 : vector<6x128xf32>
    %1737 = vector.broadcast %1734 : f32 to vector<6x128xf32>
    %1738 = arith.mulf %1737, %1736 : vector<6x128xf32>
    %1739 = arith.addf %1727, %1738 : vector<6x128xf32>
    %c19_603 = arith.constant 19 : index
    %c0_604 = arith.constant 0 : index
    %1740 = vector.load %arg9[%c19_603, %c0_604] : memref<32x128xf32, #tpu.memory_space<vmem>>, vector<1x128xf32>
    %c78_605 = arith.constant 78 : index
    %1741 = memref.load %arg3[%c78_605] : memref<128xf32, #tpu.memory_space<smem>>
    %1742 = vector.broadcast %1741 : f32 to vector<6x128xf32>
    %1743 = arith.mulf %1742, %1508 : vector<6x128xf32>
    %1744 = vector.broadcast %1740 : vector<1x128xf32> to vector<6x128xf32>
    %1745 = arith.addf %1744, %1743 : vector<6x128xf32>
    %c19_606 = arith.constant 19 : index
    %1746 = memref.load %arg5[%c19_606] : memref<32xf32, #tpu.memory_space<smem>>
    %cst_607 = arith.constant 0.000000e+00 : f32
    %1747 = vector.broadcast %cst_607 : f32 to vector<6x128xf32>
    %1748 = arith.maximumf %1745, %1747 : vector<6x128xf32>
    %1749 = vector.broadcast %1746 : f32 to vector<6x128xf32>
    %1750 = arith.mulf %1749, %1748 : vector<6x128xf32>
    %1751 = arith.addf %1739, %1750 : vector<6x128xf32>
    %c20_608 = arith.constant 20 : index
    %c0_609 = arith.constant 0 : index
    %1752 = vector.load %arg9[%c20_608, %c0_609] : memref<32x128xf32, #tpu.memory_space<vmem>>, vector<1x128xf32>
    %c82_610 = arith.constant 82 : index
    %1753 = memref.load %arg3[%c82_610] : memref<128xf32, #tpu.memory_space<smem>>
    %1754 = vector.broadcast %1753 : f32 to vector<6x128xf32>
    %1755 = arith.mulf %1754, %1508 : vector<6x128xf32>
    %1756 = vector.broadcast %1752 : vector<1x128xf32> to vector<6x128xf32>
    %1757 = arith.addf %1756, %1755 : vector<6x128xf32>
    %c20_611 = arith.constant 20 : index
    %1758 = memref.load %arg5[%c20_611] : memref<32xf32, #tpu.memory_space<smem>>
    %cst_612 = arith.constant 0.000000e+00 : f32
    %1759 = vector.broadcast %cst_612 : f32 to vector<6x128xf32>
    %1760 = arith.maximumf %1757, %1759 : vector<6x128xf32>
    %1761 = vector.broadcast %1758 : f32 to vector<6x128xf32>
    %1762 = arith.mulf %1761, %1760 : vector<6x128xf32>
    %1763 = arith.addf %1751, %1762 : vector<6x128xf32>
    %c21_613 = arith.constant 21 : index
    %c0_614 = arith.constant 0 : index
    %1764 = vector.load %arg9[%c21_613, %c0_614] : memref<32x128xf32, #tpu.memory_space<vmem>>, vector<1x128xf32>
    %c86_615 = arith.constant 86 : index
    %1765 = memref.load %arg3[%c86_615] : memref<128xf32, #tpu.memory_space<smem>>
    %1766 = vector.broadcast %1765 : f32 to vector<6x128xf32>
    %1767 = arith.mulf %1766, %1508 : vector<6x128xf32>
    %1768 = vector.broadcast %1764 : vector<1x128xf32> to vector<6x128xf32>
    %1769 = arith.addf %1768, %1767 : vector<6x128xf32>
    %c21_616 = arith.constant 21 : index
    %1770 = memref.load %arg5[%c21_616] : memref<32xf32, #tpu.memory_space<smem>>
    %cst_617 = arith.constant 0.000000e+00 : f32
    %1771 = vector.broadcast %cst_617 : f32 to vector<6x128xf32>
    %1772 = arith.maximumf %1769, %1771 : vector<6x128xf32>
    %1773 = vector.broadcast %1770 : f32 to vector<6x128xf32>
    %1774 = arith.mulf %1773, %1772 : vector<6x128xf32>
    %1775 = arith.addf %1763, %1774 : vector<6x128xf32>
    %c22_618 = arith.constant 22 : index
    %c0_619 = arith.constant 0 : index
    %1776 = vector.load %arg9[%c22_618, %c0_619] : memref<32x128xf32, #tpu.memory_space<vmem>>, vector<1x128xf32>
    %c90_620 = arith.constant 90 : index
    %1777 = memref.load %arg3[%c90_620] : memref<128xf32, #tpu.memory_space<smem>>
    %1778 = vector.broadcast %1777 : f32 to vector<6x128xf32>
    %1779 = arith.mulf %1778, %1508 : vector<6x128xf32>
    %1780 = vector.broadcast %1776 : vector<1x128xf32> to vector<6x128xf32>
    %1781 = arith.addf %1780, %1779 : vector<6x128xf32>
    %c22_621 = arith.constant 22 : index
    %1782 = memref.load %arg5[%c22_621] : memref<32xf32, #tpu.memory_space<smem>>
    %cst_622 = arith.constant 0.000000e+00 : f32
    %1783 = vector.broadcast %cst_622 : f32 to vector<6x128xf32>
    %1784 = arith.maximumf %1781, %1783 : vector<6x128xf32>
    %1785 = vector.broadcast %1782 : f32 to vector<6x128xf32>
    %1786 = arith.mulf %1785, %1784 : vector<6x128xf32>
    %1787 = arith.addf %1775, %1786 : vector<6x128xf32>
    %c23_623 = arith.constant 23 : index
    %c0_624 = arith.constant 0 : index
    %1788 = vector.load %arg9[%c23_623, %c0_624] : memref<32x128xf32, #tpu.memory_space<vmem>>, vector<1x128xf32>
    %c94_625 = arith.constant 94 : index
    %1789 = memref.load %arg3[%c94_625] : memref<128xf32, #tpu.memory_space<smem>>
    %1790 = vector.broadcast %1789 : f32 to vector<6x128xf32>
    %1791 = arith.mulf %1790, %1508 : vector<6x128xf32>
    %1792 = vector.broadcast %1788 : vector<1x128xf32> to vector<6x128xf32>
    %1793 = arith.addf %1792, %1791 : vector<6x128xf32>
    %c23_626 = arith.constant 23 : index
    %1794 = memref.load %arg5[%c23_626] : memref<32xf32, #tpu.memory_space<smem>>
    %cst_627 = arith.constant 0.000000e+00 : f32
    %1795 = vector.broadcast %cst_627 : f32 to vector<6x128xf32>
    %1796 = arith.maximumf %1793, %1795 : vector<6x128xf32>
    %1797 = vector.broadcast %1794 : f32 to vector<6x128xf32>
    %1798 = arith.mulf %1797, %1796 : vector<6x128xf32>
    %1799 = arith.addf %1787, %1798 : vector<6x128xf32>
    %c24_628 = arith.constant 24 : index
    %c0_629 = arith.constant 0 : index
    %1800 = vector.load %arg9[%c24_628, %c0_629] : memref<32x128xf32, #tpu.memory_space<vmem>>, vector<1x128xf32>
    %c98_630 = arith.constant 98 : index
    %1801 = memref.load %arg3[%c98_630] : memref<128xf32, #tpu.memory_space<smem>>
    %1802 = vector.broadcast %1801 : f32 to vector<6x128xf32>
    %1803 = arith.mulf %1802, %1508 : vector<6x128xf32>
    %1804 = vector.broadcast %1800 : vector<1x128xf32> to vector<6x128xf32>
    %1805 = arith.addf %1804, %1803 : vector<6x128xf32>
    %c24_631 = arith.constant 24 : index
    %1806 = memref.load %arg5[%c24_631] : memref<32xf32, #tpu.memory_space<smem>>
    %cst_632 = arith.constant 0.000000e+00 : f32
    %1807 = vector.broadcast %cst_632 : f32 to vector<6x128xf32>
    %1808 = arith.maximumf %1805, %1807 : vector<6x128xf32>
    %1809 = vector.broadcast %1806 : f32 to vector<6x128xf32>
    %1810 = arith.mulf %1809, %1808 : vector<6x128xf32>
    %1811 = arith.addf %1799, %1810 : vector<6x128xf32>
    %c25_633 = arith.constant 25 : index
    %c0_634 = arith.constant 0 : index
    %1812 = vector.load %arg9[%c25_633, %c0_634] : memref<32x128xf32, #tpu.memory_space<vmem>>, vector<1x128xf32>
    %c102_635 = arith.constant 102 : index
    %1813 = memref.load %arg3[%c102_635] : memref<128xf32, #tpu.memory_space<smem>>
    %1814 = vector.broadcast %1813 : f32 to vector<6x128xf32>
    %1815 = arith.mulf %1814, %1508 : vector<6x128xf32>
    %1816 = vector.broadcast %1812 : vector<1x128xf32> to vector<6x128xf32>
    %1817 = arith.addf %1816, %1815 : vector<6x128xf32>
    %c25_636 = arith.constant 25 : index
    %1818 = memref.load %arg5[%c25_636] : memref<32xf32, #tpu.memory_space<smem>>
    %cst_637 = arith.constant 0.000000e+00 : f32
    %1819 = vector.broadcast %cst_637 : f32 to vector<6x128xf32>
    %1820 = arith.maximumf %1817, %1819 : vector<6x128xf32>
    %1821 = vector.broadcast %1818 : f32 to vector<6x128xf32>
    %1822 = arith.mulf %1821, %1820 : vector<6x128xf32>
    %1823 = arith.addf %1811, %1822 : vector<6x128xf32>
    %c26_638 = arith.constant 26 : index
    %c0_639 = arith.constant 0 : index
    %1824 = vector.load %arg9[%c26_638, %c0_639] : memref<32x128xf32, #tpu.memory_space<vmem>>, vector<1x128xf32>
    %c106_640 = arith.constant 106 : index
    %1825 = memref.load %arg3[%c106_640] : memref<128xf32, #tpu.memory_space<smem>>
    %1826 = vector.broadcast %1825 : f32 to vector<6x128xf32>
    %1827 = arith.mulf %1826, %1508 : vector<6x128xf32>
    %1828 = vector.broadcast %1824 : vector<1x128xf32> to vector<6x128xf32>
    %1829 = arith.addf %1828, %1827 : vector<6x128xf32>
    %c26_641 = arith.constant 26 : index
    %1830 = memref.load %arg5[%c26_641] : memref<32xf32, #tpu.memory_space<smem>>
    %cst_642 = arith.constant 0.000000e+00 : f32
    %1831 = vector.broadcast %cst_642 : f32 to vector<6x128xf32>
    %1832 = arith.maximumf %1829, %1831 : vector<6x128xf32>
    %1833 = vector.broadcast %1830 : f32 to vector<6x128xf32>
    %1834 = arith.mulf %1833, %1832 : vector<6x128xf32>
    %1835 = arith.addf %1823, %1834 : vector<6x128xf32>
    %c27_643 = arith.constant 27 : index
    %c0_644 = arith.constant 0 : index
    %1836 = vector.load %arg9[%c27_643, %c0_644] : memref<32x128xf32, #tpu.memory_space<vmem>>, vector<1x128xf32>
    %c110_645 = arith.constant 110 : index
    %1837 = memref.load %arg3[%c110_645] : memref<128xf32, #tpu.memory_space<smem>>
    %1838 = vector.broadcast %1837 : f32 to vector<6x128xf32>
    %1839 = arith.mulf %1838, %1508 : vector<6x128xf32>
    %1840 = vector.broadcast %1836 : vector<1x128xf32> to vector<6x128xf32>
    %1841 = arith.addf %1840, %1839 : vector<6x128xf32>
    %c27_646 = arith.constant 27 : index
    %1842 = memref.load %arg5[%c27_646] : memref<32xf32, #tpu.memory_space<smem>>
    %cst_647 = arith.constant 0.000000e+00 : f32
    %1843 = vector.broadcast %cst_647 : f32 to vector<6x128xf32>
    %1844 = arith.maximumf %1841, %1843 : vector<6x128xf32>
    %1845 = vector.broadcast %1842 : f32 to vector<6x128xf32>
    %1846 = arith.mulf %1845, %1844 : vector<6x128xf32>
    %1847 = arith.addf %1835, %1846 : vector<6x128xf32>
    %c28_648 = arith.constant 28 : index
    %c0_649 = arith.constant 0 : index
    %1848 = vector.load %arg9[%c28_648, %c0_649] : memref<32x128xf32, #tpu.memory_space<vmem>>, vector<1x128xf32>
    %c114_650 = arith.constant 114 : index
    %1849 = memref.load %arg3[%c114_650] : memref<128xf32, #tpu.memory_space<smem>>
    %1850 = vector.broadcast %1849 : f32 to vector<6x128xf32>
    %1851 = arith.mulf %1850, %1508 : vector<6x128xf32>
    %1852 = vector.broadcast %1848 : vector<1x128xf32> to vector<6x128xf32>
    %1853 = arith.addf %1852, %1851 : vector<6x128xf32>
    %c28_651 = arith.constant 28 : index
    %1854 = memref.load %arg5[%c28_651] : memref<32xf32, #tpu.memory_space<smem>>
    %cst_652 = arith.constant 0.000000e+00 : f32
    %1855 = vector.broadcast %cst_652 : f32 to vector<6x128xf32>
    %1856 = arith.maximumf %1853, %1855 : vector<6x128xf32>
    %1857 = vector.broadcast %1854 : f32 to vector<6x128xf32>
    %1858 = arith.mulf %1857, %1856 : vector<6x128xf32>
    %1859 = arith.addf %1847, %1858 : vector<6x128xf32>
    %c29_653 = arith.constant 29 : index
    %c0_654 = arith.constant 0 : index
    %1860 = vector.load %arg9[%c29_653, %c0_654] : memref<32x128xf32, #tpu.memory_space<vmem>>, vector<1x128xf32>
    %c118_655 = arith.constant 118 : index
    %1861 = memref.load %arg3[%c118_655] : memref<128xf32, #tpu.memory_space<smem>>
    %1862 = vector.broadcast %1861 : f32 to vector<6x128xf32>
    %1863 = arith.mulf %1862, %1508 : vector<6x128xf32>
    %1864 = vector.broadcast %1860 : vector<1x128xf32> to vector<6x128xf32>
    %1865 = arith.addf %1864, %1863 : vector<6x128xf32>
    %c29_656 = arith.constant 29 : index
    %1866 = memref.load %arg5[%c29_656] : memref<32xf32, #tpu.memory_space<smem>>
    %cst_657 = arith.constant 0.000000e+00 : f32
    %1867 = vector.broadcast %cst_657 : f32 to vector<6x128xf32>
    %1868 = arith.maximumf %1865, %1867 : vector<6x128xf32>
    %1869 = vector.broadcast %1866 : f32 to vector<6x128xf32>
    %1870 = arith.mulf %1869, %1868 : vector<6x128xf32>
    %1871 = arith.addf %1859, %1870 : vector<6x128xf32>
    %c30_658 = arith.constant 30 : index
    %c0_659 = arith.constant 0 : index
    %1872 = vector.load %arg9[%c30_658, %c0_659] : memref<32x128xf32, #tpu.memory_space<vmem>>, vector<1x128xf32>
    %c122_660 = arith.constant 122 : index
    %1873 = memref.load %arg3[%c122_660] : memref<128xf32, #tpu.memory_space<smem>>
    %1874 = vector.broadcast %1873 : f32 to vector<6x128xf32>
    %1875 = arith.mulf %1874, %1508 : vector<6x128xf32>
    %1876 = vector.broadcast %1872 : vector<1x128xf32> to vector<6x128xf32>
    %1877 = arith.addf %1876, %1875 : vector<6x128xf32>
    %c30_661 = arith.constant 30 : index
    %1878 = memref.load %arg5[%c30_661] : memref<32xf32, #tpu.memory_space<smem>>
    %cst_662 = arith.constant 0.000000e+00 : f32
    %1879 = vector.broadcast %cst_662 : f32 to vector<6x128xf32>
    %1880 = arith.maximumf %1877, %1879 : vector<6x128xf32>
    %1881 = vector.broadcast %1878 : f32 to vector<6x128xf32>
    %1882 = arith.mulf %1881, %1880 : vector<6x128xf32>
    %1883 = arith.addf %1871, %1882 : vector<6x128xf32>
    %c31_663 = arith.constant 31 : index
    %c0_664 = arith.constant 0 : index
    %1884 = vector.load %arg9[%c31_663, %c0_664] : memref<32x128xf32, #tpu.memory_space<vmem>>, vector<1x128xf32>
    %c126_665 = arith.constant 126 : index
    %1885 = memref.load %arg3[%c126_665] : memref<128xf32, #tpu.memory_space<smem>>
    %1886 = vector.broadcast %1885 : f32 to vector<6x128xf32>
    %1887 = arith.mulf %1886, %1508 : vector<6x128xf32>
    %1888 = vector.broadcast %1884 : vector<1x128xf32> to vector<6x128xf32>
    %1889 = arith.addf %1888, %1887 : vector<6x128xf32>
    %c31_666 = arith.constant 31 : index
    %1890 = memref.load %arg5[%c31_666] : memref<32xf32, #tpu.memory_space<smem>>
    %cst_667 = arith.constant 0.000000e+00 : f32
    %1891 = vector.broadcast %cst_667 : f32 to vector<6x128xf32>
    %1892 = arith.maximumf %1889, %1891 : vector<6x128xf32>
    %1893 = vector.broadcast %1890 : f32 to vector<6x128xf32>
    %1894 = arith.mulf %1893, %1892 : vector<6x128xf32>
    %1895 = arith.addf %1883, %1894 : vector<6x128xf32>
    %c2_668 = arith.constant 2 : index
    %c0_669 = arith.constant 0 : index
    %c0_670 = arith.constant 0 : index
    %1896 = vector.load %arg7[%c2_668, %c0_669, %c0_670] : memref<4x6x128xf32, #tpu.memory_space<vmem>>, vector<1x6x128xf32>
    %1897 = vector.shape_cast %1896 : vector<1x6x128xf32> to vector<6x128xf32>
    %1898 = vector.shape_cast %1895 : vector<6x128xf32> to vector<1x6x128xf32>
    tpu.vector_store %arg7[%c2_668, %c0_669, %c0_670], %1898 {strides = array<i32>} : memref<4x6x128xf32, #tpu.memory_space<vmem>>, vector<1x6x128xf32>,
    %c3_671 = arith.constant 3 : index
    %c0_672 = arith.constant 0 : index
    %c0_673 = arith.constant 0 : index
    %1899 = vector.load %arg1[%c3_671, %c0_672, %c0_673] : memref<4x6x128xf32, #tpu.memory_space<vmem>>, vector<1x6x128xf32>
    %1900 = vector.shape_cast %1899 : vector<1x6x128xf32> to vector<6x128xf32>
    %c3_674 = arith.constant 3 : index
    %c0_675 = arith.constant 0 : index
    %1901 = vector.load %arg8[%c3_674, %c0_675] : memref<4x128xf32, #tpu.memory_space<vmem>>, vector<1x128xf32>
    %1902 = vector.broadcast %1901 : vector<1x128xf32> to vector<6x128xf32>
    %1903 = arith.subf %1900, %1902 : vector<6x128xf32>
    %cst_676 = arith.constant 0.000000e+00 : f32
    %1904 = vector.broadcast %cst_676 : f32 to vector<6x128xf32>
    %1905 = vector.broadcast %713 : f32 to vector<6x128xf32>
    %1906 = arith.addf %1904, %1905 : vector<6x128xf32>
    %c0_677 = arith.constant 0 : index
    %c0_678 = arith.constant 0 : index
    %1907 = vector.load %arg9[%c0_677, %c0_678] : memref<32x128xf32, #tpu.memory_space<vmem>>, vector<1x128xf32>
    %c3_679 = arith.constant 3 : index
    %1908 = memref.load %arg3[%c3_679] : memref<128xf32, #tpu.memory_space<smem>>
    %1909 = vector.broadcast %1908 : f32 to vector<6x128xf32>
    %1910 = arith.mulf %1909, %1903 : vector<6x128xf32>
    %1911 = vector.broadcast %1907 : vector<1x128xf32> to vector<6x128xf32>
    %1912 = arith.addf %1911, %1910 : vector<6x128xf32>
    %c0_680 = arith.constant 0 : index
    %1913 = memref.load %arg5[%c0_680] : memref<32xf32, #tpu.memory_space<smem>>
    %cst_681 = arith.constant 0.000000e+00 : f32
    %1914 = vector.broadcast %cst_681 : f32 to vector<6x128xf32>
    %1915 = arith.maximumf %1912, %1914 : vector<6x128xf32>
    %1916 = vector.broadcast %1913 : f32 to vector<6x128xf32>
    %1917 = arith.mulf %1916, %1915 : vector<6x128xf32>
    %1918 = arith.addf %1906, %1917 : vector<6x128xf32>
    %c1_682 = arith.constant 1 : index
    %c0_683 = arith.constant 0 : index
    %1919 = vector.load %arg9[%c1_682, %c0_683] : memref<32x128xf32, #tpu.memory_space<vmem>>, vector<1x128xf32>
    %c7_684 = arith.constant 7 : index
    %1920 = memref.load %arg3[%c7_684] : memref<128xf32, #tpu.memory_space<smem>>
    %1921 = vector.broadcast %1920 : f32 to vector<6x128xf32>
    %1922 = arith.mulf %1921, %1903 : vector<6x128xf32>
    %1923 = vector.broadcast %1919 : vector<1x128xf32> to vector<6x128xf32>
    %1924 = arith.addf %1923, %1922 : vector<6x128xf32>
    %c1_685 = arith.constant 1 : index
    %1925 = memref.load %arg5[%c1_685] : memref<32xf32, #tpu.memory_space<smem>>
    %cst_686 = arith.constant 0.000000e+00 : f32
    %1926 = vector.broadcast %cst_686 : f32 to vector<6x128xf32>
    %1927 = arith.maximumf %1924, %1926 : vector<6x128xf32>
    %1928 = vector.broadcast %1925 : f32 to vector<6x128xf32>
    %1929 = arith.mulf %1928, %1927 : vector<6x128xf32>
    %1930 = arith.addf %1918, %1929 : vector<6x128xf32>
    %c2_687 = arith.constant 2 : index
    %c0_688 = arith.constant 0 : index
    %1931 = vector.load %arg9[%c2_687, %c0_688] : memref<32x128xf32, #tpu.memory_space<vmem>>, vector<1x128xf32>
    %c11_689 = arith.constant 11 : index
    %1932 = memref.load %arg3[%c11_689] : memref<128xf32, #tpu.memory_space<smem>>
    %1933 = vector.broadcast %1932 : f32 to vector<6x128xf32>
    %1934 = arith.mulf %1933, %1903 : vector<6x128xf32>
    %1935 = vector.broadcast %1931 : vector<1x128xf32> to vector<6x128xf32>
    %1936 = arith.addf %1935, %1934 : vector<6x128xf32>
    %c2_690 = arith.constant 2 : index
    %1937 = memref.load %arg5[%c2_690] : memref<32xf32, #tpu.memory_space<smem>>
    %cst_691 = arith.constant 0.000000e+00 : f32
    %1938 = vector.broadcast %cst_691 : f32 to vector<6x128xf32>
    %1939 = arith.maximumf %1936, %1938 : vector<6x128xf32>
    %1940 = vector.broadcast %1937 : f32 to vector<6x128xf32>
    %1941 = arith.mulf %1940, %1939 : vector<6x128xf32>
    %1942 = arith.addf %1930, %1941 : vector<6x128xf32>
    %c3_692 = arith.constant 3 : index
    %c0_693 = arith.constant 0 : index
    %1943 = vector.load %arg9[%c3_692, %c0_693] : memref<32x128xf32, #tpu.memory_space<vmem>>, vector<1x128xf32>
    %c15_694 = arith.constant 15 : index
    %1944 = memref.load %arg3[%c15_694] : memref<128xf32, #tpu.memory_space<smem>>
    %1945 = vector.broadcast %1944 : f32 to vector<6x128xf32>
    %1946 = arith.mulf %1945, %1903 : vector<6x128xf32>
    %1947 = vector.broadcast %1943 : vector<1x128xf32> to vector<6x128xf32>
    %1948 = arith.addf %1947, %1946 : vector<6x128xf32>
    %c3_695 = arith.constant 3 : index
    %1949 = memref.load %arg5[%c3_695] : memref<32xf32, #tpu.memory_space<smem>>
    %cst_696 = arith.constant 0.000000e+00 : f32
    %1950 = vector.broadcast %cst_696 : f32 to vector<6x128xf32>
    %1951 = arith.maximumf %1948, %1950 : vector<6x128xf32>
    %1952 = vector.broadcast %1949 : f32 to vector<6x128xf32>
    %1953 = arith.mulf %1952, %1951 : vector<6x128xf32>
    %1954 = arith.addf %1942, %1953 : vector<6x128xf32>
    %c4_697 = arith.constant 4 : index
    %c0_698 = arith.constant 0 : index
    %1955 = vector.load %arg9[%c4_697, %c0_698] : memref<32x128xf32, #tpu.memory_space<vmem>>, vector<1x128xf32>
    %c19_699 = arith.constant 19 : index
    %1956 = memref.load %arg3[%c19_699] : memref<128xf32, #tpu.memory_space<smem>>
    %1957 = vector.broadcast %1956 : f32 to vector<6x128xf32>
    %1958 = arith.mulf %1957, %1903 : vector<6x128xf32>
    %1959 = vector.broadcast %1955 : vector<1x128xf32> to vector<6x128xf32>
    %1960 = arith.addf %1959, %1958 : vector<6x128xf32>
    %c4_700 = arith.constant 4 : index
    %1961 = memref.load %arg5[%c4_700] : memref<32xf32, #tpu.memory_space<smem>>
    %cst_701 = arith.constant 0.000000e+00 : f32
    %1962 = vector.broadcast %cst_701 : f32 to vector<6x128xf32>
    %1963 = arith.maximumf %1960, %1962 : vector<6x128xf32>
    %1964 = vector.broadcast %1961 : f32 to vector<6x128xf32>
    %1965 = arith.mulf %1964, %1963 : vector<6x128xf32>
    %1966 = arith.addf %1954, %1965 : vector<6x128xf32>
    %c5_702 = arith.constant 5 : index
    %c0_703 = arith.constant 0 : index
    %1967 = vector.load %arg9[%c5_702, %c0_703] : memref<32x128xf32, #tpu.memory_space<vmem>>, vector<1x128xf32>
    %c23_704 = arith.constant 23 : index
    %1968 = memref.load %arg3[%c23_704] : memref<128xf32, #tpu.memory_space<smem>>
    %1969 = vector.broadcast %1968 : f32 to vector<6x128xf32>
    %1970 = arith.mulf %1969, %1903 : vector<6x128xf32>
    %1971 = vector.broadcast %1967 : vector<1x128xf32> to vector<6x128xf32>
    %1972 = arith.addf %1971, %1970 : vector<6x128xf32>
    %c5_705 = arith.constant 5 : index
    %1973 = memref.load %arg5[%c5_705] : memref<32xf32, #tpu.memory_space<smem>>
    %cst_706 = arith.constant 0.000000e+00 : f32
    %1974 = vector.broadcast %cst_706 : f32 to vector<6x128xf32>
    %1975 = arith.maximumf %1972, %1974 : vector<6x128xf32>
    %1976 = vector.broadcast %1973 : f32 to vector<6x128xf32>
    %1977 = arith.mulf %1976, %1975 : vector<6x128xf32>
    %1978 = arith.addf %1966, %1977 : vector<6x128xf32>
    %c6_707 = arith.constant 6 : index
    %c0_708 = arith.constant 0 : index
    %1979 = vector.load %arg9[%c6_707, %c0_708] : memref<32x128xf32, #tpu.memory_space<vmem>>, vector<1x128xf32>
    %c27_709 = arith.constant 27 : index
    %1980 = memref.load %arg3[%c27_709] : memref<128xf32, #tpu.memory_space<smem>>
    %1981 = vector.broadcast %1980 : f32 to vector<6x128xf32>
    %1982 = arith.mulf %1981, %1903 : vector<6x128xf32>
    %1983 = vector.broadcast %1979 : vector<1x128xf32> to vector<6x128xf32>
    %1984 = arith.addf %1983, %1982 : vector<6x128xf32>
    %c6_710 = arith.constant 6 : index
    %1985 = memref.load %arg5[%c6_710] : memref<32xf32, #tpu.memory_space<smem>>
    %cst_711 = arith.constant 0.000000e+00 : f32
    %1986 = vector.broadcast %cst_711 : f32 to vector<6x128xf32>
    %1987 = arith.maximumf %1984, %1986 : vector<6x128xf32>
    %1988 = vector.broadcast %1985 : f32 to vector<6x128xf32>
    %1989 = arith.mulf %1988, %1987 : vector<6x128xf32>
    %1990 = arith.addf %1978, %1989 : vector<6x128xf32>
    %c7_712 = arith.constant 7 : index
    %c0_713 = arith.constant 0 : index
    %1991 = vector.load %arg9[%c7_712, %c0_713] : memref<32x128xf32, #tpu.memory_space<vmem>>, vector<1x128xf32>
    %c31_714 = arith.constant 31 : index
    %1992 = memref.load %arg3[%c31_714] : memref<128xf32, #tpu.memory_space<smem>>
    %1993 = vector.broadcast %1992 : f32 to vector<6x128xf32>
    %1994 = arith.mulf %1993, %1903 : vector<6x128xf32>
    %1995 = vector.broadcast %1991 : vector<1x128xf32> to vector<6x128xf32>
    %1996 = arith.addf %1995, %1994 : vector<6x128xf32>
    %c7_715 = arith.constant 7 : index
    %1997 = memref.load %arg5[%c7_715] : memref<32xf32, #tpu.memory_space<smem>>
    %cst_716 = arith.constant 0.000000e+00 : f32
    %1998 = vector.broadcast %cst_716 : f32 to vector<6x128xf32>
    %1999 = arith.maximumf %1996, %1998 : vector<6x128xf32>
    %2000 = vector.broadcast %1997 : f32 to vector<6x128xf32>
    %2001 = arith.mulf %2000, %1999 : vector<6x128xf32>
    %2002 = arith.addf %1990, %2001 : vector<6x128xf32>
    %c8_717 = arith.constant 8 : index
    %c0_718 = arith.constant 0 : index
    %2003 = vector.load %arg9[%c8_717, %c0_718] : memref<32x128xf32, #tpu.memory_space<vmem>>, vector<1x128xf32>
    %c35_719 = arith.constant 35 : index
    %2004 = memref.load %arg3[%c35_719] : memref<128xf32, #tpu.memory_space<smem>>
    %2005 = vector.broadcast %2004 : f32 to vector<6x128xf32>
    %2006 = arith.mulf %2005, %1903 : vector<6x128xf32>
    %2007 = vector.broadcast %2003 : vector<1x128xf32> to vector<6x128xf32>
    %2008 = arith.addf %2007, %2006 : vector<6x128xf32>
    %c8_720 = arith.constant 8 : index
    %2009 = memref.load %arg5[%c8_720] : memref<32xf32, #tpu.memory_space<smem>>
    %cst_721 = arith.constant 0.000000e+00 : f32
    %2010 = vector.broadcast %cst_721 : f32 to vector<6x128xf32>
    %2011 = arith.maximumf %2008, %2010 : vector<6x128xf32>
    %2012 = vector.broadcast %2009 : f32 to vector<6x128xf32>
    %2013 = arith.mulf %2012, %2011 : vector<6x128xf32>
    %2014 = arith.addf %2002, %2013 : vector<6x128xf32>
    %c9_722 = arith.constant 9 : index
    %c0_723 = arith.constant 0 : index
    %2015 = vector.load %arg9[%c9_722, %c0_723] : memref<32x128xf32, #tpu.memory_space<vmem>>, vector<1x128xf32>
    %c39_724 = arith.constant 39 : index
    %2016 = memref.load %arg3[%c39_724] : memref<128xf32, #tpu.memory_space<smem>>
    %2017 = vector.broadcast %2016 : f32 to vector<6x128xf32>
    %2018 = arith.mulf %2017, %1903 : vector<6x128xf32>
    %2019 = vector.broadcast %2015 : vector<1x128xf32> to vector<6x128xf32>
    %2020 = arith.addf %2019, %2018 : vector<6x128xf32>
    %c9_725 = arith.constant 9 : index
    %2021 = memref.load %arg5[%c9_725] : memref<32xf32, #tpu.memory_space<smem>>
    %cst_726 = arith.constant 0.000000e+00 : f32
    %2022 = vector.broadcast %cst_726 : f32 to vector<6x128xf32>
    %2023 = arith.maximumf %2020, %2022 : vector<6x128xf32>
    %2024 = vector.broadcast %2021 : f32 to vector<6x128xf32>
    %2025 = arith.mulf %2024, %2023 : vector<6x128xf32>
    %2026 = arith.addf %2014, %2025 : vector<6x128xf32>
    %c10_727 = arith.constant 10 : index
    %c0_728 = arith.constant 0 : index
    %2027 = vector.load %arg9[%c10_727, %c0_728] : memref<32x128xf32, #tpu.memory_space<vmem>>, vector<1x128xf32>
    %c43_729 = arith.constant 43 : index
    %2028 = memref.load %arg3[%c43_729] : memref<128xf32, #tpu.memory_space<smem>>
    %2029 = vector.broadcast %2028 : f32 to vector<6x128xf32>
    %2030 = arith.mulf %2029, %1903 : vector<6x128xf32>
    %2031 = vector.broadcast %2027 : vector<1x128xf32> to vector<6x128xf32>
    %2032 = arith.addf %2031, %2030 : vector<6x128xf32>
    %c10_730 = arith.constant 10 : index
    %2033 = memref.load %arg5[%c10_730] : memref<32xf32, #tpu.memory_space<smem>>
    %cst_731 = arith.constant 0.000000e+00 : f32
    %2034 = vector.broadcast %cst_731 : f32 to vector<6x128xf32>
    %2035 = arith.maximumf %2032, %2034 : vector<6x128xf32>
    %2036 = vector.broadcast %2033 : f32 to vector<6x128xf32>
    %2037 = arith.mulf %2036, %2035 : vector<6x128xf32>
    %2038 = arith.addf %2026, %2037 : vector<6x128xf32>
    %c11_732 = arith.constant 11 : index
    %c0_733 = arith.constant 0 : index
    %2039 = vector.load %arg9[%c11_732, %c0_733] : memref<32x128xf32, #tpu.memory_space<vmem>>, vector<1x128xf32>
    %c47_734 = arith.constant 47 : index
    %2040 = memref.load %arg3[%c47_734] : memref<128xf32, #tpu.memory_space<smem>>
    %2041 = vector.broadcast %2040 : f32 to vector<6x128xf32>
    %2042 = arith.mulf %2041, %1903 : vector<6x128xf32>
    %2043 = vector.broadcast %2039 : vector<1x128xf32> to vector<6x128xf32>
    %2044 = arith.addf %2043, %2042 : vector<6x128xf32>
    %c11_735 = arith.constant 11 : index
    %2045 = memref.load %arg5[%c11_735] : memref<32xf32, #tpu.memory_space<smem>>
    %cst_736 = arith.constant 0.000000e+00 : f32
    %2046 = vector.broadcast %cst_736 : f32 to vector<6x128xf32>
    %2047 = arith.maximumf %2044, %2046 : vector<6x128xf32>
    %2048 = vector.broadcast %2045 : f32 to vector<6x128xf32>
    %2049 = arith.mulf %2048, %2047 : vector<6x128xf32>
    %2050 = arith.addf %2038, %2049 : vector<6x128xf32>
    %c12_737 = arith.constant 12 : index
    %c0_738 = arith.constant 0 : index
    %2051 = vector.load %arg9[%c12_737, %c0_738] : memref<32x128xf32, #tpu.memory_space<vmem>>, vector<1x128xf32>
    %c51_739 = arith.constant 51 : index
    %2052 = memref.load %arg3[%c51_739] : memref<128xf32, #tpu.memory_space<smem>>
    %2053 = vector.broadcast %2052 : f32 to vector<6x128xf32>
    %2054 = arith.mulf %2053, %1903 : vector<6x128xf32>
    %2055 = vector.broadcast %2051 : vector<1x128xf32> to vector<6x128xf32>
    %2056 = arith.addf %2055, %2054 : vector<6x128xf32>
    %c12_740 = arith.constant 12 : index
    %2057 = memref.load %arg5[%c12_740] : memref<32xf32, #tpu.memory_space<smem>>
    %cst_741 = arith.constant 0.000000e+00 : f32
    %2058 = vector.broadcast %cst_741 : f32 to vector<6x128xf32>
    %2059 = arith.maximumf %2056, %2058 : vector<6x128xf32>
    %2060 = vector.broadcast %2057 : f32 to vector<6x128xf32>
    %2061 = arith.mulf %2060, %2059 : vector<6x128xf32>
    %2062 = arith.addf %2050, %2061 : vector<6x128xf32>
    %c13_742 = arith.constant 13 : index
    %c0_743 = arith.constant 0 : index
    %2063 = vector.load %arg9[%c13_742, %c0_743] : memref<32x128xf32, #tpu.memory_space<vmem>>, vector<1x128xf32>
    %c55_744 = arith.constant 55 : index
    %2064 = memref.load %arg3[%c55_744] : memref<128xf32, #tpu.memory_space<smem>>
    %2065 = vector.broadcast %2064 : f32 to vector<6x128xf32>
    %2066 = arith.mulf %2065, %1903 : vector<6x128xf32>
    %2067 = vector.broadcast %2063 : vector<1x128xf32> to vector<6x128xf32>
    %2068 = arith.addf %2067, %2066 : vector<6x128xf32>
    %c13_745 = arith.constant 13 : index
    %2069 = memref.load %arg5[%c13_745] : memref<32xf32, #tpu.memory_space<smem>>
    %cst_746 = arith.constant 0.000000e+00 : f32
    %2070 = vector.broadcast %cst_746 : f32 to vector<6x128xf32>
    %2071 = arith.maximumf %2068, %2070 : vector<6x128xf32>
    %2072 = vector.broadcast %2069 : f32 to vector<6x128xf32>
    %2073 = arith.mulf %2072, %2071 : vector<6x128xf32>
    %2074 = arith.addf %2062, %2073 : vector<6x128xf32>
    %c14_747 = arith.constant 14 : index
    %c0_748 = arith.constant 0 : index
    %2075 = vector.load %arg9[%c14_747, %c0_748] : memref<32x128xf32, #tpu.memory_space<vmem>>, vector<1x128xf32>
    %c59_749 = arith.constant 59 : index
    %2076 = memref.load %arg3[%c59_749] : memref<128xf32, #tpu.memory_space<smem>>
    %2077 = vector.broadcast %2076 : f32 to vector<6x128xf32>
    %2078 = arith.mulf %2077, %1903 : vector<6x128xf32>
    %2079 = vector.broadcast %2075 : vector<1x128xf32> to vector<6x128xf32>
    %2080 = arith.addf %2079, %2078 : vector<6x128xf32>
    %c14_750 = arith.constant 14 : index
    %2081 = memref.load %arg5[%c14_750] : memref<32xf32, #tpu.memory_space<smem>>
    %cst_751 = arith.constant 0.000000e+00 : f32
    %2082 = vector.broadcast %cst_751 : f32 to vector<6x128xf32>
    %2083 = arith.maximumf %2080, %2082 : vector<6x128xf32>
    %2084 = vector.broadcast %2081 : f32 to vector<6x128xf32>
    %2085 = arith.mulf %2084, %2083 : vector<6x128xf32>
    %2086 = arith.addf %2074, %2085 : vector<6x128xf32>
    %c15_752 = arith.constant 15 : index
    %c0_753 = arith.constant 0 : index
    %2087 = vector.load %arg9[%c15_752, %c0_753] : memref<32x128xf32, #tpu.memory_space<vmem>>, vector<1x128xf32>
    %c63_754 = arith.constant 63 : index
    %2088 = memref.load %arg3[%c63_754] : memref<128xf32, #tpu.memory_space<smem>>
    %2089 = vector.broadcast %2088 : f32 to vector<6x128xf32>
    %2090 = arith.mulf %2089, %1903 : vector<6x128xf32>
    %2091 = vector.broadcast %2087 : vector<1x128xf32> to vector<6x128xf32>
    %2092 = arith.addf %2091, %2090 : vector<6x128xf32>
    %c15_755 = arith.constant 15 : index
    %2093 = memref.load %arg5[%c15_755] : memref<32xf32, #tpu.memory_space<smem>>
    %cst_756 = arith.constant 0.000000e+00 : f32
    %2094 = vector.broadcast %cst_756 : f32 to vector<6x128xf32>
    %2095 = arith.maximumf %2092, %2094 : vector<6x128xf32>
    %2096 = vector.broadcast %2093 : f32 to vector<6x128xf32>
    %2097 = arith.mulf %2096, %2095 : vector<6x128xf32>
    %2098 = arith.addf %2086, %2097 : vector<6x128xf32>
    %c16_757 = arith.constant 16 : index
    %c0_758 = arith.constant 0 : index
    %2099 = vector.load %arg9[%c16_757, %c0_758] : memref<32x128xf32, #tpu.memory_space<vmem>>, vector<1x128xf32>
    %c67_759 = arith.constant 67 : index
    %2100 = memref.load %arg3[%c67_759] : memref<128xf32, #tpu.memory_space<smem>>
    %2101 = vector.broadcast %2100 : f32 to vector<6x128xf32>
    %2102 = arith.mulf %2101, %1903 : vector<6x128xf32>
    %2103 = vector.broadcast %2099 : vector<1x128xf32> to vector<6x128xf32>
    %2104 = arith.addf %2103, %2102 : vector<6x128xf32>
    %c16_760 = arith.constant 16 : index
    %2105 = memref.load %arg5[%c16_760] : memref<32xf32, #tpu.memory_space<smem>>
    %cst_761 = arith.constant 0.000000e+00 : f32
    %2106 = vector.broadcast %cst_761 : f32 to vector<6x128xf32>
    %2107 = arith.maximumf %2104, %2106 : vector<6x128xf32>
    %2108 = vector.broadcast %2105 : f32 to vector<6x128xf32>
    %2109 = arith.mulf %2108, %2107 : vector<6x128xf32>
    %2110 = arith.addf %2098, %2109 : vector<6x128xf32>
    %c17_762 = arith.constant 17 : index
    %c0_763 = arith.constant 0 : index
    %2111 = vector.load %arg9[%c17_762, %c0_763] : memref<32x128xf32, #tpu.memory_space<vmem>>, vector<1x128xf32>
    %c71_764 = arith.constant 71 : index
    %2112 = memref.load %arg3[%c71_764] : memref<128xf32, #tpu.memory_space<smem>>
    %2113 = vector.broadcast %2112 : f32 to vector<6x128xf32>
    %2114 = arith.mulf %2113, %1903 : vector<6x128xf32>
    %2115 = vector.broadcast %2111 : vector<1x128xf32> to vector<6x128xf32>
    %2116 = arith.addf %2115, %2114 : vector<6x128xf32>
    %c17_765 = arith.constant 17 : index
    %2117 = memref.load %arg5[%c17_765] : memref<32xf32, #tpu.memory_space<smem>>
    %cst_766 = arith.constant 0.000000e+00 : f32
    %2118 = vector.broadcast %cst_766 : f32 to vector<6x128xf32>
    %2119 = arith.maximumf %2116, %2118 : vector<6x128xf32>
    %2120 = vector.broadcast %2117 : f32 to vector<6x128xf32>
    %2121 = arith.mulf %2120, %2119 : vector<6x128xf32>
    %2122 = arith.addf %2110, %2121 : vector<6x128xf32>
    %c18_767 = arith.constant 18 : index
    %c0_768 = arith.constant 0 : index
    %2123 = vector.load %arg9[%c18_767, %c0_768] : memref<32x128xf32, #tpu.memory_space<vmem>>, vector<1x128xf32>
    %c75_769 = arith.constant 75 : index
    %2124 = memref.load %arg3[%c75_769] : memref<128xf32, #tpu.memory_space<smem>>
    %2125 = vector.broadcast %2124 : f32 to vector<6x128xf32>
    %2126 = arith.mulf %2125, %1903 : vector<6x128xf32>
    %2127 = vector.broadcast %2123 : vector<1x128xf32> to vector<6x128xf32>
    %2128 = arith.addf %2127, %2126 : vector<6x128xf32>
    %c18_770 = arith.constant 18 : index
    %2129 = memref.load %arg5[%c18_770] : memref<32xf32, #tpu.memory_space<smem>>
    %cst_771 = arith.constant 0.000000e+00 : f32
    %2130 = vector.broadcast %cst_771 : f32 to vector<6x128xf32>
    %2131 = arith.maximumf %2128, %2130 : vector<6x128xf32>
    %2132 = vector.broadcast %2129 : f32 to vector<6x128xf32>
    %2133 = arith.mulf %2132, %2131 : vector<6x128xf32>
    %2134 = arith.addf %2122, %2133 : vector<6x128xf32>
    %c19_772 = arith.constant 19 : index
    %c0_773 = arith.constant 0 : index
    %2135 = vector.load %arg9[%c19_772, %c0_773] : memref<32x128xf32, #tpu.memory_space<vmem>>, vector<1x128xf32>
    %c79_774 = arith.constant 79 : index
    %2136 = memref.load %arg3[%c79_774] : memref<128xf32, #tpu.memory_space<smem>>
    %2137 = vector.broadcast %2136 : f32 to vector<6x128xf32>
    %2138 = arith.mulf %2137, %1903 : vector<6x128xf32>
    %2139 = vector.broadcast %2135 : vector<1x128xf32> to vector<6x128xf32>
    %2140 = arith.addf %2139, %2138 : vector<6x128xf32>
    %c19_775 = arith.constant 19 : index
    %2141 = memref.load %arg5[%c19_775] : memref<32xf32, #tpu.memory_space<smem>>
    %cst_776 = arith.constant 0.000000e+00 : f32
    %2142 = vector.broadcast %cst_776 : f32 to vector<6x128xf32>
    %2143 = arith.maximumf %2140, %2142 : vector<6x128xf32>
    %2144 = vector.broadcast %2141 : f32 to vector<6x128xf32>
    %2145 = arith.mulf %2144, %2143 : vector<6x128xf32>
    %2146 = arith.addf %2134, %2145 : vector<6x128xf32>
    %c20_777 = arith.constant 20 : index
    %c0_778 = arith.constant 0 : index
    %2147 = vector.load %arg9[%c20_777, %c0_778] : memref<32x128xf32, #tpu.memory_space<vmem>>, vector<1x128xf32>
    %c83_779 = arith.constant 83 : index
    %2148 = memref.load %arg3[%c83_779] : memref<128xf32, #tpu.memory_space<smem>>
    %2149 = vector.broadcast %2148 : f32 to vector<6x128xf32>
    %2150 = arith.mulf %2149, %1903 : vector<6x128xf32>
    %2151 = vector.broadcast %2147 : vector<1x128xf32> to vector<6x128xf32>
    %2152 = arith.addf %2151, %2150 : vector<6x128xf32>
    %c20_780 = arith.constant 20 : index
    %2153 = memref.load %arg5[%c20_780] : memref<32xf32, #tpu.memory_space<smem>>
    %cst_781 = arith.constant 0.000000e+00 : f32
    %2154 = vector.broadcast %cst_781 : f32 to vector<6x128xf32>
    %2155 = arith.maximumf %2152, %2154 : vector<6x128xf32>
    %2156 = vector.broadcast %2153 : f32 to vector<6x128xf32>
    %2157 = arith.mulf %2156, %2155 : vector<6x128xf32>
    %2158 = arith.addf %2146, %2157 : vector<6x128xf32>
    %c21_782 = arith.constant 21 : index
    %c0_783 = arith.constant 0 : index
    %2159 = vector.load %arg9[%c21_782, %c0_783] : memref<32x128xf32, #tpu.memory_space<vmem>>, vector<1x128xf32>
    %c87_784 = arith.constant 87 : index
    %2160 = memref.load %arg3[%c87_784] : memref<128xf32, #tpu.memory_space<smem>>
    %2161 = vector.broadcast %2160 : f32 to vector<6x128xf32>
    %2162 = arith.mulf %2161, %1903 : vector<6x128xf32>
    %2163 = vector.broadcast %2159 : vector<1x128xf32> to vector<6x128xf32>
    %2164 = arith.addf %2163, %2162 : vector<6x128xf32>
    %c21_785 = arith.constant 21 : index
    %2165 = memref.load %arg5[%c21_785] : memref<32xf32, #tpu.memory_space<smem>>
    %cst_786 = arith.constant 0.000000e+00 : f32
    %2166 = vector.broadcast %cst_786 : f32 to vector<6x128xf32>
    %2167 = arith.maximumf %2164, %2166 : vector<6x128xf32>
    %2168 = vector.broadcast %2165 : f32 to vector<6x128xf32>
    %2169 = arith.mulf %2168, %2167 : vector<6x128xf32>
    %2170 = arith.addf %2158, %2169 : vector<6x128xf32>
    %c22_787 = arith.constant 22 : index
    %c0_788 = arith.constant 0 : index
    %2171 = vector.load %arg9[%c22_787, %c0_788] : memref<32x128xf32, #tpu.memory_space<vmem>>, vector<1x128xf32>
    %c91_789 = arith.constant 91 : index
    %2172 = memref.load %arg3[%c91_789] : memref<128xf32, #tpu.memory_space<smem>>
    %2173 = vector.broadcast %2172 : f32 to vector<6x128xf32>
    %2174 = arith.mulf %2173, %1903 : vector<6x128xf32>
    %2175 = vector.broadcast %2171 : vector<1x128xf32> to vector<6x128xf32>
    %2176 = arith.addf %2175, %2174 : vector<6x128xf32>
    %c22_790 = arith.constant 22 : index
    %2177 = memref.load %arg5[%c22_790] : memref<32xf32, #tpu.memory_space<smem>>
    %cst_791 = arith.constant 0.000000e+00 : f32
    %2178 = vector.broadcast %cst_791 : f32 to vector<6x128xf32>
    %2179 = arith.maximumf %2176, %2178 : vector<6x128xf32>
    %2180 = vector.broadcast %2177 : f32 to vector<6x128xf32>
    %2181 = arith.mulf %2180, %2179 : vector<6x128xf32>
    %2182 = arith.addf %2170, %2181 : vector<6x128xf32>
    %c23_792 = arith.constant 23 : index
    %c0_793 = arith.constant 0 : index
    %2183 = vector.load %arg9[%c23_792, %c0_793] : memref<32x128xf32, #tpu.memory_space<vmem>>, vector<1x128xf32>
    %c95_794 = arith.constant 95 : index
    %2184 = memref.load %arg3[%c95_794] : memref<128xf32, #tpu.memory_space<smem>>
    %2185 = vector.broadcast %2184 : f32 to vector<6x128xf32>
    %2186 = arith.mulf %2185, %1903 : vector<6x128xf32>
    %2187 = vector.broadcast %2183 : vector<1x128xf32> to vector<6x128xf32>
    %2188 = arith.addf %2187, %2186 : vector<6x128xf32>
    %c23_795 = arith.constant 23 : index
    %2189 = memref.load %arg5[%c23_795] : memref<32xf32, #tpu.memory_space<smem>>
    %cst_796 = arith.constant 0.000000e+00 : f32
    %2190 = vector.broadcast %cst_796 : f32 to vector<6x128xf32>
    %2191 = arith.maximumf %2188, %2190 : vector<6x128xf32>
    %2192 = vector.broadcast %2189 : f32 to vector<6x128xf32>
    %2193 = arith.mulf %2192, %2191 : vector<6x128xf32>
    %2194 = arith.addf %2182, %2193 : vector<6x128xf32>
    %c24_797 = arith.constant 24 : index
    %c0_798 = arith.constant 0 : index
    %2195 = vector.load %arg9[%c24_797, %c0_798] : memref<32x128xf32, #tpu.memory_space<vmem>>, vector<1x128xf32>
    %c99_799 = arith.constant 99 : index
    %2196 = memref.load %arg3[%c99_799] : memref<128xf32, #tpu.memory_space<smem>>
    %2197 = vector.broadcast %2196 : f32 to vector<6x128xf32>
    %2198 = arith.mulf %2197, %1903 : vector<6x128xf32>
    %2199 = vector.broadcast %2195 : vector<1x128xf32> to vector<6x128xf32>
    %2200 = arith.addf %2199, %2198 : vector<6x128xf32>
    %c24_800 = arith.constant 24 : index
    %2201 = memref.load %arg5[%c24_800] : memref<32xf32, #tpu.memory_space<smem>>
    %cst_801 = arith.constant 0.000000e+00 : f32
    %2202 = vector.broadcast %cst_801 : f32 to vector<6x128xf32>
    %2203 = arith.maximumf %2200, %2202 : vector<6x128xf32>
    %2204 = vector.broadcast %2201 : f32 to vector<6x128xf32>
    %2205 = arith.mulf %2204, %2203 : vector<6x128xf32>
    %2206 = arith.addf %2194, %2205 : vector<6x128xf32>
    %c25_802 = arith.constant 25 : index
    %c0_803 = arith.constant 0 : index
    %2207 = vector.load %arg9[%c25_802, %c0_803] : memref<32x128xf32, #tpu.memory_space<vmem>>, vector<1x128xf32>
    %c103_804 = arith.constant 103 : index
    %2208 = memref.load %arg3[%c103_804] : memref<128xf32, #tpu.memory_space<smem>>
    %2209 = vector.broadcast %2208 : f32 to vector<6x128xf32>
    %2210 = arith.mulf %2209, %1903 : vector<6x128xf32>
    %2211 = vector.broadcast %2207 : vector<1x128xf32> to vector<6x128xf32>
    %2212 = arith.addf %2211, %2210 : vector<6x128xf32>
    %c25_805 = arith.constant 25 : index
    %2213 = memref.load %arg5[%c25_805] : memref<32xf32, #tpu.memory_space<smem>>
    %cst_806 = arith.constant 0.000000e+00 : f32
    %2214 = vector.broadcast %cst_806 : f32 to vector<6x128xf32>
    %2215 = arith.maximumf %2212, %2214 : vector<6x128xf32>
    %2216 = vector.broadcast %2213 : f32 to vector<6x128xf32>
    %2217 = arith.mulf %2216, %2215 : vector<6x128xf32>
    %2218 = arith.addf %2206, %2217 : vector<6x128xf32>
    %c26_807 = arith.constant 26 : index
    %c0_808 = arith.constant 0 : index
    %2219 = vector.load %arg9[%c26_807, %c0_808] : memref<32x128xf32, #tpu.memory_space<vmem>>, vector<1x128xf32>
    %c107_809 = arith.constant 107 : index
    %2220 = memref.load %arg3[%c107_809] : memref<128xf32, #tpu.memory_space<smem>>
    %2221 = vector.broadcast %2220 : f32 to vector<6x128xf32>
    %2222 = arith.mulf %2221, %1903 : vector<6x128xf32>
    %2223 = vector.broadcast %2219 : vector<1x128xf32> to vector<6x128xf32>
    %2224 = arith.addf %2223, %2222 : vector<6x128xf32>
    %c26_810 = arith.constant 26 : index
    %2225 = memref.load %arg5[%c26_810] : memref<32xf32, #tpu.memory_space<smem>>
    %cst_811 = arith.constant 0.000000e+00 : f32
    %2226 = vector.broadcast %cst_811 : f32 to vector<6x128xf32>
    %2227 = arith.maximumf %2224, %2226 : vector<6x128xf32>
    %2228 = vector.broadcast %2225 : f32 to vector<6x128xf32>
    %2229 = arith.mulf %2228, %2227 : vector<6x128xf32>
    %2230 = arith.addf %2218, %2229 : vector<6x128xf32>
    %c27_812 = arith.constant 27 : index
    %c0_813 = arith.constant 0 : index
    %2231 = vector.load %arg9[%c27_812, %c0_813] : memref<32x128xf32, #tpu.memory_space<vmem>>, vector<1x128xf32>
    %c111_814 = arith.constant 111 : index
    %2232 = memref.load %arg3[%c111_814] : memref<128xf32, #tpu.memory_space<smem>>
    %2233 = vector.broadcast %2232 : f32 to vector<6x128xf32>
    %2234 = arith.mulf %2233, %1903 : vector<6x128xf32>
    %2235 = vector.broadcast %2231 : vector<1x128xf32> to vector<6x128xf32>
    %2236 = arith.addf %2235, %2234 : vector<6x128xf32>
    %c27_815 = arith.constant 27 : index
    %2237 = memref.load %arg5[%c27_815] : memref<32xf32, #tpu.memory_space<smem>>
    %cst_816 = arith.constant 0.000000e+00 : f32
    %2238 = vector.broadcast %cst_816 : f32 to vector<6x128xf32>
    %2239 = arith.maximumf %2236, %2238 : vector<6x128xf32>
    %2240 = vector.broadcast %2237 : f32 to vector<6x128xf32>
    %2241 = arith.mulf %2240, %2239 : vector<6x128xf32>
    %2242 = arith.addf %2230, %2241 : vector<6x128xf32>
    %c28_817 = arith.constant 28 : index
    %c0_818 = arith.constant 0 : index
    %2243 = vector.load %arg9[%c28_817, %c0_818] : memref<32x128xf32, #tpu.memory_space<vmem>>, vector<1x128xf32>
    %c115_819 = arith.constant 115 : index
    %2244 = memref.load %arg3[%c115_819] : memref<128xf32, #tpu.memory_space<smem>>
    %2245 = vector.broadcast %2244 : f32 to vector<6x128xf32>
    %2246 = arith.mulf %2245, %1903 : vector<6x128xf32>
    %2247 = vector.broadcast %2243 : vector<1x128xf32> to vector<6x128xf32>
    %2248 = arith.addf %2247, %2246 : vector<6x128xf32>
    %c28_820 = arith.constant 28 : index
    %2249 = memref.load %arg5[%c28_820] : memref<32xf32, #tpu.memory_space<smem>>
    %cst_821 = arith.constant 0.000000e+00 : f32
    %2250 = vector.broadcast %cst_821 : f32 to vector<6x128xf32>
    %2251 = arith.maximumf %2248, %2250 : vector<6x128xf32>
    %2252 = vector.broadcast %2249 : f32 to vector<6x128xf32>
    %2253 = arith.mulf %2252, %2251 : vector<6x128xf32>
    %2254 = arith.addf %2242, %2253 : vector<6x128xf32>
    %c29_822 = arith.constant 29 : index
    %c0_823 = arith.constant 0 : index
    %2255 = vector.load %arg9[%c29_822, %c0_823] : memref<32x128xf32, #tpu.memory_space<vmem>>, vector<1x128xf32>
    %c119_824 = arith.constant 119 : index
    %2256 = memref.load %arg3[%c119_824] : memref<128xf32, #tpu.memory_space<smem>>
    %2257 = vector.broadcast %2256 : f32 to vector<6x128xf32>
    %2258 = arith.mulf %2257, %1903 : vector<6x128xf32>
    %2259 = vector.broadcast %2255 : vector<1x128xf32> to vector<6x128xf32>
    %2260 = arith.addf %2259, %2258 : vector<6x128xf32>
    %c29_825 = arith.constant 29 : index
    %2261 = memref.load %arg5[%c29_825] : memref<32xf32, #tpu.memory_space<smem>>
    %cst_826 = arith.constant 0.000000e+00 : f32
    %2262 = vector.broadcast %cst_826 : f32 to vector<6x128xf32>
    %2263 = arith.maximumf %2260, %2262 : vector<6x128xf32>
    %2264 = vector.broadcast %2261 : f32 to vector<6x128xf32>
    %2265 = arith.mulf %2264, %2263 : vector<6x128xf32>
    %2266 = arith.addf %2254, %2265 : vector<6x128xf32>
    %c30_827 = arith.constant 30 : index
    %c0_828 = arith.constant 0 : index
    %2267 = vector.load %arg9[%c30_827, %c0_828] : memref<32x128xf32, #tpu.memory_space<vmem>>, vector<1x128xf32>
    %c123_829 = arith.constant 123 : index
    %2268 = memref.load %arg3[%c123_829] : memref<128xf32, #tpu.memory_space<smem>>
    %2269 = vector.broadcast %2268 : f32 to vector<6x128xf32>
    %2270 = arith.mulf %2269, %1903 : vector<6x128xf32>
    %2271 = vector.broadcast %2267 : vector<1x128xf32> to vector<6x128xf32>
    %2272 = arith.addf %2271, %2270 : vector<6x128xf32>
    %c30_830 = arith.constant 30 : index
    %2273 = memref.load %arg5[%c30_830] : memref<32xf32, #tpu.memory_space<smem>>
    %cst_831 = arith.constant 0.000000e+00 : f32
    %2274 = vector.broadcast %cst_831 : f32 to vector<6x128xf32>
    %2275 = arith.maximumf %2272, %2274 : vector<6x128xf32>
    %2276 = vector.broadcast %2273 : f32 to vector<6x128xf32>
    %2277 = arith.mulf %2276, %2275 : vector<6x128xf32>
    %2278 = arith.addf %2266, %2277 : vector<6x128xf32>
    %c31_832 = arith.constant 31 : index
    %c0_833 = arith.constant 0 : index
    %2279 = vector.load %arg9[%c31_832, %c0_833] : memref<32x128xf32, #tpu.memory_space<vmem>>, vector<1x128xf32>
    %c127_834 = arith.constant 127 : index
    %2280 = memref.load %arg3[%c127_834] : memref<128xf32, #tpu.memory_space<smem>>
    %2281 = vector.broadcast %2280 : f32 to vector<6x128xf32>
    %2282 = arith.mulf %2281, %1903 : vector<6x128xf32>
    %2283 = vector.broadcast %2279 : vector<1x128xf32> to vector<6x128xf32>
    %2284 = arith.addf %2283, %2282 : vector<6x128xf32>
    %c31_835 = arith.constant 31 : index
    %2285 = memref.load %arg5[%c31_835] : memref<32xf32, #tpu.memory_space<smem>>
    %cst_836 = arith.constant 0.000000e+00 : f32
    %2286 = vector.broadcast %cst_836 : f32 to vector<6x128xf32>
    %2287 = arith.maximumf %2284, %2286 : vector<6x128xf32>
    %2288 = vector.broadcast %2285 : f32 to vector<6x128xf32>
    %2289 = arith.mulf %2288, %2287 : vector<6x128xf32>
    %2290 = arith.addf %2278, %2289 : vector<6x128xf32>
    %c3_837 = arith.constant 3 : index
    %c0_838 = arith.constant 0 : index
    %c0_839 = arith.constant 0 : index
    %2291 = vector.load %arg7[%c3_837, %c0_838, %c0_839] : memref<4x6x128xf32, #tpu.memory_space<vmem>>, vector<1x6x128xf32>
    %2292 = vector.shape_cast %2291 : vector<1x6x128xf32> to vector<6x128xf32>
    %2293 = vector.shape_cast %2290 : vector<6x128xf32> to vector<1x6x128xf32>
    tpu.vector_store %arg7[%c3_837, %c0_838, %c0_839], %2293 {strides = array<i32>} : memref<4x6x128xf32, #tpu.memory_space<vmem>>, vector<1x6x128xf32>,
    return
  }
  func.func @transform_0(%arg0: i32) -> (i32, i32, i32) {
    %c0_i32 = arith.constant 0 : i32
    %c0_i32_0 = arith.constant 0 : i32
    %c0_i32_1 = arith.constant 0 : i32
    return %c0_i32, %c0_i32_0, %arg0 : i32, i32, i32
  }
  func.func @transform_1(%arg0: i32) -> (i32, i32) {
    %c0_i32 = arith.constant 0 : i32
    %c0_i32_0 = arith.constant 0 : i32
    return %c0_i32, %arg0 : i32, i32
  }
  func.func @transform_2(%arg0: i32) -> i32 {
    %c0_i32 = arith.constant 0 : i32
    %c0_i32_0 = arith.constant 0 : i32
    return %c0_i32 : i32
  }
  func.func @transform_3(%arg0: i32) -> i32 {
    %c0_i32 = arith.constant 0 : i32
    %c0_i32_0 = arith.constant 0 : i32
    return %c0_i32 : i32
  }
  func.func @transform_4(%arg0: i32) -> i32 {
    %c0_i32 = arith.constant 0 : i32
    %c0_i32_0 = arith.constant 0 : i32
    return %c0_i32 : i32
  }
  func.func @transform_5(%arg0: i32) -> i32 {
    %c0_i32 = arith.constant 0 : i32
    %c0_i32_0 = arith.constant 0 : i32
    return %c0_i32 : i32
  }
  func.func @transform_6(%arg0: i32) -> (i32, i32, i32) {
    %c0_i32 = arith.constant 0 : i32
    %c0_i32_0 = arith.constant 0 : i32
    %c0_i32_1 = arith.constant 0 : i32
    return %c0_i32, %c0_i32_0, %arg0 : i32, i32, i32
  }
}

</mosaic_0001>

<bundles_post_ra>
// kernel: tpu_custom_call.1
= control target key start
LH: loop header
LB: loop body
LE: loop exit
PB: predicated region body
PF: predicated region fallthrough
CT: control target
= control target key end

     0   :  { %s4520_s0 = inlined_call_operand.vmem [shape: f32[4,6,128], index: 0, kind: input, shape index: {}]   ;;  %s4521_s1 = inlined_call_operand.vmem [shape: s32[4,128], index: 1, kind: input, shape index: {}]   ;;  %s4522_s2 = inlined_call_operand.vmem [shape: f32[128], index: 2, kind: input, shape index: {}]   ;;  %s4523_s3 = inlined_call_operand.vmem [shape: f32[32], index: 3, kind: input, shape index: {}]   ;;  %s4524_s4 = inlined_call_operand.vmem [shape: f32[32], index: 4, kind: input, shape index: {}]   ;;  %s4525_s5 = inlined_call_operand.<no memory space> [shape: f32[1], index: 5, kind: input, shape index: {}]   ;;  %s4526_s6 = inlined_call_operand.vmem [shape: f32[4,6,128], index: 6, kind: output, shape index: {}]  }
   0x1   :  { %4551 = sst [smem:[#allocation22_spill]] %s4526_s6 }
   0x2   :  { %12 = vsyncpa [#allocation6], 0 }
   0x3   :  { %13 = vsyncpa [#allocation8], 0  ;;  %s32_s23 = sshll.u32 %s4523_s3, 4  ;;  %s23_s26 = sshll.u32 %s4522_s2, 4  ;;  %s33_s23 = int_to_ptr.vmem [resolvable:$true] %s32_s23  ;;  %s24_s26 = int_to_ptr.vmem [resolvable:$true] %s23_s26 }
   0x4   :  { %s2795_s27 = smov [#allocation7]   ;;  %s2796_s28 = smov [#allocation5]  }
   0x5   :  { %35 = dma.vmem_to_smem %s33_s23, 16, %s2795_s27, [#allocation8]  }
   0x6   :  { %26 = dma.vmem_to_smem %s24_s26, 16, %s2796_s28, [#allocation6]  }
   0x7   :  { %s41_s7 = sshll.u32 %s4524_s4, 4  ;;  %s2797_s8 = smov [#allocation9]   ;;  %s42_s7 = int_to_ptr.vmem [resolvable:$true] %s41_s7 }
   0x8   :  { %44 = dma.vmem_to_smem %s42_s7, 16, %s2797_s8, [#allocation8]  }
   0x9   :  { %2791 = dma.done.wait [#allocation6], 16  }
   0xa   :  { %2792 = vsyncadd [#allocation6], 4294967280 }
   0xb   :  { %2793 = dma.done.wait [#allocation8], 32  }
   0xc   :  { %2794 = vsyncadd [#allocation8], 4294967264 }
   0xd   :  { %59 = sfence }
   0xe   :  { %v60_v0 = vlaneseq  ;;  %v2619_v1 = vld [vmem:[%s4521_s1] ss:$0 sm:$0xff]  ;;  %v2198_v3 = vld [vmem:[%s4520_s0 + $0x8] sm:$0x3f]  ;;  %v2621_v5 = vld [vmem:[%s4521_s1 + $0x1] ss:$0 sm:$0xff] }
   0xf   :  { %v62_v2 = vld [vmem:[%s4520_s0] sm:$0x3f]  ;;  %vm67_vm0 = vcmask 1045504   ;;  %v2199_v6 = vld [vmem:[%s4520_s0 + $0x10] sm:$0x3f]  ;;  %s2868_s22 = sld [smem:[#allocation7]] }
  0x10   :  { %v61_v4 = vshrl.u32 %v60_v0, 7  ;;  %v2623_v7 = vld [vmem:[%s4521_s1 + $0x2] ss:$0 sm:$0xff]  ;;  %v2200_v8 = vld [vmem:[%s4520_s0 + $0x18] sm:$0x3f]  ;;  %s2870_s23 = sld [smem:[#allocation5]] }
  0x11   :  { %v2625_v11 = vld [vmem:[%s4521_s1 + $0x3] ss:$0 sm:$0xff]  ;;  %s2873_s24 = sld [smem:[#allocation5 + $0x1]] }
  0x12   :  { %vm65_vm1 = vcmp.eq.s32.totalorder %v61_v4, %v2619_v1  ;;  %vm80_vm2 = vcmp.eq.s32.totalorder %v61_v4, %v2621_v5  ;;  %vm94_vm3 = vcmp.eq.s32.totalorder %v61_v4, %v2623_v7  ;;  %vm108_vm4 = vcmp.eq.s32.totalorder %v61_v4, %v2625_v11  ;;  %s2876_s1 = sld [smem:[#allocation5 + $0x2]]  ;;  %v759_v62 = vld [vmem:[%s4520_s0] sm:$0x3f]  ;;  %v2421_v1 = vld [vmem:[%s4520_s0 + $0x8] sm:$0x3f] }
  0x13   :  { %v66_v9 = vsel %vm65_vm1, %v62_v2, 0.0  ;;  %v81_v10 = vsel %vm80_vm2, %v2198_v3, 0.0  ;;  %v95_v16 = vsel %vm94_vm3, %v2199_v6, 0.0  ;;  %v109_v18 = vsel %vm108_vm4, %v2200_v8, 0.0  ;;  %s2878_s25 = sld [smem:[#allocation5 + $0x3]] }
  0x14   :  { %v68_v12 = vsel %vm67_vm0, %v66_v9, 0.0  ;;  %v82_v13 = vsel %vm67_vm0, %v81_v10, 0.0  ;;  %v96_v17 = vsel %vm67_vm0, %v95_v16, 0.0  ;;  %v110_v22 = vsel %vm67_vm0, %v109_v18, 0.0  ;;  %s2880_s26 = sld [smem:[#allocation9]] }
  0x15   :  { %v69_v14 = vrot.slane %v68_v12, 4  ;;  %v83_v15 = vrot.slane %v82_v13, 4  ;;  %v97_v21 = vrot.slane %v96_v17, 4  ;;  %v111_v23 = vrot.slane %v110_v22, 4  ;;  %s2882_s27 = sld [smem:[#allocation7 + $0x1]] }
  0x16   :  { %s2884_s28 = sld [smem:[#allocation5 + $0x4]]  ;;  %v122_v36 = vstv %s2870_s23  ;;  %v119_v42 = vstv %s2868_s22  ;;  %v2486_v2 = vld [vmem:[%s4520_s0 + $0x10] sm:$0x3f]  ;;  %v2551_v7 = vld [vmem:[%s4520_s0 + $0x18] sm:$0x3f] }
  0x17   :  { %v70_v19 = vadd.f32 %v69_v14, %v68_v12  ;;  %v84_v20 = vadd.f32 %v83_v15, %v82_v13  ;;  %v98_v26 = vadd.f32 %v97_v21, %v96_v17  ;;  %v112_v27 = vadd.f32 %v111_v23, %v110_v22  ;;  %s2886_s29 = sld [smem:[#allocation5 + $0x5]] }
  0x18   :  { %s2888_s30 = sld [smem:[#allocation5 + $0x6]]  ;;  %v126_v37 = vstv %s2873_s24  ;;  %v130_v43 = vstv %s2876_s1  ;;  %v2986_v23 = vstv %s4525_s5 }
  0x19   :  { %v71_v24 = vrot.slane %v70_v19, 2  ;;  %v85_v25 = vrot.slane %v84_v20, 2  ;;  %v99_v30 = vrot.slane %v98_v26, 2  ;;  %v113_v31 = vrot.slane %v112_v27, 2  ;;  %s2892_s7 = sld [smem:[#allocation5 + $0x7]] }
  0x1a   :  { %s2898_s8 = sld [smem:[#allocation9 + $0x1]]  ;;  %v134_v50 = vstv %s2878_s25 }
  0x1b   :  { %v72_v28 = vadd.f32 %v71_v24, %v70_v19  ;;  %v86_v29 = vadd.f32 %v85_v25, %v84_v20  ;;  %v100_v34 = vadd.f32 %v99_v30, %v98_v26  ;;  %v114_v35 = vadd.f32 %v113_v31, %v112_v27  ;;  %s2903_s3 = sld [smem:[#allocation7 + $0x2]] }
  0x1c   :  { %v139_v44 = vstv %s2882_s27  ;;  %v142_v48 = vstv %s2884_s28  ;;  %s2915_s2 = sld [smem:[#allocation5 + $0x8]]  ;;  %v2994_v27 = vstv %s2880_s26 }
  0x1d   :  { %v73_v32 = vrot.slane %v72_v28, 1  ;;  %v87_v33 = vrot.slane %v86_v29, 1  ;;  %v101_v40 = vrot.slane %v100_v34, 1  ;;  %v115_v41 = vrot.slane %v114_v35, 1  ;;  %s2925_s9 = sld [smem:[#allocation5 + $0x9]] }
  0x1e   :  { %v146_v52 = vstv %s2886_s29  ;;  %v150_v56 = vstv %s2888_s30  ;;  %s2933_s10 = sld [smem:[#allocation5 + $0xa]] }
  0x1f   :  { %v2894_v38 = vadd.f32 %v73_v32, %v72_v28  ;;  %v2896_v39 = vadd.f32 %v87_v33, %v86_v29  ;;  %v2906_v45 = vadd.f32 %v101_v40, %v100_v34  ;;  %v2918_v49 = vadd.f32 %v115_v41, %v114_v35  ;;  %s2938_s11 = sld [smem:[#allocation5 + $0xb]] }
  0x20   :  { %v154_v59 = vstv %s2892_s7  ;;  %s2943_s12 = sld [smem:[#allocation9 + $0x2]]  ;;  %v2997_v28 = vstv %s2898_s8 }
  0x21   :  { %75 = vst [vmem:[#allocation2] sm:$0x1] %v2894_v38  ;;  %v123_v46 = vmul.f32 %v122_v36, %v2894_v38  ;;  %v127_v47 = vmul.f32 %v126_v37, %v2896_v39  ;;  %v143_v51 = vmul.f32 %v142_v48, %v2894_v38  ;;  %v131_v54 = vmul.f32 %v130_v43, %v2906_v45  ;;  %s2951_s14 = sld [smem:[#allocation7 + $0x3]] }
  0x22   :  { %89 = vst [vmem:[#allocation2 + $0x1] sm:$0x1] %v2896_v39  ;;  %v147_v55 = vmul.f32 %v146_v52, %v2896_v39  ;;  %v151_v58 = vmul.f32 %v150_v56, %v2906_v45  ;;  %v135_v61 = vmul.f32 %v134_v50, %v2918_v49  ;;  %v155_v0 = vmul.f32 %v154_v59, %v2918_v49  ;;  %s2961_s19 = sld [smem:[#allocation5 + $0xc]] }
  0x23   :  { %103 = vst [vmem:[#allocation2 + $0x2] sm:$0x1] %v2906_v45  ;;  %v124_v53 = vadd.f32 %v123_v46, %v119_v42  ;;  %v144_v57 = vadd.f32 %v143_v51, %v139_v44  ;;  %v159_v4 = vstv %s2903_s3  ;;  %v162_v5 = vstv %s2915_s2  ;;  %s2968_s22 = sld [smem:[#allocation5 + $0xd]] }
  0x24   :  { %117 = vst [vmem:[#allocation2 + $0x3] sm:$0x1] %v2918_v49  ;;  %v163_v9 = vmul.f32 %v162_v5, %v2894_v38  ;;  %v166_v10 = vstv %s2925_s9  ;;  %v170_v14 = vstv %s2933_s10  ;;  %s2972_s27 = sld [smem:[#allocation5 + $0xe]] }
  0x25   :  { %v128_v60 = vadd.f32 %v127_v47, %v124_v53  ;;  %v148_v63 = vadd.f32 %v147_v55, %v144_v57  ;;  %v167_v13 = vmul.f32 %v166_v10, %v2896_v39  ;;  %s2976_s0 = sld [smem:[#allocation5 + $0xf]]  ;;  %v171_v21 = vmul.f32 %v170_v14, %v2906_v45 }
  0x26   :  { %v164_v18 = vadd.f32 %v163_v9, %v159_v4  ;;  %v174_v25 = vstv %s2938_s11  ;;  %s2989_s3 = sld [smem:[#allocation9 + $0x3]]  ;;  %v3000_v29 = vstv %s2943_s12 }
  0x27   :  { %v132_v3 = vadd.f32 %v131_v54, %v128_v60  ;;  %v152_v8 = vadd.f32 %v151_v58, %v148_v63  ;;  %s3002_s2 = sld [smem:[#allocation7 + $0x4]]  ;;  %v175_v40 = vmul.f32 %v174_v25, %v2918_v49  ;;  %v179_v42 = vstv %s2951_s14 }
  0x28   :  { %v2620_v6 = vld [vmem:[#allocation2] ss:$0 sm:$0xff]  ;;  %v168_v24 = vadd.f32 %v167_v13, %v164_v18  ;;  %s3014_s5 = sld [smem:[#allocation5 + $0x10]]  ;;  %v182_v44 = vstv %s2961_s19 }
  0x29   :  { %v2622_v11 = vld [vmem:[#allocation2 + $0x1] ss:$0 sm:$0xff]  ;;  %v136_v12 = vadd.f32 %v135_v61, %v132_v3  ;;  %v2974_v15 = vsub.f32 %v759_v62, %v2620_v6  ;;  %v156_v17 = vadd.f32 %v155_v0, %v152_v8  ;;  %s3021_s23 = sld [smem:[#allocation5 + $0x11]]  ;;  %v186_v46 = vstv %s2968_s22 }
  0x2a   :  { %v2624_v16 = vld [vmem:[#allocation2 + $0x2] ss:$0 sm:$0xff]  ;;  %v2978_v19 = vsub.f32 %v2421_v1, %v2622_v11  ;;  %s3031_s24 = sld [smem:[#allocation5 + $0x12]]  ;;  %v190_v47 = vstv %s2972_s27  ;;  %v187_v54 = vmul.f32 %v186_v46, %v2896_v39 }
  0x2b   :  { %v2626_v20 = vld [vmem:[#allocation2 + $0x3] ss:$0 sm:$0xff]  ;;  %137 = vst [vmem:[#allocation3] sm:$0x1] %v136_v12  ;;  %v2981_v22 = vsub.f32 %v2486_v2, %v2624_v16  ;;  %v768_v30 = vmul.f32 %v2974_v15, %v122_v36  ;;  %v779_v32 = vmul.f32 %v2974_v15, %v142_v48  ;;  %v172_v36 = vadd.f32 %v171_v21, %v168_v24  ;;  %s3039_s1 = sld [smem:[#allocation5 + $0x13]] }
  0x2c   :  { %157 = vst [vmem:[#allocation3 + $0x1] sm:$0x1] %v156_v17  ;;  %v2991_v26 = vsub.f32 %v2551_v7, %v2626_v20  ;;  %v1125_v31 = vmul.f32 %v2978_v19, %v126_v37  ;;  %v1136_v33 = vmul.f32 %v2978_v19, %v146_v52  ;;  %v3027_v41 = vmul.f32 %v2974_v15, %v162_v5  ;;  %s3070_s25 = sld [smem:[#allocation9 + $0x4]] }
  0x2d   :  { %v1483_v34 = vmul.f32 %v2981_v22, %v130_v43  ;;  %v1494_v35 = vmul.f32 %v2981_v22, %v150_v56  ;;  %v183_v43 = vmul.f32 %v182_v44, %v2894_v38  ;;  %v194_v48 = vstv %s2976_s0  ;;  %s3074_s26 = sld [smem:[#allocation7 + $0x5]] }
  0x2e   :  { %4552 = vst [vmem:[#allocation12_spill] sm:$0xff] %v2991_v26  ;;  %v1841_v37 = vmul.f32 %v2991_v26, %v134_v50  ;;  %v1852_v51 = vmul.f32 %v2991_v26, %v154_v59  ;;  %v3045_v52 = vmul.f32 %v2978_v19, %v166_v10  ;;  %v3048_v53 = vmul.f32 %v2981_v22, %v170_v14  ;;  %s3078_s28 = sld [smem:[#allocation5 + $0x14]] }
  0x2f   :  { %v176_v57 = vadd.f32 %v175_v40, %v172_v36  ;;  %v3054_v58 = vmul.f32 %v2991_v26, %v174_v25  ;;  %v184_v60 = vadd.f32 %v183_v43, %v179_v42  ;;  %v191_v59 = vmul.f32 %v190_v47, %v2906_v45  ;;  %s3084_s7 = sld [smem:[#allocation5 + $0x15]] }
  0x30   :  { %v195_v63 = vmul.f32 %v194_v48, %v2918_v49  ;;  %v199_v0 = vstv %s3002_s2  ;;  %v202_v1 = vstv %s3014_s5  ;;  %v206_v11 = vstv %s3021_s23  ;;  %s3088_s8 = sld [smem:[#allocation5 + $0x16]] }
  0x31   :  { %v188_v6 = vadd.f32 %v187_v54, %v184_v60  ;;  %v203_v7 = vmul.f32 %v202_v1, %v2894_v38  ;;  %v210_v12 = vstv %s3031_s24  ;;  %177 = vst [vmem:[#allocation3 + $0x2] sm:$0x1] %v176_v57  ;;  %s3093_s9 = sld [smem:[#allocation5 + $0x17]] }
  0x32   :  { %v2627_v50 = vld [vmem:[#allocation3] ss:$0 sm:$0xff]  ;;  %s3100_s10 = sld [smem:[#allocation9 + $0x5]] }
  0x33   :  { %v2628_v55 = vld [vmem:[#allocation3] ss:$0 sm:$0xff]  ;;  %v770_v61 = vadd.f32 %v2627_v50, %v768_v30  ;;  %v2631_v4 = vld [vmem:[#allocation3 + $0x1] ss:$0 sm:$0xff]  ;;  %v192_v25 = vadd.f32 %v191_v59, %v188_v6  ;;  %v204_v60 = vadd.f32 %v203_v7, %v199_v0  ;;  %v207_v59 = vmul.f32 %v206_v11, %v2896_v39  ;;  %s3123_s11 = sld [smem:[#allocation7 + $0x6]] }
  0x34   :  { %v2629_v56 = vld [vmem:[#allocation3] ss:$0 sm:$0xff]  ;;  %v1127_v2 = vadd.f32 %v2628_v55, %v1125_v31  ;;  %v2632_v5 = vld [vmem:[#allocation3 + $0x1] ss:$0 sm:$0xff]  ;;  %v781_v16 = vadd.f32 %v2631_v4, %v779_v32  ;;  %s3131_s12 = sld [smem:[#allocation5 + $0x18]] }
  0x35   :  { %v2630_v62 = vld [vmem:[#allocation3] ss:$0 sm:$0xff]  ;;  %v1485_v3 = vadd.f32 %v2629_v56, %v1483_v34  ;;  %v772_v8 = vmax.f32 %v770_v61, 0.0  ;;  %v2633_v10 = vld [vmem:[#allocation3 + $0x1] ss:$0 sm:$0xff]  ;;  %v1138_v17 = vadd.f32 %v2632_v5, %v1136_v33  ;;  %v196_v55 = vadd.f32 %v195_v63, %v192_v25  ;;  %s3137_s4 = sld [smem:[#allocation5 + $0x19]] }
  0x36   :  { %v1843_v9 = vadd.f32 %v2630_v62, %v1841_v37  ;;  %v1129_v13 = vmax.f32 %v1127_v2, 0.0  ;;  %v2634_v18 = vld [vmem:[#allocation3 + $0x1] ss:$0 sm:$0xff]  ;;  %v1496_v24 = vadd.f32 %v2633_v10, %v1494_v35  ;;  %v783_v34 = vmax.f32 %v781_v16, 0.0  ;;  %s3140_s13 = sld [smem:[#allocation5 + $0x1a]] }
  0x37   :  { %v1487_v14 = vmax.f32 %v1485_v3, 0.0  ;;  %v774_v20 = vmul.f32 %v2994_v27, %v772_v8  ;;  %v1140_v36 = vmax.f32 %v1138_v17, 0.0  ;;  %v1854_v37 = vadd.f32 %v2634_v18, %v1852_v51  ;;  %197 = vst [vmem:[#allocation3 + $0x3] sm:$0x1] %v196_v55  ;;  %s3156_s14 = sld [smem:[#allocation5 + $0x1b]] }
  0x38   :  { %v1845_v21 = vmax.f32 %v1843_v9, 0.0  ;;  %v1131_v30 = vmul.f32 %v1129_v13, %v2994_v27  ;;  %v1498_v40 = vmax.f32 %v1496_v24, 0.0  ;;  %v785_v43 = vmul.f32 %v2997_v28, %v783_v34  ;;  %v2635_v0 = vld [vmem:[#allocation3 + $0x2] ss:$0 sm:$0xff]  ;;  %s3158_s15 = sld [smem:[#allocation9 + $0x6]] }
  0x39   :  { %v1489_v31 = vmul.f32 %v1487_v14, %v2994_v27  ;;  %v775_v32 = vadd.f32 %v774_v20, %v2986_v23  ;;  %v1142_v50 = vmul.f32 %v1140_v36, %v2997_v28  ;;  %v1856_v51 = vmax.f32 %v1854_v37, 0.0  ;;  %v2636_v6 = vld [vmem:[#allocation3 + $0x2] ss:$0 sm:$0xff]  ;;  %s3166_s16 = sld [smem:[#allocation7 + $0x7]] }
  0x3a   :  { %v1847_v33 = vmul.f32 %v1845_v21, %v2994_v27  ;;  %v1132_v35 = vadd.f32 %v1131_v30, %v2986_v23  ;;  %v1500_v27 = vmul.f32 %v1498_v40, %v2997_v28  ;;  %v211_v62 = vmul.f32 %v210_v12, %v2906_v45  ;;  %v2637_v7 = vld [vmem:[#allocation3 + $0x2] ss:$0 sm:$0xff]  ;;  %s3172_s17 = sld [smem:[#allocation5 + $0x1c]] }
  0x3b   :  { %v1490_v42 = vadd.f32 %v1489_v31, %v2986_v23  ;;  %v786_v56 = vadd.f32 %v785_v43, %v775_v32  ;;  %v1858_v61 = vmul.f32 %v1856_v51, %v2997_v28  ;;  %v214_v63 = vstv %s3039_s1  ;;  %v2638_v13 = vld [vmem:[#allocation3 + $0x2] ss:$0 sm:$0xff]  ;;  %s3180_s18 = sld [smem:[#allocation5 + $0x1d]] }
  0x3c   :  { %v1848_v54 = vadd.f32 %v1847_v33, %v2986_v23  ;;  %v1143_v57 = vadd.f32 %v1142_v50, %v1132_v35  ;;  %v801_v2 = vmul.f32 %v2974_v15, %v182_v44  ;;  %v3106_v3 = vstv %s2989_s3  ;;  %s3187_s19 = sld [smem:[#allocation5 + $0x1e]] }
  0x3d   :  { %v1501_v23 = vadd.f32 %v1500_v27, %v1490_v42  ;;  %v208_v4 = vadd.f32 %v207_v59, %v204_v60  ;;  %v215_v28 = vmul.f32 %v214_v63, %v2918_v49  ;;  %v1158_v8 = vmul.f32 %v2978_v19, %v186_v46  ;;  %s3192_s20 = sld [smem:[#allocation5 + $0x1f]] }
  0x3e   :  { %v1859_v5 = vadd.f32 %v1858_v61, %v1848_v54  ;;  %v1516_v9 = vmul.f32 %v2981_v22, %v190_v47  ;;  %v1874_v44 = vmul.f32 %v2991_v26, %v194_v48  ;;  %v792_v10 = vadd.f32 %v2635_v0, %v3027_v41  ;;  %v2639_v36 = vld [vmem:[#allocation3 + $0x3] ss:$0 sm:$0xff]  ;;  %s3213_s21 = sld [smem:[#allocation9 + $0x7]] }
  0x3f   :  { %v212_v14 = vadd.f32 %v211_v62, %v208_v4  ;;  %v219_v16 = vstv %s3074_s26  ;;  %v222_v17 = vstv %s3078_s28  ;;  %v1149_v18 = vadd.f32 %v2636_v6, %v3045_v52  ;;  %v2640_v37 = vld [vmem:[#allocation3 + $0x3] ss:$0 sm:$0xff]  ;;  %s3219_s22 = sld [smem:[#allocation7 + $0x8]] }
  0x40   :  { %v1507_v46 = vadd.f32 %v2637_v7, %v3048_v53  ;;  %v223_v47 = vmul.f32 %v222_v17, %v2894_v38  ;;  %v226_v20 = vstv %s3084_s7  ;;  %v794_v41 = vmax.f32 %v792_v10, 0.0  ;;  %v2641_v27 = vld [vmem:[#allocation3 + $0x3] ss:$0 sm:$0xff]  ;;  %s3229_s27 = sld [smem:[#allocation5 + $0x20]] }
  0x41   :  { %v1865_v48 = vadd.f32 %v2638_v13, %v3054_v58  ;;  %v216_v21 = vadd.f32 %v215_v28, %v212_v14  ;;  %v227_v24 = vmul.f32 %v226_v20, %v2896_v39  ;;  %v1151_v52 = vmax.f32 %v1149_v18, 0.0  ;;  %v2642_v51 = vld [vmem:[#allocation3 + $0x3] ss:$0 sm:$0xff]  ;;  %s3232_s0 = sld [smem:[#allocation5 + $0x21]] }
  0x42   :  { %v1509_v53 = vmax.f32 %v1507_v46, 0.0  ;;  %v224_v25 = vadd.f32 %v223_v47, %v219_v16  ;;  %v230_v30 = vstv %s3088_s8  ;;  %v796_v31 = vmul.f32 %v3000_v29, %v794_v41  ;;  %s3234_s29 = sld [smem:[#allocation5 + $0x22]] }
  0x43   :  { %v1867_v34 = vmax.f32 %v1865_v48, 0.0  ;;  %v231_v58 = vmul.f32 %v230_v30, %v2906_v45  ;;  %v234_v32 = vstv %s3093_s9  ;;  %v1153_v33 = vmul.f32 %v1151_v52, %v3000_v29  ;;  %217 = vst [vmem:[#allocation3 + $0x4] sm:$0x1] %v216_v21  ;;  %s3239_s30 = sld [smem:[#allocation5 + $0x23]] }
  0x44   :  { %v1511_v40 = vmul.f32 %v1509_v53, %v3000_v29  ;;  %v228_v35 = vadd.f32 %v227_v24, %v224_v25  ;;  %v235_v42 = vmul.f32 %v234_v32, %v2918_v49  ;;  %v797_v43 = vadd.f32 %v796_v31, %v786_v56  ;;  %s3243_s3 = sld [smem:[#allocation9 + $0x8]] }
  0x45   :  { %v1869_v50 = vmul.f32 %v1867_v34, %v3000_v29  ;;  %v803_v54 = vadd.f32 %v2639_v36, %v801_v2  ;;  %v812_v55 = vmul.f32 %v2974_v15, %v202_v1  ;;  %v1154_v60 = vadd.f32 %v1153_v33, %v1143_v57  ;;  %s3246_s2 = sld [smem:[#allocation7 + $0x9]] }
  0x46   :  { %v1512_v59 = vadd.f32 %v1511_v40, %v1501_v23  ;;  %v1160_v61 = vadd.f32 %v2640_v37, %v1158_v8  ;;  %v232_v62 = vadd.f32 %v231_v58, %v228_v35  ;;  %v1518_v29 = vadd.f32 %v2641_v27, %v1516_v9  ;;  %s3252_s5 = sld [smem:[#allocation5 + $0x24]] }
  0x47   :  { %v1870_v0 = vadd.f32 %v1869_v50, %v1859_v5  ;;  %v805_v56 = vmax.f32 %v803_v54, 0.0  ;;  %v1876_v2 = vadd.f32 %v2642_v51, %v1874_v44  ;;  %v3161_v28 = vstv %s3070_s25  ;;  %s3260_s23 = sld [smem:[#allocation5 + $0x25]] }
  0x48   :  { %v1162_v4 = vmax.f32 %v1160_v61, 0.0  ;;  %v1169_v1 = vmul.f32 %v2978_v19, %v206_v11  ;;  %v236_v57 = vadd.f32 %v235_v42, %v232_v62  ;;  %v1520_v5 = vmax.f32 %v1518_v29, 0.0  ;;  %s3275_s24 = sld [smem:[#allocation5 + $0x26]] }
  0x49   :  { %v807_v23 = vmul.f32 %v3106_v3, %v805_v56  ;;  %v1878_v6 = vmax.f32 %v1876_v2, 0.0  ;;  %v1527_v7 = vmul.f32 %v2981_v22, %v210_v12  ;;  %v1885_v11 = vmul.f32 %v2991_v26, %v214_v63  ;;  %s3281_s1 = sld [smem:[#allocation5 + $0x27]] }
  0x4a   :  { %v1164_v8 = vmul.f32 %v1162_v4, %v3106_v3  ;;  %237 = vst [vmem:[#allocation3 + $0x5] sm:$0x1] %v236_v57  ;;  %v239_v9 = vstv %s3123_s11  ;;  %v242_v44 = vstv %s3131_s12  ;;  %v1522_v13 = vmul.f32 %v1520_v5, %v3106_v3  ;;  %v2643_v48 = vld [vmem:[#allocation3 + $0x4] ss:$0 sm:$0xff]  ;;  %s3284_s25 = sld [smem:[#allocation9 + $0x9]] }
  0x4b   :  { %v808_v10 = vadd.f32 %v807_v23, %v797_v43  ;;  %v1880_v12 = vmul.f32 %v1878_v6, %v3106_v3  ;;  %v243_v14 = vmul.f32 %v242_v44, %v2894_v38  ;;  %v246_v16 = vstv %s3137_s4  ;;  %v2644_v24 = vld [vmem:[#allocation3 + $0x4] ss:$0 sm:$0xff]  ;;  %s3290_s26 = sld [smem:[#allocation7 + $0xa]] }
  0x4c   :  { %v1165_v63 = vadd.f32 %v1164_v8, %v1154_v60  ;;  %v250_v18 = vstv %s3140_s13  ;;  %v254_v46 = vstv %s3156_s14  ;;  %v1523_v47 = vadd.f32 %v1522_v13, %v1512_v59  ;;  %v2645_v52 = vld [vmem:[#allocation3 + $0x4] ss:$0 sm:$0xff]  ;;  %s3293_s28 = sld [smem:[#allocation5 + $0x28]] }
  0x4d   :  { %v1881_v41 = vadd.f32 %v1880_v12, %v1870_v0  ;;  %v244_v3 = vadd.f32 %v243_v14, %v239_v9  ;;  %v247_v21 = vmul.f32 %v246_v16, %v2896_v39  ;;  %v823_v53 = vmul.f32 %v2974_v15, %v222_v17  ;;  %v2646_v58 = vld [vmem:[#allocation3 + $0x4] ss:$0 sm:$0xff]  ;;  %s3297_s7 = sld [smem:[#allocation5 + $0x29]] }
  0x4e   :  { %v828_v25 = vstv %s3100_s10  ;;  %v1180_v31 = vmul.f32 %v2978_v19, %v226_v20  ;;  %v251_v34 = vmul.f32 %v250_v18, %v2906_v45  ;;  %v814_v36 = vadd.f32 %v2643_v48, %v812_v55  ;;  %s3300_s8 = sld [smem:[#allocation5 + $0x2a]] }
  0x4f   :  { %v1538_v33 = vmul.f32 %v2981_v22, %v230_v30  ;;  %v248_v40 = vadd.f32 %v247_v21, %v244_v3  ;;  %v255_v37 = vmul.f32 %v254_v46, %v2918_v49  ;;  %v1171_v17 = vadd.f32 %v2644_v24, %v1169_v1  ;;  %s3304_s9 = sld [smem:[#allocation5 + $0x2b]] }
  0x50   :  { %v1529_v35 = vadd.f32 %v2645_v52, %v1527_v7  ;;  %v1896_v20 = vmul.f32 %v2991_v26, %v234_v32  ;;  %v259_v42 = vstv %s3166_s16  ;;  %v816_v43 = vmax.f32 %v814_v36, 0.0  ;;  %s3319_s10 = sld [smem:[#allocation9 + $0xa]] }
  0x51   :  { %v1887_v50 = vadd.f32 %v2646_v58, %v1885_v11  ;;  %v2647_v54 = vld [vmem:[#allocation3 + $0x5] ss:$0 sm:$0xff]  ;;  %v252_v30 = vadd.f32 %v251_v34, %v248_v40  ;;  %v262_v27 = vstv %s3172_s17  ;;  %v1173_v51 = vmax.f32 %v1171_v17, 0.0  ;;  %s3323_s11 = sld [smem:[#allocation7 + $0xb]] }
  0x52   :  { %v1531_v55 = vmax.f32 %v1529_v35, 0.0  ;;  %v2648_v60 = vld [vmem:[#allocation3 + $0x5] ss:$0 sm:$0xff]  ;;  %v263_v59 = vmul.f32 %v262_v27, %v2894_v38  ;;  %v266_v61 = vstv %s3180_s18  ;;  %v818_v62 = vmul.f32 %v3161_v28, %v816_v43  ;;  %s3326_s12 = sld [smem:[#allocation5 + $0x2c]] }
  0x53   :  { %v1889_v0 = vmax.f32 %v1887_v50, 0.0  ;;  %v825_v56 = vadd.f32 %v2647_v54, %v823_v53  ;;  %v2649_v32 = vld [vmem:[#allocation3 + $0x5] ss:$0 sm:$0xff]  ;;  %v256_v29 = vadd.f32 %v255_v37, %v252_v30  ;;  %v1175_v2 = vmul.f32 %v1173_v51, %v3161_v28  ;;  %s3333_s4 = sld [smem:[#allocation5 + $0x2d]] }
  0x54   :  { %v1533_v4 = vmul.f32 %v1531_v55, %v3161_v28  ;;  %v1182_v1 = vadd.f32 %v2648_v60, %v1180_v31  ;;  %v2650_v57 = vld [vmem:[#allocation3 + $0x5] ss:$0 sm:$0xff]  ;;  %v264_v23 = vadd.f32 %v263_v59, %v259_v42  ;;  %v819_v5 = vadd.f32 %v818_v62, %v808_v10  ;;  %s3340_s13 = sld [smem:[#allocation5 + $0x2e]] }
  0x55   :  { %v1891_v6 = vmul.f32 %v1889_v0, %v3161_v28  ;;  %v827_v7 = vmax.f32 %v825_v56, 0.0  ;;  %v1540_v8 = vadd.f32 %v2649_v32, %v1538_v33  ;;  %257 = vst [vmem:[#allocation3 + $0x6] sm:$0x1] %v256_v29  ;;  %v1176_v11 = vadd.f32 %v1175_v2, %v1165_v63  ;;  %s3344_s14 = sld [smem:[#allocation5 + $0x2f]] }
  0x56   :  { %v1534_v9 = vadd.f32 %v1533_v4, %v1523_v47  ;;  %v1184_v13 = vmax.f32 %v1182_v1, 0.0  ;;  %v1898_v12 = vadd.f32 %v2650_v57, %v1896_v20  ;;  %v267_v28 = vmul.f32 %v266_v61, %v2896_v39  ;;  %s3365_s16 = sld [smem:[#allocation5 + $0x30]] }
  0x57   :  { %v1892_v14 = vadd.f32 %v1891_v6, %v1881_v41  ;;  %v829_v48 = vmul.f32 %v828_v25, %v827_v7  ;;  %v1542_v3 = vmax.f32 %v1540_v8, 0.0  ;;  %v270_v24 = vstv %s3187_s19  ;;  %s3370_s17 = sld [smem:[#allocation5 + $0x31]] }
  0x58   :  { %v1186_v10 = vmul.f32 %v1184_v13, %v828_v25  ;;  %v1900_v21 = vmax.f32 %v1898_v12, 0.0  ;;  %v274_v63 = vstv %s3192_s20  ;;  %v268_v41 = vadd.f32 %v267_v28, %v264_v23  ;;  %s3377_s18 = sld [smem:[#allocation5 + $0x32]] }
  0x59   :  { %v830_v47 = vadd.f32 %v829_v48, %v819_v5  ;;  %v1544_v52 = vmul.f32 %v1542_v3, %v828_v25  ;;  %v271_v53 = vmul.f32 %v270_v24, %v2906_v45  ;;  %v834_v36 = vmul.f32 %v2974_v15, %v242_v44  ;;  %s3384_s19 = sld [smem:[#allocation9 + $0xb]] }
  0x5a   :  { %v1187_v31 = vadd.f32 %v1186_v10, %v1176_v11  ;;  %v1902_v34 = vmul.f32 %v1900_v21, %v828_v25  ;;  %v275_v58 = vmul.f32 %v274_v63, %v2918_v49  ;;  %v1191_v40 = vmul.f32 %v2978_v19, %v246_v16  ;;  %s3400_s20 = sld [smem:[#allocation5 + $0x33]] }
  0x5b   :  { %v1545_v33 = vadd.f32 %v1544_v52, %v1534_v9  ;;  %v1549_v37 = vmul.f32 %v2981_v22, %v250_v18  ;;  %v272_v17 = vadd.f32 %v271_v53, %v268_v41  ;;  %v839_v35 = vstv %s3158_s15  ;;  %s3360_s15 = sld [smem:[#allocation7 + $0xc]] }
  0x5c   :  { %v1903_v25 = vadd.f32 %v1902_v34, %v1892_v14  ;;  %v2651_v44 = vld [vmem:[#allocation3 + $0x6] ss:$0 sm:$0xff]  ;;  %v1907_v20 = vmul.f32 %v2991_v26, %v254_v46  ;;  %v279_v42 = vstv %s3219_s22  ;;  %v282_v16 = vstv %s3229_s27  ;;  %s3409_s22 = sld [smem:[#allocation5 + $0x34]] }
  0x5d   :  { %v2652_v43 = vld [vmem:[#allocation3 + $0x6] ss:$0 sm:$0xff]  ;;  %v276_v54 = vadd.f32 %v275_v58, %v272_v17  ;;  %v286_v30 = vstv %s3232_s0  ;;  %v290_v51 = vstv %s3234_s29  ;;  %v836_v18 = vadd.f32 %v2651_v44, %v834_v36  ;;  %s3423_s27 = sld [smem:[#allocation5 + $0x35]] }
  0x5e   :  { %v2653_v50 = vld [vmem:[#allocation3 + $0x6] ss:$0 sm:$0xff]  ;;  %v845_v60 = vmul.f32 %v2974_v15, %v262_v27  ;;  %v283_v59 = vmul.f32 %v282_v16, %v2894_v38  ;;  %v287_v62 = vmul.f32 %v286_v30, %v2896_v39  ;;  %v1193_v46 = vadd.f32 %v2652_v43, %v1191_v40  ;;  %s3425_s0 = sld [smem:[#allocation5 + $0x36]] }
  0x5f   :  { %v2654_v55 = vld [vmem:[#allocation3 + $0x6] ss:$0 sm:$0xff]  ;;  %v1551_v0 = vadd.f32 %v2653_v50, %v1549_v37  ;;  %277 = vst [vmem:[#allocation3 + $0x7] sm:$0x1] %v276_v54  ;;  %v3278_v56 = vstv %s3213_s21  ;;  %v294_v32 = vstv %s3239_s30  ;;  %v838_v29 = vmax.f32 %v836_v18, 0.0  ;;  %s3404_s21 = sld [smem:[#allocation7 + $0xd]] }
  0x60   :  { %v1909_v2 = vadd.f32 %v2654_v55, %v1907_v20  ;;  %v284_v4 = vadd.f32 %v283_v59, %v279_v42  ;;  %v291_v27 = vmul.f32 %v290_v51, %v2906_v45  ;;  %v1195_v1 = vmax.f32 %v1193_v46, 0.0  ;;  %s3427_s29 = sld [smem:[#allocation5 + $0x37]] }
  0x61   :  { %v1553_v57 = vmax.f32 %v1551_v0, 0.0  ;;  %v1202_v23 = vmul.f32 %v2978_v19, %v266_v61  ;;  %v1560_v5 = vmul.f32 %v2981_v22, %v270_v24  ;;  %v840_v6 = vmul.f32 %v839_v35, %v838_v29  ;;  %s3431_s30 = sld [smem:[#allocation9 + $0xc]] }
  0x62   :  { %v1911_v7 = vmax.f32 %v1909_v2, 0.0  ;;  %v288_v8 = vadd.f32 %v287_v62, %v284_v4  ;;  %v295_v11 = vmul.f32 %v294_v32, %v2918_v49  ;;  %v1197_v9 = vmul.f32 %v1195_v1, %v839_v35  ;;  %s2302_s6 = sld [smem:[#allocation5 + $0x52]] }
  0x63   :  { %v1555_v13 = vmul.f32 %v1553_v57, %v839_v35  ;;  %v1918_v12 = vmul.f32 %v2991_v26, %v274_v63  ;;  %v299_v14 = vstv %s3246_s2  ;;  %v841_v61 = vadd.f32 %v840_v6, %v830_v47  ;;  %s3447_s2 = sld [smem:[#allocation5 + $0x38]] }
  0x64   :  { %v1913_v48 = vmul.f32 %v1911_v7, %v839_v35  ;;  %v292_v3 = vadd.f32 %v291_v27, %v288_v8  ;;  %v302_v28 = vstv %s3252_s5  ;;  %v1198_v10 = vadd.f32 %v1197_v9, %v1187_v31  ;;  %s3453_s5 = sld [smem:[#allocation5 + $0x39]] }
  0x65   :  { %v1556_v21 = vadd.f32 %v1555_v13, %v1545_v33  ;;  %v303_v24 = vmul.f32 %v302_v28, %v2894_v38  ;;  %v306_v52 = vstv %s3260_s23  ;;  %v310_v34 = vstv %s3275_s24  ;;  %s3470_s23 = sld [smem:[#allocation5 + $0x3a]] }
  0x66   :  { %v1914_v63 = vadd.f32 %v1913_v48, %v1903_v25  ;;  %v2655_v41 = vld [vmem:[#allocation3 + $0x7] ss:$0 sm:$0xff]  ;;  %v296_v53 = vadd.f32 %v295_v11, %v292_v3  ;;  %v307_v47 = vmul.f32 %v306_v52, %v2896_v39  ;;  %v856_v40 = vmul.f32 %v2974_v15, %v282_v16  ;;  %s3472_s24 = sld [smem:[#allocation5 + $0x3b]] }
  0x67   :  { %v2656_v36 = vld [vmem:[#allocation3 + $0x7] ss:$0 sm:$0xff]  ;;  %v304_v37 = vadd.f32 %v303_v24, %v299_v14  ;;  %v311_v31 = vmul.f32 %v310_v34, %v2906_v45  ;;  %v314_v33 = vstv %s3281_s1  ;;  %v847_v17 = vadd.f32 %v2655_v41, %v845_v60  ;;  %s3475_s1 = sld [smem:[#allocation7 + $0xf]] }
  0x68   :  { %v2657_v58 = vld [vmem:[#allocation3 + $0x7] ss:$0 sm:$0xff]  ;;  %297 = vst [vmem:[#allocation3 + $0x8] sm:$0x1] %v296_v53  ;;  %v3314_v35 = vstv %s3243_s3  ;;  %v1213_v25 = vmul.f32 %v2978_v19, %v286_v30  ;;  %v1571_v20 = vmul.f32 %v2981_v22, %v290_v51  ;;  %v1204_v42 = vadd.f32 %v2656_v36, %v1202_v23  ;;  %s3438_s3 = sld [smem:[#allocation7 + $0xe]] }
  0x69   :  { %v2658_v44 = vld [vmem:[#allocation3 + $0x7] ss:$0 sm:$0xff]  ;;  %v1562_v43 = vadd.f32 %v2657_v58, %v1560_v5  ;;  %v308_v50 = vadd.f32 %v307_v47, %v304_v37  ;;  %v315_v54 = vmul.f32 %v314_v33, %v2918_v49  ;;  %v849_v16 = vmax.f32 %v847_v17, 0.0 }
  0x6a   :  { %v1920_v18 = vadd.f32 %v2658_v44, %v1918_v12  ;;  %v1929_v55 = vmul.f32 %v2991_v26, %v294_v32  ;;  %v319_v60 = vstv %s3290_s26  ;;  %v1206_v30 = vmax.f32 %v1204_v42, 0.0  ;;  %s3482_s26 = sld [smem:[#allocation5 + $0x3d]] }
  0x6b   :  { %v1564_v59 = vmax.f32 %v1562_v43, 0.0  ;;  %v312_v51 = vadd.f32 %v311_v31, %v308_v50  ;;  %v322_v62 = vstv %s3293_s28  ;;  %v851_v46 = vmul.f32 %v3278_v56, %v849_v16  ;;  %s3497_s28 = sld [smem:[#allocation5 + $0x3e]] }
  0x6c   :  { %v1922_v0 = vmax.f32 %v1920_v18, 0.0  ;;  %v323_v29 = vmul.f32 %v322_v62, %v2894_v38  ;;  %v326_v2 = vstv %s3297_s7  ;;  %v1208_v32 = vmul.f32 %v1206_v30, %v3278_v56  ;;  %s3501_s7 = sld [smem:[#allocation9 + $0xd]] }
  0x6d   :  { %v1566_v4 = vmul.f32 %v1564_v59, %v3278_v56  ;;  %v316_v27 = vadd.f32 %v315_v54, %v312_v51  ;;  %v327_v1 = vmul.f32 %v326_v2, %v2896_v39  ;;  %v852_v57 = vadd.f32 %v851_v46, %v841_v61 }
  0x6e   :  { %v1924_v23 = vmul.f32 %v1922_v0, %v3278_v56  ;;  %v324_v5 = vadd.f32 %v323_v29, %v319_v60  ;;  %v330_v6 = vstv %s3300_s8  ;;  %v1209_v7 = vadd.f32 %v1208_v32, %v1198_v10  ;;  %s3511_s8 = sld [smem:[#allocation5 + $0x3f]] }
  0x6f   :  { %v1567_v8 = vadd.f32 %v1566_v4, %v1556_v21  ;;  %v2659_v11 = vld [vmem:[#allocation3 + $0x8] ss:$0 sm:$0xff]  ;;  %v331_v9 = vmul.f32 %v330_v6, %v2906_v45  ;;  %v334_v13 = vstv %s3304_s9  ;;  %v867_v61 = vmul.f32 %v2974_v15, %v302_v28  ;;  %317 = vst [vmem:[#allocation3 + $0x9] sm:$0x1] %v316_v27  ;;  %s3513_s9 = sld [smem:[#allocation7 + $0x10]] }
  0x70   :  { %v1925_v12 = vadd.f32 %v1924_v23, %v1914_v63  ;;  %v2660_v14 = vld [vmem:[#allocation3 + $0x8] ss:$0 sm:$0xff]  ;;  %v328_v56 = vadd.f32 %v327_v1, %v324_v5  ;;  %v335_v3 = vmul.f32 %v334_v13, %v2918_v49  ;;  %v858_v24 = vadd.f32 %v2659_v11, %v856_v40 }
  0x71   :  { %v2661_v48 = vld [vmem:[#allocation3 + $0x8] ss:$0 sm:$0xff]  ;;  %v3351_v10 = vstv %s3284_s25  ;;  %v1224_v21 = vmul.f32 %v2978_v19, %v306_v52  ;;  %v1582_v63 = vmul.f32 %v2981_v22, %v310_v34  ;;  %v1215_v53 = vadd.f32 %v2660_v14, %v1213_v25  ;;  %s3479_s25 = sld [smem:[#allocation5 + $0x3c]] }
  0x72   :  { %v2662_v41 = vld [vmem:[#allocation3 + $0x8] ss:$0 sm:$0xff]  ;;  %v1573_v47 = vadd.f32 %v2661_v48, %v1571_v20  ;;  %v1940_v28 = vmul.f32 %v2991_v26, %v314_v33  ;;  %v332_v36 = vadd.f32 %v331_v9, %v328_v56  ;;  %v860_v58 = vmax.f32 %v858_v24, 0.0 }
  0x73   :  { %v1931_v37 = vadd.f32 %v2662_v41, %v1929_v55  ;;  %v339_v40 = vstv %s3323_s11  ;;  %v342_v31 = vstv %s3326_s12  ;;  %v1217_v17 = vmax.f32 %v1215_v53, 0.0  ;;  %s3523_s11 = sld [smem:[#allocation5 + $0x41]] }
  0x74   :  { %v1575_v44 = vmax.f32 %v1573_v47, 0.0  ;;  %v336_v42 = vadd.f32 %v335_v3, %v332_v36  ;;  %v343_v52 = vmul.f32 %v342_v31, %v2894_v38  ;;  %v862_v34 = vmul.f32 %v3314_v35, %v860_v58  ;;  %s3528_s12 = sld [smem:[#allocation5 + $0x42]] }
  0x75   :  { %v1933_v33 = vmax.f32 %v1931_v37, 0.0  ;;  %v346_v25 = vstv %s3333_s4  ;;  %v350_v20 = vstv %s3340_s13  ;;  %v1219_v43 = vmul.f32 %v1217_v17, %v3314_v35  ;;  %s3537_s4 = sld [smem:[#allocation5 + $0x43]] }
  0x76   :  { %v1577_v50 = vmul.f32 %v1575_v44, %v3314_v35  ;;  %337 = vst [vmem:[#allocation3 + $0xa] sm:$0x1] %v336_v42  ;;  %v344_v54 = vadd.f32 %v343_v52, %v339_v40  ;;  %v347_v16 = vmul.f32 %v346_v25, %v2896_v39  ;;  %v863_v18 = vadd.f32 %v862_v34, %v852_v57  ;;  %v2663_v46 = vld [vmem:[#allocation3 + $0x9] ss:$0 sm:$0xff]  ;;  %s3553_s13 = sld [smem:[#allocation7 + $0x11]] }
  0x77   :  { %v1935_v55 = vmul.f32 %v1933_v33, %v3314_v35  ;;  %v351_v60 = vmul.f32 %v350_v20, %v2906_v45  ;;  %v354_v30 = vstv %s3344_s14  ;;  %v1220_v59 = vadd.f32 %v1219_v43, %v1209_v7  ;;  %v2664_v4 = vld [vmem:[#allocation3 + $0x9] ss:$0 sm:$0xff]  ;;  %s3558_s14 = sld [smem:[#allocation5 + $0x44]] }
  0x78   :  { %v1578_v51 = vadd.f32 %v1577_v50, %v1567_v8  ;;  %v348_v0 = vadd.f32 %v347_v16, %v344_v54  ;;  %v355_v29 = vmul.f32 %v354_v30, %v2918_v49  ;;  %v2665_v27 = vld [vmem:[#allocation3 + $0x9] ss:$0 sm:$0xff]  ;;  %v878_v35 = vmul.f32 %v2974_v15, %v322_v62 }
  0x79   :  { %v1936_v32 = vadd.f32 %v1935_v55, %v1925_v12  ;;  %v3393_v1 = vstv %s3319_s10  ;;  %v1235_v57 = vmul.f32 %v2978_v19, %v326_v2  ;;  %v869_v23 = vadd.f32 %v2663_v46, %v867_v61  ;;  %v2666_v5 = vld [vmem:[#allocation3 + $0x9] ss:$0 sm:$0xff]  ;;  %s3518_s10 = sld [smem:[#allocation5 + $0x40]] }
  0x7a   :  { %v1593_v7 = vmul.f32 %v2981_v22, %v330_v6  ;;  %v1951_v8 = vmul.f32 %v2991_v26, %v334_v13  ;;  %v352_v11 = vadd.f32 %v351_v60, %v348_v0  ;;  %v1226_v9 = vadd.f32 %v2664_v4, %v1224_v21 }
  0x7b   :  { %v1584_v12 = vadd.f32 %v2665_v27, %v1582_v63  ;;  %v359_v62 = vstv %s3360_s15  ;;  %v362_v14 = vstv %s3365_s16  ;;  %v871_v48 = vmax.f32 %v869_v23, 0.0  ;;  %s3564_s15 = sld [smem:[#allocation5 + $0x45]] }
  0x7c   :  { %v1942_v2 = vadd.f32 %v2666_v5, %v1940_v28  ;;  %v356_v61 = vadd.f32 %v355_v29, %v352_v11  ;;  %v363_v6 = vmul.f32 %v362_v14, %v2894_v38  ;;  %v1228_v13 = vmax.f32 %v1226_v9, 0.0  ;;  %s3641_s16 = sld [smem:[#allocation5 + $0x55]] }
  0x7d   :  { %v1586_v56 = vmax.f32 %v1584_v12, 0.0  ;;  %v2667_v3 = vld [vmem:[#allocation3 + $0xa] ss:$0 sm:$0xff]  ;;  %v366_v24 = vstv %s3370_s17  ;;  %v370_v41 = vstv %s3377_s18  ;;  %v873_v21 = vmul.f32 %v3351_v10, %v871_v48  ;;  %s3643_s17 = sld [smem:[#allocation5 + $0x56]] }
  0x7e   :  { %v1944_v63 = vmax.f32 %v1942_v2, 0.0  ;;  %v2668_v53 = vld [vmem:[#allocation3 + $0xa] ss:$0 sm:$0xff]  ;;  %v364_v47 = vadd.f32 %v363_v6, %v359_v62  ;;  %v367_v28 = vmul.f32 %v366_v24, %v2896_v39  ;;  %v1230_v36 = vmul.f32 %v1228_v13, %v3351_v10  ;;  %357 = vst [vmem:[#allocation3 + $0xb] sm:$0x1] %v356_v61  ;;  %s3650_s18 = sld [smem:[#allocation7 + $0x16]] }
  0x7f   :  { %v1588_v58 = vmul.f32 %v1586_v56, %v3351_v10  ;;  %v880_v37 = vadd.f32 %v2667_v3, %v878_v35  ;;  %v2669_v40 = vld [vmem:[#allocation3 + $0xa] ss:$0 sm:$0xff]  ;;  %v371_v17 = vmul.f32 %v370_v41, %v2906_v45  ;;  %v874_v44 = vadd.f32 %v873_v21, %v863_v18 }
  0x80   :  { %v1946_v42 = vmul.f32 %v1944_v63, %v3351_v10  ;;  %v1237_v52 = vadd.f32 %v2668_v53, %v1235_v57  ;;  %v2670_v34 = vld [vmem:[#allocation3 + $0xa] ss:$0 sm:$0xff]  ;;  %v368_v33 = vadd.f32 %v367_v28, %v364_v47  ;;  %v1231_v43 = vadd.f32 %v1230_v36, %v1220_v59 }
  0x81   :  { %v1589_v50 = vadd.f32 %v1588_v58, %v1578_v51  ;;  %v882_v54 = vmax.f32 %v880_v37, 0.0  ;;  %v1595_v16 = vadd.f32 %v2669_v40, %v1593_v7  ;;  %v1953_v18 = vadd.f32 %v2670_v34, %v1951_v8 }
  0x82   :  { %v1947_v55 = vadd.f32 %v1946_v42, %v1936_v32  ;;  %v1239_v60 = vmax.f32 %v1237_v52, 0.0  ;;  %v372_v10 = vadd.f32 %v371_v17, %v368_v33  ;;  %v374_v29 = vstv %s3400_s20  ;;  %s2288_s20 = sld [smem:[#allocation5 + $0x47]] }
  0x83   :  { %v884_v46 = vmul.f32 %v3393_v1, %v882_v54  ;;  %v1597_v0 = vmax.f32 %v1595_v16, 0.0  ;;  %v1955_v51 = vmax.f32 %v1953_v18, 0.0  ;;  %v889_v32 = vmul.f32 %v2974_v15, %v342_v31 }
  0x84   :  { %v1241_v59 = vmul.f32 %v1239_v60, %v3393_v1  ;;  %v375_v4 = vmul.f32 %v374_v29, %v2918_v49  ;;  %v1246_v57 = vmul.f32 %v2978_v19, %v346_v25  ;;  %v1604_v23 = vmul.f32 %v2981_v22, %v350_v20 }
  0x85   :  { %v885_v27 = vadd.f32 %v884_v46, %v874_v44  ;;  %v1599_v35 = vmul.f32 %v1597_v0, %v3393_v1  ;;  %v1957_v5 = vmul.f32 %v1955_v51, %v3393_v1  ;;  %v1962_v7 = vmul.f32 %v2991_v26, %v354_v30  ;;  %v2671_v11 = vld [vmem:[#allocation3 + $0xb] ss:$0 sm:$0xff] }
  0x86   :  { %v1242_v31 = vadd.f32 %v1241_v59, %v1231_v43  ;;  %v376_v8 = vadd.f32 %v375_v4, %v372_v10  ;;  %v379_v9 = vstv %s3404_s21  ;;  %v382_v12 = vstv %s3409_s22  ;;  %v2672_v48 = vld [vmem:[#allocation3 + $0xb] ss:$0 sm:$0xff]  ;;  %s2289_s21 = sld [smem:[#allocation7 + $0x12]] }
  0x87   :  { %v1600_v25 = vadd.f32 %v1599_v35, %v1589_v50  ;;  %v386_v20 = vstv %s3423_s27  ;;  %v1958_v62 = vadd.f32 %v1957_v5, %v1947_v55  ;;  %v2673_v2 = vld [vmem:[#allocation3 + $0xb] ss:$0 sm:$0xff]  ;;  %v383_v1 = vmul.f32 %v382_v12, %v2894_v38  ;;  %s3666_s22 = sld [smem:[#allocation5 + $0x59]] }
  0x88   :  { %v387_v61 = vmul.f32 %v386_v20, %v2896_v39  ;;  %v390_v30 = vstv %s3425_s0  ;;  %v891_v6 = vadd.f32 %v2671_v11, %v889_v32  ;;  %v894_v13 = vstv %s3384_s19  ;;  %v2674_v56 = vld [vmem:[#allocation3 + $0xb] ss:$0 sm:$0xff]  ;;  %377 = vst [vmem:[#allocation3 + $0xc] sm:$0x1] %v376_v8  ;;  %s2287_s19 = sld [smem:[#allocation5 + $0x46]] }
  0x89   :  { %v394_v3 = vstv %s3427_s29  ;;  %v1248_v21 = vadd.f32 %v2672_v48, %v1246_v57  ;;  %v1606_v63 = vadd.f32 %v2673_v2, %v1604_v23  ;;  %v384_v53 = vadd.f32 %v383_v1, %v379_v9  ;;  %s3582_s29 = sld [smem:[#allocation5 + $0x48]] }
  0x8a   :  { %v391_v47 = vmul.f32 %v390_v30, %v2906_v45  ;;  %v893_v28 = vmax.f32 %v891_v6, 0.0  ;;  %v1964_v36 = vadd.f32 %v2674_v56, %v1962_v7  ;;  %v395_v17 = vmul.f32 %v394_v3, %v2918_v49  ;;  %s3672_s27 = sld [smem:[#allocation5 + $0x5a]] }
  0x8b   :  { %v1250_v58 = vmax.f32 %v1248_v21, 0.0  ;;  %v1608_v37 = vmax.f32 %v1606_v63, 0.0  ;;  %v388_v40 = vadd.f32 %v387_v61, %v384_v53  ;;  %v1973_v52 = vmul.f32 %v2991_v26, %v374_v29  ;;  %s3686_s0 = sld [smem:[#allocation5 + $0x5b]] }
  0x8c   :  { %v895_v44 = vmul.f32 %v894_v13, %v893_v28  ;;  %v1966_v42 = vmax.f32 %v1964_v36, 0.0  ;;  %v399_v34 = vstv %s3438_s3  ;;  %v402_v54 = vstv %s3447_s2  ;;  %s2292_s3 = sld [smem:[#allocation5 + $0x4a]] }
  0x8d   :  { %v1252_v33 = vmul.f32 %v1250_v58, %v894_v13  ;;  %v1610_v43 = vmul.f32 %v1608_v37, %v894_v13  ;;  %v392_v50 = vadd.f32 %v391_v47, %v388_v40  ;;  %v403_v60 = vmul.f32 %v402_v54, %v2894_v38  ;;  %s3695_s2 = sld [smem:[#allocation7 + $0x17]] }
  0x8e   :  { %v3484_v16 = vadd.f32 %v895_v44, %v885_v27  ;;  %v1968_v55 = vmul.f32 %v1966_v42, %v894_v13  ;;  %v406_v18 = vstv %s3453_s5  ;;  %v410_v32 = vstv %s3470_s23  ;;  %s3704_s5 = sld [smem:[#allocation5 + $0x5c]] }
  0x8f   :  { %v3490_v10 = vadd.f32 %v1252_v33, %v1242_v31  ;;  %v3492_v46 = vadd.f32 %v1610_v43, %v1600_v25  ;;  %v396_v0 = vadd.f32 %v395_v17, %v392_v50  ;;  %v407_v29 = vmul.f32 %v406_v18, %v2896_v39  ;;  %v2678_v27 = vld [vmem:[#allocation3 + $0xc] ss:$0 sm:$0xff]  ;;  %s3714_s23 = sld [smem:[#allocation5 + $0x5d]] }
  0x90   :  { %v3499_v59 = vadd.f32 %v1968_v55, %v1958_v62  ;;  %v404_v51 = vadd.f32 %v403_v60, %v399_v34  ;;  %v414_v4 = vstv %s3472_s24  ;;  %v411_v35 = vmul.f32 %v410_v32, %v2906_v45  ;;  %s3720_s24 = sld [smem:[#allocation5 + $0x5e]] }
  0x91   :  { %397 = vst [vmem:[#allocation3 + $0xd] sm:$0x1] %v396_v0  ;;  %v415_v23 = vmul.f32 %v414_v4, %v2918_v49  ;;  %v1975_v31 = vadd.f32 %v2678_v27, %v1973_v52  ;;  %v3516_v5 = vstv %s3431_s30  ;;  %v419_v25 = vstv %s3475_s1  ;;  %s3587_s30 = sld [smem:[#allocation5 + $0x49]] }
  0x92   :  { %4553 = vst [vmem:[#allocation13_spill] sm:$0xff] %v3499_v59  ;;  %v408_v57 = vadd.f32 %v407_v29, %v404_v51  ;;  %v422_v11 = vstv %s3479_s25  ;;  %v426_v9 = vstv %s3482_s26  ;;  %v430_v61 = vstv %s3497_s28  ;;  %s2293_s1 = sld [smem:[#allocation5 + $0x4b]] }
  0x93   :  { %v1977_v8 = vmax.f32 %v1975_v31, 0.0  ;;  %v423_v48 = vmul.f32 %v422_v11, %v2894_v38  ;;  %v427_v1 = vmul.f32 %v426_v9, %v2896_v39  ;;  %v1984_v6 = vmul.f32 %v2991_v26, %v394_v3  ;;  %s3728_s25 = sld [smem:[#allocation5 + $0x5f]] }
  0x94   :  { %v412_v7 = vadd.f32 %v411_v35, %v408_v57  ;;  %v431_v56 = vmul.f32 %v430_v61, %v2906_v45  ;;  %v434_v21 = vstv %s3511_s8  ;;  %v439_v28 = vstv %s3513_s9  ;;  %s3596_s9 = sld [smem:[#allocation5 + $0x4c]] }
  0x95   :  { %v3531_v2 = vmul.f32 %v1977_v8, %v3516_v5  ;;  %v424_v13 = vadd.f32 %v423_v48, %v419_v25  ;;  %v435_v47 = vmul.f32 %v434_v21, %v2918_v49  ;;  %v442_v36 = vstv %s3518_s10  ;;  %s3754_s26 = sld [smem:[#allocation5 + $0x61]] }
  0x96   :  { %v416_v62 = vadd.f32 %v415_v23, %v412_v7  ;;  %v443_v58 = vmul.f32 %v442_v36, %v2894_v38  ;;  %v446_v3 = vstv %s3523_s11  ;;  %v3561_v44 = vstv %s3501_s7  ;;  %s2294_s7 = sld [smem:[#allocation7 + $0x13]] }
  0x97   :  { %4554 = vst [vmem:[#allocation14_spill] sm:$0xff] %v3531_v2  ;;  %v428_v53 = vadd.f32 %v427_v1, %v424_v13  ;;  %v447_v17 = vmul.f32 %v446_v3, %v2896_v39  ;;  %v450_v52 = vstv %s3528_s12  ;;  %v454_v55 = vstv %s3537_s4  ;;  %4556 = sst [smem:[#allocation16_spill]] %s3587_s30 }
  0x98   :  { %v2682_v63 = vld [vmem:[#allocation3 + $0xd] ss:$0 sm:$0xff]  ;;  %417 = vst [vmem:[#allocation3 + $0xe] sm:$0x1] %v416_v62  ;;  %v444_v42 = vadd.f32 %v443_v58, %v439_v28  ;;  %v451_v43 = vmul.f32 %v450_v52, %v2906_v45  ;;  %v455_v0 = vmul.f32 %v454_v55, %v2918_v49  ;;  %v459_v51 = vstv %s3553_s13  ;;  %s3603_s13 = sld [smem:[#allocation5 + $0x4d]] }
  0x99   :  { %v1986_v37 = vadd.f32 %v2682_v63, %v1984_v6  ;;  %v432_v40 = vadd.f32 %v431_v56, %v428_v53  ;;  %v462_v27 = vstv %s3558_s14  ;;  %v4538_v23 = vstv %s3564_s15  ;;  %s3761_s28 = sld [smem:[#allocation5 + $0x62]] }
  0x9a   :  { %v448_v50 = vadd.f32 %v447_v17, %v444_v42  ;;  %v463_v57 = vmul.f32 %v462_v27, %v2894_v38  ;;  %v467_v31 = vmul.f32 %v4538_v23, %v2896_v39  ;;  %v470_v7 = vstv %s2287_s19  ;;  %s2297_s19 = sld [smem:[#allocation5 + $0x4e]] }
  0x9b   :  { %v1988_v34 = vmax.f32 %v1986_v37, 0.0  ;;  %v436_v33 = vadd.f32 %v435_v47, %v432_v40  ;;  %v471_v25 = vmul.f32 %v470_v7, %v2906_v45  ;;  %v474_v62 = vstv %s2288_s20  ;;  %s2298_s20 = sld [smem:[#allocation5 + $0x4f]] }
  0x9c   :  { %v452_v29 = vadd.f32 %v451_v43, %v448_v50  ;;  %v464_v8 = vadd.f32 %v463_v57, %v459_v51  ;;  %v475_v1 = vmul.f32 %v474_v62, %v2918_v49  ;;  %v479_v13 = vstv %s2289_s21  ;;  %s2299_s21 = sld [smem:[#allocation7 + $0x14]] }
  0x9d   :  { %v3571_v60 = vmul.f32 %v1988_v34, %v3561_v44  ;;  %437 = vst [vmem:[#allocation3 + $0xf] sm:$0x1] %v436_v33  ;;  %v482_v56 = vstv %s3582_s29  ;;  %v4535_v53 = vstv %s3587_s30  ;;  %v490_v37 = vstv %s2292_s3  ;;  %s3609_s3 = sld [smem:[#allocation5 + $0x50]] }
  0x9e   :  { %v456_v35 = vadd.f32 %v455_v0, %v452_v29  ;;  %v468_v48 = vadd.f32 %v467_v31, %v464_v8  ;;  %v483_v63 = vmul.f32 %v482_v56, %v2894_v38  ;;  %v487_v58 = vmul.f32 %v4535_v53, %v2896_v39  ;;  %s3623_s30 = sld [smem:[#allocation7 + $0x15]] }
  0x9f   :  { %4555 = vst [vmem:[#allocation15_spill] sm:$0xff] %v3571_v60  ;;  %v491_v40 = vmul.f32 %v490_v37, %v2906_v45  ;;  %v494_v17 = vstv %s2293_s1  ;;  %v499_v43 = vstv %s2294_s7  ;;  %v502_v50 = vstv %s3596_s9  ;;  %s3611_s1 = sld [smem:[#allocation5 + $0x51]] }
  0xa0   :  { %457 = vst [vmem:[#allocation3 + $0x10] sm:$0x1] %v456_v35  ;;  %v472_v6 = vadd.f32 %v471_v25, %v468_v48  ;;  %v484_v28 = vadd.f32 %v483_v63, %v479_v13  ;;  %v495_v34 = vmul.f32 %v494_v17, %v2918_v49  ;;  %v503_v29 = vmul.f32 %v502_v50, %v2894_v38  ;;  %s2303_s7 = sld [smem:[#allocation5 + $0x53]]  ;;  %v2675_v13 = vld [vmem:[#allocation3 + $0xc] ss:$0 sm:$0xff] }
  0xa1   :  { %v4534_v35 = vstv %s3603_s13  ;;  %v510_v31 = vstv %s2297_s19  ;;  %v514_v8 = vstv %s2298_s20  ;;  %v900_v48 = vmul.f32 %v2974_v15, %v362_v14  ;;  %s3632_s19 = sld [smem:[#allocation5 + $0x54]]  ;;  %v2677_v14 = vld [vmem:[#allocation3 + $0xc] ss:$0 sm:$0xff] }
  0xa2   :  { %v476_v47 = vadd.f32 %v475_v1, %v472_v6  ;;  %v488_v42 = vadd.f32 %v487_v58, %v484_v28  ;;  %v504_v51 = vadd.f32 %v503_v29, %v499_v43  ;;  %v507_v57 = vmul.f32 %v4534_v35, %v2896_v39  ;;  %s3661_s20 = sld [smem:[#allocation5 + $0x58]] }
  0xa3   :  { %v511_v7 = vmul.f32 %v510_v31, %v2906_v45  ;;  %v515_v62 = vmul.f32 %v514_v8, %v2918_v49  ;;  %v519_v1 = vstv %s2299_s21  ;;  %v522_v6 = vstv %s3609_s3  ;;  %s3749_s21 = sld [smem:[#allocation5 + $0x60]] }
  0xa4   :  { %477 = vst [vmem:[#allocation3 + $0x11] sm:$0x1] %v476_v47  ;;  %v492_v33 = vadd.f32 %v491_v40, %v488_v42  ;;  %v508_v25 = vadd.f32 %v507_v57, %v504_v51  ;;  %v1257_v63 = vmul.f32 %v2978_v19, %v366_v24  ;;  %v2676_v47 = vld [vmem:[#allocation3 + $0xc] ss:$0 sm:$0xff]  ;;  %v523_v58 = vmul.f32 %v522_v6, %v2894_v38  ;;  %s3770_s8 = sld [smem:[#allocation5 + $0x63]] }
  0xa5   :  { %v4533_v37 = vstv %s3611_s1  ;;  %v1615_v40 = vmul.f32 %v2981_v22, %v370_v41  ;;  %v530_v42 = vstv %s2302_s6  ;;  %v902_v43 = vadd.f32 %v2675_v13, %v900_v48  ;;  %s3646_s6 = sld [smem:[#allocation5 + $0x57]] }
  0xa6   :  { %v496_v0 = vadd.f32 %v495_v34, %v492_v33  ;;  %v512_v28 = vadd.f32 %v511_v7, %v508_v25  ;;  %v527_v17 = vmul.f32 %v4533_v37, %v2896_v39  ;;  %v524_v24 = vadd.f32 %v523_v58, %v519_v1  ;;  %s3826_s10 = sld [smem:[#allocation5 + $0x69]] }
  0xa7   :  { %v531_v33 = vmul.f32 %v530_v42, %v2906_v45  ;;  %v534_v29 = vstv %s2303_s7  ;;  %v1617_v51 = vadd.f32 %v2677_v14, %v1615_v40  ;;  %v539_v7 = vstv %s3623_s30  ;;  %s3732_s30 = sld [smem:[#allocation7 + $0x18]] }
  0xa8   :  { %497 = vst [vmem:[#allocation3 + $0x12] sm:$0x1] %v496_v0  ;;  %v516_v34 = vadd.f32 %v515_v62, %v512_v28  ;;  %v1259_v0 = vadd.f32 %v2676_v47, %v1257_v63  ;;  %v528_v41 = vadd.f32 %v527_v17, %v524_v24  ;;  %v535_v57 = vmul.f32 %v534_v29, %v2918_v49  ;;  %v2679_v62 = vld [vmem:[#allocation3 + $0xd] ss:$0 sm:$0xff]  ;;  %s3776_s7 = sld [smem:[#allocation7 + $0x19]] }
  0xa9   :  { %v542_v8 = vstv %s3632_s19  ;;  %v911_v25 = vmul.f32 %v2974_v15, %v382_v12  ;;  %v1268_v48 = vmul.f32 %v2978_v19, %v386_v20  ;;  %v904_v13 = vmax.f32 %v902_v43, 0.0  ;;  %v2680_v20 = vld [vmem:[#allocation3 + $0xd] ss:$0 sm:$0xff]  ;;  %s3872_s11 = sld [smem:[#allocation5 + $0x6d]] }
  0xaa   :  { %517 = vst [vmem:[#allocation3 + $0x13] sm:$0x1] %v516_v34  ;;  %v532_v31 = vadd.f32 %v531_v33, %v528_v41  ;;  %v543_v1 = vmul.f32 %v542_v8, %v2894_v38  ;;  %v1261_v63 = vmax.f32 %v1259_v0, 0.0  ;;  %v1626_v47 = vmul.f32 %v2981_v22, %v390_v30  ;;  %v2681_v17 = vld [vmem:[#allocation3 + $0xd] ss:$0 sm:$0xff]  ;;  %s3881_s12 = sld [smem:[#allocation5 + $0x6e]] }
  0xab   :  { %v1619_v12 = vmax.f32 %v1617_v51, 0.0  ;;  %v922_v58 = vmul.f32 %v2974_v15, %v402_v54  ;;  %v4530_v14 = vstv %s3641_s16  ;;  %v1279_v42 = vmul.f32 %v2978_v19, %v406_v18  ;;  %v2683_v51 = vld [vmem:[#allocation3 + $0xe] ss:$0 sm:$0xff]  ;;  %s3890_s4 = sld [smem:[#allocation5 + $0x6f]] }
  0xac   :  { %v536_v28 = vadd.f32 %v535_v57, %v532_v31  ;;  %v544_v40 = vadd.f32 %v543_v1, %v539_v7  ;;  %v3680_v30 = vmul.f32 %v2981_v22, %v410_v32  ;;  %v547_v34 = vmul.f32 %v4530_v14, %v2896_v39  ;;  %s3927_s14 = sld [smem:[#allocation5 + $0x73]] }
  0xad   :  { %v550_v24 = vstv %s3643_s17  ;;  %v913_v54 = vadd.f32 %v2679_v62, %v911_v25  ;;  %v3691_v33 = vmul.f32 %v2991_v26, %v414_v4  ;;  %v554_v32 = vstv %s3646_s6  ;;  %s3785_s17 = sld [smem:[#allocation5 + $0x64]] }
  0xae   :  { %537 = vst [vmem:[#allocation3 + $0x14] sm:$0x1] %v536_v28  ;;  %v551_v18 = vmul.f32 %v550_v24, %v2906_v45  ;;  %v3698_v43 = vmul.f32 %v3516_v5, %v904_v13  ;;  %v3701_v0 = vmul.f32 %v1261_v63, %v3516_v5  ;;  %v548_v41 = vadd.f32 %v547_v34, %v544_v40  ;;  %s3790_s6 = sld [smem:[#allocation5 + $0x65]] }
  0xaf   :  { %v555_v29 = vmul.f32 %v554_v32, %v2918_v49  ;;  %v3707_v4 = vmul.f32 %v1619_v12, %v3516_v5  ;;  %v933_v57 = vmul.f32 %v2974_v15, %v422_v11  ;;  %v559_v31 = vstv %s3650_s18  ;;  %v2684_v11 = vld [vmem:[#allocation3 + $0xe] ss:$0 sm:$0xff]  ;;  %s3801_s18 = sld [smem:[#allocation5 + $0x66]] }
  0xb0   :  { %v562_v7 = vstv %s3661_s20  ;;  %v1270_v25 = vadd.f32 %v2680_v20, %v1268_v48  ;;  %v552_v62 = vadd.f32 %v551_v18, %v548_v41  ;;  %v4529_v13 = vstv %s3666_s22  ;;  %v2685_v48 = vld [vmem:[#allocation3 + $0xe] ss:$0 sm:$0xff]  ;;  %s3939_s29 = sld [smem:[#allocation5 + $0x74]] }
  0xb1   :  { %v563_v1 = vmul.f32 %v562_v7, %v2894_v38  ;;  %v915_v5 = vmax.f32 %v913_v54, 0.0  ;;  %v3722_v63 = vadd.f32 %v2681_v17, %v1626_v47  ;;  %v567_v28 = vmul.f32 %v4529_v13, %v2896_v39  ;;  %v2686_v20 = vld [vmem:[#allocation3 + $0xe] ss:$0 sm:$0xff]  ;;  %s3965_s9 = sld [smem:[#allocation5 + $0x77]] }
  0xb2   :  { %v570_v12 = vstv %s3672_s27  ;;  %v556_v40 = vadd.f32 %v555_v29, %v552_v62  ;;  %v574_v54 = vstv %s3686_s0  ;;  %v3734_v47 = vadd.f32 %v2683_v51, %v922_v58  ;;  %s3809_s27 = sld [smem:[#allocation5 + $0x67]] }
  0xb3   :  { %v564_v34 = vadd.f32 %v563_v1, %v559_v31  ;;  %v571_v24 = vmul.f32 %v570_v12, %v2906_v45  ;;  %v1290_v17 = vmul.f32 %v2978_v19, %v426_v9  ;;  %v3742_v18 = vmul.f32 %v2981_v22, %v430_v61  ;;  %v2687_v1 = vld [vmem:[#allocation3 + $0xf] ss:$0 sm:$0xff]  ;;  %s3816_s0 = sld [smem:[#allocation7 + $0x1a]] }
  0xb4   :  { %v3747_v32 = vmul.f32 %v2991_v26, %v434_v21  ;;  %557 = vst [vmem:[#allocation3 + $0x15] sm:$0x1] %v556_v40  ;;  %v575_v58 = vmul.f32 %v574_v54, %v2918_v49  ;;  %v579_v29 = vstv %s3695_s2  ;;  %v582_v51 = vstv %s3704_s5  ;;  %s3821_s2 = sld [smem:[#allocation5 + $0x68]] }
  0xb5   :  { %v568_v41 = vadd.f32 %v567_v28, %v564_v34  ;;  %v1272_v9 = vmax.f32 %v1270_v25, 0.0  ;;  %v1630_v61 = vmax.f32 %v3722_v63, 0.0  ;;  %v583_v21 = vmul.f32 %v582_v51, %v2894_v38  ;;  %v2688_v34 = vld [vmem:[#allocation3 + $0xf] ss:$0 sm:$0xff]  ;;  %s3971_s3 = sld [smem:[#allocation7 + $0x1e]] }
  0xb6   :  { %v4531_v31 = vstv %s3714_s23  ;;  %v3764_v62 = vmul.f32 %v3561_v44, %v915_v5  ;;  %v590_v40 = vstv %s3720_s24  ;;  %v3772_v25 = vadd.f32 %v2684_v11, %v1279_v42  ;;  %s3834_s24 = sld [smem:[#allocation5 + $0x6a]] }
  0xb7   :  { %v572_v28 = vadd.f32 %v571_v24, %v568_v41  ;;  %v587_v12 = vmul.f32 %v4531_v31, %v2896_v39  ;;  %v584_v54 = vadd.f32 %v583_v21, %v579_v29  ;;  %v591_v13 = vmul.f32 %v590_v40, %v2906_v45  ;;  %s3977_s19 = sld [smem:[#allocation5 + $0x78]] }
  0xb8   :  { %v594_v14 = vstv %s3728_s25  ;;  %v926_v5 = vmax.f32 %v3734_v47, 0.0  ;;  %v3780_v24 = vadd.f32 %v2685_v48, %v3680_v30  ;;  %v3783_v41 = vadd.f32 %v2686_v20, %v3691_v33  ;;  %v2689_v33 = vld [vmem:[#allocation3 + $0xf] ss:$0 sm:$0xff]  ;;  %s3843_s25 = sld [smem:[#allocation5 + $0x6b]] }
  0xb9   :  { %v576_v31 = vadd.f32 %v575_v58, %v572_v28  ;;  %v588_v42 = vadd.f32 %v587_v12, %v584_v54  ;;  %v595_v11 = vmul.f32 %v594_v14, %v2918_v49  ;;  %v599_v29 = vstv %s3732_s30  ;;  %s3852_s30 = sld [smem:[#allocation7 + $0x1b]] }
  0xba   :  { %4557 = vst [vmem:[#allocation17_spill] sm:$0xff] %v3783_v41  ;;  %v602_v21 = vstv %s3749_s21  ;;  %v3793_v30 = vmul.f32 %v1272_v9, %v3561_v44  ;;  %v3795_v48 = vadd.f32 %v2687_v1, %v933_v57  ;;  %v4532_v58 = vstv %s3754_s26  ;;  %s4007_s20 = sld [smem:[#allocation7 + $0x1f]] }
  0xbb   :  { %577 = vst [vmem:[#allocation3 + $0x16] sm:$0x1] %v576_v31  ;;  %v603_v20 = vmul.f32 %v602_v21, %v2894_v38  ;;  %v3803_v14 = vadd.f32 %v2688_v34, %v1290_v17  ;;  %v592_v28 = vadd.f32 %v591_v13, %v588_v42  ;;  %v607_v12 = vmul.f32 %v4532_v58, %v2896_v39  ;;  %v2690_v17 = vld [vmem:[#allocation3 + $0xf] ss:$0 sm:$0xff]  ;;  %s4013_s5 = sld [smem:[#allocation5 + $0x7c]] }
  0xbc   :  { %v610_v9 = vstv %s3761_s28  ;;  %v944_v57 = vmul.f32 %v2974_v15, %v442_v36  ;;  %v614_v40 = vstv %s3770_s8  ;;  %v3848_v35 = vmul.f32 %v1630_v61, %v3561_v44  ;;  %s3867_s28 = sld [smem:[#allocation5 + $0x6c]] }
  0xbd   :  { %v604_v31 = vadd.f32 %v603_v20, %v599_v29  ;;  %v611_v1 = vmul.f32 %v610_v9, %v2906_v45  ;;  %v596_v54 = vadd.f32 %v595_v11, %v592_v28  ;;  %v615_v36 = vmul.f32 %v614_v40, %v2918_v49  ;;  %v2692_v40 = vld [vmem:[#allocation3 + $0x10] ss:$0 sm:$0xff]  ;;  %s3896_s8 = sld [smem:[#allocation7 + $0x1c]] }
  0xbe   :  { %v619_v29 = vstv %s3776_s7  ;;  %v622_v20 = vstv %s3785_s17  ;;  %v937_v9 = vmax.f32 %v3795_v48, 0.0  ;;  %v4536_v28 = vstv %s3790_s6  ;;  %s3900_s7 = sld [smem:[#allocation5 + $0x70]] }
  0xbf   :  { %v608_v42 = vadd.f32 %v607_v12, %v604_v31  ;;  %597 = vst [vmem:[#allocation3 + $0x17] sm:$0x1] %v596_v54  ;;  %v623_v11 = vmul.f32 %v622_v20, %v2894_v38  ;;  %v3837_v12 = vadd.f32 %v2689_v33, %v3742_v18  ;;  %v2691_v31 = vld [vmem:[#allocation3 + $0x10] ss:$0 sm:$0xff]  ;;  %v627_v37 = vmul.f32 %v4536_v28, %v2896_v39  ;;  %s4038_s21 = sld [smem:[#allocation5 + $0x7f]] }
  0xc0   :  { %v630_v54 = vstv %s3801_s18  ;;  %v634_v33 = vstv %s3809_s27  ;;  %v3865_v63 = vmul.f32 %v2991_v26, %v454_v55  ;;  %s3905_s18 = sld [smem:[#allocation5 + $0x71]]  ;;  %v674_v23 = vstv %s3890_s4 }
  0xc1   :  { %v612_v34 = vadd.f32 %v611_v1, %v608_v42  ;;  %v624_v53 = vadd.f32 %v623_v11, %v619_v29  ;;  %v631_v18 = vmul.f32 %v630_v54, %v2906_v45  ;;  %v1301_v1 = vmul.f32 %v2978_v19, %v446_v3  ;;  %s3915_s27 = sld [smem:[#allocation5 + $0x72]] }
  0xc2   :  { %v3860_v42 = vmul.f32 %v2981_v22, %v450_v52  ;;  %v635_v29 = vmul.f32 %v634_v33, %v2918_v49  ;;  %v639_v11 = vstv %s3816_s0  ;;  %v642_v54 = vstv %s3821_s2  ;;  %s3933_s0 = sld [smem:[#allocation7 + $0x1d]] }
  0xc3   :  { %v616_v44 = vadd.f32 %v615_v36, %v612_v34  ;;  %v628_v61 = vadd.f32 %v627_v37, %v624_v53  ;;  %v3875_v52 = vadd.f32 %v2691_v31, %v944_v57  ;;  %v643_v55 = vmul.f32 %v642_v54, %v2894_v38  ;;  %v2695_v37 = vld [vmem:[#allocation3 + $0x11] ss:$0 sm:$0xff]  ;;  %v2699_v36 = vld [vmem:[#allocation3 + $0x12] ss:$0 sm:$0xff]  ;;  %s4002_s4 = sld [smem:[#allocation5 + $0x7b]] }
  0xc4   :  { %v4537_v34 = vstv %s3826_s10  ;;  %v3884_v53 = vadd.f32 %v2690_v17, %v3747_v32  ;;  %v650_v57 = vstv %s3834_s24  ;;  %v3892_v31 = vadd.f32 %v2692_v40, %v1301_v1  ;;  %s3943_s24 = sld [smem:[#allocation5 + $0x75]] }
  0xc5   :  { %617 = vst [vmem:[#allocation3 + $0x18] sm:$0x1] %v616_v44  ;;  %v632_v33 = vadd.f32 %v631_v18, %v628_v61  ;;  %v647_v3 = vmul.f32 %v4537_v34, %v2896_v39  ;;  %v644_v44 = vadd.f32 %v643_v55, %v639_v11  ;;  %v651_v28 = vmul.f32 %v650_v57, %v2906_v45  ;;  %s4050_s17 = sld [smem:[#allocation9 + $0xf]] }
  0xc6   :  { %4558 = vst [vmem:[#allocation18_spill] sm:$0xff] %v3884_v53  ;;  %v654_v32 = vstv %s3843_s25  ;;  %v659_v61 = vstv %s3852_s30  ;;  %v907_v40 = vadd.f32 %v3698_v43, %v3484_v16  ;;  %v662_v11 = vstv %s3867_s28  ;;  %s3953_s25 = sld [smem:[#allocation5 + $0x76]] }
  0xc7   :  { %v636_v17 = vadd.f32 %v635_v29, %v632_v33  ;;  %v655_v18 = vmul.f32 %v654_v32, %v2918_v49  ;;  %v648_v1 = vadd.f32 %v647_v3, %v644_v44  ;;  %v948_v55 = vmax.f32 %v3875_v52, 0.0  ;;  %s3981_s30 = sld [smem:[#allocation5 + $0x79]] }
  0xc8   :  { %v955_v29 = vmul.f32 %v2974_v15, %v462_v27  ;;  %v663_v33 = vmul.f32 %v662_v11, %v2894_v38  ;;  %v4539_v57 = vstv %s3872_s11  ;;  %v3918_v16 = vadd.f32 %v3764_v62, %v907_v40  ;;  %v2703_v62 = vld [vmem:[#allocation3 + $0x13] ss:$0 sm:$0xff]  ;;  %s2394_s2 = sld [smem:[#allocation9 + $0x12]] }
  0xc9   :  { %637 = vst [vmem:[#allocation3 + $0x19] sm:$0x1] %v636_v17  ;;  %v966_v43 = vmul.f32 %v2974_v15, %v482_v56  ;;  %v652_v3 = vadd.f32 %v651_v28, %v648_v1  ;;  %v667_v44 = vmul.f32 %v4539_v57, %v2896_v39  ;;  %v670_v27 = vstv %s3881_s12  ;;  %s3990_s12 = sld [smem:[#allocation5 + $0x7a]] }
  0xca   :  { %v3929_v32 = vadd.f32 %v2695_v37, %v955_v29  ;;  %v664_v17 = vadd.f32 %v663_v33, %v659_v61  ;;  %v671_v34 = vmul.f32 %v670_v27, %v2906_v45  ;;  %v675_v40 = vmul.f32 %v674_v23, %v2918_v49  ;;  %v2705_v27 = vld [vmem:[#allocation3 + $0x15] ss:$0 sm:$0xff]  ;;  %s4083_s28 = sld [smem:[#allocation9 + $0x13]] }
  0xcb   :  { %v3935_v56 = vadd.f32 %v2699_v36, %v966_v43  ;;  %v656_v28 = vadd.f32 %v655_v18, %v652_v3  ;;  %v679_v1 = vstv %s3896_s8  ;;  %v682_v29 = vstv %s3900_s7  ;;  %v2704_v18 = vld [vmem:[#allocation3 + $0x14] ss:$0 sm:$0xff]  ;;  %s4018_s8 = sld [smem:[#allocation5 + $0x7d]] }
  0xcc   :  { %v668_v61 = vadd.f32 %v667_v44, %v664_v17  ;;  %v977_v33 = vmul.f32 %v2974_v15, %v502_v50  ;;  %v683_v23 = vmul.f32 %v682_v29, %v2894_v38  ;;  %v4540_v43 = vstv %s3905_s18  ;;  %s4089_s7 = sld [smem:[#allocation9 + $0x14]] }
  0xcd   :  { %657 = vst [vmem:[#allocation3 + $0x1a] sm:$0x1] %v656_v28  ;;  %v988_v3 = vmul.f32 %v2974_v15, %v522_v6  ;;  %v999_v44 = vmul.f32 %v2974_v15, %v542_v8  ;;  %v687_v50 = vmul.f32 %v4540_v43, %v2896_v39  ;;  %v690_v28 = vstv %s3915_s27  ;;  %s4028_s27 = sld [smem:[#allocation5 + $0x7e]] }
  0xce   :  { %v672_v17 = vadd.f32 %v671_v34, %v668_v61  ;;  %v3967_v57 = vadd.f32 %v2703_v62, %v977_v33  ;;  %v684_v58 = vadd.f32 %v683_v23, %v679_v1  ;;  %v691_v13 = vmul.f32 %v690_v28, %v2906_v45  ;;  %v2706_v1 = vld [vmem:[#allocation3 + $0x16] ss:$0 sm:$0xff] }
  0xcf   :  { %v694_v36 = vstv %s3927_s14  ;;  %v3973_v6 = vadd.f32 %v2704_v18, %v988_v3  ;;  %v699_v61 = vstv %s3933_s0  ;;  %v702_v23 = vstv %s3939_s29  ;;  %v2707_v3 = vld [vmem:[#allocation3 + $0x17] ss:$0 sm:$0xff]  ;;  %s4044_s14 = sld [smem:[#allocation9 + $0xe]] }
  0xd0   :  { %v676_v8 = vadd.f32 %v675_v40, %v672_v17  ;;  %v695_v34 = vmul.f32 %v694_v36, %v2918_v49  ;;  %v688_v33 = vadd.f32 %v687_v50, %v684_v58  ;;  %v3984_v40 = vadd.f32 %v2705_v27, %v999_v44  ;;  %s4054_s0 = sld [smem:[#allocation9 + $0x10]] }
  0xd1   :  { %v703_v36 = vmul.f32 %v702_v23, %v2894_v38  ;;  %v4541_v17 = vstv %s3943_s24  ;;  %v1010_v58 = vmul.f32 %v2974_v15, %v562_v7  ;;  %v1021_v50 = vmul.f32 %v2974_v15, %v582_v51  ;;  %v2708_v51 = vld [vmem:[#allocation3 + $0x18] ss:$0 sm:$0xff]  ;;  %s4137_s29 = sld [smem:[#allocation9 + $0x19]] }
  0xd2   :  { %677 = vst [vmem:[#allocation3 + $0x1b] sm:$0x1] %v676_v8  ;;  %v692_v28 = vadd.f32 %v691_v13, %v688_v33  ;;  %v707_v44 = vmul.f32 %v4541_v17, %v2896_v39  ;;  %v710_v27 = vstv %s3953_s25  ;;  %v714_v62 = vstv %s3965_s9  ;;  %s4064_s25 = sld [smem:[#allocation9 + $0x11]] }
  0xd3   :  { %v704_v43 = vadd.f32 %v703_v36, %v699_v61  ;;  %v711_v18 = vmul.f32 %v710_v27, %v2906_v45  ;;  %v4009_v7 = vadd.f32 %v2706_v1, %v1010_v58  ;;  %v715_v33 = vmul.f32 %v714_v62, %v2918_v49  ;;  %v2709_v36 = vld [vmem:[#allocation3 + $0x19] ss:$0 sm:$0xff]  ;;  %s4099_s9 = sld [smem:[#allocation9 + $0x15]] }
  0xd4   :  { %v696_v13 = vadd.f32 %v695_v34, %v692_v28  ;;  %v719_v17 = vstv %s3971_s3  ;;  %v4015_v61 = vadd.f32 %v2707_v3, %v1021_v50  ;;  %v4542_v8 = vstv %s3977_s19  ;;  %s2402_s3 = sld [smem:[#allocation9 + $0x16]] }
  0xd5   :  { %v708_v27 = vadd.f32 %v707_v44, %v704_v43  ;;  %v1032_v34 = vmul.f32 %v2974_v15, %v602_v21  ;;  %v723_v62 = vmul.f32 %v4542_v8, %v2894_v38  ;;  %v4543_v58 = vstv %s3981_s30 }
  0xd6   :  { %697 = vst [vmem:[#allocation3 + $0x1c] sm:$0x1] %v696_v13  ;;  %v1043_v43 = vmul.f32 %v2974_v15, %v622_v20  ;;  %v727_v28 = vmul.f32 %v4543_v58, %v2896_v39  ;;  %v730_v44 = vstv %s3990_s12  ;;  %v734_v8 = vstv %s4002_s4  ;;  %v2710_v20 = vld [vmem:[#allocation3 + $0x1a] ss:$0 sm:$0xff]  ;;  %s4117_s12 = sld [smem:[#allocation9 + $0x17]] }
  0xd7   :  { %v712_v50 = vadd.f32 %v711_v18, %v708_v27  ;;  %v4040_v21 = vadd.f32 %v2708_v51, %v1032_v34  ;;  %v724_v13 = vadd.f32 %v723_v62, %v719_v17  ;;  %v731_v1 = vmul.f32 %v730_v44, %v2906_v45  ;;  %v2693_v18 = vld [vmem:[#allocation3 + $0x10] ss:$0 sm:$0xff]  ;;  %s4127_s4 = sld [smem:[#allocation9 + $0x18]] }
  0xd8   :  { %v4046_v3 = vadd.f32 %v2709_v36, %v1043_v43  ;;  %v735_v58 = vmul.f32 %v734_v8, %v2918_v49  ;;  %v739_v51 = vstv %s4007_s20  ;;  %v4544_v62 = vstv %s4013_s5  ;;  %s4148_s20 = sld [smem:[#allocation9 + $0x1a]] }
  0xd9   :  { %v716_v27 = vadd.f32 %v715_v33, %v712_v50  ;;  %v728_v34 = vadd.f32 %v727_v28, %v724_v13  ;;  %v1054_v43 = vmul.f32 %v2974_v15, %v642_v54  ;;  %v2711_v33 = vld [vmem:[#allocation3 + $0x1b] ss:$0 sm:$0xff]  ;;  %v743_v8 = vmul.f32 %v4544_v62, %v2894_v38  ;;  %v2694_v13 = vld [vmem:[#allocation3 + $0x10] ss:$0 sm:$0xff] }
  0xda   :  { %v4545_v50 = vstv %s4018_s8  ;;  %v1065_v28 = vmul.f32 %v2974_v15, %v662_v11  ;;  %v1076_v44 = vmul.f32 %v2974_v15, %v682_v29  ;;  %v750_v17 = vstv %s4028_s27  ;;  %s4156_s27 = sld [smem:[#allocation9 + $0x1b]] }
  0xdb   :  { %717 = vst [vmem:[#allocation3 + $0x1d] sm:$0x1] %v716_v27  ;;  %v732_v36 = vadd.f32 %v731_v1, %v728_v34  ;;  %v747_v54 = vmul.f32 %v4545_v50, %v2896_v39  ;;  %v4076_v27 = vadd.f32 %v2710_v20, %v1054_v43  ;;  %v4079_v38 = vadd.f32 %v2693_v18, %v3860_v42  ;;  %v2720_v50 = vld [vmem:[#allocation3 + $0x17] ss:$0 sm:$0xff] }
  0xdc   :  { %v744_v62 = vadd.f32 %v743_v8, %v739_v51  ;;  %v751_v11 = vmul.f32 %v750_v17, %v2906_v45  ;;  %v754_v37 = vstv %s4038_s21  ;;  %v4087_v39 = vstv %s4044_s14  ;;  %s4186_s21 = sld [smem:[#allocation9 + $0x1e]] }
  0xdd   :  { %v2712_v29 = vld [vmem:[#allocation3 + $0x1c] ss:$0 sm:$0xff]  ;;  %v736_v1 = vadd.f32 %v735_v58, %v732_v36  ;;  %v755_v34 = vmul.f32 %v754_v37, %v2918_v49  ;;  %v4091_v20 = vadd.f32 %v2711_v33, %v1065_v28  ;;  %v928_v45 = vmul.f32 %v4087_v39, %v926_v5  ;;  %s4193_s14 = sld [smem:[#allocation9 + $0x1f]] }
  0xde   :  { %v748_v42 = vadd.f32 %v747_v54, %v744_v62  ;;  %v4097_v18 = vstv %s4050_s17  ;;  %v1058_v58 = vmax.f32 %v4076_v27, 0.0  ;;  %v4103_v49 = vadd.f32 %v2694_v13, %v3865_v63  ;;  %s4350_s17 = sld [smem:[#allocation5 + $0x6e]] }
  0xdf   :  { %737 = vst [vmem:[#allocation3 + $0x1e] sm:$0x1] %v736_v1  ;;  %v939_v37 = vmul.f32 %v4097_v18, %v937_v9  ;;  %v4109_v51 = vstv %s4054_s0  ;;  %v4111_v47 = vadd.f32 %v2712_v29, %v1076_v44  ;;  %v929_v17 = vadd.f32 %v928_v45, %v3918_v16  ;;  %s4354_s0 = sld [smem:[#allocation5 + $0x72]] }
  0xe0   :  { %4559 = vst [vmem:[#allocation19_spill] sm:$0xff] %v4103_v49  ;;  %v752_v5 = vadd.f32 %v751_v11, %v748_v42  ;;  %v4115_v62 = vstv %s4064_s25  ;;  %v1087_v63 = vmul.f32 %v2974_v15, %v702_v23  ;;  %v950_v48 = vmul.f32 %v4109_v51, %v948_v55  ;;  %s4358_s25 = sld [smem:[#allocation5 + $0x76]] }
  0xe1   :  { %4560 = vst [vmem:[#allocation20_spill] sm:$0xff] %v4109_v51  ;;  %v4125_v9 = vstv %s2394_s2  ;;  %v1069_v16 = vmax.f32 %v4091_v20, 0.0  ;;  %v1080_v36 = vmax.f32 %v4111_v47, 0.0  ;;  %v940_v33 = vadd.f32 %v939_v37, %v929_v17  ;;  %s4366_s2 = sld [smem:[#allocation5 + $0x7a]] }
  0xe2   :  { %4561 = vst [vmem:[#allocation21_spill] sm:$0xff] %v4115_v62  ;;  %v756_v43 = vadd.f32 %v755_v34, %v752_v5  ;;  %v4562_v8 = vmax.f32 %v3929_v32, 0.0  ;;  %v4135_v52 = vstv %s4083_s28  ;;  %v2713_v55 = vld [vmem:[#allocation3 + $0x1d] ss:$0 sm:$0xff]  ;;  %v4563_v28 = vmax.f32 %v3935_v56, 0.0  ;;  %s4372_s28 = sld [smem:[#allocation5 + $0x7e]] }
  0xe3   :  { %v4564_v13 = vmax.f32 %v3967_v57, 0.0  ;;  %v4146_v11 = vstv %s4089_s7  ;;  %v4565_v32 = vstv %s3977_s19  ;;  %v951_v1 = vadd.f32 %v950_v48, %v940_v33  ;;  %s2414_s19 = sld [smem:[#allocation9 + $0x1c]]  ;;  %v2696_v48 = vld [vmem:[#allocation3 + $0x11] ss:$0 sm:$0xff] }
  0xe4   :  { %v961_v23 = vmul.f32 %v4115_v62, %v4562_v8  ;;  %v972_v44 = vmul.f32 %v4125_v9, %v4563_v28  ;;  %v1098_v29 = vmul.f32 %v2974_v15, %v4565_v32  ;;  %757 = vst [vmem:[#allocation3 + $0x1f] sm:$0x1] %v756_v43  ;;  %v4154_v34 = vstv %s4099_s9  ;;  %s4375_s7 = sld [smem:[#allocation9 + $0xe]] }
  0xe5   :  { %v983_v54 = vmul.f32 %v4135_v52, %v4564_v13  ;;  %v1089_v56 = vadd.f32 %v2713_v55, %v1087_v63  ;;  %v4566_v20 = vstv %s4013_s5  ;;  %v4567_v42 = vmax.f32 %v3973_v6, 0.0  ;;  %s2416_s5 = sld [smem:[#allocation9 + $0x1d]] }
  0xe6   :  { %v1109_v57 = vmul.f32 %v2974_v15, %v4566_v20  ;;  %v4164_v37 = vstv %s2402_s3  ;;  %v1264_v47 = vadd.f32 %v3701_v0, %v3490_v10  ;;  %v4568_v5 = vmax.f32 %v3772_v25, 0.0  ;;  %v2714_v55 = vld [vmem:[#allocation3 + $0x1e] ss:$0 sm:$0xff]  ;;  %s4379_s9 = sld [smem:[#allocation9 + $0xf]] }
  0xe7   :  { %v994_v45 = vmul.f32 %v4146_v11, %v4567_v42  ;;  %v962_v63 = vadd.f32 %v961_v23, %v951_v1  ;;  %v4569_v15 = vmax.f32 %v3984_v40, 0.0  ;;  %v4175_v43 = vstv %s4117_s12  ;;  %s4382_s3 = sld [smem:[#allocation9 + $0x10]] }
  0xe8   :  { %v1285_v17 = vmul.f32 %v4568_v5, %v4087_v39  ;;  %v4570_v33 = vmax.f32 %v3803_v14, 0.0  ;;  %v4571_v10 = vmax.f32 %v4009_v7, 0.0  ;;  %v4184_v25 = vstv %s4127_s4  ;;  %s4501_s12 = sld [smem:[#allocation9 + $0x1c]] }
  0xe9   :  { %v1005_v6 = vmul.f32 %v4154_v34, %v4569_v15  ;;  %v1275_v40 = vadd.f32 %v3793_v30, %v1264_v47  ;;  %v1305_v23 = vmax.f32 %v3892_v31, 0.0  ;;  %v973_v28 = vadd.f32 %v972_v44, %v962_v63  ;;  %s4506_s4 = sld [smem:[#allocation9 + $0x1d]] }
  0xea   :  { %v1296_v8 = vmul.f32 %v4570_v33, %v4097_v18  ;;  %v1016_v0 = vmul.f32 %v4164_v37, %v4571_v10  ;;  %v4191_v13 = vstv %s4137_s29  ;;  %v1091_v32 = vmax.f32 %v1089_v56, 0.0  ;;  %s4391_s29 = sld [smem:[#allocation5 + $0x47]] }
  0xeb   :  { %v4572_v14 = vstv %s3564_s15  ;;  %v4573_v1 = vmax.f32 %v4015_v61, 0.0  ;;  %v4202_v42 = vstv %s4148_s20  ;;  %v1100_v5 = vadd.f32 %v2714_v55, %v1098_v29  ;;  %v2715_v29 = vld [vmem:[#allocation3 + $0x1f] ss:$0 sm:$0xff]  ;;  %s4576_s15 = sld [smem:[#allocation16_spill]] }
  0xec   :  { %v1312_v7 = vmul.f32 %v2978_v19, %v4572_v14  ;;  %v1286_v15 = vadd.f32 %v1285_v17, %v1275_v40  ;;  %v984_v30 = vadd.f32 %v983_v54, %v973_v28  ;;  %v4574_v31 = vmax.f32 %v4040_v21, 0.0  ;;  %v2700_v17 = vld [vmem:[#allocation3 + $0x12] ss:$0 sm:$0xff]  ;;  %s4395_s20 = sld [smem:[#allocation9 + $0x11]] }
  0xed   :  { %v1027_v20 = vmul.f32 %v4175_v43, %v4573_v1  ;;  %v4575_v56 = vmax.f32 %v4046_v3, 0.0  ;;  %v4211_v63 = vstv %s4156_s27  ;;  %v4216_v61 = vmul.f32 %v4202_v42, %v1058_v58  ;;  %v2716_v58 = vld [vmem:[#allocation3 + $0x13] ss:$0 sm:$0xff]  ;;  %s4399_s27 = sld [smem:[#allocation5 + $0x4b]] }
  0xee   :  { %v1038_v44 = vmul.f32 %v4184_v25, %v4574_v31  ;;  %v4218_v33 = vstv %s2414_s19  ;;  %v1297_v54 = vadd.f32 %v1296_v8, %v1286_v15  ;;  %v1307_v21 = vmul.f32 %v1305_v23, %v4109_v51  ;;  %s4402_s19 = sld [smem:[#allocation9 + $0x12]] }
  0xef   :  { %v1049_v47 = vmul.f32 %v4191_v13, %v4575_v56  ;;  %v995_v10 = vadd.f32 %v994_v45, %v984_v30  ;;  %v4222_v3 = vmul.f32 %v4211_v63, %v1069_v16  ;;  %v4224_v55 = vstv %s2416_s5  ;;  %v2717_v45 = vld [vmem:[#allocation3 + $0x14] ss:$0 sm:$0xff]  ;;  %v2718_v30 = vld [vmem:[#allocation3 + $0x15] ss:$0 sm:$0xff]  ;;  %s4407_s5 = sld [smem:[#allocation5 + $0x4f]] }
  0xf0   :  { %v1314_v27 = vadd.f32 %v2696_v48, %v1312_v7  ;;  %v4227_v40 = vmul.f32 %v4218_v33, %v1080_v36  ;;  %v1102_v28 = vmax.f32 %v1100_v5, 0.0  ;;  %v1111_v8 = vadd.f32 %v2715_v29, %v1109_v57  ;;  %v2719_v48 = vld [vmem:[#allocation3 + $0x16] ss:$0 sm:$0xff] }
  0xf1   :  { %v1308_v23 = vadd.f32 %v1307_v21, %v1297_v54  ;;  %v1006_v14 = vadd.f32 %v1005_v6, %v995_v10  ;;  %v4230_v16 = vmul.f32 %v4224_v55, %v1091_v32  ;;  %v4233_v1 = vstv %s4186_s21  ;;  %s4410_s21 = sld [smem:[#allocation9 + $0x13]] }
  0xf2   :  { %v1316_v15 = vmax.f32 %v1314_v27, 0.0  ;;  %v4236_v7 = vstv %s4193_s14  ;;  %v4577_v31 = vstv %s4576_s15  ;;  %v4578_v5 = vstv %s3603_s13  ;;  %s4281_s13 = sld [smem:[#allocation5 + $0x46]] }
  0xf3   :  { %v1323_v36 = vmul.f32 %v2978_v19, %v4577_v31  ;;  %v1334_v57 = vmul.f32 %v2978_v19, %v4578_v5  ;;  %v4579_v56 = vstv %s3611_s1  ;;  %v1017_v6 = vadd.f32 %v1016_v0, %v1006_v14  ;;  %v2721_v0 = vld [vmem:[#allocation3 + $0x18] ss:$0 sm:$0xff]  ;;  %s4285_s1 = sld [smem:[#allocation5 + $0x4a]] }
  0xf4   :  { %v1345_v29 = vmul.f32 %v2978_v19, %v4579_v56  ;;  %v1318_v32 = vmul.f32 %v1316_v15, %v4115_v62  ;;  %v4580_v54 = vstv %s3641_s16  ;;  %v4581_v10 = vstv %s3666_s22  ;;  %s4290_s16 = sld [smem:[#allocation5 + $0x4e]] }
  0xf5   :  { %v1356_v21 = vmul.f32 %v2978_v19, %v4580_v54  ;;  %v1367_v27 = vmul.f32 %v2978_v19, %v4581_v10  ;;  %v1113_v26 = vmax.f32 %v1111_v8, 0.0  ;;  %v1325_v31 = vadd.f32 %v2700_v17, %v1323_v36  ;;  %s4296_s22 = sld [smem:[#allocation5 + $0x52]] }
  0xf6   :  { %v1336_v49 = vadd.f32 %v2716_v58, %v1334_v57  ;;  %v1347_v41 = vadd.f32 %v2717_v45, %v1345_v29  ;;  %v1028_v5 = vadd.f32 %v1027_v20, %v1017_v6  ;;  %v1319_v60 = vadd.f32 %v1318_v32, %v1308_v23  ;;  %s4416_s14 = sld [smem:[#allocation5 + $0x53]] }
  0xf7   :  { %v1358_v53 = vadd.f32 %v2718_v30, %v1356_v21  ;;  %v1369_v56 = vadd.f32 %v2719_v48, %v1367_v27  ;;  %v1327_v14 = vmax.f32 %v1325_v31, 0.0  ;;  %v4582_v59 = vstv %s3714_s23  ;;  %v2724_v30 = vld [vmem:[#allocation3 + $0x1b] ss:$0 sm:$0xff]  ;;  %v2725_v48 = vld [vmem:[#allocation3 + $0x1c] ss:$0 sm:$0xff]  ;;  %s4305_s23 = sld [smem:[#allocation5 + $0x56]] }
  0xf8   :  { %v1338_v15 = vmax.f32 %v1336_v49, 0.0  ;;  %v1349_v2 = vmax.f32 %v1347_v41, 0.0  ;;  %v1378_v54 = vmul.f32 %v2978_v19, %v4582_v59  ;;  %v1039_v62 = vadd.f32 %v1038_v44, %v1028_v5  ;;  %v2722_v49 = vld [vmem:[#allocation3 + $0x19] ss:$0 sm:$0xff]  ;;  %v2723_v59 = vld [vmem:[#allocation3 + $0x1a] ss:$0 sm:$0xff] }
  0xf9   :  { %v1104_v10 = vmul.f32 %v4233_v1, %v1102_v28  ;;  %v1360_v51 = vmax.f32 %v1358_v53, 0.0  ;;  %v4583_v8 = vstv %s3754_s26  ;;  %v4262_v20 = vmul.f32 %v4236_v7, %v1113_v26  ;;  %s4315_s26 = sld [smem:[#allocation5 + $0x5a]] }
  0xfa   :  { %v1389_v17 = vmul.f32 %v2978_v19, %v4583_v8  ;;  %v1329_v58 = vmul.f32 %v1327_v14, %v4125_v9  ;;  %v1371_v23 = vmax.f32 %v1369_v56, 0.0  ;;  %v1380_v41 = vadd.f32 %v2720_v50, %v1378_v54  ;;  %v2726_v56 = vld [vmem:[#allocation3 + $0x1d] ss:$0 sm:$0xff]  ;;  %v2727_v54 = vld [vmem:[#allocation3 + $0x1e] ss:$0 sm:$0xff]  ;;  %s4419_s15 = sld [smem:[#allocation5 + $0x57]] }
  0xfb   :  { %v1050_v44 = vadd.f32 %v1049_v47, %v1039_v62  ;;  %v1340_v28 = vmul.f32 %v1338_v15, %v4135_v52  ;;  %v1351_v53 = vmul.f32 %v1349_v2, %v4146_v11  ;;  %v1362_v26 = vmul.f32 %v1360_v51, %v4154_v34 }
  0xfc   :  { %v1391_v45 = vadd.f32 %v2721_v0, %v1389_v17  ;;  %v1330_v36 = vadd.f32 %v1329_v58, %v1319_v60  ;;  %v4584_v57 = vstv %s3790_s6  ;;  %v4585_v6 = vstv %s3826_s10  ;;  %s4327_s6 = sld [smem:[#allocation5 + $0x5e]] }
  0xfd   :  { %v1400_v29 = vmul.f32 %v2978_v19, %v4584_v57  ;;  %v1411_v50 = vmul.f32 %v2978_v19, %v4585_v6  ;;  %v1061_v32 = vadd.f32 %v4216_v61, %v1050_v44  ;;  %v1382_v21 = vmax.f32 %v1380_v41, 0.0  ;;  %s4454_s10 = sld [smem:[#allocation5 + $0x67]] }
  0xfe   :  { %v4586_v62 = vstv %s3872_s11  ;;  %v4587_v27 = vstv %s3905_s18  ;;  %v1341_v31 = vadd.f32 %v1340_v28, %v1330_v36  ;;  %v1393_v60 = vmax.f32 %v1391_v45, 0.0  ;;  %v2728_v36 = vld [vmem:[#allocation3 + $0x1f] ss:$0 sm:$0xff]  ;;  %s4593_s18 = sld [smem:[#allocation22_spill]] }
  0xff   :  { %v1422_v47 = vmul.f32 %v2978_v19, %v4586_v62  ;;  %v1433_v2 = vmul.f32 %v2978_v19, %v4587_v27  ;;  %v1402_v5 = vadd.f32 %v2722_v49, %v1400_v29  ;;  %v1413_v51 = vadd.f32 %v2723_v59, %v1411_v50  ;;  %s4459_s11 = sld [smem:[#allocation9 + $0x18]] }
 0x100   :  { %v1072_v0 = vadd.f32 %v4222_v3, %v1061_v32  ;;  %v1373_v61 = vmul.f32 %v1371_v23, %v4164_v37  ;;  %v1352_v8 = vadd.f32 %v1351_v53, %v1341_v31  ;;  %v4588_v41 = vstv %s3943_s24  ;;  %v2697_v31 = vld [vmem:[#allocation3 + $0x11] ss:$0 sm:$0xff]  ;;  %s4338_s24 = sld [smem:[#allocation5 + $0x62]] }
 0x101   :  { %v1424_v14 = vadd.f32 %v2724_v30, %v1422_v47  ;;  %v1435_v15 = vadd.f32 %v2725_v48, %v1433_v2  ;;  %v1404_v17 = vmax.f32 %v1402_v5, 0.0  ;;  %v1415_v58 = vmax.f32 %v1413_v51, 0.0 }
 0x102   :  { %v1444_v49 = vmul.f32 %v2978_v19, %v4588_v41  ;;  %v1083_v59 = vadd.f32 %v4227_v40, %v1072_v0  ;;  %v4589_v28 = vstv %s3981_s30  ;;  %v1363_v45 = vadd.f32 %v1362_v26, %v1352_v8  ;;  %v2730_v8 = vld [vmem:[#allocation3 + $0x14] ss:$0 sm:$0xff]  ;;  %v4594_v41 = vld [vmem:[#allocation20_spill] sm:$0xff]  ;;  %s4344_s30 = sld [smem:[#allocation5 + $0x66]] }
 0x103   :  { %v1426_v44 = vmax.f32 %v1424_v14, 0.0  ;;  %v1437_v3 = vmax.f32 %v1435_v15, 0.0  ;;  %v1455_v23 = vmul.f32 %v2978_v19, %v4589_v28  ;;  %v1384_v53 = vmul.f32 %v1382_v21, %v4175_v43  ;;  %v2701_v14 = vld [vmem:[#allocation3 + $0x12] ss:$0 sm:$0xff] }
 0x104   :  { %v1395_v30 = vmul.f32 %v1393_v60, %v4184_v25  ;;  %v1446_v48 = vadd.f32 %v2726_v56, %v1444_v49  ;;  %v1094_v57 = vadd.f32 %v4230_v16, %v1083_v59  ;;  %v1406_v29 = vmul.f32 %v1404_v17, %v4191_v13 }
 0x105   :  { %v1417_v40 = vmul.f32 %v1415_v58, %v4202_v42  ;;  %v4303_v6 = vadd.f32 %v2727_v54, %v1455_v23  ;;  %v1374_v50 = vadd.f32 %v1373_v61, %v1363_v45  ;;  %v4590_v62 = vstv %s4018_s8  ;;  %s4347_s8 = sld [smem:[#allocation5 + $0x6a]] }
 0x106   :  { %v1448_v32 = vmax.f32 %v1446_v48, 0.0  ;;  %v1466_v26 = vmul.f32 %v2978_v19, %v4590_v62  ;;  %v1622_v21 = vadd.f32 %v3707_v4, %v3492_v46  ;;  %v1105_v47 = vadd.f32 %v1104_v10, %v1094_v57  ;;  %v2732_v57 = vld [vmem:[#allocation3 + $0x16] ss:$0 sm:$0xff] }
 0x107   :  { %v1428_v16 = vmul.f32 %v1426_v44, %v4211_v63  ;;  %v1439_v27 = vmul.f32 %v1437_v3, %v4218_v33  ;;  %v1459_v2 = vmax.f32 %v4303_v6, 0.0  ;;  %v1385_v60 = vadd.f32 %v1384_v53, %v1374_v50  ;;  %v2731_v44 = vld [vmem:[#allocation3 + $0x15] ss:$0 sm:$0xff] }
 0x108   :  { %v1468_v5 = vadd.f32 %v2728_v36, %v1466_v26  ;;  %v1633_v51 = vadd.f32 %v3848_v35, %v1622_v21  ;;  %v4591_v19 = vmax.f32 %v3780_v24, 0.0  ;;  %v1116_v4 = vadd.f32 %v4262_v20, %v1105_v47  ;;  %v2729_v20 = vld [vmem:[#allocation3 + $0x13] ss:$0 sm:$0xff]  ;;  %v4595_v26 = vld [vmem:[#allocation21_spill] sm:$0xff] }
 0x109   :  { %v4592_v10 = vmax.f32 %v3837_v12, 0.0  ;;  %v1663_v0 = vmax.f32 %v4079_v38, 0.0  ;;  %v1669_v61 = vstv %s4281_s13  ;;  %v1396_v15 = vadd.f32 %v1395_v30, %v1385_v60  ;;  %s4426_s13 = sld [smem:[#allocation5 + $0x5b]] }
 0x10a   :  { %v1643_v46 = vmul.f32 %v4591_v19, %v4087_v39  ;;  %v1450_v35 = vmul.f32 %v1448_v32, %v4224_v55  ;;  %v1670_v24 = vmul.f32 %v1669_v61, %v2981_v22  ;;  %1117 = vst [vmem:[%s4593_s18] sm:$0x3f] %v1116_v4  ;;  %v1470_v39 = vmax.f32 %v1468_v5, 0.0  ;;  %v2733_v19 = vld [vmem:[#allocation3 + $0x17] ss:$0 sm:$0xff] }
 0x10b   :  { %v1654_v56 = vmul.f32 %v4592_v10, %v4097_v18  ;;  %v1680_v12 = vstv %s4285_s1  ;;  %v1691_v18 = vstv %s4290_s16  ;;  %v1702_v38 = vstv %s4296_s22  ;;  %s4431_s1 = sld [smem:[#allocation9 + $0x14]] }
 0x10c   :  { %v1644_v54 = vadd.f32 %v1643_v46, %v1633_v51  ;;  %v1407_v17 = vadd.f32 %v1406_v29, %v1396_v15  ;;  %v1665_v49 = vmul.f32 %v1663_v0, %v4594_v41  ;;  %v1672_v59 = vadd.f32 %v2697_v31, %v1670_v24  ;;  %v2734_v15 = vld [vmem:[#allocation3 + $0x18] ss:$0 sm:$0xff]  ;;  %s4434_s16 = sld [smem:[#allocation9 + $0x15]] }
 0x10d   :  { %v1681_v3 = vmul.f32 %v1680_v12, %v2981_v22  ;;  %v1692_v28 = vmul.f32 %v1691_v18, %v2981_v22  ;;  %v1703_v23 = vmul.f32 %v1702_v38, %v2981_v22  ;;  %v1713_v45 = vstv %s4305_s23  ;;  %v2735_v12 = vld [vmem:[#allocation3 + $0x19] ss:$0 sm:$0xff]  ;;  %v2736_v38 = vld [vmem:[#allocation3 + $0x1a] ss:$0 sm:$0xff]  ;;  %s4439_s22 = sld [smem:[#allocation9 + $0x16]] }
 0x10e   :  { %v1655_v58 = vadd.f32 %v1654_v56, %v1644_v54  ;;  %v1418_v53 = vadd.f32 %v1417_v40, %v1407_v17  ;;  %v1674_v48 = vmax.f32 %v1672_v59, 0.0  ;;  %v1714_v36 = vmul.f32 %v1713_v45, %v2981_v22  ;;  %v2738_v45 = vld [vmem:[#allocation3 + $0x1c] ss:$0 sm:$0xff]  ;;  %s4443_s23 = sld [smem:[#allocation5 + $0x5f]] }
 0x10f   :  { %v1683_v29 = vadd.f32 %v2701_v14, %v1681_v3  ;;  %v1694_v6 = vadd.f32 %v2729_v20, %v1692_v28  ;;  %v1705_v50 = vadd.f32 %v2730_v8, %v1703_v23  ;;  %v1724_v32 = vstv %s4315_s26  ;;  %v2737_v28 = vld [vmem:[#allocation3 + $0x1b] ss:$0 sm:$0xff]  ;;  %s4447_s26 = sld [smem:[#allocation9 + $0x17]] }
 0x110   :  { %v1666_v30 = vadd.f32 %v1665_v49, %v1655_v58  ;;  %v1429_v62 = vadd.f32 %v1428_v16, %v1418_v53  ;;  %v1676_v21 = vmul.f32 %v1674_v48, %v4595_v26  ;;  %v1716_v47 = vadd.f32 %v2731_v44, %v1714_v36 }
 0x111   :  { %v1725_v40 = vmul.f32 %v1724_v32, %v2981_v22  ;;  %v1685_v31 = vmax.f32 %v1683_v29, 0.0  ;;  %v1696_v60 = vmax.f32 %v1694_v6, 0.0  ;;  %v1707_v5 = vmax.f32 %v1705_v50, 0.0 }
 0x112   :  { %v1735_v51 = vstv %s4327_s6  ;;  %v1440_v46 = vadd.f32 %v1439_v27, %v1429_v62  ;;  %v1461_v4 = vmul.f32 %v1459_v2, %v4233_v1  ;;  %v1677_v10 = vadd.f32 %v1676_v21, %v1666_v30  ;;  %s4451_s6 = sld [smem:[#allocation5 + $0x63]] }
 0x113   :  { %v1727_v56 = vadd.f32 %v2732_v57, %v1725_v40  ;;  %v1472_v16 = vmul.f32 %v1470_v39, %v4236_v7  ;;  %v1687_v0 = vmul.f32 %v1685_v31, %v4125_v9  ;;  %v1718_v61 = vmax.f32 %v1716_v47, 0.0  ;;  %v2739_v57 = vld [vmem:[#allocation3 + $0x1d] ss:$0 sm:$0xff]  ;;  %v2740_v47 = vld [vmem:[#allocation3 + $0x1e] ss:$0 sm:$0xff] }
 0x114   :  { %v1736_v14 = vmul.f32 %v1735_v51, %v2981_v22  ;;  %v1451_v54 = vadd.f32 %v1450_v35, %v1440_v46  ;;  %v1698_v24 = vmul.f32 %v1696_v60, %v4135_v52  ;;  %v1709_v27 = vmul.f32 %v1707_v5, %v4146_v11 }
 0x115   :  { %v1746_v2 = vstv %s4338_s24  ;;  %v1688_v18 = vadd.f32 %v1687_v0, %v1677_v10  ;;  %v1757_v9 = vstv %s4344_s30  ;;  %v1729_v17 = vmax.f32 %v1727_v56, 0.0  ;;  %v4597_v0 = vld [vmem:[#allocation14_spill] sm:$0xff]  ;;  %s4461_s24 = sld [smem:[#allocation5 + $0x6b]] }
 0x116   :  { %v1738_v20 = vadd.f32 %v2733_v19, %v1736_v14  ;;  %v1747_v39 = vmul.f32 %v1746_v2, %v2981_v22  ;;  %v1462_v8 = vadd.f32 %v1461_v4, %v1451_v54  ;;  %v1758_v35 = vmul.f32 %v1757_v9, %v2981_v22  ;;  %s4467_s30 = sld [smem:[#allocation5 + $0x6f]] }
 0x117   :  { %v1768_v58 = vstv %s4347_s8  ;;  %v1699_v52 = vadd.f32 %v1698_v24, %v1688_v18  ;;  %v1779_v3 = vstv %s4350_s17  ;;  %v1790_v23 = vstv %s4354_s0  ;;  %v4598_v24 = vld [vmem:[#allocation18_spill] sm:$0xff]  ;;  %s4471_s8 = sld [smem:[#allocation5 + $0x73]] }
 0x118   :  { %v1740_v11 = vmax.f32 %v1738_v20, 0.0  ;;  %v1749_v41 = vadd.f32 %v2734_v15, %v1747_v39  ;;  %v1769_v49 = vmul.f32 %v1768_v58, %v2981_v22  ;;  %v1473_v59 = vadd.f32 %v1472_v16, %v1462_v8  ;;  %v4596_v16 = vld [vmem:[#allocation13_spill] sm:$0xff]  ;;  %s4474_s17 = sld [smem:[#allocation9 + $0x19]] }
 0x119   :  { %v1760_v44 = vadd.f32 %v2735_v12, %v1758_v35  ;;  %v1710_v53 = vadd.f32 %v1709_v27, %v1699_v52  ;;  %v1720_v30 = vmul.f32 %v1718_v61, %v4154_v34  ;;  %v1731_v29 = vmul.f32 %v1729_v17, %v4164_v37  ;;  %v4599_v12 = vld [vmem:[#allocation15_spill] sm:$0xff]  ;;  %v4600_v17 = vld [vmem:[#allocation17_spill] sm:$0xff]  ;;  %v4602_v52 = vld [vmem:[#allocation19_spill] sm:$0xff]  ;;  %s4477_s0 = sld [smem:[#allocation5 + $0x77]] }
 0x11a   :  { %v1751_v48 = vmax.f32 %v1749_v41, 0.0  ;;  %v1771_v36 = vadd.f32 %v2736_v38, %v1769_v49  ;;  %2485 = vst [vmem:[%s4593_s18 + $0x8] sm:$0x3f] %v1473_v59  ;;  %v1780_v6 = vmul.f32 %v1779_v3, %v2981_v22  ;;  %v1791_v50 = vmul.f32 %v1790_v23, %v2981_v22  ;;  %v2698_v41 = vld [vmem:[#allocation3 + $0x11] ss:$0 sm:$0xff] }
 0x11b   :  { %v1801_v32 = vstv %s4358_s25  ;;  %v1721_v34 = vadd.f32 %v1720_v30, %v1710_v53  ;;  %v1742_v62 = vmul.f32 %v1740_v11, %v4175_v43  ;;  %v1762_v26 = vmax.f32 %v1760_v44, 0.0  ;;  %v2741_v43 = vld [vmem:[#allocation3 + $0x1f] ss:$0 sm:$0xff] }
 0x11c   :  { %v1802_v21 = vmul.f32 %v1801_v32, %v2981_v22  ;;  %v1753_v40 = vmul.f32 %v1751_v48, %v4184_v25  ;;  %v1782_v37 = vadd.f32 %v2737_v28, %v1780_v6  ;;  %v1793_v31 = vadd.f32 %v2738_v45, %v1791_v50  ;;  %v4603_v48 = vld [vmem:[#allocation12_spill] sm:$0xff] }
 0x11d   :  { %v1812_v60 = vstv %s4366_s2  ;;  %v1732_v5 = vadd.f32 %v1731_v29, %v1721_v34  ;;  %v1773_v51 = vmax.f32 %v1771_v36, 0.0  ;;  %v1823_v56 = vstv %s4372_s28  ;;  %s4484_s28 = sld [smem:[#allocation9 + $0x1a]] }
 0x11e   :  { %v1804_v19 = vadd.f32 %v2739_v57, %v1802_v21  ;;  %v1813_v46 = vmul.f32 %v1812_v60, %v2981_v22  ;;  %v1784_v4 = vmax.f32 %v1782_v37, 0.0  ;;  %v1795_v10 = vmax.f32 %v1793_v31, 0.0  ;;  %v2742_v57 = vld [vmem:[#allocation3 + $0x13] ss:$0 sm:$0xff] }
 0x11f   :  { %v1980_v25 = vadd.f32 %v4597_v0, %v4596_v16  ;;  %v1743_v61 = vadd.f32 %v1742_v62, %v1732_v5  ;;  %v1824_v54 = vmul.f32 %v1823_v56, %v2981_v22  ;;  %v2010_v27 = vmax.f32 %v4598_v24, 0.0 }
 0x120   :  { %v1806_v14 = vmax.f32 %v1804_v19, 0.0  ;;  %v1815_v15 = vadd.f32 %v2740_v47, %v1813_v46  ;;  %v1764_v2 = vmul.f32 %v1762_v26, %v4191_v13  ;;  %v2000_v20 = vstv %s4375_s7  ;;  %v2743_v26 = vld [vmem:[#allocation3 + $0x14] ss:$0 sm:$0xff]  ;;  %v2744_v19 = vld [vmem:[#allocation3 + $0x15] ss:$0 sm:$0xff]  ;;  %s4489_s7 = sld [smem:[#allocation5 + $0x7b]] }
 0x121   :  { %v1991_v18 = vadd.f32 %v4599_v12, %v1980_v25  ;;  %v1754_v39 = vadd.f32 %v1753_v40, %v1743_v61  ;;  %v1775_v9 = vmul.f32 %v1773_v51, %v4202_v42  ;;  %v1826_v8 = vadd.f32 %v2741_v43, %v1824_v54 }
 0x122   :  { %v1817_v38 = vmax.f32 %v1815_v15, 0.0  ;;  %v1786_v22 = vmul.f32 %v1784_v4, %v4211_v63  ;;  %v4601_v35 = vmax.f32 %v4600_v17, 0.0  ;;  %v2011_v13 = vstv %s4379_s9  ;;  %v2702_v63 = vld [vmem:[#allocation3 + $0x12] ss:$0 sm:$0xff]  ;;  %s4492_s9 = sld [smem:[#allocation9 + $0x1b]] }
 0x123   :  { %v2021_v11 = vmax.f32 %v4602_v52, 0.0  ;;  %v1765_v49 = vadd.f32 %v1764_v2, %v1754_v39  ;;  %v1797_v42 = vmul.f32 %v1795_v10, %v4218_v33  ;;  %v1808_v59 = vmul.f32 %v1806_v14, %v4224_v55 }
 0x124   :  { %v2001_v58 = vmul.f32 %v2000_v20, %v4601_v35  ;;  %v2022_v44 = vstv %s4382_s3  ;;  %v1828_v3 = vmax.f32 %v1826_v8, 0.0  ;;  %v2012_v23 = vmul.f32 %v2011_v13, %v2010_v27  ;;  %s4497_s3 = sld [smem:[#allocation5 + $0x7f]] }
 0x125   :  { %v2027_v45 = vstv %s4391_s29  ;;  %v1776_v53 = vadd.f32 %v1775_v9, %v1765_v49  ;;  %v1819_v30 = vmul.f32 %v1817_v38, %v4233_v1  ;;  %v2038_v33 = vstv %s4399_s27  ;;  %v2748_v49 = vld [vmem:[#allocation3 + $0x19] ss:$0 sm:$0xff]  ;;  %s2612_s29 = sld [smem:[#allocation9 + $0x1e]] }
 0x126   :  { %v2002_v28 = vadd.f32 %v2001_v58, %v1991_v18  ;;  %v2028_v36 = vmul.f32 %v2027_v45, %v4603_v48  ;;  %v2023_v29 = vmul.f32 %v2022_v44, %v2021_v11  ;;  %v2039_v6 = vmul.f32 %v2038_v33, %v4603_v48  ;;  %v2746_v18 = vld [vmem:[#allocation3 + $0x17] ss:$0 sm:$0xff]  ;;  %v2747_v58 = vld [vmem:[#allocation3 + $0x18] ss:$0 sm:$0xff] }
 0x127   :  { %v2049_v50 = vstv %s4407_s5  ;;  %v1787_v32 = vadd.f32 %v1786_v22, %v1776_v53  ;;  %v2033_v62 = vstv %s4395_s20  ;;  %v1830_v21 = vmul.f32 %v1828_v3, %v4236_v7  ;;  %v2745_v7 = vld [vmem:[#allocation3 + $0x16] ss:$0 sm:$0xff]  ;;  %v2749_v53 = vld [vmem:[#allocation3 + $0x1a] ss:$0 sm:$0xff]  ;;  %s2614_s20 = sld [smem:[#allocation9 + $0x1f]] }
 0x128   :  { %v2013_v55 = vadd.f32 %v2012_v23, %v2002_v28  ;;  %v2030_v34 = vadd.f32 %v2698_v41, %v2028_v36  ;;  %v2050_v1 = vmul.f32 %v2049_v50, %v4603_v48  ;;  %v2041_v40 = vadd.f32 %v2702_v63, %v2039_v6 }
 0x129   :  { %v2060_v37 = vstv %s4416_s14  ;;  %v1798_v31 = vadd.f32 %v1797_v42, %v1787_v32  ;;  %v2044_v43 = vstv %s4402_s19  ;;  %v2071_v4 = vstv %s4419_s15 }
 0x12a   :  { %v2024_v47 = vadd.f32 %v2023_v29, %v2013_v55  ;;  %v2032_v60 = vmax.f32 %v2030_v34, 0.0  ;;  %v2052_v5 = vadd.f32 %v2742_v57, %v2050_v1  ;;  %v2061_v51 = vmul.f32 %v2060_v37, %v4603_v48  ;;  %v2750_v55 = vld [vmem:[#allocation3 + $0x1b] ss:$0 sm:$0xff] }
 0x12b   :  { %v2043_v46 = vmax.f32 %v2041_v40, 0.0  ;;  %v2082_v10 = vstv %s4426_s13  ;;  %v1809_v56 = vadd.f32 %v1808_v59, %v1798_v31  ;;  %v2055_v61 = vstv %s4410_s21 }
 0x12c   :  { %v2034_v16 = vmul.f32 %v2033_v62, %v2032_v60  ;;  %v2054_v0 = vmax.f32 %v2052_v5, 0.0  ;;  %v2063_v25 = vadd.f32 %v2743_v26, %v2061_v51  ;;  %v2066_v14 = vstv %s4431_s1 }
 0x12d   :  { %v2072_v15 = vmul.f32 %v2071_v4, %v4603_v48  ;;  %v2083_v54 = vmul.f32 %v2082_v10, %v4603_v48  ;;  %v1820_v24 = vadd.f32 %v1819_v30, %v1809_v56  ;;  %v2045_v2 = vmul.f32 %v2044_v43, %v2043_v46 }
 0x12e   :  { %v2035_v27 = vadd.f32 %v2034_v16, %v2024_v47  ;;  %v2065_v12 = vmax.f32 %v2063_v25, 0.0  ;;  %v2077_v39 = vstv %s4434_s16  ;;  %v2093_v38 = vstv %s4443_s23 }
 0x12f   :  { %v2074_v20 = vadd.f32 %v2744_v19, %v2072_v15  ;;  %v2085_v9 = vadd.f32 %v2745_v7, %v2083_v54  ;;  %v1831_v8 = vadd.f32 %v1830_v21, %v1820_v24  ;;  %v2056_v17 = vmul.f32 %v2055_v61, %v2054_v0  ;;  %v2751_v21 = vld [vmem:[#allocation3 + $0x1c] ss:$0 sm:$0xff]  ;;  %v2752_v19 = vld [vmem:[#allocation3 + $0x1d] ss:$0 sm:$0xff]  ;;  %v2753_v61 = vld [vmem:[#allocation3 + $0x1e] ss:$0 sm:$0xff] }
 0x130   :  { %v2046_v22 = vadd.f32 %v2045_v2, %v2035_v27  ;;  %v2094_v35 = vmul.f32 %v2093_v38, %v4603_v48  ;;  %v2067_v13 = vmul.f32 %v2066_v14, %v2065_v12  ;;  %v2104_v41 = vstv %s4451_s6  ;;  %v2754_v27 = vld [vmem:[#allocation3 + $0x1f] ss:$0 sm:$0xff] }
 0x131   :  { %v2076_v52 = vmax.f32 %v2074_v20, 0.0  ;;  %v2087_v11 = vmax.f32 %v2085_v9, 0.0  ;;  %2550 = vst [vmem:[%s4593_s18 + $0x10] sm:$0x3f] %v1831_v8  ;;  %v2105_v44 = vmul.f32 %v2104_v41, %v4603_v48  ;;  %v2115_v63 = vstv %s4454_s10 }
 0x132   :  { %v2057_v42 = vadd.f32 %v2056_v17, %v2046_v22  ;;  %v2096_v59 = vadd.f32 %v2746_v18, %v2094_v35  ;;  %v2088_v28 = vstv %s4439_s22  ;;  %v2099_v23 = vstv %s4447_s26 }
 0x133   :  { %v2078_v3 = vmul.f32 %v2077_v39, %v2076_v52  ;;  %v2116_v45 = vmul.f32 %v2115_v63, %v4603_v48  ;;  %v2107_v33 = vadd.f32 %v2747_v58, %v2105_v44  ;;  %v2126_v57 = vstv %s4461_s24 }
 0x134   :  { %v2068_v30 = vadd.f32 %v2067_v13, %v2057_v42  ;;  %v2098_v36 = vmax.f32 %v2096_v59, 0.0  ;;  %v2110_v29 = vstv %s4459_s11  ;;  %v2127_v50 = vmul.f32 %v2126_v57, %v4603_v48 }
 0x135   :  { %v2118_v6 = vadd.f32 %v2748_v49, %v2116_v45  ;;  %v2137_v32 = vstv %s4467_s30  ;;  %v2089_v62 = vmul.f32 %v2088_v28, %v2087_v11  ;;  %v2109_v1 = vmax.f32 %v2107_v33, 0.0 }
 0x136   :  { %v2079_v34 = vadd.f32 %v2078_v3, %v2068_v30  ;;  %v2138_v26 = vmul.f32 %v2137_v32, %v4603_v48  ;;  %v2100_v47 = vmul.f32 %v2099_v23, %v2098_v36  ;;  %v2129_v40 = vadd.f32 %v2749_v53, %v2127_v50 }
 0x137   :  { %v2148_v37 = vstv %s4471_s8  ;;  %v2120_v60 = vmax.f32 %v2118_v6, 0.0  ;;  %v2111_v46 = vmul.f32 %v2110_v29, %v2109_v1  ;;  %v2121_v43 = vstv %s4474_s17 }
 0x138   :  { %v2090_v31 = vadd.f32 %v2089_v62, %v2079_v34  ;;  %v2140_v5 = vadd.f32 %v2750_v55, %v2138_v26  ;;  %v2149_v51 = vmul.f32 %v2148_v37, %v4603_v48  ;;  %v2159_v4 = vstv %s4477_s0 }
 0x139   :  { %v2131_v7 = vmax.f32 %v2129_v40, 0.0  ;;  %v2160_v16 = vmul.f32 %v2159_v4, %v4603_v48  ;;  %v2132_v0 = vstv %s4484_s28  ;;  %v2170_v25 = vstv %s4489_s7 }
 0x13a   :  { %v2101_v10 = vadd.f32 %v2100_v47, %v2090_v31  ;;  %v2151_v56 = vadd.f32 %v2751_v21, %v2149_v51  ;;  %v2122_v15 = vmul.f32 %v2121_v43, %v2120_v60  ;;  %v2142_v54 = vmax.f32 %v2140_v5, 0.0 }
 0x13b   :  { %v2162_v24 = vadd.f32 %v2752_v19, %v2160_v16  ;;  %v2143_v2 = vstv %s4492_s9  ;;  %v2171_v12 = vmul.f32 %v2170_v25, %v4603_v48  ;;  %v2181_v18 = vstv %s4497_s3 }
 0x13c   :  { %v2112_v14 = vadd.f32 %v2111_v46, %v2101_v10  ;;  %v2133_v39 = vmul.f32 %v2132_v0, %v2131_v7  ;;  %v2153_v9 = vmax.f32 %v2151_v56, 0.0  ;;  %v2182_v38 = vmul.f32 %v2181_v18, %v4603_v48 }
 0x13d   :  { %v2154_v8 = vstv %s4501_s12  ;;  %v2173_v22 = vadd.f32 %v2753_v61, %v2171_v12  ;;  %v2144_v35 = vmul.f32 %v2143_v2, %v2142_v54  ;;  %v2164_v58 = vmax.f32 %v2162_v24, 0.0 }
 0x13e   :  { %v2123_v20 = vadd.f32 %v2122_v15, %v2112_v14  ;;  %v2184_v13 = vadd.f32 %v2754_v27, %v2182_v38  ;;  %v2165_v52 = vstv %s4506_s4  ;;  %v2155_v41 = vmul.f32 %v2154_v8, %v2153_v9 }
 0x13f   :  { %v2175_v49 = vmax.f32 %v2173_v22, 0.0  ;;  %v2176_v42 = vstv %s2612_s29  ;;  %v2166_v44 = vmul.f32 %v2165_v52, %v2164_v58  ;;  %v2187_v3 = vstv %s2614_s20 }
 0x140   :  { %v2134_v17 = vadd.f32 %v2133_v39, %v2123_v20  ;;  %v2186_v63 = vmax.f32 %v2184_v13, 0.0 }
 0x141   :  { %v2177_v23 = vmul.f32 %v2176_v42, %v2175_v49 }
 0x142   :  { %v2145_v11 = vadd.f32 %v2144_v35, %v2134_v17  ;;  %v2188_v53 = vmul.f32 %v2187_v3, %v2186_v63 }
 0x144   :  { %v2156_v59 = vadd.f32 %v2155_v41, %v2145_v11 }
 0x146   :  { %v2167_v28 = vadd.f32 %v2166_v44, %v2156_v59 }
 0x148   :  { %v2178_v45 = vadd.f32 %v2177_v23, %v2167_v28 }
 0x14a   :  { %v2189_v48 = vadd.f32 %v2188_v53, %v2178_v45 }
 0x14c   :  { %2615 = vst [vmem:[%s4593_s18 + $0x18] sm:$0x3f] %v2189_v48 }
 0x14d   :  { %2196 = vsyncpa [#allocation6], 1 }
 0x14e   :  { %2197 = vsyncpa [#allocation8], 1 }

</bundles_post_ra>
